<compile_context>
chip_gen: v5e
topology: v5e:2x2
jax: 0.10.0
libtpu: 0.0.40
codegen_flags: <defaults>
</compile_context>

<pallas_src>
import jax
import jax.numpy as jnp
from jax import lax
from jax.experimental import pallas as pl
from jax.experimental.pallas import tpu as pltpu

_VMEM = pl.BlockSpec(memory_space=pltpu.MemorySpace.VMEM)
EPS = 1e-5            # torch.nn.BatchNorm2d default
N_CONV_LAYERS = 4     # 2 ConvBlocks x 2 (conv -> BN -> ReLU)


# --------------------------------------------------------------------------
# Fused kernel: ConvT(2,2) + 4 x (Conv3x3 -> BN(train batch stats) -> ReLU)
# --------------------------------------------------------------------------
def _make_fused_kernel(batch, out_h, out_w, c):
    s_h = out_h
    sc = out_w * c                       # lane extent, channel-minor (w, ch)
    rows = batch * s_h                   # sublane extent (image-major, row-minor)
    inv_cnt = 1.0 / float(batch * out_h * out_w)
    assert (out_w & (out_w - 1)) == 0, "roll-based BN fold needs power-of-two width"
    fold_shifts = []
    s = c
    while s < sc:                        # c, 2c, 4c, ... sc/2  (log2(Sw) steps)
        fold_shifts.append(s)
        s *= 2

    def kernel(xs_ref, wup_ref, bup_ref, cw_ref, cb_ref, g_ref, be_ref, o_ref):
        f32, bf16 = jnp.float32, jnp.bfloat16

        # Per-image top/bottom boundary masks for the height halos (computed once).
        row_id = lax.broadcasted_iota(jnp.int32, (rows, sc), 0)
        top_edge = (row_id % s_h) == 0
        bot_edge = (row_id % s_h) == (s_h - 1)

        def fold_bcast(v):
            # Per-channel all-reduce over the w-groups of the lane axis AND broadcast back,
            # entirely with circular lane rolls (XLU) + adds (VPU): lanes with equal (l mod c)
            # form a ring of Sw positions; doubling shifts give a full ring all-reduce.
            for sh in fold_shifts:
                v = v + pltpu.roll(v, sh, 1)
            return v

        # ---- ConvTranspose2d(k=2, s=2): pixel shuffle folded into xs packing + block weight;
        #      one bf16 GEMM + a pre-broadcast bias add.
        act = jnp.dot(xs_ref[...], wup_ref[...], preferred_element_type=f32) + bup_ref[...]

        # ---- 4 x (Conv3x3 pad=1 -> BatchNorm2d (training batch stats) -> ReLU)
        for layer in range(N_CONV_LAYERS):
            a16 = act.astype(bf16)
            # Height halos: XLU sublane rolls + VPU boundary mask (no MXU).
            up = jnp.where(top_edge, 0.0, pltpu.roll(act, 1, 0)).astype(bf16)
            dn = jnp.where(bot_edge, 0.0, pltpu.roll(act, rows - 1, 0)).astype(bf16)
            # The only MXU work per layer: 3 banded GEMMs (width halo / zero pad is in the band).
            acc = jnp.dot(up, cw_ref[layer, 0], preferred_element_type=f32)
            acc = acc + jnp.dot(a16, cw_ref[layer, 1], preferred_element_type=f32)
            acc = acc + jnp.dot(dn, cw_ref[layer, 2], preferred_element_type=f32)
            acc = acc + cb_ref[layer]                      # pre-broadcast [1, Sw*C] bias

            # BatchNorm2d (training mode, biased single-pass stats) — all off the MXU:
            # sublane reduce (XLU) -> lane roll-reduce fold+broadcast (XLU) -> VPU/EUP math.
            mean_bc = fold_bcast(jnp.sum(acc, axis=0, keepdims=True)) * inv_cnt
            msq_bc = fold_bcast(jnp.sum(acc * acc, axis=0, keepdims=True)) * inv_cnt
            var_bc = msq_bc - mean_bc * mean_bc
            scale_bc = g_ref[layer] * lax.rsqrt(var_bc + EPS)      # [1, Sw*C]
            shift_bc = be_ref[layer] - mean_bc * scale_bc          # [1, Sw*C]
            act = jnp.maximum(acc * scale_bc + shift_bc, 0.0)

        o_ref[...] = act                 # lane-dense [N*Sh, Sw*C] f32 (= row-major NHWC)

    return kernel


# --------------------------------------------------------------------------
# One-time parameter packing (hoisted out of the per-step forward)
# --------------------------------------------------------------------------
def prepare_params(p, in_w):
    cin, c = p["up_w"].shape[0], p["up_w"].shape[1]
    win = in_w
    s_w = 2 * win
    sc = s_w * c
    f32, bf16 = jnp.float32, jnp.bfloat16

    # ConvTranspose2d weight as a block matrix: row (kh, w, ci) -> col (q=2w+kw, co).
    wt = p["up_w"].astype(f32)                                   # [Cin, C, 2, 2]
    w_idx = jnp.arange(win)
    blocks = []
    for kh in (0, 1):
        blk = jnp.zeros((win * cin, sc), f32)
        for kw in (0, 1):
            sel = jnp.zeros((win, s_w), f32).at[w_idx, 2 * w_idx + kw].set(1.0)
            blk = blk + jnp.kron(sel, wt[:, :, kh, kw])
        blocks.append(blk)
    wup = jnp.concatenate(blocks, axis=0).astype(bf16)           # [2*Win*Cin, Sw*C]

    # Each 3x3 conv as 3 banded matrices (one per kernel row) on the (w, channel) lane axis;
    # the band structure also implements the zero pad in W.
    def banded(wc):                                              # wc: [C, C, 3, 3] (torch layout)
        mats = []
        for dp in range(3):
            m = jnp.zeros((sc, sc), f32)
            for dq in range(3):
                sel = jnp.eye(s_w, s_w, k=1 - dq, dtype=f32)
                m = m + jnp.kron(sel, wc[:, :, dp, dq].T)
            mats.append(m)
        return jnp.stack(mats)                                   # [3, Sw*C, Sw*C]

    cw = jnp.stack([banded(p[f"conv{i}_w"].astype(f32))
                    for i in range(N_CONV_LAYERS)]).astype(bf16)  # [4, 3, Sw*C, Sw*C]

    def bc(v):   # per-channel vector -> lane-dense channel-minor broadcast [1, Sw*C]
        return jnp.tile(v.reshape(1, c).astype(f32), (1, s_w))

    bup = bc(p["up_b"])                                                         # [1, Sw*C]
    cb = jnp.stack([bc(p[f"conv{i}_b"]) for i in range(N_CONV_LAYERS)])         # [4, 1, Sw*C]
    g = jnp.stack([bc(p[f"bn{i}_g"]) for i in range(N_CONV_LAYERS)])            # [4, 1, Sw*C]
    be = jnp.stack([bc(p[f"bn{i}_b"]) for i in range(N_CONV_LAYERS)])           # [4, 1, Sw*C]

    return {"wup": wup, "bup": bup, "cw": cw, "cb": cb, "g": g, "be": be}


# --------------------------------------------------------------------------
# Per-step forward: input packing + one pallas_call.  Returns NHWC.
# --------------------------------------------------------------------------
def upsample_forward(x_nchw, pk):
    n, cin, hin, win = x_nchw.shape
    sc = pk["cw"].shape[-1]
    s_h, s_w = 2 * hin, 2 * win
    c = sc // s_w
    rows = n * s_h
    bf16 = jnp.bfloat16

    # Kernel row r = (image, upsampled output row p); each input row is duplicated for both
    # output-row parities and masked into one of two K-blocks so the ConvTranspose pixel
    # shuffle happens inside the first GEMM.
    xr = jnp.transpose(x_nchw, (0, 2, 3, 1)).reshape(n, hin, win * cin)
    xd = jnp.repeat(xr, 2, axis=1)
    par = (jnp.arange(s_h) % 2).reshape(1, s_h, 1)
    xs = jnp.concatenate([jnp.where(par == 0, xd, 0.0),
                          jnp.where(par == 1, xd, 0.0)], axis=-1)
    xs = xs.reshape(rows, 2 * win * cin).astype(bf16)

    kernel = _make_fused_kernel(n, s_h, s_w, c)
    out2d = pl.pallas_call(
        kernel,
        out_shape=jax.ShapeDtypeStruct((rows, sc), jnp.float32),
        in_specs=[_VMEM] * 7,
        out_specs=_VMEM,
        compiler_params=pltpu.CompilerParams(vmem_limit_bytes=32 * 1024 * 1024),
    )(xs, pk["wup"], pk["bup"], pk["cw"], pk["cb"], pk["g"], pk["be"])

    # [rows, Sw*C] is the contiguous row-major view of NHWC -> free reshape.  NCHW consumers
    # should fold a transpose(0,3,1,2) into the consumer (perf review: saves an HBM round trip).
    return out2d.reshape(n, s_h, s_w, c)


# --------------------------------------------------------------------------
# Deterministic parameter init (same tensor shapes as the torch module)
# --------------------------------------------------------------------------
def init_params(key, in_ch, out_ch):
    keys = jax.random.split(key, 2 + 2 * N_CONV_LAYERS)

    def rnd(k, shape, fan_in):
        return (jax.random.normal(k, shape, jnp.float32) / jnp.sqrt(fan_in)).astype(jnp.float32)

    p = {
        "up_w": rnd(keys[0], (in_ch, out_ch, 2, 2), in_ch * 4),
        "up_b": rnd(keys[1], (out_ch,), in_ch * 4),
    }
    for i in range(N_CONV_LAYERS):
        p[f"conv{i}_w"] = rnd(keys[2 + 2 * i], (out_ch, out_ch, 3, 3), out_ch * 9)
        p[f"conv{i}_b"] = rnd(keys[3 + 2 * i], (out_ch,), out_ch * 9)
        p[f"bn{i}_g"] = jnp.ones((out_ch,), jnp.float32)     # torch BN defaults
        p[f"bn{i}_b"] = jnp.zeros((out_ch,), jnp.float32)
    return p


# --------------------------------------------------------------------------
# Pure-JAX reference (HIGHEST precision), NHWC output, for numerical check
# --------------------------------------------------------------------------
def _ref_forward_nhwc(x_nchw, p):
    x = jnp.transpose(x_nchw, (0, 2, 3, 1))
    n, h, w, _ = x.shape
    wt = p["up_w"]
    cout = wt.shape[1]
    t = jnp.einsum("nhwi,iokl->nhwklo", x, wt, precision=lax.Precision.HIGHEST)
    y = t.transpose(0, 1, 3, 2, 4, 5).reshape(n, 2 * h, 2 * w, cout) + p["up_b"]

    def cbr(xx, wc, b, gg, bb):
        k = jnp.transpose(wc, (2, 3, 1, 0))
        yy = lax.conv_general_dilated(
            xx, k, (1, 1), ((1, 1), (1, 1)),
            dimension_numbers=("NHWC", "HWIO", "NHWC"),
            precision=lax.Precision.HIGHEST) + b
        m = jnp.mean(yy, axis=(0, 1, 2), keepdims=True)
        v = jnp.mean((yy - m) ** 2, axis=(0, 1, 2), keepdims=True)
        return jnp.maximum((yy - m) * lax.rsqrt(v + EPS) * gg + bb, 0.0)

    for i in range(N_CONV_LAYERS):
        y = cbr(y, p[f"conv{i}_w"], p[f"conv{i}_b"], p[f"bn{i}_g"], p[f"bn{i}_b"])
    return y


# --------------------------------------------------------------------------
if __name__ == "__main__":
    key = jax.random.PRNGKey(0)
    kx, kp = jax.random.split(key)

    N, CIN, COUT, H, W = 2, 4, 8, 16, 16           # Upsample(in_channel=4, out_channel=8)
    x = jax.random.normal(kx, (N, CIN, H, W), jnp.float32)   # NCHW like PyTorch
    params = init_params(kp, CIN, COUT)

    packed = prepare_params(params, W)             # one-time parameter packing (hoisted)
    fwd = jax.jit(upsample_forward)
    out = jax.block_until_ready(fwd(x, packed))    # NHWC
    assert out.shape == (N, 2 * H, 2 * W, COUT), out.shape

    ref = _ref_forward_nhwc(x, params)
    if not jnp.allclose(out, ref, atol=4e-2, rtol=4e-2):     # bf16 MXU operands vs f32 ref
        raise AssertionError(f"mismatch, max abs err = {jnp.max(jnp.abs(out - ref))}")

    print("KERNEL_OK")
</pallas_src>

<mosaic_0001>
module attributes {stable_mosaic.version = 11 : i64} {
  func.func @kernel(%arg0: memref<64x128xbf16, #tpu.memory_space<vmem>>, %arg1: memref<128x256xbf16, #tpu.memory_space<vmem>>, %arg2: memref<1x256xf32, #tpu.memory_space<vmem>>, %arg3: memref<4x3x256x256xbf16, #tpu.memory_space<vmem>>, %arg4: memref<4x1x256xf32, #tpu.memory_space<vmem>>, %arg5: memref<4x1x256xf32, #tpu.memory_space<vmem>>, %arg6: memref<4x1x256xf32, #tpu.memory_space<vmem>>, %arg7: memref<64x256xf32, #tpu.memory_space<vmem>>) attributes {dimension_semantics = [], scalar_prefetch = 0 : i64, scratch_operands = 0 : i64, tpu.core_type = #tpu.core_type<tc>} {
    %0 = tpu.iota {dimensions = array<i32: 0>} : vector<64x256xi32>
    %c32_i32 = arith.constant 32 : i32
    %c0_i32 = arith.constant 0 : i32
    %1 = arith.cmpi eq, %c32_i32, %c0_i32 : i32
    %c1_i32 = arith.constant 1 : i32
    %2 = arith.select %1, %c1_i32, %c32_i32 : i32
    %3 = vector.broadcast %2 : i32 to vector<64x256xi32>
    %4 = arith.remsi %0, %3 : vector<64x256xi32>
    %c0_i32_0 = arith.constant 0 : i32
    %5 = vector.broadcast %c0_i32_0 : i32 to vector<64x256xi32>
    %6 = arith.cmpi ne, %4, %5 : vector<64x256xi32>
    %c0_i32_1 = arith.constant 0 : i32
    %7 = vector.broadcast %c0_i32_1 : i32 to vector<64x256xi32>
    %8 = arith.cmpi slt, %4, %7 : vector<64x256xi32>
    %c0_i32_2 = arith.constant 0 : i32
    %9 = arith.cmpi slt, %2, %c0_i32_2 : i32
    %10 = vector.broadcast %9 : i1 to vector<64x256xi1>
    %11 = vector.broadcast %10 : vector<64x256xi1> to vector<64x256xi1>
    %12 = arith.xori %8, %11 : vector<64x256xi1>
    %13 = arith.andi %12, %6 : vector<64x256xi1>
    %14 = vector.broadcast %2 : i32 to vector<64x256xi32>
    %15 = arith.addi %4, %14 : vector<64x256xi32>
    %16 = arith.select %13, %15, %4 : vector<64x256xi1>, vector<64x256xi32>
    %c0_i32_3 = arith.constant 0 : i32
    %17 = vector.broadcast %c0_i32_3 : i32 to vector<64x256xi32>
    %18 = arith.cmpi eq, %16, %17 : vector<64x256xi32>
    %c32_i32_4 = arith.constant 32 : i32
    %c0_i32_5 = arith.constant 0 : i32
    %19 = arith.cmpi eq, %c32_i32_4, %c0_i32_5 : i32
    %c1_i32_6 = arith.constant 1 : i32
    %20 = arith.select %19, %c1_i32_6, %c32_i32_4 : i32
    %21 = vector.broadcast %20 : i32 to vector<64x256xi32>
    %22 = arith.remsi %0, %21 : vector<64x256xi32>
    %c0_i32_7 = arith.constant 0 : i32
    %23 = vector.broadcast %c0_i32_7 : i32 to vector<64x256xi32>
    %24 = arith.cmpi ne, %22, %23 : vector<64x256xi32>
    %c0_i32_8 = arith.constant 0 : i32
    %25 = vector.broadcast %c0_i32_8 : i32 to vector<64x256xi32>
    %26 = arith.cmpi slt, %22, %25 : vector<64x256xi32>
    %c0_i32_9 = arith.constant 0 : i32
    %27 = arith.cmpi slt, %20, %c0_i32_9 : i32
    %28 = vector.broadcast %27 : i1 to vector<64x256xi1>
    %29 = vector.broadcast %28 : vector<64x256xi1> to vector<64x256xi1>
    %30 = arith.xori %26, %29 : vector<64x256xi1>
    %31 = arith.andi %30, %24 : vector<64x256xi1>
    %32 = vector.broadcast %20 : i32 to vector<64x256xi32>
    %33 = arith.addi %22, %32 : vector<64x256xi32>
    %34 = arith.select %31, %33, %22 : vector<64x256xi1>, vector<64x256xi32>
    %c31_i32 = arith.constant 31 : i32
    %35 = vector.broadcast %c31_i32 : i32 to vector<64x256xi32>
    %36 = arith.cmpi eq, %34, %35 : vector<64x256xi32>
    %c0 = arith.constant 0 : index
    %c0_10 = arith.constant 0 : index
    %37 = vector.load %arg0[%c0, %c0_10] : memref<64x128xbf16, #tpu.memory_space<vmem>>, vector<64x128xbf16>
    %c0_11 = arith.constant 0 : index
    %c0_12 = arith.constant 0 : index
    %38 = vector.load %arg1[%c0_11, %c0_12] : memref<128x256xbf16, #tpu.memory_space<vmem>>, vector<128x256xbf16>
    %cst = arith.constant dense<0.000000e+00> : vector<64x256xf32>
    %39 = tpu.matmul %37, %38, %cst {dimension_numbers = #tpu.dot_dimension_numbers<[1], [0], [0], [1], [0, 0, 1, 1], [], []>} : vector<64x128xbf16>, vector<128x256xbf16>, vector<64x256xf32> -> vector<64x256xf32>
    %c0_13 = arith.constant 0 : index
    %c0_14 = arith.constant 0 : index
    %40 = vector.load %arg2[%c0_13, %c0_14] : memref<1x256xf32, #tpu.memory_space<vmem>>, vector<1x256xf32>
    %41 = vector.broadcast %40 : vector<1x256xf32> to vector<64x256xf32>
    %42 = arith.addf %39, %41 : vector<64x256xf32>
    %43 = arith.truncf %42 : vector<64x256xf32> to vector<64x256xbf16>
    %c1_i32_15 = arith.constant 1 : i32
    %44 = tpu.dynamic_rotate %42 by %c1_i32_15 dim 0 : vector<64x256xf32>, i32 -> vector<64x256xf32>
    %cst_16 = arith.constant 0.000000e+00 : f32
    %45 = vector.broadcast %cst_16 : f32 to vector<64x256xf32>
    %46 = arith.select %18, %45, %44 : vector<64x256xi1>, vector<64x256xf32>
    %47 = arith.truncf %46 : vector<64x256xf32> to vector<64x256xbf16>
    %c63_i32 = arith.constant 63 : i32
    %48 = tpu.dynamic_rotate %42 by %c63_i32 dim 0 : vector<64x256xf32>, i32 -> vector<64x256xf32>
    %cst_17 = arith.constant 0.000000e+00 : f32
    %49 = vector.broadcast %cst_17 : f32 to vector<64x256xf32>
    %50 = arith.select %36, %49, %48 : vector<64x256xi1>, vector<64x256xf32>
    %51 = arith.truncf %50 : vector<64x256xf32> to vector<64x256xbf16>
    %c0_18 = arith.constant 0 : index
    %c0_19 = arith.constant 0 : index
    %c0_20 = arith.constant 0 : index
    %c0_21 = arith.constant 0 : index
    %52 = vector.load %arg3[%c0_18, %c0_19, %c0_20, %c0_21] : memref<4x3x256x256xbf16, #tpu.memory_space<vmem>>, vector<1x1x256x256xbf16>
    %53 = vector.shape_cast %52 : vector<1x1x256x256xbf16> to vector<256x256xbf16>
    %cst_22 = arith.constant dense<0.000000e+00> : vector<64x256xf32>
    %54 = tpu.matmul %47, %53, %cst_22 {dimension_numbers = #tpu.dot_dimension_numbers<[1], [0], [0], [1], [0, 0, 1, 1], [], []>} : vector<64x256xbf16>, vector<256x256xbf16>, vector<64x256xf32> -> vector<64x256xf32>
    %c0_23 = arith.constant 0 : index
    %c1 = arith.constant 1 : index
    %c0_24 = arith.constant 0 : index
    %c0_25 = arith.constant 0 : index
    %55 = vector.load %arg3[%c0_23, %c1, %c0_24, %c0_25] : memref<4x3x256x256xbf16, #tpu.memory_space<vmem>>, vector<1x1x256x256xbf16>
    %56 = vector.shape_cast %55 : vector<1x1x256x256xbf16> to vector<256x256xbf16>
    %cst_26 = arith.constant dense<0.000000e+00> : vector<64x256xf32>
    %57 = tpu.matmul %43, %56, %cst_26 {dimension_numbers = #tpu.dot_dimension_numbers<[1], [0], [0], [1], [0, 0, 1, 1], [], []>} : vector<64x256xbf16>, vector<256x256xbf16>, vector<64x256xf32> -> vector<64x256xf32>
    %58 = arith.addf %54, %57 : vector<64x256xf32>
    %c0_27 = arith.constant 0 : index
    %c2 = arith.constant 2 : index
    %c0_28 = arith.constant 0 : index
    %c0_29 = arith.constant 0 : index
    %59 = vector.load %arg3[%c0_27, %c2, %c0_28, %c0_29] : memref<4x3x256x256xbf16, #tpu.memory_space<vmem>>, vector<1x1x256x256xbf16>
    %60 = vector.shape_cast %59 : vector<1x1x256x256xbf16> to vector<256x256xbf16>
    %cst_30 = arith.constant dense<0.000000e+00> : vector<64x256xf32>
    %61 = tpu.matmul %51, %60, %cst_30 {dimension_numbers = #tpu.dot_dimension_numbers<[1], [0], [0], [1], [0, 0, 1, 1], [], []>} : vector<64x256xbf16>, vector<256x256xbf16>, vector<64x256xf32> -> vector<64x256xf32>
    %62 = arith.addf %58, %61 : vector<64x256xf32>
    %c0_31 = arith.constant 0 : index
    %c0_32 = arith.constant 0 : index
    %c0_33 = arith.constant 0 : index
    %63 = vector.load %arg4[%c0_31, %c0_32, %c0_33] : memref<4x1x256xf32, #tpu.memory_space<vmem>>, vector<1x1x256xf32>
    %64 = vector.shape_cast %63 : vector<1x1x256xf32> to vector<1x256xf32>
    %65 = vector.broadcast %64 : vector<1x256xf32> to vector<64x256xf32>
    %66 = arith.addf %62, %65 : vector<64x256xf32>
    %cst_34 = arith.constant dense<0.000000e+00> : vector<256xf32>
    %67 = vector.multi_reduction <add>, %66, %cst_34 [0] : vector<64x256xf32> to vector<256xf32>
    %68 = vector.shape_cast %67 : vector<256xf32> to vector<1x256xf32>
    %c8_i32 = arith.constant 8 : i32
    %69 = tpu.dynamic_rotate %68 by %c8_i32 dim 1 : vector<1x256xf32>, i32 -> vector<1x256xf32>
    %70 = arith.addf %68, %69 : vector<1x256xf32>
    %c16_i32 = arith.constant 16 : i32
    %71 = tpu.dynamic_rotate %70 by %c16_i32 dim 1 : vector<1x256xf32>, i32 -> vector<1x256xf32>
    %72 = arith.addf %70, %71 : vector<1x256xf32>
    %c32_i32_35 = arith.constant 32 : i32
    %73 = tpu.dynamic_rotate %72 by %c32_i32_35 dim 1 : vector<1x256xf32>, i32 -> vector<1x256xf32>
    %74 = arith.addf %72, %73 : vector<1x256xf32>
    %c64_i32 = arith.constant 64 : i32
    %75 = tpu.dynamic_rotate %74 by %c64_i32 dim 1 : vector<1x256xf32>, i32 -> vector<1x256xf32>
    %76 = arith.addf %74, %75 : vector<1x256xf32>
    %c128_i32 = arith.constant 128 : i32
    %77 = tpu.dynamic_rotate %76 by %c128_i32 dim 1 : vector<1x256xf32>, i32 -> vector<1x256xf32>
    %78 = arith.addf %76, %77 : vector<1x256xf32>
    %cst_36 = arith.constant 4.8828125E-4 : f32
    %79 = vector.broadcast %cst_36 : f32 to vector<1x256xf32>
    %80 = arith.mulf %78, %79 : vector<1x256xf32>
    %81 = arith.mulf %66, %66 : vector<64x256xf32>
    %cst_37 = arith.constant dense<0.000000e+00> : vector<256xf32>
    %82 = vector.multi_reduction <add>, %81, %cst_37 [0] : vector<64x256xf32> to vector<256xf32>
    %83 = vector.shape_cast %82 : vector<256xf32> to vector<1x256xf32>
    %c8_i32_38 = arith.constant 8 : i32
    %84 = tpu.dynamic_rotate %83 by %c8_i32_38 dim 1 : vector<1x256xf32>, i32 -> vector<1x256xf32>
    %85 = arith.addf %83, %84 : vector<1x256xf32>
    %c16_i32_39 = arith.constant 16 : i32
    %86 = tpu.dynamic_rotate %85 by %c16_i32_39 dim 1 : vector<1x256xf32>, i32 -> vector<1x256xf32>
    %87 = arith.addf %85, %86 : vector<1x256xf32>
    %c32_i32_40 = arith.constant 32 : i32
    %88 = tpu.dynamic_rotate %87 by %c32_i32_40 dim 1 : vector<1x256xf32>, i32 -> vector<1x256xf32>
    %89 = arith.addf %87, %88 : vector<1x256xf32>
    %c64_i32_41 = arith.constant 64 : i32
    %90 = tpu.dynamic_rotate %89 by %c64_i32_41 dim 1 : vector<1x256xf32>, i32 -> vector<1x256xf32>
    %91 = arith.addf %89, %90 : vector<1x256xf32>
    %c128_i32_42 = arith.constant 128 : i32
    %92 = tpu.dynamic_rotate %91 by %c128_i32_42 dim 1 : vector<1x256xf32>, i32 -> vector<1x256xf32>
    %93 = arith.addf %91, %92 : vector<1x256xf32>
    %cst_43 = arith.constant 4.8828125E-4 : f32
    %94 = vector.broadcast %cst_43 : f32 to vector<1x256xf32>
    %95 = arith.mulf %93, %94 : vector<1x256xf32>
    %96 = arith.mulf %80, %80 : vector<1x256xf32>
    %97 = arith.subf %95, %96 : vector<1x256xf32>
    %c0_44 = arith.constant 0 : index
    %c0_45 = arith.constant 0 : index
    %c0_46 = arith.constant 0 : index
    %98 = vector.load %arg5[%c0_44, %c0_45, %c0_46] : memref<4x1x256xf32, #tpu.memory_space<vmem>>, vector<1x1x256xf32>
    %99 = vector.shape_cast %98 : vector<1x1x256xf32> to vector<1x256xf32>
    %cst_47 = arith.constant 9.99999974E-6 : f32
    %100 = vector.broadcast %cst_47 : f32 to vector<1x256xf32>
    %101 = arith.addf %97, %100 : vector<1x256xf32>
    %102 = math.rsqrt %101 : vector<1x256xf32>
    %103 = arith.mulf %99, %102 : vector<1x256xf32>
    %c0_48 = arith.constant 0 : index
    %c0_49 = arith.constant 0 : index
    %c0_50 = arith.constant 0 : index
    %104 = vector.load %arg6[%c0_48, %c0_49, %c0_50] : memref<4x1x256xf32, #tpu.memory_space<vmem>>, vector<1x1x256xf32>
    %105 = vector.shape_cast %104 : vector<1x1x256xf32> to vector<1x256xf32>
    %106 = arith.mulf %80, %103 : vector<1x256xf32>
    %107 = arith.subf %105, %106 : vector<1x256xf32>
    %108 = vector.broadcast %103 : vector<1x256xf32> to vector<64x256xf32>
    %109 = arith.mulf %66, %108 : vector<64x256xf32>
    %110 = vector.broadcast %107 : vector<1x256xf32> to vector<64x256xf32>
    %111 = arith.addf %109, %110 : vector<64x256xf32>
    %cst_51 = arith.constant 0.000000e+00 : f32
    %112 = vector.broadcast %cst_51 : f32 to vector<64x256xf32>
    %113 = arith.maximumf %111, %112 : vector<64x256xf32>
    %114 = arith.truncf %113 : vector<64x256xf32> to vector<64x256xbf16>
    %c1_i32_52 = arith.constant 1 : i32
    %115 = tpu.dynamic_rotate %113 by %c1_i32_52 dim 0 : vector<64x256xf32>, i32 -> vector<64x256xf32>
    %cst_53 = arith.constant 0.000000e+00 : f32
    %116 = vector.broadcast %cst_53 : f32 to vector<64x256xf32>
    %117 = arith.select %18, %116, %115 : vector<64x256xi1>, vector<64x256xf32>
    %118 = arith.truncf %117 : vector<64x256xf32> to vector<64x256xbf16>
    %c63_i32_54 = arith.constant 63 : i32
    %119 = tpu.dynamic_rotate %113 by %c63_i32_54 dim 0 : vector<64x256xf32>, i32 -> vector<64x256xf32>
    %cst_55 = arith.constant 0.000000e+00 : f32
    %120 = vector.broadcast %cst_55 : f32 to vector<64x256xf32>
    %121 = arith.select %36, %120, %119 : vector<64x256xi1>, vector<64x256xf32>
    %122 = arith.truncf %121 : vector<64x256xf32> to vector<64x256xbf16>
    %c1_56 = arith.constant 1 : index
    %c0_57 = arith.constant 0 : index
    %c0_58 = arith.constant 0 : index
    %c0_59 = arith.constant 0 : index
    %123 = vector.load %arg3[%c1_56, %c0_57, %c0_58, %c0_59] : memref<4x3x256x256xbf16, #tpu.memory_space<vmem>>, vector<1x1x256x256xbf16>
    %124 = vector.shape_cast %123 : vector<1x1x256x256xbf16> to vector<256x256xbf16>
    %cst_60 = arith.constant dense<0.000000e+00> : vector<64x256xf32>
    %125 = tpu.matmul %118, %124, %cst_60 {dimension_numbers = #tpu.dot_dimension_numbers<[1], [0], [0], [1], [0, 0, 1, 1], [], []>} : vector<64x256xbf16>, vector<256x256xbf16>, vector<64x256xf32> -> vector<64x256xf32>
    %c1_61 = arith.constant 1 : index
    %c1_62 = arith.constant 1 : index
    %c0_63 = arith.constant 0 : index
    %c0_64 = arith.constant 0 : index
    %126 = vector.load %arg3[%c1_61, %c1_62, %c0_63, %c0_64] : memref<4x3x256x256xbf16, #tpu.memory_space<vmem>>, vector<1x1x256x256xbf16>
    %127 = vector.shape_cast %126 : vector<1x1x256x256xbf16> to vector<256x256xbf16>
    %cst_65 = arith.constant dense<0.000000e+00> : vector<64x256xf32>
    %128 = tpu.matmul %114, %127, %cst_65 {dimension_numbers = #tpu.dot_dimension_numbers<[1], [0], [0], [1], [0, 0, 1, 1], [], []>} : vector<64x256xbf16>, vector<256x256xbf16>, vector<64x256xf32> -> vector<64x256xf32>
    %129 = arith.addf %125, %128 : vector<64x256xf32>
    %c1_66 = arith.constant 1 : index
    %c2_67 = arith.constant 2 : index
    %c0_68 = arith.constant 0 : index
    %c0_69 = arith.constant 0 : index
    %130 = vector.load %arg3[%c1_66, %c2_67, %c0_68, %c0_69] : memref<4x3x256x256xbf16, #tpu.memory_space<vmem>>, vector<1x1x256x256xbf16>
    %131 = vector.shape_cast %130 : vector<1x1x256x256xbf16> to vector<256x256xbf16>
    %cst_70 = arith.constant dense<0.000000e+00> : vector<64x256xf32>
    %132 = tpu.matmul %122, %131, %cst_70 {dimension_numbers = #tpu.dot_dimension_numbers<[1], [0], [0], [1], [0, 0, 1, 1], [], []>} : vector<64x256xbf16>, vector<256x256xbf16>, vector<64x256xf32> -> vector<64x256xf32>
    %133 = arith.addf %129, %132 : vector<64x256xf32>
    %c1_71 = arith.constant 1 : index
    %c0_72 = arith.constant 0 : index
    %c0_73 = arith.constant 0 : index
    %134 = vector.load %arg4[%c1_71, %c0_72, %c0_73] : memref<4x1x256xf32, #tpu.memory_space<vmem>>, vector<1x1x256xf32>
    %135 = vector.shape_cast %134 : vector<1x1x256xf32> to vector<1x256xf32>
    %136 = vector.broadcast %135 : vector<1x256xf32> to vector<64x256xf32>
    %137 = arith.addf %133, %136 : vector<64x256xf32>
    %cst_74 = arith.constant dense<0.000000e+00> : vector<256xf32>
    %138 = vector.multi_reduction <add>, %137, %cst_74 [0] : vector<64x256xf32> to vector<256xf32>
    %139 = vector.shape_cast %138 : vector<256xf32> to vector<1x256xf32>
    %c8_i32_75 = arith.constant 8 : i32
    %140 = tpu.dynamic_rotate %139 by %c8_i32_75 dim 1 : vector<1x256xf32>, i32 -> vector<1x256xf32>
    %141 = arith.addf %139, %140 : vector<1x256xf32>
    %c16_i32_76 = arith.constant 16 : i32
    %142 = tpu.dynamic_rotate %141 by %c16_i32_76 dim 1 : vector<1x256xf32>, i32 -> vector<1x256xf32>
    %143 = arith.addf %141, %142 : vector<1x256xf32>
    %c32_i32_77 = arith.constant 32 : i32
    %144 = tpu.dynamic_rotate %143 by %c32_i32_77 dim 1 : vector<1x256xf32>, i32 -> vector<1x256xf32>
    %145 = arith.addf %143, %144 : vector<1x256xf32>
    %c64_i32_78 = arith.constant 64 : i32
    %146 = tpu.dynamic_rotate %145 by %c64_i32_78 dim 1 : vector<1x256xf32>, i32 -> vector<1x256xf32>
    %147 = arith.addf %145, %146 : vector<1x256xf32>
    %c128_i32_79 = arith.constant 128 : i32
    %148 = tpu.dynamic_rotate %147 by %c128_i32_79 dim 1 : vector<1x256xf32>, i32 -> vector<1x256xf32>
    %149 = arith.addf %147, %148 : vector<1x256xf32>
    %cst_80 = arith.constant 4.8828125E-4 : f32
    %150 = vector.broadcast %cst_80 : f32 to vector<1x256xf32>
    %151 = arith.mulf %149, %150 : vector<1x256xf32>
    %152 = arith.mulf %137, %137 : vector<64x256xf32>
    %cst_81 = arith.constant dense<0.000000e+00> : vector<256xf32>
    %153 = vector.multi_reduction <add>, %152, %cst_81 [0] : vector<64x256xf32> to vector<256xf32>
    %154 = vector.shape_cast %153 : vector<256xf32> to vector<1x256xf32>
    %c8_i32_82 = arith.constant 8 : i32
    %155 = tpu.dynamic_rotate %154 by %c8_i32_82 dim 1 : vector<1x256xf32>, i32 -> vector<1x256xf32>
    %156 = arith.addf %154, %155 : vector<1x256xf32>
    %c16_i32_83 = arith.constant 16 : i32
    %157 = tpu.dynamic_rotate %156 by %c16_i32_83 dim 1 : vector<1x256xf32>, i32 -> vector<1x256xf32>
    %158 = arith.addf %156, %157 : vector<1x256xf32>
    %c32_i32_84 = arith.constant 32 : i32
    %159 = tpu.dynamic_rotate %158 by %c32_i32_84 dim 1 : vector<1x256xf32>, i32 -> vector<1x256xf32>
    %160 = arith.addf %158, %159 : vector<1x256xf32>
    %c64_i32_85 = arith.constant 64 : i32
    %161 = tpu.dynamic_rotate %160 by %c64_i32_85 dim 1 : vector<1x256xf32>, i32 -> vector<1x256xf32>
    %162 = arith.addf %160, %161 : vector<1x256xf32>
    %c128_i32_86 = arith.constant 128 : i32
    %163 = tpu.dynamic_rotate %162 by %c128_i32_86 dim 1 : vector<1x256xf32>, i32 -> vector<1x256xf32>
    %164 = arith.addf %162, %163 : vector<1x256xf32>
    %cst_87 = arith.constant 4.8828125E-4 : f32
    %165 = vector.broadcast %cst_87 : f32 to vector<1x256xf32>
    %166 = arith.mulf %164, %165 : vector<1x256xf32>
    %167 = arith.mulf %151, %151 : vector<1x256xf32>
    %168 = arith.subf %166, %167 : vector<1x256xf32>
    %c1_88 = arith.constant 1 : index
    %c0_89 = arith.constant 0 : index
    %c0_90 = arith.constant 0 : index
    %169 = vector.load %arg5[%c1_88, %c0_89, %c0_90] : memref<4x1x256xf32, #tpu.memory_space<vmem>>, vector<1x1x256xf32>
    %170 = vector.shape_cast %169 : vector<1x1x256xf32> to vector<1x256xf32>
    %cst_91 = arith.constant 9.99999974E-6 : f32
    %171 = vector.broadcast %cst_91 : f32 to vector<1x256xf32>
    %172 = arith.addf %168, %171 : vector<1x256xf32>
    %173 = math.rsqrt %172 : vector<1x256xf32>
    %174 = arith.mulf %170, %173 : vector<1x256xf32>
    %c1_92 = arith.constant 1 : index
    %c0_93 = arith.constant 0 : index
    %c0_94 = arith.constant 0 : index
    %175 = vector.load %arg6[%c1_92, %c0_93, %c0_94] : memref<4x1x256xf32, #tpu.memory_space<vmem>>, vector<1x1x256xf32>
    %176 = vector.shape_cast %175 : vector<1x1x256xf32> to vector<1x256xf32>
    %177 = arith.mulf %151, %174 : vector<1x256xf32>
    %178 = arith.subf %176, %177 : vector<1x256xf32>
    %179 = vector.broadcast %174 : vector<1x256xf32> to vector<64x256xf32>
    %180 = arith.mulf %137, %179 : vector<64x256xf32>
    %181 = vector.broadcast %178 : vector<1x256xf32> to vector<64x256xf32>
    %182 = arith.addf %180, %181 : vector<64x256xf32>
    %cst_95 = arith.constant 0.000000e+00 : f32
    %183 = vector.broadcast %cst_95 : f32 to vector<64x256xf32>
    %184 = arith.maximumf %182, %183 : vector<64x256xf32>
    %185 = arith.truncf %184 : vector<64x256xf32> to vector<64x256xbf16>
    %c1_i32_96 = arith.constant 1 : i32
    %186 = tpu.dynamic_rotate %184 by %c1_i32_96 dim 0 : vector<64x256xf32>, i32 -> vector<64x256xf32>
    %cst_97 = arith.constant 0.000000e+00 : f32
    %187 = vector.broadcast %cst_97 : f32 to vector<64x256xf32>
    %188 = arith.select %18, %187, %186 : vector<64x256xi1>, vector<64x256xf32>
    %189 = arith.truncf %188 : vector<64x256xf32> to vector<64x256xbf16>
    %c63_i32_98 = arith.constant 63 : i32
    %190 = tpu.dynamic_rotate %184 by %c63_i32_98 dim 0 : vector<64x256xf32>, i32 -> vector<64x256xf32>
    %cst_99 = arith.constant 0.000000e+00 : f32
    %191 = vector.broadcast %cst_99 : f32 to vector<64x256xf32>
    %192 = arith.select %36, %191, %190 : vector<64x256xi1>, vector<64x256xf32>
    %193 = arith.truncf %192 : vector<64x256xf32> to vector<64x256xbf16>
    %c2_100 = arith.constant 2 : index
    %c0_101 = arith.constant 0 : index
    %c0_102 = arith.constant 0 : index
    %c0_103 = arith.constant 0 : index
    %194 = vector.load %arg3[%c2_100, %c0_101, %c0_102, %c0_103] : memref<4x3x256x256xbf16, #tpu.memory_space<vmem>>, vector<1x1x256x256xbf16>
    %195 = vector.shape_cast %194 : vector<1x1x256x256xbf16> to vector<256x256xbf16>
    %cst_104 = arith.constant dense<0.000000e+00> : vector<64x256xf32>
    %196 = tpu.matmul %189, %195, %cst_104 {dimension_numbers = #tpu.dot_dimension_numbers<[1], [0], [0], [1], [0, 0, 1, 1], [], []>} : vector<64x256xbf16>, vector<256x256xbf16>, vector<64x256xf32> -> vector<64x256xf32>
    %c2_105 = arith.constant 2 : index
    %c1_106 = arith.constant 1 : index
    %c0_107 = arith.constant 0 : index
    %c0_108 = arith.constant 0 : index
    %197 = vector.load %arg3[%c2_105, %c1_106, %c0_107, %c0_108] : memref<4x3x256x256xbf16, #tpu.memory_space<vmem>>, vector<1x1x256x256xbf16>
    %198 = vector.shape_cast %197 : vector<1x1x256x256xbf16> to vector<256x256xbf16>
    %cst_109 = arith.constant dense<0.000000e+00> : vector<64x256xf32>
    %199 = tpu.matmul %185, %198, %cst_109 {dimension_numbers = #tpu.dot_dimension_numbers<[1], [0], [0], [1], [0, 0, 1, 1], [], []>} : vector<64x256xbf16>, vector<256x256xbf16>, vector<64x256xf32> -> vector<64x256xf32>
    %200 = arith.addf %196, %199 : vector<64x256xf32>
    %c2_110 = arith.constant 2 : index
    %c2_111 = arith.constant 2 : index
    %c0_112 = arith.constant 0 : index
    %c0_113 = arith.constant 0 : index
    %201 = vector.load %arg3[%c2_110, %c2_111, %c0_112, %c0_113] : memref<4x3x256x256xbf16, #tpu.memory_space<vmem>>, vector<1x1x256x256xbf16>
    %202 = vector.shape_cast %201 : vector<1x1x256x256xbf16> to vector<256x256xbf16>
    %cst_114 = arith.constant dense<0.000000e+00> : vector<64x256xf32>
    %203 = tpu.matmul %193, %202, %cst_114 {dimension_numbers = #tpu.dot_dimension_numbers<[1], [0], [0], [1], [0, 0, 1, 1], [], []>} : vector<64x256xbf16>, vector<256x256xbf16>, vector<64x256xf32> -> vector<64x256xf32>
    %204 = arith.addf %200, %203 : vector<64x256xf32>
    %c2_115 = arith.constant 2 : index
    %c0_116 = arith.constant 0 : index
    %c0_117 = arith.constant 0 : index
    %205 = vector.load %arg4[%c2_115, %c0_116, %c0_117] : memref<4x1x256xf32, #tpu.memory_space<vmem>>, vector<1x1x256xf32>
    %206 = vector.shape_cast %205 : vector<1x1x256xf32> to vector<1x256xf32>
    %207 = vector.broadcast %206 : vector<1x256xf32> to vector<64x256xf32>
    %208 = arith.addf %204, %207 : vector<64x256xf32>
    %cst_118 = arith.constant dense<0.000000e+00> : vector<256xf32>
    %209 = vector.multi_reduction <add>, %208, %cst_118 [0] : vector<64x256xf32> to vector<256xf32>
    %210 = vector.shape_cast %209 : vector<256xf32> to vector<1x256xf32>
    %c8_i32_119 = arith.constant 8 : i32
    %211 = tpu.dynamic_rotate %210 by %c8_i32_119 dim 1 : vector<1x256xf32>, i32 -> vector<1x256xf32>
    %212 = arith.addf %210, %211 : vector<1x256xf32>
    %c16_i32_120 = arith.constant 16 : i32
    %213 = tpu.dynamic_rotate %212 by %c16_i32_120 dim 1 : vector<1x256xf32>, i32 -> vector<1x256xf32>
    %214 = arith.addf %212, %213 : vector<1x256xf32>
    %c32_i32_121 = arith.constant 32 : i32
    %215 = tpu.dynamic_rotate %214 by %c32_i32_121 dim 1 : vector<1x256xf32>, i32 -> vector<1x256xf32>
    %216 = arith.addf %214, %215 : vector<1x256xf32>
    %c64_i32_122 = arith.constant 64 : i32
    %217 = tpu.dynamic_rotate %216 by %c64_i32_122 dim 1 : vector<1x256xf32>, i32 -> vector<1x256xf32>
    %218 = arith.addf %216, %217 : vector<1x256xf32>
    %c128_i32_123 = arith.constant 128 : i32
    %219 = tpu.dynamic_rotate %218 by %c128_i32_123 dim 1 : vector<1x256xf32>, i32 -> vector<1x256xf32>
    %220 = arith.addf %218, %219 : vector<1x256xf32>
    %cst_124 = arith.constant 4.8828125E-4 : f32
    %221 = vector.broadcast %cst_124 : f32 to vector<1x256xf32>
    %222 = arith.mulf %220, %221 : vector<1x256xf32>
    %223 = arith.mulf %208, %208 : vector<64x256xf32>
    %cst_125 = arith.constant dense<0.000000e+00> : vector<256xf32>
    %224 = vector.multi_reduction <add>, %223, %cst_125 [0] : vector<64x256xf32> to vector<256xf32>
    %225 = vector.shape_cast %224 : vector<256xf32> to vector<1x256xf32>
    %c8_i32_126 = arith.constant 8 : i32
    %226 = tpu.dynamic_rotate %225 by %c8_i32_126 dim 1 : vector<1x256xf32>, i32 -> vector<1x256xf32>
    %227 = arith.addf %225, %226 : vector<1x256xf32>
    %c16_i32_127 = arith.constant 16 : i32
    %228 = tpu.dynamic_rotate %227 by %c16_i32_127 dim 1 : vector<1x256xf32>, i32 -> vector<1x256xf32>
    %229 = arith.addf %227, %228 : vector<1x256xf32>
    %c32_i32_128 = arith.constant 32 : i32
    %230 = tpu.dynamic_rotate %229 by %c32_i32_128 dim 1 : vector<1x256xf32>, i32 -> vector<1x256xf32>
    %231 = arith.addf %229, %230 : vector<1x256xf32>
    %c64_i32_129 = arith.constant 64 : i32
    %232 = tpu.dynamic_rotate %231 by %c64_i32_129 dim 1 : vector<1x256xf32>, i32 -> vector<1x256xf32>
    %233 = arith.addf %231, %232 : vector<1x256xf32>
    %c128_i32_130 = arith.constant 128 : i32
    %234 = tpu.dynamic_rotate %233 by %c128_i32_130 dim 1 : vector<1x256xf32>, i32 -> vector<1x256xf32>
    %235 = arith.addf %233, %234 : vector<1x256xf32>
    %cst_131 = arith.constant 4.8828125E-4 : f32
    %236 = vector.broadcast %cst_131 : f32 to vector<1x256xf32>
    %237 = arith.mulf %235, %236 : vector<1x256xf32>
    %238 = arith.mulf %222, %222 : vector<1x256xf32>
    %239 = arith.subf %237, %238 : vector<1x256xf32>
    %c2_132 = arith.constant 2 : index
    %c0_133 = arith.constant 0 : index
    %c0_134 = arith.constant 0 : index
    %240 = vector.load %arg5[%c2_132, %c0_133, %c0_134] : memref<4x1x256xf32, #tpu.memory_space<vmem>>, vector<1x1x256xf32>
    %241 = vector.shape_cast %240 : vector<1x1x256xf32> to vector<1x256xf32>
    %cst_135 = arith.constant 9.99999974E-6 : f32
    %242 = vector.broadcast %cst_135 : f32 to vector<1x256xf32>
    %243 = arith.addf %239, %242 : vector<1x256xf32>
    %244 = math.rsqrt %243 : vector<1x256xf32>
    %245 = arith.mulf %241, %244 : vector<1x256xf32>
    %c2_136 = arith.constant 2 : index
    %c0_137 = arith.constant 0 : index
    %c0_138 = arith.constant 0 : index
    %246 = vector.load %arg6[%c2_136, %c0_137, %c0_138] : memref<4x1x256xf32, #tpu.memory_space<vmem>>, vector<1x1x256xf32>
    %247 = vector.shape_cast %246 : vector<1x1x256xf32> to vector<1x256xf32>
    %248 = arith.mulf %222, %245 : vector<1x256xf32>
    %249 = arith.subf %247, %248 : vector<1x256xf32>
    %250 = vector.broadcast %245 : vector<1x256xf32> to vector<64x256xf32>
    %251 = arith.mulf %208, %250 : vector<64x256xf32>
    %252 = vector.broadcast %249 : vector<1x256xf32> to vector<64x256xf32>
    %253 = arith.addf %251, %252 : vector<64x256xf32>
    %cst_139 = arith.constant 0.000000e+00 : f32
    %254 = vector.broadcast %cst_139 : f32 to vector<64x256xf32>
    %255 = arith.maximumf %253, %254 : vector<64x256xf32>
    %256 = arith.truncf %255 : vector<64x256xf32> to vector<64x256xbf16>
    %c1_i32_140 = arith.constant 1 : i32
    %257 = tpu.dynamic_rotate %255 by %c1_i32_140 dim 0 : vector<64x256xf32>, i32 -> vector<64x256xf32>
    %cst_141 = arith.constant 0.000000e+00 : f32
    %258 = vector.broadcast %cst_141 : f32 to vector<64x256xf32>
    %259 = arith.select %18, %258, %257 : vector<64x256xi1>, vector<64x256xf32>
    %260 = arith.truncf %259 : vector<64x256xf32> to vector<64x256xbf16>
    %c63_i32_142 = arith.constant 63 : i32
    %261 = tpu.dynamic_rotate %255 by %c63_i32_142 dim 0 : vector<64x256xf32>, i32 -> vector<64x256xf32>
    %cst_143 = arith.constant 0.000000e+00 : f32
    %262 = vector.broadcast %cst_143 : f32 to vector<64x256xf32>
    %263 = arith.select %36, %262, %261 : vector<64x256xi1>, vector<64x256xf32>
    %264 = arith.truncf %263 : vector<64x256xf32> to vector<64x256xbf16>
    %c3 = arith.constant 3 : index
    %c0_144 = arith.constant 0 : index
    %c0_145 = arith.constant 0 : index
    %c0_146 = arith.constant 0 : index
    %265 = vector.load %arg3[%c3, %c0_144, %c0_145, %c0_146] : memref<4x3x256x256xbf16, #tpu.memory_space<vmem>>, vector<1x1x256x256xbf16>
    %266 = vector.shape_cast %265 : vector<1x1x256x256xbf16> to vector<256x256xbf16>
    %cst_147 = arith.constant dense<0.000000e+00> : vector<64x256xf32>
    %267 = tpu.matmul %260, %266, %cst_147 {dimension_numbers = #tpu.dot_dimension_numbers<[1], [0], [0], [1], [0, 0, 1, 1], [], []>} : vector<64x256xbf16>, vector<256x256xbf16>, vector<64x256xf32> -> vector<64x256xf32>
    %c3_148 = arith.constant 3 : index
    %c1_149 = arith.constant 1 : index
    %c0_150 = arith.constant 0 : index
    %c0_151 = arith.constant 0 : index
    %268 = vector.load %arg3[%c3_148, %c1_149, %c0_150, %c0_151] : memref<4x3x256x256xbf16, #tpu.memory_space<vmem>>, vector<1x1x256x256xbf16>
    %269 = vector.shape_cast %268 : vector<1x1x256x256xbf16> to vector<256x256xbf16>
    %cst_152 = arith.constant dense<0.000000e+00> : vector<64x256xf32>
    %270 = tpu.matmul %256, %269, %cst_152 {dimension_numbers = #tpu.dot_dimension_numbers<[1], [0], [0], [1], [0, 0, 1, 1], [], []>} : vector<64x256xbf16>, vector<256x256xbf16>, vector<64x256xf32> -> vector<64x256xf32>
    %271 = arith.addf %267, %270 : vector<64x256xf32>
    %c3_153 = arith.constant 3 : index
    %c2_154 = arith.constant 2 : index
    %c0_155 = arith.constant 0 : index
    %c0_156 = arith.constant 0 : index
    %272 = vector.load %arg3[%c3_153, %c2_154, %c0_155, %c0_156] : memref<4x3x256x256xbf16, #tpu.memory_space<vmem>>, vector<1x1x256x256xbf16>
    %273 = vector.shape_cast %272 : vector<1x1x256x256xbf16> to vector<256x256xbf16>
    %cst_157 = arith.constant dense<0.000000e+00> : vector<64x256xf32>
    %274 = tpu.matmul %264, %273, %cst_157 {dimension_numbers = #tpu.dot_dimension_numbers<[1], [0], [0], [1], [0, 0, 1, 1], [], []>} : vector<64x256xbf16>, vector<256x256xbf16>, vector<64x256xf32> -> vector<64x256xf32>
    %275 = arith.addf %271, %274 : vector<64x256xf32>
    %c3_158 = arith.constant 3 : index
    %c0_159 = arith.constant 0 : index
    %c0_160 = arith.constant 0 : index
    %276 = vector.load %arg4[%c3_158, %c0_159, %c0_160] : memref<4x1x256xf32, #tpu.memory_space<vmem>>, vector<1x1x256xf32>
    %277 = vector.shape_cast %276 : vector<1x1x256xf32> to vector<1x256xf32>
    %278 = vector.broadcast %277 : vector<1x256xf32> to vector<64x256xf32>
    %279 = arith.addf %275, %278 : vector<64x256xf32>
    %cst_161 = arith.constant dense<0.000000e+00> : vector<256xf32>
    %280 = vector.multi_reduction <add>, %279, %cst_161 [0] : vector<64x256xf32> to vector<256xf32>
    %281 = vector.shape_cast %280 : vector<256xf32> to vector<1x256xf32>
    %c8_i32_162 = arith.constant 8 : i32
    %282 = tpu.dynamic_rotate %281 by %c8_i32_162 dim 1 : vector<1x256xf32>, i32 -> vector<1x256xf32>
    %283 = arith.addf %281, %282 : vector<1x256xf32>
    %c16_i32_163 = arith.constant 16 : i32
    %284 = tpu.dynamic_rotate %283 by %c16_i32_163 dim 1 : vector<1x256xf32>, i32 -> vector<1x256xf32>
    %285 = arith.addf %283, %284 : vector<1x256xf32>
    %c32_i32_164 = arith.constant 32 : i32
    %286 = tpu.dynamic_rotate %285 by %c32_i32_164 dim 1 : vector<1x256xf32>, i32 -> vector<1x256xf32>
    %287 = arith.addf %285, %286 : vector<1x256xf32>
    %c64_i32_165 = arith.constant 64 : i32
    %288 = tpu.dynamic_rotate %287 by %c64_i32_165 dim 1 : vector<1x256xf32>, i32 -> vector<1x256xf32>
    %289 = arith.addf %287, %288 : vector<1x256xf32>
    %c128_i32_166 = arith.constant 128 : i32
    %290 = tpu.dynamic_rotate %289 by %c128_i32_166 dim 1 : vector<1x256xf32>, i32 -> vector<1x256xf32>
    %291 = arith.addf %289, %290 : vector<1x256xf32>
    %cst_167 = arith.constant 4.8828125E-4 : f32
    %292 = vector.broadcast %cst_167 : f32 to vector<1x256xf32>
    %293 = arith.mulf %291, %292 : vector<1x256xf32>
    %294 = arith.mulf %279, %279 : vector<64x256xf32>
    %cst_168 = arith.constant dense<0.000000e+00> : vector<256xf32>
    %295 = vector.multi_reduction <add>, %294, %cst_168 [0] : vector<64x256xf32> to vector<256xf32>
    %296 = vector.shape_cast %295 : vector<256xf32> to vector<1x256xf32>
    %c8_i32_169 = arith.constant 8 : i32
    %297 = tpu.dynamic_rotate %296 by %c8_i32_169 dim 1 : vector<1x256xf32>, i32 -> vector<1x256xf32>
    %298 = arith.addf %296, %297 : vector<1x256xf32>
    %c16_i32_170 = arith.constant 16 : i32
    %299 = tpu.dynamic_rotate %298 by %c16_i32_170 dim 1 : vector<1x256xf32>, i32 -> vector<1x256xf32>
    %300 = arith.addf %298, %299 : vector<1x256xf32>
    %c32_i32_171 = arith.constant 32 : i32
    %301 = tpu.dynamic_rotate %300 by %c32_i32_171 dim 1 : vector<1x256xf32>, i32 -> vector<1x256xf32>
    %302 = arith.addf %300, %301 : vector<1x256xf32>
    %c64_i32_172 = arith.constant 64 : i32
    %303 = tpu.dynamic_rotate %302 by %c64_i32_172 dim 1 : vector<1x256xf32>, i32 -> vector<1x256xf32>
    %304 = arith.addf %302, %303 : vector<1x256xf32>
    %c128_i32_173 = arith.constant 128 : i32
    %305 = tpu.dynamic_rotate %304 by %c128_i32_173 dim 1 : vector<1x256xf32>, i32 -> vector<1x256xf32>
    %306 = arith.addf %304, %305 : vector<1x256xf32>
    %cst_174 = arith.constant 4.8828125E-4 : f32
    %307 = vector.broadcast %cst_174 : f32 to vector<1x256xf32>
    %308 = arith.mulf %306, %307 : vector<1x256xf32>
    %309 = arith.mulf %293, %293 : vector<1x256xf32>
    %310 = arith.subf %308, %309 : vector<1x256xf32>
    %c3_175 = arith.constant 3 : index
    %c0_176 = arith.constant 0 : index
    %c0_177 = arith.constant 0 : index
    %311 = vector.load %arg5[%c3_175, %c0_176, %c0_177] : memref<4x1x256xf32, #tpu.memory_space<vmem>>, vector<1x1x256xf32>
    %312 = vector.shape_cast %311 : vector<1x1x256xf32> to vector<1x256xf32>
    %cst_178 = arith.constant 9.99999974E-6 : f32
    %313 = vector.broadcast %cst_178 : f32 to vector<1x256xf32>
    %314 = arith.addf %310, %313 : vector<1x256xf32>
    %315 = math.rsqrt %314 : vector<1x256xf32>
    %316 = arith.mulf %312, %315 : vector<1x256xf32>
    %c3_179 = arith.constant 3 : index
    %c0_180 = arith.constant 0 : index
    %c0_181 = arith.constant 0 : index
    %317 = vector.load %arg6[%c3_179, %c0_180, %c0_181] : memref<4x1x256xf32, #tpu.memory_space<vmem>>, vector<1x1x256xf32>
    %318 = vector.shape_cast %317 : vector<1x1x256xf32> to vector<1x256xf32>
    %319 = arith.mulf %293, %316 : vector<1x256xf32>
    %320 = arith.subf %318, %319 : vector<1x256xf32>
    %321 = vector.broadcast %316 : vector<1x256xf32> to vector<64x256xf32>
    %322 = arith.mulf %279, %321 : vector<64x256xf32>
    %323 = vector.broadcast %320 : vector<1x256xf32> to vector<64x256xf32>
    %324 = arith.addf %322, %323 : vector<64x256xf32>
    %cst_182 = arith.constant 0.000000e+00 : f32
    %325 = vector.broadcast %cst_182 : f32 to vector<64x256xf32>
    %326 = arith.maximumf %324, %325 : vector<64x256xf32>
    %c0_183 = arith.constant 0 : index
    %c0_184 = arith.constant 0 : index
    %327 = vector.load %arg7[%c0_183, %c0_184] : memref<64x256xf32, #tpu.memory_space<vmem>>, vector<64x256xf32>
    tpu.vector_store %arg7[%c0_183, %c0_184], %326 {strides = array<i32>} : memref<64x256xf32, #tpu.memory_space<vmem>>, vector<64x256xf32>,
    return
  }
}

</mosaic_0001>

<bundles_post_ra>
// kernel: upsample_forward.1
= control target key start
LH: loop header
LB: loop body
LE: loop exit
PB: predicated region body
PF: predicated region fallthrough
CT: control target
= control target key end

     0   :  { %12 = vsyncpa [#allocation3], 0  ;;  %s10525_s0 = inlined_call_operand.vmem [shape: bf16[64,128], index: 0, kind: input, shape index: {}]   ;;  %s10526_s1 = inlined_call_operand.hbm [shape: bf16[128,256], index: 1, kind: input, shape index: {}]   ;;  %s10527_s2 = inlined_call_operand.hbm [shape: f32[1,256], index: 2, kind: input, shape index: {}]   ;;  %s10528_s3 = inlined_call_operand.hbm [shape: bf16[4,3,256,256], index: 3, kind: input, shape index: {}]   ;;  %s10529_s4 = inlined_call_operand.hbm [shape: f32[4,1,256], index: 4, kind: input, shape index: {}]   ;;  %s10530_s5 = inlined_call_operand.hbm [shape: f32[4,1,256], index: 5, kind: input, shape index: {}]   ;;  %s10531_s6 = inlined_call_operand.hbm [shape: f32[4,1,256], index: 6, kind: input, shape index: {}]   ;;  %s10532_s7 = inlined_call_operand.vmem [shape: f32[64,256], index: 7, kind: output, shape index: {}]  }
   0x1   :  { %13 = vsyncpa [#allocation5], 0 }
   0x2   :  { %14 = vsyncpa [#allocation8], 0  ;;  %s36_s26 = sshll.u32 %s10527_s2, 4  ;;  %s37_s26 = int_to_ptr.hbm [resolvable:$true] %s36_s26 }
   0x3   :  { %15 = vsyncpa [#allocation11], 0  ;;  %s8169_s27 = smov [#allocation4]   ;;  %s59_s8 = sshll.u32 %s10529_s4, 4  ;;  %s60_s8 = int_to_ptr.hbm [resolvable:$true] %s59_s8 }
   0x4   :  { %s38_s28 = sshll.u32 %s8169_s27, 4  ;;  %s8170_s9 = smov [#allocation7]   ;;  %s39_s28 = int_to_ptr.vmem [resolvable:$true] %s38_s28 }
   0x5   :  { %41 = dma.hbm_to_vmem [thread:$0]  %s37_s26, 32, %s39_s28, [#allocation5]  }
   0x6   :  { %s61_s10 = sshll.u32 %s8170_s9, 4  ;;  %s8171_s11 = smov 32   ;;  %s62_s10 = int_to_ptr.vmem [resolvable:$true] %s61_s10 }
   0x7   :  { %s8172_s12 = smov 2   ;;  %s22_s14 = sshll.u32 %s10526_s1, 4  ;;  %s23_s14 = int_to_ptr.hbm [resolvable:$true] %s22_s14 }
   0x8   :  { %67 = dma.hbm_to_vmem [thread:$0]  %s60_s8, 128, %s62_s10, [#allocation8], %s8171_s11, %s8171_s11, %s8172_s12  }
   0x9   :  { %s8173_s15 = smov [#allocation2]   ;;  %s46_s18 = sshll.u32 %s10528_s3, 4  ;;  %s47_s18 = int_to_ptr.hbm [resolvable:$true] %s46_s18 }
   0xa   :  { %s24_s16 = sshll.u32 %s8173_s15, 4  ;;  %s8174_s19 = smov 128   ;;  %s25_s16 = int_to_ptr.vmem [resolvable:$true] %s24_s16 }
   0xb   :  { %s8175_s20 = smov 8   ;;  %s8176_s21 = smov [#allocation6]  }
   0xc   :  { %30 = dma.hbm_to_vmem [thread:$0]  %s23_s14, 2048, %s25_s16, [#allocation3], %s8174_s19, %s8174_s19, %s8175_s20  }
   0xd   :  { %s48_s22 = sshll.u32 %s8176_s21, 4  ;;  %s72_s25 = sshll.u32 %s10530_s5, 4  ;;  %s49_s22 = int_to_ptr.vmem [resolvable:$true] %s48_s22  ;;  %s73_s25 = int_to_ptr.hbm [resolvable:$true] %s72_s25 }
   0xe   :  { %54 = dma.hbm_to_vmem [thread:$0]  %s47_s18, 49152, %s49_s22, [#allocation5], %s8174_s19, %s8174_s19, %s8175_s20  }
   0xf   :  { %s85_s27 = sshll.u32 %s10531_s6, 4  ;;  %s8177_s3 = smov [#allocation9]   ;;  %s86_s27 = int_to_ptr.hbm [resolvable:$true] %s85_s27 }
  0x10   :  { %s74_s28 = sshll.u32 %s8177_s3, 4  ;;  %s8178_s29 = smov [#allocation10]   ;;  %s75_s28 = int_to_ptr.vmem [resolvable:$true] %s74_s28 }
  0x11   :  { %80 = dma.hbm_to_vmem [thread:$0]  %s73_s25, 128, %s75_s28, [#allocation8], %s8171_s11, %s8171_s11, %s8172_s12  }
  0x12   :  { %s87_s30 = sshll.u32 %s8178_s29, 4  ;;  %s88_s30 = int_to_ptr.vmem [resolvable:$true] %s87_s30 }
  0x13   :  { %93 = dma.hbm_to_vmem [thread:$0]  %s86_s27, 128, %s88_s30, [#allocation11], %s8171_s11, %s8171_s11, %s8172_s12  }
  0x14   :  { %8161 = dma.done.wait [#allocation3], 2048  }
  0x15   :  { %8162 = vsyncadd [#allocation3], 4294965248 }
  0x16   :  { %8163 = dma.done.wait [#allocation5], 49184  }
  0x17   :  { %8164 = vsyncadd [#allocation5], 4294918112 }
  0x18   :  { %8165 = dma.done.wait [#allocation8], 256  }
  0x19   :  { %8166 = vsyncadd [#allocation8], 4294967040 }
  0x1a   :  { %8167 = dma.done.wait [#allocation11], 128  }
  0x1b   :  { %8168 = vsyncadd [#allocation11], 4294967168  ;;  %v5774_v0 = vld [vmem:[#allocation2 + $0x70] sm:$0xf]  ;;  %v7591_v1 = vld [vmem:[#allocation2 + $0x74] sm:$0xf0] }
  0x1c   :  { %v7590_v2 = vld [vmem:[#allocation2 + $0x74] sm:$0xf]  ;;  %v5775_v3 = vor.u32 %v7591_v1, %v5774_v0  ;;  %v5776_v4 = vld [vmem:[#allocation2 + $0x78] sm:$0xf0]  ;;  %v5766_v5 = vld [vmem:[#allocation2 + $0x60] sm:$0xf] }
  0x1d   :  { %v7589_v6 = vld [vmem:[#allocation2 + $0x64] sm:$0xf0]  ;;  %v5779_v7 = vor.u32 %v7590_v2, %v5776_v4  ;;  %v7588_v8 = vld [vmem:[#allocation2 + $0x64] sm:$0xf]  ;;  %v5768_v9 = vld [vmem:[#allocation2 + $0x68] sm:$0xf0] }
  0x1e   :  { %373 = vmatpush.bf16.msra.mxu0 %v5775_v3  ;;  %7980 = vmatpush.bf16.msra.mxu2 %v5775_v3  ;;  %v5767_v10 = vor.u32 %v7589_v6, %v5766_v5  ;;  %v5771_v11 = vor.u32 %v7588_v8, %v5768_v9  ;;  %v5758_v12 = vld [vmem:[#allocation2 + $0x50] sm:$0xf]  ;;  %v7587_v13 = vld [vmem:[#allocation2 + $0x54] sm:$0xf0]  ;;  %v7586_v14 = vld [vmem:[#allocation2 + $0x54] sm:$0xf] }
  0x1f   :  { %402 = vmatpush.bf16.msra.mxu1 %v5779_v7  ;;  %7988 = vmatpush.bf16.msra.mxu3 %v5779_v7  ;;  %v5760_v15 = vld [vmem:[#allocation2 + $0x58] sm:$0xf0]  ;;  %v5759_v16 = vor.u32 %v7587_v13, %v5758_v12  ;;  %v5750_v18 = vld [vmem:[#allocation2 + $0x40] sm:$0xf]  ;;  %v7585_v19 = vld [vmem:[#allocation2 + $0x44] sm:$0xf0] }
  0x20   :  { %v5763_v17 = vor.u32 %v7586_v14, %v5760_v15  ;;  %v7584_v20 = vld [vmem:[#allocation2 + $0x44] sm:$0xf]  ;;  %v5752_v21 = vld [vmem:[#allocation2 + $0x48] sm:$0xf0]  ;;  %v5751_v22 = vor.u32 %v7585_v19, %v5750_v18  ;;  %v5742_v24 = vld [vmem:[#allocation2 + $0x30] sm:$0xf] }
  0x21   :  { %v5755_v23 = vor.u32 %v7584_v20, %v5752_v21  ;;  %v7583_v25 = vld [vmem:[#allocation2 + $0x34] sm:$0xf0]  ;;  %v7582_v26 = vld [vmem:[#allocation2 + $0x34] sm:$0xf]  ;;  %v5744_v27 = vld [vmem:[#allocation2 + $0x38] sm:$0xf0] }
  0x22   :  { %374 = vmatpush.bf16.msra.mxu0 %v5767_v10  ;;  %7981 = vmatpush.bf16.msra.mxu2 %v5767_v10  ;;  %v5743_v28 = vor.u32 %v7583_v25, %v5742_v24  ;;  %v5747_v29 = vor.u32 %v7582_v26, %v5744_v27  ;;  %v5734_v30 = vld [vmem:[#allocation2 + $0x20] sm:$0xf]  ;;  %v7581_v31 = vld [vmem:[#allocation2 + $0x24] sm:$0xf0]  ;;  %v7580_v32 = vld [vmem:[#allocation2 + $0x24] sm:$0xf] }
  0x23   :  { %403 = vmatpush.bf16.msra.mxu1 %v5771_v11  ;;  %7989 = vmatpush.bf16.msra.mxu3 %v5771_v11  ;;  %v5736_v33 = vld [vmem:[#allocation2 + $0x28] sm:$0xf0]  ;;  %v5735_v34 = vor.u32 %v7581_v31, %v5734_v30  ;;  %v5726_v36 = vld [vmem:[#allocation2 + $0x10] sm:$0xf]  ;;  %v7579_v37 = vld [vmem:[#allocation2 + $0x14] sm:$0xf0] }
  0x24   :  { %v5739_v35 = vor.u32 %v7580_v32, %v5736_v33  ;;  %v7578_v38 = vld [vmem:[#allocation2 + $0x14] sm:$0xf]  ;;  %v5728_v39 = vld [vmem:[#allocation2 + $0x18] sm:$0xf0]  ;;  %v5727_v40 = vor.u32 %v7579_v37, %v5726_v36  ;;  %v5718_v42 = vld [vmem:[#allocation2] sm:$0xf] }
  0x25   :  { %v5731_v41 = vor.u32 %v7578_v38, %v5728_v39  ;;  %v7577_v43 = vld [vmem:[#allocation2 + $0x4] sm:$0xf0]  ;;  %v7576_v44 = vld [vmem:[#allocation2 + $0x4] sm:$0xf]  ;;  %v5720_v45 = vld [vmem:[#allocation2 + $0x8] sm:$0xf0] }
  0x26   :  { %375 = vmatpush.bf16.msra.mxu0 %v5759_v16  ;;  %7982 = vmatpush.bf16.msra.mxu2 %v5759_v16  ;;  %v5838_v46 = vld [vmem:[#allocation6 + $0x170] sm:$0xf]  ;;  %v7639_v47 = vld [vmem:[#allocation6 + $0x174] sm:$0xf0]  ;;  %v5719_v50 = vor.u32 %v7577_v43, %v5718_v42  ;;  %v5723_v51 = vor.u32 %v7576_v44, %v5720_v45  ;;  %v7572_v52 = vld [vmem:[%s10525_s0] sm:$0xff]  ;;  %vm8179_vm3 = vmmov 1  }
  0x27   :  { %404 = vmatpush.bf16.msra.mxu1 %v5763_v17  ;;  %7990 = vmatpush.bf16.msra.mxu3 %v5763_v17  ;;  %v5902_v48 = vld [vmem:[#allocation6 + $0x1f0] sm:$0xf]  ;;  %v7655_v49 = vld [vmem:[#allocation6 + $0x1f4] sm:$0xf0]  ;;  %v7638_v54 = vld [vmem:[#allocation6 + $0x174] sm:$0xf]  ;;  %v5839_v56 = vor.u32 %v7639_v47, %v5838_v46 }
  0x28   :  { %v7574_v53 = vld [vmem:[%s10525_s0 + $0x10] sm:$0xff]  ;;  %v5840_v55 = vld [vmem:[#allocation6 + $0x178] sm:$0xf0]  ;;  %v5903_v57 = vor.u32 %v7655_v49, %v5902_v48  ;;  %v5830_v60 = vld [vmem:[#allocation6 + $0x160] sm:$0xf]  ;;  %s8181_s14 = smov 64  }
  0x29   :  { %v7654_v58 = vld [vmem:[#allocation6 + $0x1f4] sm:$0xf]  ;;  %v5904_v59 = vld [vmem:[#allocation6 + $0x1f8] sm:$0xf0]  ;;  %v7637_v61 = vld [vmem:[#allocation6 + $0x164] sm:$0xf0]  ;;  %v5843_v0 = vor.u32 %v7638_v54, %v5840_v55 }
  0x2a   :  { %376 = vmatpush.bf16.msra.mxu0 %v5751_v22  ;;  %7983 = vmatpush.bf16.msra.mxu2 %v5751_v22  ;;  %v5894_v62 = vld [vmem:[#allocation6 + $0x1e0] sm:$0xf]  ;;  %v7653_v63 = vld [vmem:[#allocation6 + $0x1e4] sm:$0xf0]  ;;  %v5907_v1 = vor.u32 %v7654_v58, %v5904_v59  ;;  %v7636_v2 = vld [vmem:[#allocation6 + $0x164] sm:$0xf]  ;;  %v5831_v4 = vor.u32 %v7637_v61, %v5830_v60 }
  0x2b   :  { %405 = vmatpush.bf16.msra.mxu1 %v5755_v23  ;;  %7991 = vmatpush.bf16.msra.mxu3 %v5755_v23  ;;  %v5832_v3 = vld [vmem:[#allocation6 + $0x168] sm:$0xf0]  ;;  %v5895_v5 = vor.u32 %v7653_v63, %v5894_v62  ;;  %v7652_v6 = vld [vmem:[#allocation6 + $0x1e4] sm:$0xf]  ;;  %v5822_v8 = vld [vmem:[#allocation6 + $0x150] sm:$0xf] }
  0x2c   :  { %v5896_v7 = vld [vmem:[#allocation6 + $0x1e8] sm:$0xf0]  ;;  %v7635_v9 = vld [vmem:[#allocation6 + $0x154] sm:$0xf0]  ;;  %v5886_v10 = vld [vmem:[#allocation6 + $0x1d0] sm:$0xf]  ;;  %v5835_v12 = vor.u32 %v7636_v2, %v5832_v3 }
  0x2d   :  { %v7651_v11 = vld [vmem:[#allocation6 + $0x1d4] sm:$0xf0]  ;;  %v5899_v13 = vor.u32 %v7652_v6, %v5896_v7  ;;  %v7634_v14 = vld [vmem:[#allocation6 + $0x154] sm:$0xf]  ;;  %v5824_v15 = vld [vmem:[#allocation6 + $0x158] sm:$0xf0]  ;;  %v5823_v16 = vor.u32 %v7635_v9, %v5822_v8 }
  0x2e   :  { %377 = vmatpush.bf16.msra.mxu0 %v5743_v28  ;;  %7984 = vmatpush.bf16.msra.mxu2 %v5743_v28  ;;  %v5887_v17 = vor.u32 %v7651_v11, %v5886_v10  ;;  %v7650_v18 = vld [vmem:[#allocation6 + $0x1d4] sm:$0xf]  ;;  %v5888_v19 = vld [vmem:[#allocation6 + $0x1d8] sm:$0xf0]  ;;  %v5814_v20 = vld [vmem:[#allocation6 + $0x140] sm:$0xf]  ;;  %v5827_v24 = vor.u32 %v7634_v14, %v5824_v15 }
  0x2f   :  { %406 = vmatpush.bf16.msra.mxu1 %v5747_v29  ;;  %7992 = vmatpush.bf16.msra.mxu3 %v5747_v29  ;;  %v7633_v21 = vld [vmem:[#allocation6 + $0x144] sm:$0xf0]  ;;  %v5878_v22 = vld [vmem:[#allocation6 + $0x1c0] sm:$0xf]  ;;  %v5891_v25 = vor.u32 %v7650_v18, %v5888_v19  ;;  %v7632_v26 = vld [vmem:[#allocation6 + $0x144] sm:$0xf] }
  0x30   :  { %v7649_v23 = vld [vmem:[#allocation6 + $0x1c4] sm:$0xf0]  ;;  %v5816_v27 = vld [vmem:[#allocation6 + $0x148] sm:$0xf0]  ;;  %v5815_v28 = vor.u32 %v7633_v21, %v5814_v20  ;;  %v7648_v30 = vld [vmem:[#allocation6 + $0x1c4] sm:$0xf] }
  0x31   :  { %v5879_v29 = vor.u32 %v7649_v23, %v5878_v22  ;;  %v5880_v31 = vld [vmem:[#allocation6 + $0x1c8] sm:$0xf0]  ;;  %v5806_v32 = vld [vmem:[#allocation6 + $0x130] sm:$0xf]  ;;  %v7631_v33 = vld [vmem:[#allocation6 + $0x134] sm:$0xf0]  ;;  %v5819_v36 = vor.u32 %v7632_v26, %v5816_v27 }
  0x32   :  { %378 = vmatpush.bf16.msra.mxu0 %v5735_v34  ;;  %7985 = vmatpush.bf16.msra.mxu2 %v5735_v34  ;;  %v5870_v34 = vld [vmem:[#allocation6 + $0x1b0] sm:$0xf]  ;;  %v5883_v37 = vor.u32 %v7648_v30, %v5880_v31  ;;  %v7630_v38 = vld [vmem:[#allocation6 + $0x134] sm:$0xf]  ;;  %v5807_v39 = vor.u32 %v7631_v33, %v5806_v32  ;;  %v5872_v43 = vld [vmem:[#allocation6 + $0x1b8] sm:$0xf0] }
  0x33   :  { %407 = vmatpush.bf16.msra.mxu1 %v5739_v35  ;;  %7993 = vmatpush.bf16.msra.mxu3 %v5739_v35  ;;  %v7647_v35 = vld [vmem:[#allocation6 + $0x1b4] sm:$0xf0]  ;;  %v7646_v42 = vld [vmem:[#allocation6 + $0x1b4] sm:$0xf]  ;;  %v7573_v44 = vld [vmem:[%s10525_s0 + $0x8] sm:$0xff] }
  0x34   :  { %v7575_v45 = vld [vmem:[%s10525_s0 + $0x18] sm:$0xff]  ;;  %v5875_v47 = vor.u32 %v7646_v42, %v5872_v43  ;;  %v5798_v48 = vld [vmem:[#allocation6 + $0x120] sm:$0xf]  ;;  %v7629_v49 = vld [vmem:[#allocation6 + $0x124] sm:$0xf0]  ;;  %s8180_s0 = smov 16  }
  0x35   :  { %v5800_v55 = vld [vmem:[#allocation6 + $0x128] sm:$0xf0]  ;;  %v5790_v60 = vld [vmem:[#allocation6 + $0x110] sm:$0xf]  ;;  %v7627_v61 = vld [vmem:[#allocation6 + $0x114] sm:$0xf0] }
  0x36   :  { %379 = vmatpush.bf16.msra.mxu0 %v5727_v40  ;;  %7986 = vmatpush.bf16.msra.mxu2 %v5727_v40  ;;  %v5871_v40 = vor.u32 %v7647_v35, %v5870_v34  ;;  %v5854_v62 = vld [vmem:[#allocation6 + $0x190] sm:$0xf]  ;;  %v5791_v63 = vor.u32 %v7627_v61, %v5790_v60  ;;  %v5792_v2 = vld [vmem:[#allocation6 + $0x118] sm:$0xf0]  ;;  %v5782_v8 = vld [vmem:[#allocation6 + $0x100] sm:$0xf] }
  0x37   :  { %408 = vmatpush.bf16.msra.mxu1 %v5731_v41  ;;  %7994 = vmatpush.bf16.msra.mxu3 %v5731_v41  ;;  %v5808_v41 = vld [vmem:[#allocation6 + $0x138] sm:$0xf0]  ;;  %v7625_v9 = vld [vmem:[#allocation6 + $0x104] sm:$0xf0]  ;;  %v5846_v10 = vld [vmem:[#allocation6 + $0x180] sm:$0xf] }
  0x38   :  { %v5811_v46 = vor.u32 %v7630_v38, %v5808_v41  ;;  %v5856_v6 = vld [vmem:[#allocation6 + $0x198] sm:$0xf0]  ;;  %v5783_v11 = vor.u32 %v7625_v9, %v5782_v8  ;;  %v5784_v14 = vld [vmem:[#allocation6 + $0x108] sm:$0xf0]  ;;  %v5966_v20 = vld [vmem:[#allocation6 + $0x70] sm:$0xf] }
  0x39   :  { %v5848_v18 = vld [vmem:[#allocation6 + $0x188] sm:$0xf0]  ;;  %v7607_v21 = vld [vmem:[#allocation6 + $0x74] sm:$0xf0]  ;;  %v6030_v22 = vld [vmem:[#allocation6 + $0xf0] sm:$0xf] }
  0x3a   :  { %380 = vmatpush.bf16.msra.mxu0 %v5719_v50  ;;  %7987 = vmatpush.bf16.msra.mxu2 %v5719_v50  ;;  %v5799_v50 = vor.u32 %v7629_v49, %v5798_v48  ;;  %v5967_v23 = vor.u32 %v7607_v21, %v5966_v20  ;;  %v5958_v26 = vld [vmem:[#allocation6 + $0x60] sm:$0xf]  ;;  %v7605_v27 = vld [vmem:[#allocation6 + $0x64] sm:$0xf0]  ;;  %v7606_v32 = vld [vmem:[#allocation6 + $0x74] sm:$0xf] }
  0x3b   :  { %409 = vmatpush.bf16.msra.mxu1 %v5723_v51  ;;  %7995 = vmatpush.bf16.msra.mxu3 %v5723_v51  ;;  %v5862_v51 = vld [vmem:[#allocation6 + $0x1a0] sm:$0xf]  ;;  %v7621_v30 = vld [vmem:[#allocation6 + $0xe4] sm:$0xf0]  ;;  %v5968_v33 = vld [vmem:[#allocation6 + $0x78] sm:$0xf0] }
  0x3c   :  { %v7622_v34 = vld [vmem:[#allocation6 + $0xf4] sm:$0xf]  ;;  %v5971_v35 = vor.u32 %v7606_v32, %v5968_v33  ;;  %v5950_v38 = vld [vmem:[#allocation6 + $0x50] sm:$0xf]  ;;  %v7619_v42 = vld [vmem:[#allocation6 + $0xd4] sm:$0xf0] }
  0x3d   :  { %381 = vmatmul.bf16.vlgmr.msra.gmra.mxu0 %v7572_v52  ;;  %391 = vmatmul.bf16.vlgmr.msra.gmra.mxu2 %v7574_v53  ;;  %v263_v43 = vld [vmem:[#allocation4] sm:$0x3]  ;;  %v5934_v21 = vld [vmem:[#allocation6 + $0x30] sm:$0xf]  ;;  %v7616_v33 = vld [vmem:[#allocation6 + $0xc4] sm:$0xf] }
  0x3e   :  { %778 = vmatpush.bf16.msrb.mxu2 %v5839_v56  ;;  %410 = vmatmul.bf16.vlgmr.msra.gmra.mxu1 %v7572_v52  ;;  %v7645_v52 = vld [vmem:[#allocation6 + $0x1a4] sm:$0xf0]  ;;  %v7644_v56 = vld [vmem:[#allocation6 + $0x1a4] sm:$0xf]  ;;  %v8263_v48 = vperm.slane %v263_v43, 0  ;;  %v8265_v49 = vperm.slane %v263_v43, 1 }
  0x3f   :  { %807 = vmatpush.bf16.msrb.mxu3 %v5903_v57  ;;  %836 = vmatpush.bf16.msrb.mxu0 %v5843_v0  ;;  %v5863_v54 = vor.u32 %v7645_v52, %v5862_v51  ;;  %v5864_v57 = vld [vmem:[#allocation6 + $0x1a8] sm:$0xf0]  ;;  %v7643_v0 = vld [vmem:[#allocation6 + $0x194] sm:$0xf0]  ;;  %v7604_v51 = vld [vmem:[#allocation6 + $0x64] sm:$0xf] }
  0x40   :  { %420 = vmatmul.bf16.vlgmr.msra.gmra.mxu3 %v7574_v53  ;;  %865 = vmatpush.bf16.msrb.mxu1 %v5907_v1  ;;  %v7628_v53 = vld [vmem:[#allocation6 + $0x124] sm:$0xf]  ;;  %v5867_v59 = vor.u32 %v7644_v56, %v5864_v57  ;;  %v7626_v1 = vld [vmem:[#allocation6 + $0x114] sm:$0xf]  ;;  %v5855_v3 = vor.u32 %v7643_v0, %v5854_v62  ;;  %v5960_v52 = vld [vmem:[#allocation6 + $0x68] sm:$0xf0] }
  0x41   :  { %v5803_v58 = vor.u32 %v7628_v53, %v5800_v55  ;;  %v7620_v53 = vld [vmem:[#allocation6 + $0xe4] sm:$0xf]  ;;  %v5963_v55 = vor.u32 %v7604_v51, %v5960_v52  ;;  %v6024_v56 = vld [vmem:[#allocation6 + $0xe8] sm:$0xf0]  ;;  %v5942_v57 = vld [vmem:[#allocation6 + $0x40] sm:$0xf] }
  0x42   :  { %779 = vmatpush.bf16.msrb.mxu2 %v5831_v4  ;;  %v5795_v4 = vor.u32 %v7626_v1, %v5792_v2  ;;  %v6027_v61 = vor.u32 %v7620_v53, %v6024_v56  ;;  %v7617_v0 = vld [vmem:[#allocation6 + $0xc4] sm:$0xf0]  ;;  %v7602_v1 = vld [vmem:[#allocation6 + $0x54] sm:$0xf] }
  0x43   :  { %808 = vmatpush.bf16.msrb.mxu3 %v5895_v5  ;;  %837 = vmatpush.bf16.msrb.mxu0 %v5835_v12  ;;  %v7642_v5 = vld [vmem:[#allocation6 + $0x194] sm:$0xf]  ;;  %v7641_v12 = vld [vmem:[#allocation6 + $0x184] sm:$0xf0] }
  0x44   :  { %866 = vmatpush.bf16.msrb.mxu1 %v5899_v13  ;;  %v5859_v7 = vor.u32 %v7642_v5, %v5856_v6  ;;  %v7624_v13 = vld [vmem:[#allocation6 + $0x104] sm:$0xf]  ;;  %v5847_v15 = vor.u32 %v7641_v12, %v5846_v10  ;;  %v5952_v5 = vld [vmem:[#allocation6 + $0x58] sm:$0xf0]  ;;  %v7618_v6 = vld [vmem:[#allocation6 + $0xd4] sm:$0xf] }
  0x45   :  { %v5955_v10 = vor.u32 %v7602_v1, %v5952_v5  ;;  %v7614_v56 = vld [vmem:[#allocation6 + $0xb4] sm:$0xf] }
  0x46   :  { %780 = vmatpush.bf16.msrb.mxu2 %v5823_v16  ;;  %v5787_v16 = vor.u32 %v7624_v13, %v5784_v14 }
  0x47   :  { %809 = vmatpush.bf16.msrb.mxu3 %v5887_v17  ;;  %838 = vmatpush.bf16.msrb.mxu0 %v5827_v24  ;;  %v7640_v17 = vld [vmem:[#allocation6 + $0x184] sm:$0xf]  ;;  %v7623_v24 = vld [vmem:[#allocation6 + $0xf4] sm:$0xf0] }
  0x48   :  { %867 = vmatpush.bf16.msrb.mxu1 %v5891_v25  ;;  %v5851_v19 = vor.u32 %v7640_v17, %v5848_v18  ;;  %v6031_v25 = vor.u32 %v7623_v24, %v6030_v22  ;;  %v7599_v22 = vld [vmem:[#allocation6 + $0x34] sm:$0xf0] }
  0x4a   :  { %781 = vmatpush.bf16.msrb.mxu2 %v5815_v28  ;;  %v6022_v28 = vld [vmem:[#allocation6 + $0xe0] sm:$0xf] }
  0x4b   :  { %810 = vmatpush.bf16.msrb.mxu3 %v5879_v29  ;;  %839 = vmatpush.bf16.msrb.mxu0 %v5819_v36  ;;  %v5959_v29 = vor.u32 %v7605_v27, %v5958_v26  ;;  %v6023_v31 = vor.u32 %v7621_v30, %v6022_v28  ;;  %v6032_v36 = vld [vmem:[#allocation6 + $0xf8] sm:$0xf0]  ;;  %v5935_v26 = vor.u32 %v7599_v22, %v5934_v21  ;;  %v7615_v27 = vld [vmem:[#allocation6 + $0xb4] sm:$0xf0]  ;;  %v7600_v28 = vld [vmem:[#allocation6 + $0x44] sm:$0xf] }
  0x4c   :  { %868 = vmatpush.bf16.msrb.mxu1 %v5883_v37  ;;  %v6035_v37 = vor.u32 %v7622_v34, %v6032_v36  ;;  %v6008_v34 = vld [vmem:[#allocation6 + $0xc8] sm:$0xf0] }
  0x4d   :  { %386 = vmatmul.bf16.gmra.mxu0 %v7573_v44  ;;  %396 = vmatmul.bf16.gmra.mxu2 %v7575_v45  ;;  %v6011_v53 = vor.u32 %v7616_v33, %v6008_v34  ;;  %v5928_v33 = vld [vmem:[#allocation6 + $0x28] sm:$0xf0] }
  0x4e   :  { %782 = vmatpush.bf16.msrb.mxu2 %v5807_v39  ;;  %415 = vmatmul.bf16.gmra.mxu1 %v7573_v44  ;;  %v7603_v39 = vld [vmem:[#allocation6 + $0x54] sm:$0xf0] }
  0x4f   :  { %811 = vmatpush.bf16.msrb.mxu3 %v5871_v40  ;;  %840 = vmatpush.bf16.msrb.mxu0 %v5811_v46  ;;  %v6014_v40 = vld [vmem:[#allocation6 + $0xd0] sm:$0xf]  ;;  %v5951_v41 = vor.u32 %v7603_v39, %v5950_v38 }
  0x50   :  { %425 = vmatmul.bf16.gmra.mxu3 %v7575_v45  ;;  %869 = vmatpush.bf16.msrb.mxu1 %v5875_v47  ;;  %v10533_v45 = vlaneseq  ;;  %v6015_v46 = vor.u32 %v7619_v42, %v6014_v40  ;;  %v7597_v40 = vld [vmem:[#allocation6 + $0x24] sm:$0xf0] }
  0x52   :  { %783 = vmatpush.bf16.msrb.mxu2 %v5799_v50  ;;  %v8268_v50 = vshrl.u32 %v10533_v45, 7 }
  0x53   :  { %812 = vmatpush.bf16.msrb.mxu3 %v5863_v54  ;;  %841 = vmatpush.bf16.msrb.mxu0 %v5803_v58  ;;  %v7601_v58 = vld [vmem:[#allocation6 + $0x44] sm:$0xf0] }
  0x54   :  { %870 = vmatpush.bf16.msrb.mxu1 %v5867_v59  ;;  %10557 = vst [vmem:[#allocation16_spill] sm:$0xff] %v8268_v50  ;;  %v5943_v62 = vor.u32 %v7601_v58, %v5942_v57  ;;  %vm512_vm0 = vcmp.lt.s32.totalorder %v8268_v50, 7  ;;  %vm455_vm1 = vcmp.lt.s32.totalorder %v8268_v50, 1 }
  0x56   :  { %784 = vmatpush.bf16.msrb.mxu2 %v5791_v63  ;;  %v6006_v63 = vld [vmem:[#allocation6 + $0xc0] sm:$0xf] }
  0x57   :  { %813 = vmatpush.bf16.msrb.mxu3 %v5855_v3  ;;  %842 = vmatpush.bf16.msrb.mxu0 %v5795_v4  ;;  %v6007_v4 = vor.u32 %v7617_v0, %v6006_v63 }
  0x58   :  { %871 = vmatpush.bf16.msrb.mxu1 %v5859_v7  ;;  %v6016_v7 = vld [vmem:[#allocation6 + $0xd8] sm:$0xf0] }
  0x5a   :  { %785 = vmatpush.bf16.msrb.mxu2 %v5783_v11 }
  0x5b   :  { %814 = vmatpush.bf16.msrb.mxu3 %v5847_v15  ;;  %843 = vmatpush.bf16.msrb.mxu0 %v5787_v16  ;;  %v6019_v15 = vor.u32 %v7618_v6, %v6016_v7 }
  0x5c   :  { %872 = vmatpush.bf16.msrb.mxu1 %v5851_v19 }
  0x5e   :  { %1054 = vmatpush.bf16.msra.mxu2 %v5967_v23  ;;  %v5998_v23 = vld [vmem:[#allocation6 + $0xb0] sm:$0xf] }
  0x5f   :  { %1083 = vmatpush.bf16.msra.mxu3 %v6031_v25  ;;  %1112 = vmatpush.bf16.msra.mxu0 %v5971_v35  ;;  %v5926_v35 = vld [vmem:[#allocation6 + $0x20] sm:$0xf] }
  0x60   :  { %1141 = vmatpush.bf16.msra.mxu1 %v6035_v37 }
  0x62   :  { %1055 = vmatpush.bf16.msra.mxu2 %v5959_v29  ;;  %v5944_v29 = vld [vmem:[#allocation6 + $0x48] sm:$0xf0] }
  0x63   :  { %1084 = vmatpush.bf16.msra.mxu3 %v6023_v31  ;;  %1113 = vmatpush.bf16.msra.mxu0 %v5963_v55  ;;  %v5999_v31 = vor.u32 %v7615_v27, %v5998_v23  ;;  %v5947_v32 = vor.u32 %v7600_v28, %v5944_v29  ;;  %v5936_v55 = vld [vmem:[#allocation6 + $0x38] sm:$0xf0]  ;;  %v5982_v27 = vld [vmem:[#allocation6 + $0x90] sm:$0xf] }
  0x64   :  { %1142 = vmatpush.bf16.msra.mxu1 %v6027_v61 }
  0x66   :  { %1056 = vmatpush.bf16.msra.mxu2 %v5951_v41  ;;  %v5990_v41 = vld [vmem:[#allocation6 + $0xa0] sm:$0xf] }
  0x67   :  { %1085 = vmatpush.bf16.msra.mxu3 %v6015_v46  ;;  %1114 = vmatpush.bf16.msra.mxu0 %v5955_v10  ;;  %v7613_v46 = vld [vmem:[#allocation6 + $0xa4] sm:$0xf0] }
  0x68   :  { %1143 = vmatpush.bf16.msra.mxu1 %v6019_v15 }
  0x6a   :  { %1057 = vmatpush.bf16.msra.mxu2 %v5943_v62  ;;  %v6000_v62 = vld [vmem:[#allocation6 + $0xb8] sm:$0xf0] }
  0x6b   :  { %1086 = vmatpush.bf16.msra.mxu3 %v6007_v4  ;;  %1115 = vmatpush.bf16.msra.mxu0 %v5947_v32  ;;  %v6003_v0 = vor.u32 %v7614_v56, %v6000_v62  ;;  %v7596_v32 = vld [vmem:[#allocation6 + $0x24] sm:$0xf]  ;;  %v7609_v62 = vld [vmem:[#allocation6 + $0x84] sm:$0xf0] }
  0x6c   :  { %1144 = vmatpush.bf16.msra.mxu1 %v6011_v53 }
  0x6e   :  { %1058 = vmatpush.bf16.msra.mxu2 %v5935_v26  ;;  %v7595_v26 = vld [vmem:[#allocation6 + $0x14] sm:$0xf0] }
  0x6f   :  { %1087 = vmatpush.bf16.msra.mxu3 %v5999_v31  ;;  %v7611_v31 = vld [vmem:[#allocation6 + $0x94] sm:$0xf0] }
  0x70   :  { %1145 = vmatpush.bf16.msra.mxu1 %v6003_v0  ;;  %v5983_v34 = vor.u32 %v7611_v31, %v5982_v27 }
  0xba   :  { %v382_v44 = vpop.f32.mrf.mxu0 }
  0xbb   :  { %v411_v47 = vpop.f32.mrf.mxu1  ;;  %v8271_v59 = vadd.f32 %v382_v44, %v8263_v48 }
  0xbc   :  { %v8274_v2 = vadd.f32 %v411_v47, %v8265_v49  ;;  %v7598_v47 = vld [vmem:[#allocation6 + $0x34] sm:$0xf] }
  0xbd   :  { %v496_v12 = vrot.slane %v8271_v59, 1  ;;  %v5939_v61 = vor.u32 %v7598_v47, %v5936_v55 }
  0xbe   :  { %v497_v16 = vrot.slane %v8274_v2, 1 }
  0xbf   :  { %1116 = vmatpush.bf16.msra.mxu0 %v5939_v61 }
  0xc0   :  { %v392_v54 = vpop.f32.mrf.mxu2 }
  0xc1   :  { %v8302_v36 = vadd.f32 %v392_v54, %v8263_v48  ;;  %v5927_v54 = vor.u32 %v7597_v40, %v5926_v35  ;;  %v5931_v35 = vor.u32 %v7596_v32, %v5928_v33  ;;  %v5992_v40 = vld [vmem:[#allocation6 + $0xa8] sm:$0xf0] }
  0xc2   :  { %v384_v3 = vpop.f32.mrf.mxu0 }
  0xc3   :  { %v421_v60 = vpop.f32.mrf.mxu3  ;;  %v8277_v8 = vadd.f32 %v384_v3, %v8263_v48  ;;  %v413_v9 = vpop.f32.mrf.mxu1  ;;  %v504_v63 = vrot.slane %v8302_v36, 1  ;;  %1059 = vmatpush.bf16.msra.mxu2 %v5927_v54  ;;  %v7593_v54 = vld [vmem:[#allocation6 + $0x4] sm:$0xf0]  ;;  %1117 = vmatpush.bf16.msra.mxu0 %v5931_v35 }
  0xc4   :  { %v8280_v11 = vadd.f32 %v413_v9, %v8265_v49  ;;  %v8311_v42 = vadd.f32 %v421_v60, %v8265_v49  ;;  %v5991_v60 = vor.u32 %v7613_v46, %v5990_v41  ;;  %v5910_v41 = vld [vmem:[#allocation6] sm:$0xf] }
  0xc5   :  { %v498_v13 = vrot.slane %v8277_v8, 1  ;;  %v431_v14 = vpack.c.bf16 %v8277_v8, %v8271_v59  ;;  %v5911_v61 = vor.u32 %v7593_v54, %v5910_v41  ;;  %v6190_v41 = vld [vmem:[#allocation6 + $0x2f0] sm:$0xf]  ;;  %v6118_v54 = vld [vmem:[#allocation6 + $0x260] sm:$0xf] }
  0xc6   :  { %v499_v17 = vrot.slane %v8280_v11, 1  ;;  %v432_v18 = vpack.c.bf16 %v8280_v11, %v8274_v2  ;;  %v505_v1 = vrot.slane %v8311_v42, 1  ;;  %1088 = vmatpush.bf16.msra.mxu3 %v5991_v60 }
  0xc7   :  { %786 = vmatmul.bf16.vlgmr.msrb.gmra.mxu2 %v431_v14  ;;  %844 = vmatmul.bf16.vlgmr.msrb.gmra.mxu0 %v431_v14  ;;  %v525_v19 = vsel %vm512_vm0, %v496_v12, %v498_v13 }
  0xc8   :  { %815 = vmatmul.bf16.vlgmr.msrb.gmra.mxu3 %v432_v18  ;;  %873 = vmatmul.bf16.vlgmr.msrb.gmra.mxu1 %v432_v18  ;;  %v394_v20 = vpop.f32.mrf.mxu2  ;;  %v526_v24 = vsel %vm512_vm0, %v497_v16, %v499_v17 }
  0xc9   :  { %v8305_v37 = vadd.f32 %v394_v20, %v8263_v48 }
  0xca   :  { %v387_v30 = vpop.f32.mrf.mxu0  ;;  %1089 = vmatpush.bf16.msra.mxu3 %v5983_v34 }
  0xcb   :  { %v423_v25 = vpop.f32.mrf.mxu3  ;;  %v8308_v38 = vadd.f32 %v387_v30, %v8263_v48  ;;  %v416_v39 = vpop.f32.mrf.mxu1  ;;  %v506_v51 = vrot.slane %v8305_v37, 1 }
  0xcc   :  { %v8314_v43 = vadd.f32 %v423_v25, %v8265_v49  ;;  %v8317_v44 = vadd.f32 %v416_v39, %v8265_v49  ;;  %v5918_v25 = vld [vmem:[#allocation6 + $0x10] sm:$0xf]  ;;  %v7612_v39 = vld [vmem:[#allocation6 + $0xa4] sm:$0xf] }
  0xcd   :  { %v500_v52 = vrot.slane %v8308_v38, 1  ;;  %v8341_v9 = vsel %vm512_vm0, %v504_v63, %v506_v51  ;;  %v5919_v30 = vor.u32 %v7595_v26, %v5918_v25  ;;  %v5995_v53 = vor.u32 %v7612_v39, %v5992_v40  ;;  %v6126_v39 = vld [vmem:[#allocation6 + $0x270] sm:$0xf]  ;;  %v7671_v40 = vld [vmem:[#allocation6 + $0x274] sm:$0xf0] }
  0xce   :  { %v507_v57 = vrot.slane %v8314_v43, 1  ;;  %v501_v58 = vrot.slane %v8317_v44, 1 }
  0xcf   :  { %v523_v4 = vsel %vm512_vm0, %v498_v13, %v500_v52  ;;  %1060 = vmatpush.bf16.msra.mxu2 %v5919_v30  ;;  %1146 = vmatpush.bf16.msra.mxu1 %v5995_v53  ;;  %v7687_v53 = vld [vmem:[#allocation6 + $0x2f4] sm:$0xf0] }
  0xd0   :  { %v397_v3 = vpop.f32.mrf.mxu2  ;;  %v8331_v6 = vpack.c.bf16 %v523_v4, %v525_v19  ;;  %v524_v7 = vsel %vm512_vm0, %v499_v17, %v501_v58  ;;  %v8351_v13 = vsel %vm512_vm0, %v505_v1, %v507_v57  ;;  %v7610_v4 = vld [vmem:[#allocation6 + $0x94] sm:$0xf] }
  0xd1   :  { %v8343_v14 = vpack.c.bf16 %v524_v7, %v526_v24  ;;  %v8365_v22 = vadd.f32 %v397_v3, %v8263_v48  ;;  %v5920_v3 = vld [vmem:[#allocation6 + $0x18] sm:$0xf0] }
  0xd2   :  { %v389_v10 = vpop.f32.mrf.mxu0 }
  0xd3   :  { %v426_v5 = vpop.f32.mrf.mxu3  ;;  %v8354_v15 = vadd.f32 %v389_v10, %v8263_v48  ;;  %v418_v17 = vpop.f32.mrf.mxu1  ;;  %v508_v46 = vrot.slane %v8365_v22, 1  ;;  %1061 = vmatpush.bf16.msra.mxu2 %v5911_v61  ;;  %v7670_v61 = vld [vmem:[#allocation6 + $0x274] sm:$0xf] }
  0xd4   :  { %v8357_v18 = vadd.f32 %v418_v17, %v8265_v49  ;;  %v8374_v47 = vadd.f32 %v426_v5, %v8265_v49  ;;  %v5984_v5 = vld [vmem:[#allocation6 + $0x98] sm:$0xf0] }
  0xd5   :  { %v502_v19 = vrot.slane %v8354_v15, 1  ;;  %v433_v20 = vpack.c.bf16 %v8354_v15, %v8308_v38  ;;  %v5987_v17 = vor.u32 %v7610_v4, %v5984_v5  ;;  %v515_v31 = vsel %vm512_vm0, %v506_v51, %v508_v46 }
  0xd6   :  { %v434_v21 = vpack.c.bf16 %v8357_v18, %v8317_v44  ;;  %v503_v55 = vrot.slane %v8357_v18, 1  ;;  %v509_v25 = vrot.slane %v8374_v47, 1 }
  0xd7   :  { %791 = vmatmul.bf16.gmra.mxu2 %v433_v20  ;;  %849 = vmatmul.bf16.gmra.mxu0 %v433_v20  ;;  %v519_v23 = vsel %vm512_vm0, %v502_v19, %v504_v63  ;;  %v7594_v63 = vld [vmem:[#allocation6 + $0x14] sm:$0xf]  ;;  %v521_v7 = vsel %vm512_vm0, %v500_v52, %v502_v19  ;;  %v7592_v20 = vld [vmem:[#allocation6 + $0x4] sm:$0xf] }
  0xd8   :  { %820 = vmatmul.bf16.gmra.mxu3 %v434_v21  ;;  %878 = vmatmul.bf16.gmra.mxu1 %v434_v21  ;;  %v399_v24 = vpop.f32.mrf.mxu2  ;;  %v5923_v10 = vor.u32 %v7594_v63, %v5920_v3  ;;  %v7608_v21 = vld [vmem:[#allocation6 + $0x84] sm:$0xf]  ;;  %v8387_v30 = vpack.c.bf16 %v519_v23, %v521_v7  ;;  %v520_v52 = vsel %vm512_vm0, %v503_v55, %v505_v1  ;;  %v6128_v63 = vld [vmem:[#allocation6 + $0x278] sm:$0xf0] }
  0xd9   :  { %v8370_v28 = vadd.f32 %v399_v24, %v8263_v48  ;;  %v5974_v48 = vld [vmem:[#allocation6 + $0x80] sm:$0xf]  ;;  %v5976_v24 = vld [vmem:[#allocation6 + $0x88] sm:$0xf0]  ;;  %1147 = vmatpush.bf16.msra.mxu1 %v5987_v17  ;;  %v522_v19 = vsel %vm512_vm0, %v501_v58, %v503_v55  ;;  %v516_v23 = vsel %vm512_vm0, %v507_v57, %v509_v25  ;;  %v8410_v1 = vpack.c.bf16 %v515_v31, %v8341_v9  ;;  %v6192_v3 = vld [vmem:[#allocation6 + $0x2f8] sm:$0xf0] }
  0xda   :  { %v5975_v0 = vor.u32 %v7609_v62, %v5974_v48  ;;  %1118 = vmatpush.bf16.msra.mxu0 %v5923_v10  ;;  %v8407_v33 = vpack.c.bf16 %v520_v52, %v522_v19  ;;  %v8413_v58 = vpack.c.bf16 %v516_v23, %v8351_v13  ;;  %v435_v13 = vpack.c.bf16 %v8305_v37, %v8302_v36  ;;  %v6182_v55 = vld [vmem:[#allocation6 + $0x2e0] sm:$0xf]  ;;  %v7684_v19 = vld [vmem:[#allocation6 + $0x2e4] sm:$0xf]  ;;  %v6184_v31 = vld [vmem:[#allocation6 + $0x2e8] sm:$0xf0] }
  0xdb   :  { %v428_v29 = vpop.f32.mrf.mxu3  ;;  %v510_v56 = vrot.slane %v8370_v28, 1  ;;  %v6191_v48 = vor.u32 %v7687_v53, %v6190_v41  ;;  %v6131_v5 = vor.u32 %v7670_v61, %v6128_v63  ;;  %v437_v10 = vpack.c.bf16 %v8370_v28, %v8365_v22  ;;  %v6102_v23 = vld [vmem:[#allocation6 + $0x240] sm:$0xf]  ;;  %v7682_v41 = vld [vmem:[#allocation6 + $0x2d4] sm:$0xf] }
  0xdc   :  { %v8379_v60 = vadd.f32 %v428_v29, %v8265_v49  ;;  %v5912_v49 = vld [vmem:[#allocation6 + $0x8] sm:$0xf0]  ;;  %1090 = vmatpush.bf16.msra.mxu3 %v5975_v0  ;;  %v5979_v29 = vor.u32 %v7608_v21, %v5976_v24  ;;  %v7686_v0 = vld [vmem:[#allocation6 + $0x2f4] sm:$0xf]  ;;  %v6174_v21 = vld [vmem:[#allocation6 + $0x2d0] sm:$0xf] }
  0xdd   :  { %v5915_v27 = vor.u32 %v7592_v20, %v5912_v49  ;;  %v513_v32 = vsel %vm512_vm0, %v508_v46, %v510_v56  ;;  %v527_v51 = vsel %vm512_vm0, %v510_v56, %v496_v12  ;;  %v436_v12 = vpack.c.bf16 %v8314_v43, %v8311_v42  ;;  %v7685_v56 = vld [vmem:[#allocation6 + $0x2e4] sm:$0xf0]  ;;  %v6110_v20 = vld [vmem:[#allocation6 + $0x250] sm:$0xf]  ;;  %v7667_v49 = vld [vmem:[#allocation6 + $0x254] sm:$0xf0] }
  0xde   :  { %v511_v26 = vrot.slane %v8379_v60, 1  ;;  %v8419_v34 = vpack.c.bf16 %v527_v51, %v513_v32  ;;  %1148 = vmatpush.bf16.msra.mxu1 %v5979_v29  ;;  %v6127_v46 = vor.u32 %v7671_v40, %v6126_v39  ;;  %v6183_v4 = vor.u32 %v7685_v56, %v6182_v55  ;;  %v7665_v51 = vld [vmem:[#allocation6 + $0x244] sm:$0xf0]  ;;  %v7666_v39 = vld [vmem:[#allocation6 + $0x254] sm:$0xf] }
  0xdf   :  { %1119 = vmatpush.bf16.msra.mxu0 %v5915_v27  ;;  %v6195_v7 = vor.u32 %v7686_v0, %v6192_v3  ;;  %v438_v17 = vpack.c.bf16 %v8379_v60, %v8374_v47  ;;  %v6111_v24 = vor.u32 %v7667_v49, %v6110_v20  ;;  %v6120_v27 = vld [vmem:[#allocation6 + $0x268] sm:$0xf0]  ;;  %v6187_v32 = vor.u32 %v7684_v19, %v6184_v31  ;;  %v6112_v40 = vld [vmem:[#allocation6 + $0x258] sm:$0xf0]  ;;  %v7679_v20 = vld [vmem:[#allocation6 + $0x2b4] sm:$0xf0] }
  0xe0   :  { %v514_v57 = vsel %vm512_vm0, %v509_v25, %v511_v26  ;;  %v528_v9 = vsel %vm512_vm0, %v511_v26, %v497_v16  ;;  %v7669_v16 = vld [vmem:[#allocation6 + $0x264] sm:$0xf0]  ;;  %1363 = vmatpush.bf16.msrb.mxu2 %v6127_v46  ;;  %1392 = vmatpush.bf16.msrb.mxu3 %v6191_v48  ;;  %v7683_v25 = vld [vmem:[#allocation6 + $0x2d4] sm:$0xf0]  ;;  %v7668_v26 = vld [vmem:[#allocation6 + $0x264] sm:$0xf]  ;;  %v6115_v53 = vor.u32 %v7666_v39, %v6112_v40 }
  0xe1   :  { %v8429_v35 = vpack.c.bf16 %v528_v9, %v514_v57  ;;  %v6119_v62 = vor.u32 %v7669_v16, %v6118_v54  ;;  %v6175_v29 = vor.u32 %v7683_v25, %v6174_v21  ;;  %v6123_v52 = vor.u32 %v7668_v26, %v6120_v27  ;;  %v6166_v57 = vld [vmem:[#allocation6 + $0x2c0] sm:$0xf]  ;;  %v7681_v9 = vld [vmem:[#allocation6 + $0x2c4] sm:$0xf0]  ;;  %v6176_v54 = vld [vmem:[#allocation6 + $0x2d8] sm:$0xf0] }
  0xe2   :  { %1450 = vmatpush.bf16.msrb.mxu1 %v6195_v7  ;;  %v131_v46 = vand.u32 31, %v8268_v50  ;;  %v453_v16 = vrot.slane %v8370_v28, 7  ;;  %v6179_v48 = vor.u32 %v7682_v41, %v6176_v54  ;;  %v454_v55 = vrot.slane %v8379_v60, 7  ;;  %v7663_v7 = vld [vmem:[#allocation6 + $0x234] sm:$0xf0] }
  0xe3   :  { %1421 = vmatpush.bf16.msrb.mxu0 %v6131_v5  ;;  %v439_v56 = vrot.slane %v8271_v59, 7  ;;  %v441_v61 = vrot.slane %v8277_v8, 7  ;;  %v442_v63 = vrot.slane %v8280_v11, 7  ;;  %v6094_v5 = vld [vmem:[#allocation6 + $0x230] sm:$0xf]  ;;  %v445_v40 = vrot.slane %v8354_v15, 7 }
  0xe4   :  { %1364 = vmatpush.bf16.msrb.mxu2 %v6119_v62  ;;  %1393 = vmatpush.bf16.msrb.mxu3 %v6183_v4  ;;  %v440_v62 = vrot.slane %v8274_v2, 7  ;;  %vm7976_vm2 = vcmp.ne.s32.totalorder %v131_v46, 0  ;;  %v10558_v2 = vmov 0  ;;  %v7664_v49 = vld [vmem:[#allocation6 + $0x244] sm:$0xf]  ;;  %v446_v46 = vrot.slane %v8357_v18, 7 }
  0xe5   :  { %v470_v0 = vsel %vm455_vm1, %v453_v16, %v439_v56  ;;  %v468_v8 = vsel %vm455_vm1, %v439_v56, %v441_v61  ;;  %vm8456_vm4 = vmpackc.low %vm8179_vm3, %vm7976_vm2  ;;  %v6104_v21 = vld [vmem:[#allocation6 + $0x248] sm:$0xf0]  ;;  %v7680_v26 = vld [vmem:[#allocation6 + $0x2c4] sm:$0xf]  ;;  %v444_v54 = vrot.slane %v8317_v44, 7  ;;  %v122_v60 = vadd.s32 24, %v8268_v50 }
  0xe6   :  { %1451 = vmatpush.bf16.msrb.mxu1 %v6187_v32  ;;  %v471_v59 = vsel %vm455_vm1, %v454_v55, %v440_v62  ;;  %v10559_v2 = vsel %vm8456_vm4, 4294967295, %v10558_v2  ;;  %v469_v11 = vsel %vm455_vm1, %v440_v62, %v442_v63  ;;  %v6038_v3 = vpack.c.bf16 %v468_v8, %v470_v0  ;;  %v6168_v27 = vld [vmem:[#allocation6 + $0x2c8] sm:$0xf0]  ;;  %v7661_v19 = vld [vmem:[#allocation6 + $0x224] sm:$0xf0] }
  0xe7   :  { %796 = vmatmul.bf16.gmra.mxu2 %v435_v13  ;;  %854 = vmatmul.bf16.gmra.mxu0 %v435_v13  ;;  %v6103_v13 = vor.u32 %v7665_v51, %v6102_v23  ;;  %10560 = vst [vmem:[#allocation17_spill] sm:$0xff] %v10559_v2  ;;  %v6046_v4 = vpack.c.bf16 %v469_v11, %v471_v59  ;;  %v6150_v31 = vld [vmem:[#allocation6 + $0x2a0] sm:$0xf]  ;;  %v7677_v23 = vld [vmem:[#allocation6 + $0x2a4] sm:$0xf0] }
  0xe8   :  { %825 = vmatmul.bf16.gmra.mxu3 %v436_v12  ;;  %883 = vmatmul.bf16.gmra.mxu1 %v436_v12  ;;  %v6167_v12 = vor.u32 %v7681_v9, %v6166_v57  ;;  %v6107_v25 = vor.u32 %v7664_v49, %v6104_v21  ;;  %v6151_v51 = vor.u32 %v7677_v23, %v6150_v31  ;;  %v7662_v57 = vld [vmem:[#allocation6 + $0x234] sm:$0xf]  ;;  %v6096_v9 = vld [vmem:[#allocation6 + $0x238] sm:$0xf0]  ;;  %v6078_v44 = vld [vmem:[#allocation6 + $0x210] sm:$0xf] }
  0xe9   :  { %1365 = vmatpush.bf16.msrb.mxu2 %v6111_v24  ;;  %1394 = vmatpush.bf16.msrb.mxu3 %v6175_v29  ;;  %v6086_v29 = vld [vmem:[#allocation6 + $0x220] sm:$0xf]  ;;  %v6160_v39 = vld [vmem:[#allocation6 + $0x2b8] sm:$0xf0]  ;;  %v465_v56 = vsel %vm455_vm1, %v444_v54, %v446_v46  ;;  %v467_v18 = vsel %vm455_vm1, %v442_v63, %v444_v54  ;;  %v7659_v59 = vld [vmem:[#allocation6 + $0x214] sm:$0xf0] }
  0xea   :  { %1422 = vmatpush.bf16.msrb.mxu0 %v6123_v52  ;;  %1452 = vmatpush.bf16.msrb.mxu1 %v6179_v48  ;;  %v6171_v52 = vor.u32 %v7680_v26, %v6168_v27  ;;  %v6087_v32 = vor.u32 %v7661_v19, %v6086_v29  ;;  %v491_v0 = vpack.c.bf16 %v465_v56, %v467_v18  ;;  %v6142_v8 = vld [vmem:[#allocation6 + $0x290] sm:$0xf]  ;;  %v7657_v49 = vld [vmem:[#allocation6 + $0x204] sm:$0xf0]  ;;  %v6134_v21 = vld [vmem:[#allocation6 + $0x280] sm:$0xf] }
  0xeb   :  { %v6079_v11 = vor.u32 %v7659_v59, %v6078_v44  ;;  %v7658_v27 = vld [vmem:[#allocation6 + $0x214] sm:$0xf]  ;;  %v6080_v29 = vld [vmem:[#allocation6 + $0x218] sm:$0xf0] }
  0xec   :  { %v6083_v31 = vor.u32 %v7658_v27, %v6080_v29  ;;  %v6144_v23 = vld [vmem:[#allocation6 + $0x298] sm:$0xf0] }
  0xed   :  { %1366 = vmatpush.bf16.msrb.mxu2 %v6103_v13  ;;  %1395 = vmatpush.bf16.msrb.mxu3 %v6167_v12  ;;  %v7678_v13 = vld [vmem:[#allocation6 + $0x2b4] sm:$0xf]  ;;  %v6099_v12 = vor.u32 %v7662_v57, %v6096_v9  ;;  %v448_v9 = vrot.slane %v8311_v42, 7  ;;  %v7656_v42 = vld [vmem:[#allocation6 + $0x204] sm:$0xf] }
  0xee   :  { %1423 = vmatpush.bf16.msrb.mxu0 %v6115_v53  ;;  %1453 = vmatpush.bf16.msrb.mxu1 %v6171_v52  ;;  %v6163_v41 = vor.u32 %v7678_v13, %v6160_v39  ;;  %v443_v53 = vrot.slane %v8308_v38, 7  ;;  %v123_v38 = vadd.s32 32, %v8268_v50  ;;  %v7674_v52 = vld [vmem:[#allocation6 + $0x294] sm:$0xf]  ;;  %v450_v13 = vrot.slane %v8314_v43, 7 }
  0xef   :  { %v6147_v57 = vor.u32 %v7674_v52, %v6144_v23  ;;  %v7672_v43 = vld [vmem:[#allocation6 + $0x284] sm:$0xf] }
  0xf0   :  { %v464_v48 = vsel %vm455_vm1, %v443_v53, %v445_v40  ;;  %v466_v15 = vsel %vm455_vm1, %v441_v61, %v443_v53  ;;  %v159_v19 = vand.u32 31, %v123_v38  ;;  %v10561_v53 = vmov 0 }
  0xf1   :  { %v490_v62 = vpack.c.bf16 %v464_v48, %v466_v15  ;;  %v6136_v48 = vld [vmem:[#allocation6 + $0x288] sm:$0xf0] }
  0xf2   :  { %1424 = vmatpush.bf16.msrb.mxu0 %v6107_v25  ;;  %1454 = vmatpush.bf16.msrb.mxu1 %v6163_v41  ;;  %vm7977_vm5 = vcmp.ne.s32.totalorder %v159_v19, 0  ;;  %v6072_v41 = vld [vmem:[#allocation6 + $0x208] sm:$0xf0]  ;;  %v6139_v15 = vor.u32 %v7672_v43, %v6136_v48 }
  0xf3   :  { %vm8496_vm6 = vmpackc.low %vm8179_vm3, %vm7977_vm5  ;;  %v6075_v54 = vor.u32 %v7656_v42, %v6072_v41  ;;  %vm1675_vm5 = vcmask 1040384  }
  0xf4   :  { %v10562_v53 = vsel %vm8496_vm6, 4294967295, %v10561_v53 }
  0xf5   :  { %10563 = vst [vmem:[#allocation18_spill] sm:$0xff] %v10562_v53 }
  0xf6   :  { %1425 = vmatpush.bf16.msrb.mxu0 %v6099_v12 }
  0xf7   :  { %801 = vmatmul.bf16.gmra.mxu2 %v437_v10  ;;  %859 = vmatmul.bf16.gmra.mxu0 %v437_v10  ;;  %v6158_v10 = vld [vmem:[#allocation6 + $0x2b0] sm:$0xf] }
  0xf8   :  { %830 = vmatmul.bf16.gmra.mxu3 %v438_v17  ;;  %888 = vmatmul.bf16.gmra.mxu1 %v438_v17  ;;  %v6095_v17 = vor.u32 %v7663_v7, %v6094_v5  ;;  %v6159_v24 = vor.u32 %v7679_v20, %v6158_v10  ;;  %v6088_v5 = vld [vmem:[#allocation6 + $0x228] sm:$0xf0]  ;;  %v7676_v10 = vld [vmem:[#allocation6 + $0x2a4] sm:$0xf]  ;;  %v6070_v20 = vld [vmem:[#allocation6 + $0x200] sm:$0xf] }
  0xf9   :  { %v6071_v25 = vor.u32 %v7657_v49, %v6070_v20 }
  0xfa   :  { %1367 = vmatpush.bf16.msrb.mxu2 %v6095_v17  ;;  %1396 = vmatpush.bf16.msrb.mxu3 %v6159_v24  ;;  %v6152_v17 = vld [vmem:[#allocation6 + $0x2a8] sm:$0xf0]  ;;  %v7673_v24 = vld [vmem:[#allocation6 + $0x284] sm:$0xf0] }
  0xfb   :  { %v6155_v63 = vor.u32 %v7676_v10, %v6152_v17  ;;  %v6135_v26 = vor.u32 %v7673_v24, %v6134_v21  ;;  %v10564_v10 = vmov 0 }
  0xfd   :  { %1455 = vmatpush.bf16.msrb.mxu1 %v6155_v63 }
  0xfe   :  { %1368 = vmatpush.bf16.msrb.mxu2 %v6087_v32  ;;  %1397 = vmatpush.bf16.msrb.mxu3 %v6151_v51  ;;  %v447_v32 = vrot.slane %v8302_v36, 7  ;;  %v449_v51 = vrot.slane %v8305_v37, 7  ;;  %v461_v36 = vsel %vm455_vm1, %v448_v9, %v450_v13  ;;  %v463_v37 = vsel %vm455_vm1, %v446_v46, %v448_v9 }
  0xff   :  { %v452_v46 = vrot.slane %v8374_v47, 7 }
 0x100   :  { %v460_v12 = vsel %vm455_vm1, %v447_v32, %v449_v51  ;;  %v462_v39 = vsel %vm455_vm1, %v445_v40, %v447_v32  ;;  %v451_v40 = vrot.slane %v8365_v22, 7 }
 0x101   :  { %1456 = vmatpush.bf16.msrb.mxu1 %v6147_v57  ;;  %v6042_v56 = vpack.c.bf16 %v460_v12, %v462_v39  ;;  %v457_v38 = vsel %vm455_vm1, %v452_v46, %v454_v55  ;;  %v459_v44 = vsel %vm455_vm1, %v450_v13, %v452_v46  ;;  %v10567_v13 = vmov 0 }
 0x102   :  { %1369 = vmatpush.bf16.msrb.mxu2 %v6079_v11  ;;  %v456_v18 = vsel %vm455_vm1, %v451_v40, %v453_v16  ;;  %v495_v22 = vpack.c.bf16 %v457_v38, %v459_v44 }
 0x105   :  { %1457 = vmatpush.bf16.msrb.mxu1 %v6139_v15 }
 0x106   :  { %1370 = vmatpush.bf16.msrb.mxu2 %v6071_v25 }
 0x107   :  { %6039 = vmatmul.msk.bf16.vlgmr.msra.gmra.mxu2 %vm8456_vm4, %v6038_v3  ;;  %6055 = vmatmul.msk.bf16.vlgmr.msra.gmra.mxu0 %vm8456_vm4, %v6038_v3  ;;  %v7675_v3 = vld [vmem:[#allocation6 + $0x294] sm:$0xf0] }
 0x108   :  { %6047 = vmatmul.msk.bf16.vlgmr.msra.gmra.mxu3 %vm8456_vm4, %v6046_v4  ;;  %6063 = vmatmul.msk.bf16.vlgmr.msra.gmra.mxu1 %vm8456_vm4, %v6046_v4  ;;  %v7660_v4 = vld [vmem:[#allocation6 + $0x224] sm:$0xf]  ;;  %v6143_v7 = vor.u32 %v7675_v3, %v6142_v8 }
 0x109   :  { %v6091_v61 = vor.u32 %v7660_v4, %v6088_v5  ;;  %v152_v5 = vand.u32 31, %v122_v60 }
 0x10a   :  { %1398 = vmatpush.bf16.msrb.mxu3 %v6143_v7 }
 0x10b   :  { %1426 = vmatpush.bf16.msrb.mxu0 %v6091_v61  ;;  %vm7978_vm7 = vcmp.ne.s32.totalorder %v152_v5, 31 }
 0x10c   :  { %vm8538_vm8 = vmpackc.low %vm7978_vm7, %vm8179_vm3 }
 0x10d   :  { %v10565_v10 = vsel %vm8538_vm8, 4294967295, %v10564_v10 }
 0x10e   :  { %1399 = vmatpush.bf16.msrb.mxu3 %v6135_v26  ;;  %10566 = vst [vmem:[#allocation19_spill] sm:$0xff] %v10565_v10 }
 0x10f   :  { %1427 = vmatpush.bf16.msrb.mxu0 %v6083_v31 }
 0x113   :  { %1428 = vmatpush.bf16.msrb.mxu0 %v6075_v54 }
 0x117   :  { %1067 = vmatmul.bf16.gmra.mxu2 %v490_v62  ;;  %1125 = vmatmul.bf16.gmra.mxu0 %v490_v62  ;;  %v6050_v62 = vpack.c.bf16 %v461_v36, %v463_v37 }
 0x118   :  { %1096 = vmatmul.bf16.gmra.mxu3 %v491_v0  ;;  %1154 = vmatmul.bf16.gmra.mxu1 %v491_v0  ;;  %v458_v0 = vsel %vm455_vm1, %v449_v51, %v451_v40 }
 0x119   :  { %v494_v59 = vpack.c.bf16 %v456_v18, %v458_v0 }
 0x127   :  { %6043 = vmatmul.msk.bf16.gmra.mxu2 %vm8496_vm6, %v6042_v56  ;;  %6059 = vmatmul.msk.bf16.gmra.mxu0 %vm8496_vm6, %v6042_v56 }
 0x128   :  { %6051 = vmatmul.msk.bf16.gmra.mxu3 %vm8496_vm6, %v6050_v62  ;;  %6067 = vmatmul.msk.bf16.gmra.mxu1 %vm8496_vm6, %v6050_v62 }
 0x137   :  { %1077 = vmatmul.bf16.gmra.mxu2 %v494_v59  ;;  %1135 = vmatmul.bf16.gmra.mxu0 %v494_v59 }
 0x138   :  { %1106 = vmatmul.bf16.gmra.mxu3 %v495_v22  ;;  %1164 = vmatmul.bf16.gmra.mxu1 %v495_v22 }
 0x144   :  { %v845_v28 = vpop.f32.mrf.mxu0 }
 0x145   :  { %v874_v47 = vpop.f32.mrf.mxu1 }
 0x146   :  { %v8522_v16 = vadd.f32 %v874_v47, %v845_v28 }
 0x147   :  { %1371 = vmatmul.bf16.vlgmr.msrb.gmra.mxu2 %v8331_v6  ;;  %1429 = vmatmul.bf16.vlgmr.msrb.gmra.mxu0 %v8331_v6 }
 0x148   :  { %1400 = vmatmul.bf16.vlgmr.msrb.gmra.mxu3 %v8343_v14  ;;  %1458 = vmatmul.bf16.vlgmr.msrb.gmra.mxu1 %v8343_v14 }
 0x14a   :  { %v787_v55 = vpop.f32.mrf.mxu2 }
 0x14b   :  { %v816_v8 = vpop.f32.mrf.mxu3 }
 0x14c   :  { %v817_v11 = vadd.f32 %v816_v8, %v787_v55  ;;  %v8529_v3 = vpop.f32.mrf.mxu0 }
 0x14d   :  { %v8531_v4 = vpop.f32.mrf.mxu1 }
 0x14e   :  { %v877_v45 = vadd.f32 %v8531_v4, %v8529_v3 }
 0x152   :  { %v8533_v7 = vpop.f32.mrf.mxu2 }
 0x153   :  { %v8535_v61 = vpop.f32.mrf.mxu3 }
 0x154   :  { %v850_v6 = vpop.f32.mrf.mxu0 }
 0x155   :  { %v879_v14 = vpop.f32.mrf.mxu1 }
 0x156   :  { %v880_v17 = vadd.f32 %v879_v14, %v850_v6 }
 0x157   :  { %6199 = vmatmul.msk.bf16.gmra.mxu2 %vm8538_vm8, %v8387_v30  ;;  %6215 = vmatmul.msk.bf16.gmra.mxu0 %vm8538_vm8, %v8387_v30 }
 0x158   :  { %6207 = vmatmul.msk.bf16.gmra.mxu3 %vm8538_vm8, %v8407_v33  ;;  %6223 = vmatmul.msk.bf16.gmra.mxu1 %vm8538_vm8, %v8407_v33  ;;  %v126_v33 = vadd.s32 56, %v8268_v50 }
 0x15a   :  { %v792_v20 = vpop.f32.mrf.mxu2  ;;  %v180_v51 = vand.u32 31, %v126_v33 }
 0x15b   :  { %v821_v63 = vpop.f32.mrf.mxu3 }
 0x15c   :  { %v822_v49 = vadd.f32 %v821_v63, %v792_v20  ;;  %v8554_v21 = vpop.f32.mrf.mxu0  ;;  %vm7979_vm9 = vcmp.ne.s32.totalorder %v180_v51, 31 }
 0x15d   :  { %v8556_v24 = vpop.f32.mrf.mxu1  ;;  %vm8576_vm10 = vmpackc.low %vm7979_vm9, %vm8179_vm3 }
 0x15e   :  { %v10568_v13 = vsel %vm8576_vm10, 4294967295, %v10567_v13 }
 0x15f   :  { %10569 = vst [vmem:[#allocation20_spill] sm:$0xff] %v10568_v13  ;;  %v819_v13 = vadd.f32 %v8535_v61, %v8533_v7 }
 0x162   :  { %v8558_v25 = vpop.f32.mrf.mxu2 }
 0x163   :  { %v8560_v26 = vpop.f32.mrf.mxu3 }
 0x164   :  { %v855_v30 = vpop.f32.mrf.mxu0 }
 0x165   :  { %v884_v27 = vpop.f32.mrf.mxu1 }
 0x166   :  { %v885_v29 = vadd.f32 %v884_v27, %v855_v30 }
 0x167   :  { %1381 = vmatmul.bf16.gmra.mxu2 %v8410_v1  ;;  %1439 = vmatmul.bf16.gmra.mxu0 %v8410_v1 }
 0x168   :  { %1410 = vmatmul.bf16.gmra.mxu3 %v8413_v58  ;;  %1468 = vmatmul.bf16.gmra.mxu1 %v8413_v58 }
 0x16a   :  { %v797_v52 = vpop.f32.mrf.mxu2 }
 0x16b   :  { %v826_v19 = vpop.f32.mrf.mxu3 }
 0x16c   :  { %v827_v31 = vadd.f32 %v826_v19, %v797_v52  ;;  %v8567_v23 = vpop.f32.mrf.mxu0 }
 0x16d   :  { %v8569_v32 = vpop.f32.mrf.mxu1 }
 0x16e   :  { %v887_v3 = vadd.f32 %v8569_v32, %v8567_v23 }
 0x172   :  { %v8571_v57 = vpop.f32.mrf.mxu2 }
 0x173   :  { %v8573_v9 = vpop.f32.mrf.mxu3 }
 0x174   :  { %v860_v1 = vpop.f32.mrf.mxu0 }
 0x175   :  { %v889_v58 = vpop.f32.mrf.mxu1 }
 0x176   :  { %v890_v12 = vadd.f32 %v889_v58, %v860_v1 }
 0x177   :  { %6203 = vmatmul.msk.bf16.gmra.mxu2 %vm8576_vm10, %v8419_v34  ;;  %6219 = vmatmul.msk.bf16.gmra.mxu0 %vm8576_vm10, %v8419_v34 }
 0x178   :  { %6211 = vmatmul.msk.bf16.gmra.mxu3 %vm8576_vm10, %v8429_v35  ;;  %6227 = vmatmul.msk.bf16.gmra.mxu1 %vm8576_vm10, %v8429_v35 }
 0x17a   :  { %v802_v39 = vpop.f32.mrf.mxu2 }
 0x17b   :  { %v831_v36 = vpop.f32.mrf.mxu3 }
 0x17c   :  { %v832_v37 = vadd.f32 %v831_v36, %v802_v39  ;;  %v8592_v42 = vpop.f32.mrf.mxu0 }
 0x17d   :  { %v8594_v41 = vpop.f32.mrf.mxu1 }
 0x182   :  { %v8596_v43 = vpop.f32.mrf.mxu2 }
 0x183   :  { %v8598_v54 = vpop.f32.mrf.mxu3 }
 0x184   :  { %v1121_v34 = vpop.f32.mrf.mxu0 }
 0x185   :  { %v1122_v48 = vadd.f32 %v1121_v34, %v8522_v16  ;;  %v1150_v56 = vpop.f32.mrf.mxu1 }
 0x187   :  { %v8601_v15 = vadd.f32 %v1150_v56, %v1122_v48 }
 0x18a   :  { %v1063_v62 = vpop.f32.mrf.mxu2 }
 0x18b   :  { %v1064_v40 = vadd.f32 %v1063_v62, %v817_v11  ;;  %v1092_v35 = vpop.f32.mrf.mxu3 }
 0x18c   :  { %v1123_v46 = vpop.f32.mrf.mxu0 }
 0x18d   :  { %v8603_v18 = vadd.f32 %v1092_v35, %v1064_v40  ;;  %v8605_v0 = vpop.f32.mrf.mxu1  ;;  %v1124_v10 = vadd.f32 %v1123_v46, %v877_v45  ;;  %v1495_v45 = vld [vmem:[#allocation7] sm:$0x3]  ;;  %v892_v46 = vadd.f32 %v8594_v41, %v8592_v42 }
 0x192   :  { %v1065_v38 = vpop.f32.mrf.mxu2 }
 0x193   :  { %v8607_v44 = vpop.f32.mrf.mxu3  ;;  %v1066_v53 = vadd.f32 %v1065_v38, %v819_v13  ;;  %v829_v13 = vadd.f32 %v8573_v9, %v8571_v57  ;;  %v8659_v38 = vperm.slane %v1495_v45, 1 }
 0x194   :  { %v1126_v59 = vpop.f32.mrf.mxu0 }
 0x195   :  { %v1127_v22 = vadd.f32 %v1126_v59, %v880_v17  ;;  %v1155_v28 = vpop.f32.mrf.mxu1 }
 0x197   :  { %v8609_v47 = vadd.f32 %v1155_v28, %v1127_v22 }
 0x19a   :  { %v1068_v16 = vpop.f32.mrf.mxu2 }
 0x19b   :  { %v1069_v60 = vadd.f32 %v1068_v16, %v822_v49  ;;  %v1097_v55 = vpop.f32.mrf.mxu3 }
 0x19c   :  { %v1128_v8 = vpop.f32.mrf.mxu0 }
 0x19d   :  { %v8611_v5 = vadd.f32 %v1097_v55, %v1069_v60  ;;  %v8613_v11 = vpop.f32.mrf.mxu1 }
 0x1a2   :  { %v8615_v6 = vpop.f32.mrf.mxu2 }
 0x1a3   :  { %v8617_v14 = vpop.f32.mrf.mxu3 }
 0x1a4   :  { %v1131_v20 = vpop.f32.mrf.mxu0 }
 0x1a5   :  { %v1132_v63 = vadd.f32 %v1131_v20, %v885_v29  ;;  %v1160_v30 = vpop.f32.mrf.mxu1 }
 0x1a7   :  { %v8619_v27 = vadd.f32 %v1160_v30, %v1132_v63 }
 0x1aa   :  { %v1073_v17 = vpop.f32.mrf.mxu2 }
 0x1ab   :  { %v1074_v33 = vadd.f32 %v1073_v17, %v827_v31  ;;  %v1102_v52 = vpop.f32.mrf.mxu3 }
 0x1ac   :  { %v1133_v19 = vpop.f32.mrf.mxu0 }
 0x1ad   :  { %v8621_v49 = vadd.f32 %v1102_v52, %v1074_v33  ;;  %v8623_v51 = vpop.f32.mrf.mxu1  ;;  %v1134_v32 = vadd.f32 %v1133_v19, %v887_v3 }
 0x1af   :  { %10570 = vst [vmem:[#allocation21_spill] sm:$0xff] %v8621_v49 }
 0x1b2   :  { %v8625_v1 = vpop.f32.mrf.mxu2 }
 0x1b3   :  { %v8627_v58 = vpop.f32.mrf.mxu3  ;;  %v1076_v42 = vadd.f32 %v8625_v1, %v829_v13 }
 0x1b4   :  { %10571 = vst [vmem:[#allocation22_spill] sm:$0xff] %v8627_v58  ;;  %v1136_v39 = vpop.f32.mrf.mxu0  ;;  %v824_v58 = vadd.f32 %v8560_v26, %v8558_v25  ;;  %v834_v25 = vadd.f32 %v8598_v54, %v8596_v43  ;;  %v8665_v43 = vperm.slane %v1495_v45, 0 }
 0x1b5   :  { %v1137_v36 = vadd.f32 %v1136_v39, %v890_v12  ;;  %v1165_v34 = vpop.f32.mrf.mxu1 }
 0x1b6   :  { %v1071_v26 = vadd.f32 %v8615_v6, %v824_v58 }
 0x1b7   :  { %v8629_v48 = vadd.f32 %v1165_v34, %v1137_v36 }
 0x1b9   :  { %10572 = vst [vmem:[#allocation23_spill] sm:$0xff] %v8629_v48  ;;  %v1153_v48 = vadd.f32 %v8605_v0, %v1124_v10 }
 0x1ba   :  { %v1078_v29 = vpop.f32.mrf.mxu2 }
 0x1bb   :  { %v1079_v56 = vadd.f32 %v1078_v29, %v832_v37  ;;  %v1107_v62 = vpop.f32.mrf.mxu3 }
 0x1bc   :  { %v1138_v40 = vpop.f32.mrf.mxu0 }
 0x1bd   :  { %v8631_v31 = vadd.f32 %v1107_v62, %v1079_v56  ;;  %v8633_v35 = vpop.f32.mrf.mxu1 }
 0x1be   :  { %10574 = vst [vmem:[#allocation25_spill] sm:$0xff] %v8633_v35 }
 0x1bf   :  { %10573 = vst [vmem:[#allocation24_spill] sm:$0xff] %v8631_v31 }
 0x1c0   :  { %v10581_v3 = vld [vmem:[#allocation23_spill] sm:$0xff] }
 0x1c2   :  { %v8635_v59 = vpop.f32.mrf.mxu2 }
 0x1c3   :  { %10575 = vst [vmem:[#allocation26_spill] sm:$0xff] %v8635_v59  ;;  %v8637_v22 = vpop.f32.mrf.mxu3 }
 0x1c4   :  { %10576 = vst [vmem:[#allocation27_spill] sm:$0xff] %v8637_v22  ;;  %v1430_v28 = vpop.f32.mrf.mxu0  ;;  %v882_v22 = vadd.f32 %v8556_v24, %v8554_v21  ;;  %v1095_v21 = vadd.f32 %v8607_v44, %v1066_v53 }
 0x1c5   :  { %v1459_v16 = vpop.f32.mrf.mxu1 }
 0x1c6   :  { %v1460_v49 = vadd.f32 %v1459_v16, %v1430_v28  ;;  %v1129_v4 = vadd.f32 %v1128_v8, %v882_v22  ;;  %v10577_v16 = vld [vmem:[#allocation22_spill] sm:$0xff] }
 0x1c8   :  { %v1480_v0 = vadd.f32 %v1460_v49, %v8601_v15  ;;  %v1158_v57 = vadd.f32 %v8613_v11, %v1129_v4  ;;  %v1139_v15 = vadd.f32 %v1138_v40, %v892_v46  ;;  %v1100_v11 = vadd.f32 %v8617_v14, %v1071_v26 }
 0x1c9   :  { %v1105_v14 = vadd.f32 %v10577_v16, %v1076_v42  ;;  %v10582_v42 = vld [vmem:[#allocation24_spill] sm:$0xff] }
 0x1ca   :  { %v1372_v60 = vpop.f32.mrf.mxu2 }
 0x1cb   :  { %v1401_v55 = vpop.f32.mrf.mxu3 }
 0x1cc   :  { %v1432_v12 = vpop.f32.mrf.mxu0  ;;  %v1402_v24 = vadd.f32 %v1401_v55, %v1372_v60 }
 0x1cd   :  { %v1461_v20 = vpop.f32.mrf.mxu1 }
 0x1ce   :  { %v1462_v2 = vadd.f32 %v1461_v20, %v1432_v12  ;;  %v1479_v41 = vadd.f32 %v1402_v24, %v8603_v18  ;;  %v10578_v12 = vld [vmem:[#allocation25_spill] sm:$0xff] }
 0x1cf   :  { %v1168_v20 = vadd.f32 %v10578_v12, %v1139_v15  ;;  %v10583_v12 = vld [vmem:[#allocation27_spill] sm:$0xff] }
 0x1d0   :  { %v1482_v10 = vadd.f32 %v1462_v2, %v1153_v48  ;;  %v8673_v48 = vadd.f32 %v8659_v38, %v1480_v0 }
 0x1d2   :  { %v1374_v63 = vpop.f32.mrf.mxu2  ;;  %v8668_v54 = vadd.f32 %v8659_v38, %v1482_v10 }
 0x1d3   :  { %v1403_v30 = vpop.f32.mrf.mxu3 }
 0x1d4   :  { %v1435_v17 = vpop.f32.mrf.mxu0  ;;  %v1404_v59 = vadd.f32 %v1403_v30, %v1374_v63  ;;  %v1586_v60 = vmul.f32 %v8668_v54, %v8668_v54 }
 0x1d5   :  { %v1464_v37 = vpop.f32.mrf.mxu1 }
 0x1d6   :  { %v1465_v7 = vadd.f32 %v1464_v37, %v1435_v17  ;;  %v1481_v8 = vadd.f32 %v1404_v59, %v1095_v21  ;;  %v10579_v17 = vld [vmem:[#allocation26_spill] sm:$0xff] }
 0x1d8   :  { %v1484_v53 = vadd.f32 %v1465_v7, %v8609_v47  ;;  %v1163_v47 = vadd.f32 %v8623_v51, %v1134_v32  ;;  %v8676_v18 = vadd.f32 %v8665_v43, %v1481_v8  ;;  %v8685_v51 = vadd.f32 %v8665_v43, %v1479_v41 }
 0x1da   :  { %v1377_v33 = vpop.f32.mrf.mxu2  ;;  %v8679_v59 = vadd.f32 %v8659_v38, %v1484_v53  ;;  %v1517_v7 = vadd.f32 %v8676_v18, %v8685_v51 }
 0x1db   :  { %v1406_v52 = vpop.f32.mrf.mxu3 }
 0x1dc   :  { %v1437_v39 = vpop.f32.mrf.mxu0  ;;  %v1407_v2 = vadd.f32 %v1406_v52, %v1377_v33  ;;  %v1588_v33 = vmul.f32 %v8679_v59, %v8679_v59 }
 0x1dd   :  { %v1466_v36 = vpop.f32.mrf.mxu1 }
 0x1de   :  { %v1467_v23 = vadd.f32 %v1466_v36, %v1437_v39  ;;  %v1483_v40 = vadd.f32 %v1407_v2, %v8611_v5  ;;  %v10580_v36 = vld [vmem:[#allocation21_spill] sm:$0xff] }
 0x1e0   :  { %v1486_v6 = vadd.f32 %v1467_v23, %v1158_v57  ;;  %v8701_v52 = vadd.f32 %v8665_v43, %v1483_v40 }
 0x1e2   :  { %v1379_v34 = vpop.f32.mrf.mxu2  ;;  %v8691_v63 = vadd.f32 %v8659_v38, %v1486_v6  ;;  %v1587_v0 = vmul.f32 %v8701_v52, %v8701_v52  ;;  %v1518_v15 = vadd.f32 %v1517_v7, %v8701_v52 }
 0x1e3   :  { %v1408_v29 = vpop.f32.mrf.mxu3 }
 0x1e4   :  { %v1440_v56 = vpop.f32.mrf.mxu0  ;;  %v1409_v19 = vadd.f32 %v1408_v29, %v1379_v34  ;;  %v1583_v29 = vmul.f32 %v8685_v51, %v8685_v51 }
 0x1e5   :  { %v1469_v62 = vpop.f32.mrf.mxu1 }
 0x1e6   :  { %v1470_v9 = vadd.f32 %v1469_v62, %v1440_v56  ;;  %v1485_v30 = vadd.f32 %v1409_v19, %v1100_v11  ;;  %v1530_v56 = vadd.f32 %v8668_v54, %v8673_v48 }
 0x1e8   :  { %v1488_v22 = vadd.f32 %v1470_v9, %v8619_v27  ;;  %v1081_v27 = vadd.f32 %v10579_v17, %v834_v25  ;;  %v8717_v13 = vadd.f32 %v8665_v43, %v1485_v30  ;;  %v1531_v46 = vadd.f32 %v1530_v56, %v8679_v59 }
 0x1ea   :  { %v1382_v50 = vpop.f32.mrf.mxu2  ;;  %v8704_v39 = vadd.f32 %v8659_v38, %v1488_v22  ;;  %v1532_v2 = vadd.f32 %v1531_v46, %v8691_v63  ;;  %v1589_v19 = vmul.f32 %v8717_v13, %v8717_v13  ;;  %v1519_v40 = vadd.f32 %v1518_v15, %v8717_v13 }
 0x1eb   :  { %v1411_v31 = vpop.f32.mrf.mxu3 }
 0x1ec   :  { %v1442_v35 = vpop.f32.mrf.mxu0  ;;  %v1592_v8 = vmul.f32 %v8704_v39, %v8704_v39 }
 0x1ed   :  { %v1471_v61 = vpop.f32.mrf.mxu1 }
 0x1ee   :  { %v1472_v49 = vadd.f32 %v1471_v61, %v1442_v35  ;;  %v1412_v35 = vadd.f32 %v1411_v31, %v1382_v50  ;;  %v1584_v50 = vmul.f32 %v8673_v48, %v8673_v48  ;;  %v1585_v31 = vmul.f32 %v8676_v18, %v8676_v18 }
 0x1ef   :  { %v1590_v61 = vmul.f32 %v8691_v63, %v8691_v63 }
 0x1f0   :  { %v1490_v5 = vadd.f32 %v1472_v49, %v1163_v47  ;;  %v1487_v34 = vadd.f32 %v1412_v35, %v10580_v36  ;;  %v1612_v62 = vadd.f32 %v1586_v60, %v1584_v50  ;;  %v1599_v10 = vadd.f32 %v1585_v31, %v1583_v29 }
 0x1f2   :  { %v1384_v44 = vpop.f32.mrf.mxu2  ;;  %v8720_v21 = vadd.f32 %v8659_v38, %v1490_v5  ;;  %v1613_v32 = vadd.f32 %v1612_v62, %v1588_v33  ;;  %v8728_v57 = vadd.f32 %v8665_v43, %v1487_v34 }
 0x1f3   :  { %v1413_v58 = vpop.f32.mrf.mxu3 }
 0x1f4   :  { %v1445_v1 = vpop.f32.mrf.mxu0  ;;  %v1414_v37 = vadd.f32 %v1413_v58, %v1384_v44  ;;  %v1614_v6 = vadd.f32 %v1613_v32, %v1590_v61  ;;  %v1594_v49 = vmul.f32 %v8720_v21, %v8720_v21  ;;  %v1533_v58 = vadd.f32 %v1532_v2, %v8704_v39 }
 0x1f5   :  { %v1474_v28 = vpop.f32.mrf.mxu1  ;;  %v1591_v35 = vmul.f32 %v8728_v57, %v8728_v57  ;;  %v1520_v5 = vadd.f32 %v1519_v40, %v8728_v57 }
 0x1f6   :  { %v1475_v55 = vadd.f32 %v1474_v28, %v1445_v1  ;;  %v1489_v25 = vadd.f32 %v1414_v37, %v1105_v14  ;;  %v1600_v1 = vadd.f32 %v1599_v10, %v1587_v0  ;;  %v1615_v22 = vadd.f32 %v1614_v6, %v1592_v8 }
 0x1f7   :  { %v1534_v28 = vadd.f32 %v1533_v58, %v8720_v21 }
 0x1f8   :  { %v1492_v4 = vadd.f32 %v1475_v55, %v10581_v3  ;;  %v8742_v11 = vadd.f32 %v8665_v43, %v1489_v25  ;;  %v1601_v30 = vadd.f32 %v1600_v1, %v1589_v19  ;;  %v1616_v50 = vadd.f32 %v1615_v22, %v1594_v49 }
 0x1fa   :  { %v1387_v45 = vpop.f32.mrf.mxu2  ;;  %v8732_v9 = vadd.f32 %v8659_v38, %v1492_v4  ;;  %v1593_v31 = vmul.f32 %v8742_v11, %v8742_v11  ;;  %v1602_v34 = vadd.f32 %v1601_v30, %v1591_v35 }
 0x1fb   :  { %v1416_v24 = vpop.f32.mrf.mxu3 }
 0x1fc   :  { %v1417_v26 = vadd.f32 %v1416_v24, %v1387_v45  ;;  %v1447_v23 = vpop.f32.mrf.mxu0  ;;  %v1596_v16 = vmul.f32 %v8732_v9, %v8732_v9  ;;  %v1535_v37 = vadd.f32 %v1534_v28, %v8732_v9  ;;  %v1603_v45 = vadd.f32 %v1602_v34, %v1593_v31 }
 0x1fd   :  { %v1476_v53 = vpop.f32.mrf.mxu1 }
 0x1fe   :  { %v1491_v41 = vadd.f32 %v1417_v26, %v10582_v42  ;;  %v1477_v44 = vadd.f32 %v1476_v53, %v1447_v23  ;;  %v1617_v62 = vadd.f32 %v1616_v50, %v1596_v16 }
 0x200   :  { %v1494_v47 = vadd.f32 %v1477_v44, %v1168_v20  ;;  %v8751_v14 = vadd.f32 %v8665_v43, %v1491_v41  ;;  %v1110_v20 = vadd.f32 %v10583_v12, %v1081_v27 }
 0x202   :  { %v8754_v60 = vadd.f32 %v8659_v38, %v1494_v47  ;;  %v1389_v55 = vpop.f32.mrf.mxu2  ;;  %v1521_v38 = vadd.f32 %v1520_v5, %v8742_v11  ;;  %v1595_v27 = vmul.f32 %v8751_v14, %v8751_v14 }
 0x203   :  { %v1418_v17 = vpop.f32.mrf.mxu3 }
 0x204   :  { %v1419_v33 = vadd.f32 %v1418_v17, %v1389_v55  ;;  %v1598_v36 = vmul.f32 %v8754_v60, %v8754_v60  ;;  %v1536_v56 = vadd.f32 %v1535_v37, %v8754_v60  ;;  %v1522_v3 = vadd.f32 %v1521_v38, %v8751_v14 }
 0x205   :  { %v1604_v10 = vadd.f32 %v1603_v45, %v1595_v27 }
 0x206   :  { %v1493_v29 = vadd.f32 %v1419_v33, %v1110_v20  ;;  %v1618_v7 = vadd.f32 %v1617_v62, %v1598_v36  ;;  %v1537_v46 = vrot.slane %v1536_v56, 4  ;;  %v10584_v20 = vlaneseq }
 0x208   :  { %v8769_v4 = vadd.f32 %v8665_v43, %v1493_v29  ;;  %v1619_v23 = vrot.slane %v1618_v7, 4  ;;  %v1538_v8 = vadd.f32 %v1537_v46, %v1536_v56  ;;  %v8779_v30 = vand.u32 127, %v10584_v20  ;;  %v6288_v20 = vld [vmem:[#allocation6 + $0x478] sm:$0xf0] }
 0x20a   :  { %v1523_v61 = vadd.f32 %v1522_v3, %v8769_v4  ;;  %v1597_v24 = vmul.f32 %v8769_v4, %v8769_v4  ;;  %v1620_v42 = vadd.f32 %v1619_v23, %v1618_v7  ;;  %v1539_v44 = vrot.slane %v1538_v8, 2  ;;  %10585 = vst [vmem:[#allocation22_spill] sm:$0xff] %v8779_v30 }
 0x20b   :  { %vm1549_vm11 = vcmp.lt.s32.totalorder %v8779_v30, 8  ;;  %vm1558_vm12 = vcmp.lt.s32.totalorder %v8779_v30, 16  ;;  %vm1567_vm13 = vcmp.lt.s32.totalorder %v8779_v30, 32  ;;  %vm1576_vm14 = vcmp.lt.s32.totalorder %v8779_v30, 64 }
 0x20c   :  { %v1524_v25 = vrot.slane %v1523_v61, 4  ;;  %v1605_v26 = vadd.f32 %v1604_v10, %v1597_v24  ;;  %v1621_v19 = vrot.slane %v1620_v42, 2  ;;  %v1540_v47 = vadd.f32 %v1539_v44, %v1538_v8 }
 0x20e   :  { %v1525_v32 = vadd.f32 %v1524_v25, %v1523_v61  ;;  %v1606_v0 = vrot.slane %v1605_v26, 4  ;;  %v1622_v40 = vadd.f32 %v1621_v19, %v1620_v42  ;;  %v1541_v22 = vrot.slane %v1540_v47, 1  ;;  %v6286_v19 = vld [vmem:[#allocation6 + $0x470] sm:$0xf] }
 0x210   :  { %v1526_v53 = vrot.slane %v1525_v32, 2  ;;  %v1607_v2 = vadd.f32 %v1606_v0, %v1605_v26  ;;  %v1623_v35 = vrot.slane %v1622_v40, 1  ;;  %v1542_v28 = vadd.f32 %v1541_v22, %v1540_v47  ;;  %v7733_v22 = vld [vmem:[#allocation6 + $0x464] sm:$0xf0] }
 0x212   :  { %v1527_v43 = vadd.f32 %v1526_v53, %v1525_v32  ;;  %v1608_v41 = vrot.slane %v1607_v2, 2  ;;  %v1624_v16 = vadd.f32 %v1623_v35, %v1622_v40  ;;  %v6278_v40 = vld [vmem:[#allocation6 + $0x460] sm:$0xf] }
 0x214   :  { %v1528_v15 = vrot.slane %v1527_v43, 1  ;;  %v1609_v6 = vadd.f32 %v1608_v41, %v1607_v2 }
 0x216   :  { %v1529_v49 = vadd.f32 %v1528_v15, %v1527_v43  ;;  %v1610_v58 = vrot.slane %v1609_v6, 1 }
 0x218   :  { %1543 = vrot.lane.b32.xlu0 %v1529_v49, %s8175_s20  ;;  %v1611_v1 = vadd.f32 %v1610_v58, %v1609_v6  ;;  %v6350_v58 = vld [vmem:[#allocation6 + $0x4f0] sm:$0xf] }
 0x21a   :  { %1625 = vrot.lane.b32.xlu1 %v1611_v1, %s8175_s20 }
 0x220   :  { %1545 = vrot.lane.b32.xlu0 %v1542_v28, %s8175_s20 }
 0x222   :  { %1627 = vrot.lane.b32.xlu1 %v1624_v16, %s8175_s20 }
 0x28a   :  { %v1544_v55 = vpop.permute.xlu0 %1543 }
 0x28c   :  { %v1626_v12 = vpop.permute.xlu1 %1625 }
 0x292   :  { %v1546_v5 = vpop.permute.xlu0 %1545 }
 0x293   :  { %v1551_v17 = vsel %vm1549_vm11, %v1546_v5, %v1544_v55  ;;  %v1550_v38 = vsel %vm1549_vm11, %v1544_v55, %v1546_v5  ;;  %v7734_v55 = vld [vmem:[#allocation6 + $0x474] sm:$0xf] }
 0x294   :  { %v1628_v50 = vpop.permute.xlu1 %1627  ;;  %v1552_v31 = vadd.f32 %v1551_v17, %v1529_v49  ;;  %v1553_v27 = vadd.f32 %v1550_v38, %v1542_v28  ;;  %v7735_v49 = vld [vmem:[#allocation6 + $0x474] sm:$0xf0]  ;;  %v6342_v28 = vld [vmem:[#allocation6 + $0x4e0] sm:$0xf]  ;;  %v7750_v5 = vld [vmem:[#allocation6 + $0x4f4] sm:$0xf] }
 0x295   :  { %v1629_v37 = vsel %vm1549_vm11, %v1626_v12, %v1628_v50  ;;  %v1630_v33 = vsel %vm1549_vm11, %v1628_v50, %v1626_v12  ;;  %v6287_v47 = vor.u32 %v7735_v49, %v6286_v19  ;;  %v6279_v12 = vor.u32 %v7733_v22, %v6278_v40  ;;  %v6352_v17 = vld [vmem:[#allocation6 + $0x4f8] sm:$0xf0]  ;;  %v7746_v40 = vld [vmem:[#allocation6 + $0x4d4] sm:$0xf] }
 0x296   :  { %v1631_v36 = vadd.f32 %v1630_v33, %v1611_v1  ;;  %v1632_v34 = vadd.f32 %v1629_v37, %v1624_v16  ;;  %1554 = vrot.lane.b32.xlu2 %v1552_v31, %s8180_s0  ;;  %v7751_v1 = vld [vmem:[#allocation6 + $0x4f4] sm:$0xf0]  ;;  %v7749_v16 = vld [vmem:[#allocation6 + $0x4e4] sm:$0xf0]  ;;  %v6355_v37 = vor.u32 %v7750_v5, %v6352_v17  ;;  %v6272_v19 = vld [vmem:[#allocation6 + $0x458] sm:$0xf0] }
 0x297   :  { %v6351_v35 = vor.u32 %v7751_v1, %v6350_v58  ;;  %2092 = vmatpush.bf16.msra.mxu2 %v6287_v47  ;;  %v6343_v50 = vor.u32 %v7749_v16, %v6342_v28  ;;  %v7729_v28 = vld [vmem:[#allocation6 + $0x444] sm:$0xf0]  ;;  %v6326_v16 = vld [vmem:[#allocation6 + $0x4c0] sm:$0xf]  ;;  %v6264_v5 = vld [vmem:[#allocation6 + $0x448] sm:$0xf0] }
 0x298   :  { %1635 = vrot.lane.b32.xlu1 %v1632_v34, %s8180_s0  ;;  %1633 = vrot.lane.b32.xlu0 %v1631_v36, %s8180_s0 }
 0x299   :  { %2121 = vmatpush.bf16.msra.mxu3 %v6351_v35  ;;  %2179 = vmatpush.bf16.msra.mxu1 %v6355_v37  ;;  %v6262_v35 = vld [vmem:[#allocation6 + $0x440] sm:$0xf]  ;;  %v7727_v37 = vld [vmem:[#allocation6 + $0x434] sm:$0xf0] }
 0x29b   :  { %2093 = vmatpush.bf16.msra.mxu2 %v6279_v12  ;;  %v7745_v12 = vld [vmem:[#allocation6 + $0x4c4] sm:$0xf0] }
 0x29d   :  { %2122 = vmatpush.bf16.msra.mxu3 %v6343_v50  ;;  %v6327_v50 = vor.u32 %v7745_v12, %v6326_v16  ;;  %v7738_v12 = vld [vmem:[#allocation6 + $0x494] sm:$0xf] }
 0x29e   :  { %1556 = vrot.lane.b32.xlu2 %v1553_v27, %s8180_s0 }
 0x2f0   :  { %v1555_v29 = vpop.permute.xlu2 %1554 }
 0x2f8   :  { %v1557_v56 = vpop.permute.xlu2 %1556 }
 0x2f9   :  { %v1559_v62 = vsel %vm1558_vm12, %v1555_v29, %v1557_v56  ;;  %v1560_v3 = vsel %vm1558_vm12, %v1557_v56, %v1555_v29 }
 0x2fa   :  { %v1561_v45 = vadd.f32 %v1560_v3, %v1552_v31  ;;  %v1562_v7 = vadd.f32 %v1559_v62, %v1553_v27  ;;  %v6291_v31 = vor.u32 %v7734_v55, %v6288_v20  ;;  %v6263_v55 = vor.u32 %v7729_v28, %v6262_v35  ;;  %v7728_v20 = vld [vmem:[#allocation6 + $0x444] sm:$0xf]  ;;  %v7722_v35 = vld [vmem:[#allocation6 + $0x414] sm:$0xf]  ;;  %v6240_v28 = vld [vmem:[#allocation6 + $0x418] sm:$0xf0] }
 0x2fc   :  { %1563 = vrot.lane.b32.xlu2 %v1561_v45, %s8171_s11  ;;  %1565 = vrot.lane.b32.xlu0 %v1562_v7, %s8171_s11 }
 0x2fd   :  { %2150 = vmatpush.bf16.msra.mxu0 %v6291_v31  ;;  %v6254_v31 = vld [vmem:[#allocation6 + $0x430] sm:$0xf] }
 0x30a   :  { %v1636_v61 = vpop.permute.xlu1 %1635  ;;  %v1634_v24 = vpop.permute.xlu0 %1633 }
 0x30b   :  { %v1637_v10 = vsel %vm1558_vm12, %v1634_v24, %v1636_v61  ;;  %v1638_v46 = vsel %vm1558_vm12, %v1636_v61, %v1634_v24  ;;  %v7748_v61 = vld [vmem:[#allocation6 + $0x4e4] sm:$0xf] }
 0x30c   :  { %v1639_v25 = vadd.f32 %v1638_v46, %v1631_v36  ;;  %v1640_v26 = vadd.f32 %v1637_v10, %v1632_v34 }
 0x30e   :  { %1641 = vrot.lane.b32.xlu1 %v1639_v25, %s8171_s11  ;;  %1643 = vrot.lane.b32.xlu2 %v1640_v26, %s8171_s11 }
 0x356   :  { %v1564_v23 = vpop.permute.xlu2 %1563 }
 0x368   :  { %v1644_v42 = vpop.permute.xlu2 %1643 }
 0x36e   :  { %v1566_v32 = vpop.permute.xlu0 %1565 }
 0x36f   :  { %v1568_v0 = vsel %vm1567_vm13, %v1564_v23, %v1566_v32  ;;  %v1569_v8 = vsel %vm1567_vm13, %v1566_v32, %v1564_v23 }
 0x370   :  { %v1570_v53 = vadd.f32 %v1569_v8, %v1561_v45  ;;  %v1571_v2 = vadd.f32 %v1568_v0, %v1562_v7  ;;  %v7732_v45 = vld [vmem:[#allocation6 + $0x464] sm:$0xf]  ;;  %v6280_v7 = vld [vmem:[#allocation6 + $0x468] sm:$0xf0] }
 0x371   :  { %v6283_v46 = vor.u32 %v7732_v45, %v6280_v7  ;;  %v6310_v7 = vld [vmem:[#allocation6 + $0x4a0] sm:$0xf] }
 0x372   :  { %1572 = vrot.lane.b32.xlu0 %v1570_v53, %s8181_s14  ;;  %1574 = vrot.lane.b32.xlu1 %v1571_v2, %s8181_s14 }
 0x373   :  { %2151 = vmatpush.bf16.msra.mxu0 %v6283_v46  ;;  %v7742_v46 = vld [vmem:[#allocation6 + $0x4b4] sm:$0xf] }
 0x380   :  { %v1642_v43 = vpop.permute.xlu1 %1641 }
 0x381   :  { %v1645_v41 = vsel %vm1567_vm13, %v1642_v43, %v1644_v42  ;;  %v1646_v44 = vsel %vm1567_vm13, %v1644_v42, %v1642_v43  ;;  %v6334_v42 = vld [vmem:[#allocation6 + $0x4d0] sm:$0xf] }
 0x382   :  { %v1647_v15 = vadd.f32 %v1646_v44, %v1639_v25  ;;  %v1648_v6 = vadd.f32 %v1645_v41, %v1640_v26  ;;  %v6344_v25 = vld [vmem:[#allocation6 + $0x4e8] sm:$0xf0]  ;;  %v7747_v41 = vld [vmem:[#allocation6 + $0x4d4] sm:$0xf0]  ;;  %v7730_v44 = vld [vmem:[#allocation6 + $0x454] sm:$0xf] }
 0x383   :  { %v6347_v0 = vor.u32 %v7748_v61, %v6344_v25  ;;  %v6335_v47 = vor.u32 %v7747_v41, %v6334_v42  ;;  %v6275_v1 = vor.u32 %v7730_v44, %v6272_v19  ;;  %v7741_v61 = vld [vmem:[#allocation6 + $0x4a4] sm:$0xf0]  ;;  %v6320_v25 = vld [vmem:[#allocation6 + $0x4b8] sm:$0xf0]  ;;  %v6302_v42 = vld [vmem:[#allocation6 + $0x490] sm:$0xf] }
 0x384   :  { %1649 = vrot.lane.b32.xlu2 %v1647_v15, %s8181_s14  ;;  %1651 = vrot.lane.b32.xlu0 %v1648_v6, %s8181_s14  ;;  %v6248_v41 = vld [vmem:[#allocation6 + $0x428] sm:$0xf0]  ;;  %v7739_v44 = vld [vmem:[#allocation6 + $0x494] sm:$0xf0] }
 0x385   :  { %2180 = vmatpush.bf16.msra.mxu1 %v6347_v0  ;;  %2123 = vmatpush.bf16.msra.mxu3 %v6335_v47  ;;  %v6323_v0 = vor.u32 %v7742_v46, %v6320_v25  ;;  %v6303_v16 = vor.u32 %v7739_v44, %v6302_v42  ;;  %v6470_v46 = vld [vmem:[#allocation6 + $0x3e0] sm:$0xf]  ;;  %v7718_v42 = vld [vmem:[#allocation6 + $0x3f4] sm:$0xf] }
 0x386   :  { %2152 = vmatpush.bf16.msra.mxu0 %v6275_v1  ;;  %v6230_v1 = vld [vmem:[#allocation6 + $0x400] sm:$0xf] }
 0x389   :  { %2124 = vmatpush.bf16.msra.mxu3 %v6327_v50  ;;  %v7737_v50 = vld [vmem:[#allocation6 + $0x484] sm:$0xf0] }
 0x3de   :  { %v1650_v62 = vpop.permute.xlu2 %1649 }
 0x3e4   :  { %v1573_v33 = vpop.permute.xlu0 %1572  ;;  %v1575_v36 = vpop.permute.xlu1 %1574 }
 0x3e5   :  { %v1577_v34 = vsel %vm1576_vm14, %v1573_v33, %v1575_v36  ;;  %v1578_v38 = vsel %vm1576_vm14, %v1575_v36, %v1573_v33  ;;  %v6267_v33 = vor.u32 %v7728_v20, %v6264_v5  ;;  %v6255_v36 = vor.u32 %v7727_v37, %v6254_v31  ;;  %v6304_v20 = vld [vmem:[#allocation6 + $0x498] sm:$0xf0]  ;;  %v7720_v37 = vld [vmem:[#allocation6 + $0x404] sm:$0xf] }
 0x3e6   :  { %v1579_v27 = vadd.f32 %v1578_v38, %v1570_v53  ;;  %v1580_v29 = vadd.f32 %v1577_v34, %v1571_v2  ;;  %v6270_v53 = vld [vmem:[#allocation6 + $0x450] sm:$0xf]  ;;  %v7731_v2 = vld [vmem:[#allocation6 + $0x454] sm:$0xf0]  ;;  %v6243_v31 = vor.u32 %v7722_v35, %v6240_v28 }
 0x3e7   :  { %v6271_v43 = vor.u32 %v7731_v2, %v6270_v53  ;;  %v6318_v34 = vld [vmem:[#allocation6 + $0x4b0] sm:$0xf]  ;;  %v7743_v38 = vld [vmem:[#allocation6 + $0x4b4] sm:$0xf0]  ;;  %2153 = vmatpush.bf16.msra.mxu0 %v6267_v33  ;;  %v6311_v2 = vor.u32 %v7741_v61, %v6310_v7  ;;  %v6232_v33 = vld [vmem:[#allocation6 + $0x408] sm:$0xf0] }
 0x3e8   :  { %v1581_v56 = vadd.f32 %v1580_v29, %v1579_v27  ;;  %v7744_v27 = vld [vmem:[#allocation6 + $0x4c4] sm:$0xf]  ;;  %v6319_v29 = vor.u32 %v7743_v38, %v6318_v34  ;;  %v7723_v53 = vld [vmem:[#allocation6 + $0x414] sm:$0xf0]  ;;  %v6414_v34 = vld [vmem:[#allocation6 + $0x370] sm:$0xf] }
 0x3e9   :  { %2094 = vmatpush.bf16.msra.mxu2 %v6271_v43  ;;  %v7724_v43 = vld [vmem:[#allocation6 + $0x424] sm:$0xf]  ;;  %v7703_v38 = vld [vmem:[#allocation6 + $0x374] sm:$0xf0]  ;;  %v1679_v28 = vld [vmem:[#allocation10] sm:$0x3] }
 0x3ea   :  { %v8829_v26 = vmul.f32 0.00048828125, %v1581_v56  ;;  %v6328_v56 = vld [vmem:[#allocation6 + $0x4c8] sm:$0xf0]  ;;  %2125 = vmatpush.bf16.msra.mxu3 %v6319_v29  ;;  %v6251_v19 = vor.u32 %v7724_v43, %v6248_v41  ;;  %v6415_v61 = vor.u32 %v7703_v38, %v6414_v34  ;;  %v6480_v43 = vld [vmem:[#allocation6 + $0x3f8] sm:$0xf0] }
 0x3eb   :  { %v6331_v45 = vor.u32 %v7744_v27, %v6328_v56  ;;  %v6478_v27 = vld [vmem:[#allocation6 + $0x3f0] sm:$0xf]  ;;  %v6472_v34 = vld [vmem:[#allocation6 + $0x3e8] sm:$0xf0] }
 0x3ec   :  { %v1659_v58 = vmul.f32 %v8829_v26, %v8829_v26 }
 0x3ed   :  { %2095 = vmatpush.bf16.msra.mxu2 %v6263_v55  ;;  %v6294_v55 = vld [vmem:[#allocation6 + $0x480] sm:$0xf] }
 0x3ee   :  { %2126 = vmatpush.bf16.msra.mxu3 %v6311_v2  ;;  %v6295_v7 = vor.u32 %v7737_v50, %v6294_v55  ;;  %v7699_v55 = vld [vmem:[#allocation6 + $0x354] sm:$0xf0]  ;;  %v6408_v50 = vld [vmem:[#allocation6 + $0x368] sm:$0xf0] }
 0x3f1   :  { %2096 = vmatpush.bf16.msra.mxu2 %v6255_v36  ;;  %v7736_v36 = vld [vmem:[#allocation6 + $0x484] sm:$0xf] }
 0x3f2   :  { %2127 = vmatpush.bf16.msra.mxu3 %v6303_v16  ;;  %v6398_v16 = vld [vmem:[#allocation6 + $0x350] sm:$0xf] }
 0x3f6   :  { %v1652_v3 = vpop.permute.xlu0 %1651  ;;  %2128 = vmatpush.bf16.msra.mxu3 %v6295_v7 }
 0x3f7   :  { %v1653_v24 = vsel %vm1576_vm14, %v1650_v62, %v1652_v3  ;;  %v1654_v10 = vsel %vm1576_vm14, %v1652_v3, %v1650_v62  ;;  %v6246_v62 = vld [vmem:[#allocation6 + $0x420] sm:$0xf]  ;;  %v7725_v3 = vld [vmem:[#allocation6 + $0x424] sm:$0xf0] }
 0x3f8   :  { %v1655_v23 = vadd.f32 %v1654_v10, %v1647_v15  ;;  %v1656_v32 = vadd.f32 %v1653_v24, %v1648_v6  ;;  %v6336_v15 = vld [vmem:[#allocation6 + $0x4d8] sm:$0xf0]  ;;  %v7726_v24 = vld [vmem:[#allocation6 + $0x434] sm:$0xf] }
 0x3f9   :  { %v6339_v6 = vor.u32 %v7746_v40, %v6336_v15  ;;  %v6256_v10 = vld [vmem:[#allocation6 + $0x438] sm:$0xf0] }
 0x3fa   :  { %v1657_v8 = vadd.f32 %v1656_v32, %v1655_v23  ;;  %v6247_v23 = vor.u32 %v7725_v3, %v6246_v62  ;;  %v6259_v32 = vor.u32 %v7726_v24, %v6256_v10  ;;  %v6307_v62 = vor.u32 %v7738_v12, %v6304_v20  ;;  %v6296_v3 = vld [vmem:[#allocation6 + $0x488] sm:$0xf0]  ;;  %v6406_v24 = vld [vmem:[#allocation6 + $0x360] sm:$0xf]  ;;  %v7701_v10 = vld [vmem:[#allocation6 + $0x364] sm:$0xf0] }
 0x3fb   :  { %2181 = vmatpush.bf16.msra.mxu1 %v6339_v6  ;;  %v6299_v44 = vor.u32 %v7736_v36, %v6296_v3  ;;  %v6462_v12 = vld [vmem:[#allocation6 + $0x3d0] sm:$0xf]  ;;  %v7715_v20 = vld [vmem:[#allocation6 + $0x3d4] sm:$0xf0]  ;;  %v7716_v36 = vld [vmem:[#allocation6 + $0x3e4] sm:$0xf] }
 0x3fc   :  { %v1658_v49 = vmul.f32 0.00048828125, %v1657_v8  ;;  %v6238_v8 = vld [vmem:[#allocation6 + $0x410] sm:$0xf]  ;;  %2154 = vmatpush.bf16.msra.mxu0 %v6259_v32  ;;  %2097 = vmatpush.bf16.msra.mxu2 %v6247_v23  ;;  %v6235_v23 = vor.u32 %v7720_v37, %v6232_v33  ;;  %v6399_v33 = vor.u32 %v7699_v55, %v6398_v16  ;;  %v6463_v38 = vor.u32 %v7715_v20, %v6462_v12  ;;  %v6454_v3 = vld [vmem:[#allocation6 + $0x3c0] sm:$0xf] }
 0x3fd   :  { %v6239_v15 = vor.u32 %v7723_v53, %v6238_v8  ;;  %v6416_v8 = vld [vmem:[#allocation6 + $0x378] sm:$0xf0]  ;;  %v7717_v53 = vld [vmem:[#allocation6 + $0x3e4] sm:$0xf0]  ;;  %v7711_v55 = vld [vmem:[#allocation6 + $0x3b4] sm:$0xf0] }
 0x3fe   :  { %v1660_v22 = vsub.f32 %v1658_v49, %v1659_v58  ;;  %v7740_v49 = vld [vmem:[#allocation6 + $0x4a4] sm:$0xf]  ;;  %v6312_v58 = vld [vmem:[#allocation6 + $0x4a8] sm:$0xf0] }
 0x3ff   :  { %2182 = vmatpush.bf16.msra.mxu1 %v6331_v45  ;;  %v6315_v6 = vor.u32 %v7740_v49, %v6312_v58  ;;  %v7719_v45 = vld [vmem:[#allocation6 + $0x3f4] sm:$0xf0]  ;;  %v6483_v49 = vor.u32 %v7718_v42, %v6480_v43  ;;  %v7696_v12 = vld [vmem:[#allocation6 + $0x344] sm:$0xf] }
 0x400   :  { %v8833_v17 = vadd.f32 1e-05, %v1660_v22  ;;  %v7721_v22 = vld [vmem:[#allocation6 + $0x404] sm:$0xf0]  ;;  %2155 = vmatpush.bf16.msra.mxu0 %v6251_v19  ;;  %2098 = vmatpush.bf16.msra.mxu2 %v6239_v15  ;;  %v6479_v32 = vor.u32 %v7719_v45, %v6478_v27  ;;  %v6407_v19 = vor.u32 %v7701_v10, %v6406_v24  ;;  %v7698_v24 = vld [vmem:[#allocation6 + $0x354] sm:$0xf] }
 0x401   :  { %v6231_v56 = vor.u32 %v7721_v22, %v6230_v1  ;;  %v6471_v1 = vor.u32 %v7717_v53, %v6470_v46  ;;  %v6400_v10 = vld [vmem:[#allocation6 + $0x358] sm:$0xf0] }
 0x402   :  { %8009 = vrsqrt.f32 %v8833_v17  ;;  %vm1669_vm2 = vweird.f32 %v8833_v17  ;;  %2397 = vmatpush.bf16.msrb.mxu3 %v6479_v32  ;;  %v6403_v53 = vor.u32 %v7698_v24, %v6400_v10  ;;  %v7710_v24 = vld [vmem:[#allocation6 + $0x3b4] sm:$0xf]  ;;  %v6448_v10 = vld [vmem:[#allocation6 + $0x3b8] sm:$0xf0] }
 0x403   :  { %2183 = vmatpush.bf16.msra.mxu1 %v6323_v0  ;;  %v7702_v0 = vld [vmem:[#allocation6 + $0x374] sm:$0xf] }
 0x404   :  { %2156 = vmatpush.bf16.msra.mxu0 %v6243_v31  ;;  %v6419_v2 = vor.u32 %v7702_v0, %v6416_v8  ;;  %2099 = vmatpush.bf16.msra.mxu2 %v6231_v56  ;;  %v6390_v56 = vld [vmem:[#allocation6 + $0x340] sm:$0xf] }
 0x406   :  { %2398 = vmatpush.bf16.msrb.mxu3 %v6471_v1 }
 0x407   :  { %2184 = vmatpush.bf16.msra.mxu1 %v6315_v6 }
 0x408   :  { %v8010_v47 = vpop.eup %8009  ;;  %2368 = vmatpush.bf16.msrb.mxu2 %v6415_v61  ;;  %2157 = vmatpush.bf16.msra.mxu0 %v6235_v23  ;;  %v7713_v61 = vld [vmem:[#allocation6 + $0x3c4] sm:$0xf0]  ;;  %v6464_v23 = vld [vmem:[#allocation6 + $0x3d8] sm:$0xf0] }
 0x409   :  { %v1664_v40 = vmul.f32 %v8010_v47, %v8833_v17  ;;  %vm1670_vm15 = vweird.f32 %v8010_v47 }
 0x40a   :  { %vm1671_vm3 = vmor %vm1669_vm2, %vm1670_vm15  ;;  %2399 = vmatpush.bf16.msrb.mxu3 %v6463_v38  ;;  %v7693_v38 = vld [vmem:[#allocation6 + $0x324] sm:$0xf0] }
 0x40b   :  { %v1665_v5 = vmul.f32 %v8010_v47, %v1664_v40  ;;  %2185 = vmatpush.bf16.msra.mxu1 %v6307_v62  ;;  %v1661_v40 = vld [vmem:[#allocation9] sm:$0x3] }
 0x40c   :  { %2426 = vmatpush.bf16.msrb.mxu0 %v6419_v2  ;;  %2369 = vmatpush.bf16.msrb.mxu2 %v6407_v19  ;;  %v7697_v62 = vld [vmem:[#allocation6 + $0x344] sm:$0xf0] }
 0x40d   :  { %v1666_v29 = vmul.f32 0.5, %v1665_v5  ;;  %v7700_v5 = vld [vmem:[#allocation6 + $0x364] sm:$0xf]  ;;  %v6391_v7 = vor.u32 %v7697_v62, %v6390_v56  ;;  %v7709_v62 = vld [vmem:[#allocation6 + $0x3a4] sm:$0xf0] }
 0x40e   :  { %v6411_v27 = vor.u32 %v7700_v5, %v6408_v50 }
 0x40f   :  { %v1667_v25 = vsub.f32 1.5, %v1666_v29  ;;  %2186 = vmatpush.bf16.msra.mxu1 %v6299_v44  ;;  %v6475_v29 = vor.u32 %v7716_v36, %v6472_v34  ;;  %v6456_v34 = vld [vmem:[#allocation6 + $0x3c8] sm:$0xf0] }
 0x410   :  { %2370 = vmatpush.bf16.msrb.mxu2 %v6399_v33  ;;  %2427 = vmatpush.bf16.msrb.mxu0 %v6411_v27 }
 0x411   :  { %v1668_v41 = vmul.f32 %v8010_v47, %v1667_v25  ;;  %v7714_v25 = vld [vmem:[#allocation6 + $0x3d4] sm:$0xf] }
 0x413   :  { %v1672_v58 = vsel %vm1671_vm3, %v8010_v47, %v1668_v41  ;;  %2455 = vmatpush.bf16.msrb.mxu1 %v6483_v49  ;;  %v6467_v41 = vor.u32 %v7714_v25, %v6464_v23  ;;  %v6451_v23 = vor.u32 %v7710_v24, %v6448_v10  ;;  %v7690_v10 = vld [vmem:[#allocation6 + $0x314] sm:$0xf] }
 0x414   :  { %v1674_v15 = vrot.slane %v1672_v58, 7  ;;  %2371 = vmatpush.bf16.msrb.mxu2 %v6391_v7  ;;  %2428 = vmatpush.bf16.msrb.mxu0 %v6403_v53 }
 0x416   :  { %v1676_v17 = vsel %vm1675_vm5, %v1672_v58, %v1674_v15  ;;  %v6382_v15 = vld [vmem:[#allocation6 + $0x330] sm:$0xf] }
 0x417   :  { %v1678_v6 = vmul.f32 %v1676_v17, %v1661_v40  ;;  %2456 = vmatpush.bf16.msrb.mxu1 %v6475_v29  ;;  %v7695_v17 = vld [vmem:[#allocation6 + $0x334] sm:$0xf0] }
 0x418   :  { %v6383_v16 = vor.u32 %v7695_v17, %v6382_v15 }
 0x419   :  { %v8840_v22 = vperm.slane %v1678_v6, 0  ;;  %v8842_v35 = vperm.slane %v1678_v6, 1  ;;  %v6446_v6 = vld [vmem:[#allocation6 + $0x3b0] sm:$0xf] }
 0x41a   :  { %v6447_v50 = vor.u32 %v7711_v55, %v6446_v6  ;;  %2372 = vmatpush.bf16.msrb.mxu2 %v6383_v16 }
 0x41b   :  { %v1686_v47 = vmul.f32 %v8842_v35, %v8829_v26  ;;  %v1685_v31 = vmul.f32 %v8840_v22, %v8829_v26  ;;  %v6455_v26 = vor.u32 %v7713_v61, %v6454_v3  ;;  %v1693_v32 = vmul.f32 %v8840_v22, %v8685_v51  ;;  %2457 = vmatpush.bf16.msrb.mxu1 %v6467_v41  ;;  %v7694_v3 = vld [vmem:[#allocation6 + $0x334] sm:$0xf]  ;;  %v6384_v61 = vld [vmem:[#allocation6 + $0x338] sm:$0xf0] }
 0x41c   :  { %v1695_v0 = vmul.f32 %v8840_v22, %v8676_v18  ;;  %v1694_v8 = vmul.f32 %v8842_v35, %v8673_v48  ;;  %v1696_v42 = vmul.f32 %v8842_v35, %v8668_v54  ;;  %v1698_v20 = vmul.f32 %v8842_v35, %v8679_v59 }
 0x41d   :  { %v1689_v37 = vrot.slane %v1686_v47, 7  ;;  %2400 = vmatpush.bf16.msrb.mxu3 %v6455_v26  ;;  %v1699_v47 = vmul.f32 %v8840_v22, %v8717_v13  ;;  %v1700_v5 = vmul.f32 %v8842_v35, %v8691_v63  ;;  %v6374_v13 = vld [vmem:[#allocation6 + $0x320] sm:$0xf]  ;;  %v1702_v26 = vmul.f32 %v8842_v35, %v8704_v39 }
 0x41e   :  { %v6375_v56 = vor.u32 %v7693_v38, %v6374_v13  ;;  %v6438_v63 = vld [vmem:[#allocation6 + $0x3a0] sm:$0xf]  ;;  %v6387_v25 = vor.u32 %v7694_v3, %v6384_v61 }
 0x41f   :  { %v1690_v45 = vsel %vm1675_vm5, %v1685_v31, %v1689_v37  ;;  %v6392_v31 = vld [vmem:[#allocation6 + $0x348] sm:$0xf0]  ;;  %v7712_v37 = vld [vmem:[#allocation6 + $0x3c4] sm:$0xf]  ;;  %v6439_v7 = vor.u32 %v7709_v62, %v6438_v63  ;;  %v7689_v62 = vld [vmem:[#allocation6 + $0x304] sm:$0xf0] }
 0x420   :  { %v1692_v46 = vsub.f32 %v1679_v28, %v1690_v45  ;;  %v1697_v28 = vmul.f32 %v8840_v22, %v8701_v52  ;;  %v6395_v52 = vor.u32 %v7696_v12, %v6392_v31  ;;  %v6459_v59 = vor.u32 %v7712_v37, %v6456_v34  ;;  %2373 = vmatpush.bf16.msrb.mxu2 %v6375_v56  ;;  %v7707_v37 = vld [vmem:[#allocation6 + $0x394] sm:$0xf0]  ;;  %v6422_v3 = vld [vmem:[#allocation6 + $0x380] sm:$0xf] }
 0x421   :  { %2401 = vmatpush.bf16.msrb.mxu3 %v6447_v50  ;;  %v1701_v45 = vmul.f32 %v8840_v22, %v8728_v57  ;;  %v1705_v57 = vmul.f32 %v8840_v22, %v8751_v14  ;;  %v6430_v50 = vld [vmem:[#allocation6 + $0x390] sm:$0xf] }
 0x422   :  { %v8855_v2 = vperm.slane %v1692_v46, 0  ;;  %v8859_v43 = vperm.slane %v1692_v46, 1  ;;  %2429 = vmatpush.bf16.msrb.mxu0 %v6395_v52  ;;  %v1703_v46 = vmul.f32 %v8840_v22, %v8742_v11  ;;  %2458 = vmatpush.bf16.msrb.mxu1 %v6459_v59  ;;  %v6431_v13 = vor.u32 %v7707_v37, %v6430_v50  ;;  %v6358_v59 = vld [vmem:[#allocation6 + $0x300] sm:$0xf] }
 0x423   :  { %v6359_v61 = vor.u32 %v7689_v62, %v6358_v59 }
 0x424   :  { %v1714_v44 = vadd.f32 %v8855_v2, %v1693_v32  ;;  %v1716_v51 = vadd.f32 %v8855_v2, %v1695_v0  ;;  %v1715_v18 = vadd.f32 %v8859_v43, %v1694_v8  ;;  %v1717_v19 = vadd.f32 %v8859_v43, %v1696_v42 }
 0x425   :  { %v1718_v33 = vadd.f32 %v8855_v2, %v1697_v28  ;;  %v1720_v36 = vadd.f32 %v8855_v2, %v1699_v47  ;;  %v1719_v27 = vadd.f32 %v8859_v43, %v1698_v20  ;;  %v1721_v29 = vadd.f32 %v8859_v43, %v1700_v5  ;;  %2402 = vmatpush.bf16.msrb.mxu3 %v6439_v7  ;;  %v6366_v20 = vld [vmem:[#allocation6 + $0x310] sm:$0xf]  ;;  %v7691_v5 = vld [vmem:[#allocation6 + $0x314] sm:$0xf0] }
 0x426   :  { %v8865_v48 = vmax.f32 %v1714_v44, 0.0  ;;  %v8867_v49 = vmax.f32 %v1716_v51, 0.0  ;;  %v8869_v58 = vmax.f32 %v1715_v18, 0.0  ;;  %v8871_v54 = vmax.f32 %v1717_v19, 0.0  ;;  %2430 = vmatpush.bf16.msrb.mxu0 %v6387_v25  ;;  %2459 = vmatpush.bf16.msrb.mxu1 %v6451_v23  ;;  %v6432_v23 = vld [vmem:[#allocation6 + $0x398] sm:$0xf0] }
 0x427   :  { %v1704_v32 = vmul.f32 %v8842_v35, %v8720_v21  ;;  %v1707_v0 = vmul.f32 %v8840_v22, %v8769_v4  ;;  %v1706_v8 = vmul.f32 %v8842_v35, %v8732_v9  ;;  %v8903_v11 = vmax.f32 %v1718_v33, 0.0  ;;  %v7692_v33 = vld [vmem:[#allocation6 + $0x324] sm:$0xf] }
 0x428   :  { %v1746_v1 = vpack.c.bf16 %v8867_v49, %v8865_v48  ;;  %v1747_v40 = vpack.c.bf16 %v8871_v54, %v8869_v58  ;;  %v8905_v53 = vmax.f32 %v1720_v36, 0.0  ;;  %v8907_v39 = vmax.f32 %v1719_v27, 0.0  ;;  %v6376_v36 = vld [vmem:[#allocation6 + $0x328] sm:$0xf0]  ;;  %v7708_v27 = vld [vmem:[#allocation6 + $0x3a4] sm:$0xf] }
 0x429   :  { %v8909_v42 = vmax.f32 %v1721_v29, 0.0  ;;  %v1722_v21 = vadd.f32 %v8855_v2, %v1701_v45  ;;  %v1724_v41 = vadd.f32 %v8855_v2, %v1703_v46  ;;  %v1723_v14 = vadd.f32 %v8859_v43, %v1702_v26  ;;  %v6440_v29 = vld [vmem:[#allocation6 + $0x3a8] sm:$0xf0]  ;;  %v7705_v45 = vld [vmem:[#allocation6 + $0x384] sm:$0xf0]  ;;  %2403 = vmatpush.bf16.msrb.mxu3 %v6431_v13 }
 0x42a   :  { %2100 = vmatmul.bf16.vlgmr.msra.gmra.mxu2 %v1746_v1  ;;  %2129 = vmatmul.bf16.vlgmr.msra.gmra.mxu3 %v1747_v40  ;;  %v1708_v4 = vmul.f32 %v8842_v35, %v8754_v60  ;;  %v1725_v9 = vadd.f32 %v8859_v43, %v1704_v32  ;;  %v1726_v22 = vadd.f32 %v8855_v2, %v1705_v57  ;;  %v1815_v60 = vrot.slane %v8907_v39, 1  ;;  %v6368_v46 = vld [vmem:[#allocation6 + $0x318] sm:$0xf0]  ;;  %v7706_v26 = vld [vmem:[#allocation6 + $0x394] sm:$0xf] }
 0x42b   :  { %2158 = vmatmul.bf16.vlgmr.msra.gmra.mxu0 %v1746_v1  ;;  %2187 = vmatmul.bf16.vlgmr.msra.gmra.mxu1 %v1747_v40  ;;  %v1728_v44 = vadd.f32 %v8855_v2, %v1707_v0  ;;  %v1727_v51 = vadd.f32 %v8859_v43, %v1706_v8  ;;  %v1748_v19 = vpack.c.bf16 %v8905_v53, %v8903_v11  ;;  %v1814_v1 = vrot.slane %v8903_v11, 1  ;;  %v7688_v32 = vld [vmem:[#allocation6 + $0x304] sm:$0xf]  ;;  %v6360_v57 = vld [vmem:[#allocation6 + $0x308] sm:$0xf0] }
 0x42c   :  { %v1729_v18 = vadd.f32 %v8859_v43, %v1708_v4  ;;  %v1749_v40 = vpack.c.bf16 %v8909_v42, %v8907_v39  ;;  %v8927_v35 = vmax.f32 %v1722_v21, 0.0  ;;  %v8929_v15 = vmax.f32 %v1724_v41, 0.0  ;;  %v7704_v21 = vld [vmem:[#allocation6 + $0x384] sm:$0xf]  ;;  %v6424_v41 = vld [vmem:[#allocation6 + $0x388] sm:$0xf0] }
 0x42d   :  { %v8931_v17 = vmax.f32 %v1723_v14, 0.0  ;;  %v8933_v2 = vmax.f32 %v1725_v9, 0.0  ;;  %v8935_v6 = vmax.f32 %v1726_v22, 0.0  ;;  %v1810_v43 = vrot.slane %v8865_v48, 1 }
 0x42e   :  { %v1812_v28 = vrot.slane %v8867_v49, 1  ;;  %v8939_v47 = vmax.f32 %v1728_v44, 0.0  ;;  %v8941_v16 = vmax.f32 %v1727_v51, 0.0  ;;  %v8943_v55 = vmax.f32 %v1729_v18, 0.0 }
 0x42f   :  { %v1811_v12 = vrot.slane %v8869_v58, 1  ;;  %v6367_v31 = vor.u32 %v7691_v5, %v6366_v20  ;;  %v6379_v38 = vor.u32 %v7692_v33, %v6376_v36  ;;  %v6443_v63 = vor.u32 %v7708_v27, %v6440_v29 }
 0x430   :  { %v1836_v34 = vsel %vm512_vm0, %v1812_v28, %v1814_v1  ;;  %v1838_v56 = vsel %vm512_vm0, %v1810_v43, %v1812_v28  ;;  %v6423_v24 = vor.u32 %v7705_v45, %v6422_v3  ;;  %v6371_v25 = vor.u32 %v7690_v10, %v6368_v46 }
 0x431   :  { %2374 = vmatpush.bf16.msrb.mxu2 %v6367_v31  ;;  %v8954_v7 = vpack.c.bf16 %v1836_v34, %v1838_v56  ;;  %2431 = vmatpush.bf16.msrb.mxu0 %v6379_v38  ;;  %v6435_v0 = vor.u32 %v7706_v26, %v6432_v23  ;;  %v6363_v8 = vor.u32 %v7688_v32, %v6360_v57  ;;  %v1813_v14 = vrot.slane %v8871_v54, 1  ;;  %v7767_v23 = vld [vmem:[#allocation6 + $0x574] sm:$0xf0]  ;;  %v6638_v32 = vld [vmem:[#allocation6 + $0x5f0] sm:$0xf] }
 0x432   :  { %2460 = vmatpush.bf16.msrb.mxu1 %v6443_v63  ;;  %v1816_v4 = vrot.slane %v8905_v53, 1  ;;  %v6427_v9 = vor.u32 %v7704_v21, %v6424_v41  ;;  %v1818_v22 = vrot.slane %v8927_v35, 1  ;;  %v1817_v44 = vrot.slane %v8909_v42, 1  ;;  %2404 = vmatpush.bf16.msrb.mxu3 %v6423_v24  ;;  %v7783_v57 = vld [vmem:[#allocation6 + $0x5f4] sm:$0xf0] }
 0x433   :  { %v1819_v51 = vrot.slane %v8931_v17, 1  ;;  %v1837_v18 = vsel %vm512_vm0, %v1813_v14, %v1815_v60  ;;  %v1820_v28 = vrot.slane %v8929_v15, 1  ;;  %v1821_v34 = vrot.slane %v8933_v2, 1  ;;  %v6630_v41 = vld [vmem:[#allocation6 + $0x5e0] sm:$0xf] }
 0x434   :  { %v1832_v5 = vsel %vm512_vm0, %v1816_v4, %v1818_v22  ;;  %v1835_v31 = vsel %vm512_vm0, %v1815_v60, %v1817_v44  ;;  %v1823_v13 = vrot.slane %v8941_v16, 1  ;;  %v1824_v38 = vrot.slane %v8939_v47, 1 }
 0x435   :  { %2375 = vmatpush.bf16.msrb.mxu2 %v6359_v61  ;;  %2432 = vmatpush.bf16.msrb.mxu0 %v6371_v25  ;;  %v1833_v50 = vsel %vm512_vm0, %v1817_v44, %v1819_v51  ;;  %v1830_v36 = vsel %vm512_vm0, %v1818_v22, %v1820_v28  ;;  %v1825_v27 = vrot.slane %v8943_v55, 1  ;;  %v1750_v60 = vpack.c.bf16 %v8929_v15, %v8927_v35  ;;  %v6574_v25 = vld [vmem:[#allocation6 + $0x570] sm:$0xf]  ;;  %v7782_v22 = vld [vmem:[#allocation6 + $0x5f4] sm:$0xf] }
 0x436   :  { %2461 = vmatpush.bf16.msrb.mxu1 %v6435_v0  ;;  %v8986_v33 = vpack.c.bf16 %v1833_v50, %v1835_v31  ;;  %v1751_v29 = vpack.c.bf16 %v8933_v2, %v8931_v17  ;;  %v1829_v63 = vsel %vm512_vm0, %v1821_v34, %v1823_v13  ;;  %v1831_v62 = vsel %vm512_vm0, %v1819_v51, %v1821_v34  ;;  %v6566_v0 = vld [vmem:[#allocation6 + $0x560] sm:$0xf]  ;;  %v6640_v44 = vld [vmem:[#allocation6 + $0x5f8] sm:$0xf0]  ;;  %v7763_v50 = vld [vmem:[#allocation6 + $0x554] sm:$0xf0] }
 0x437   :  { %v9009_v45 = vpack.c.bf16 %v1829_v63, %v1831_v62  ;;  %v1840_v61 = vsel %vm512_vm0, %v1824_v38, %v1810_v43  ;;  %v1827_v24 = vsel %vm512_vm0, %v1823_v13, %v1825_v27  ;;  %v1841_v10 = vsel %vm512_vm0, %v1825_v27, %v1811_v12  ;;  %v6622_v31 = vld [vmem:[#allocation6 + $0x5d0] sm:$0xf]  ;;  %v7764_v34 = vld [vmem:[#allocation6 + $0x564] sm:$0xf]  ;;  %v6568_v13 = vld [vmem:[#allocation6 + $0x568] sm:$0xf0] }
 0x438   :  { %v9023_v26 = vpack.c.bf16 %v1841_v10, %v1827_v24  ;;  %v6575_v43 = vor.u32 %v7767_v23, %v6574_v25  ;;  %v6639_v21 = vor.u32 %v7783_v57, %v6638_v32  ;;  %v6571_v27 = vor.u32 %v7764_v34, %v6568_v13  ;;  %v7761_v62 = vld [vmem:[#allocation6 + $0x544] sm:$0xf0]  ;;  %v7762_v25 = vld [vmem:[#allocation6 + $0x554] sm:$0xf]  ;;  %v6560_v23 = vld [vmem:[#allocation6 + $0x558] sm:$0xf0] }
 0x439   :  { %2433 = vmatpush.bf16.msrb.mxu0 %v6363_v8  ;;  %v7765_v8 = vld [vmem:[#allocation6 + $0x564] sm:$0xf0]  ;;  %v7778_v32 = vld [vmem:[#allocation6 + $0x5d4] sm:$0xf]  ;;  %v1756_v57 = vrot.slane %v8867_v49, 7 }
 0x43a   :  { %2105 = vmatmul.bf16.gmra.mxu2 %v1748_v19  ;;  %2134 = vmatmul.bf16.gmra.mxu3 %v1749_v40  ;;  %v6616_v34 = vld [vmem:[#allocation6 + $0x5c8] sm:$0xf0]  ;;  %v6534_v13 = vld [vmem:[#allocation6 + $0x520] sm:$0xf] }
 0x43b   :  { %2163 = vmatmul.bf16.gmra.mxu0 %v1748_v19  ;;  %2192 = vmatmul.bf16.gmra.mxu1 %v1749_v40  ;;  %v1839_v19 = vsel %vm512_vm0, %v1811_v12, %v1813_v14  ;;  %v1834_v40 = vsel %vm512_vm0, %v1814_v1, %v1816_v4  ;;  %v1822_v1 = vrot.slane %v8935_v6, 1  ;;  %v7781_v14 = vld [vmem:[#allocation6 + $0x5e4] sm:$0xf0]  ;;  %v7766_v4 = vld [vmem:[#allocation6 + $0x574] sm:$0xf]  ;;  %v6567_v12 = vor.u32 %v7765_v8, %v6566_v0 }
 0x43c   :  { %v8974_v20 = vpack.c.bf16 %v1837_v18, %v1839_v19  ;;  %v8984_v37 = vpack.c.bf16 %v1832_v5, %v1834_v40  ;;  %2462 = vmatpush.bf16.msrb.mxu1 %v6427_v9  ;;  %2677 = vmatpush.bf16.msra.mxu2 %v6575_v43  ;;  %v6576_v9 = vld [vmem:[#allocation6 + $0x578] sm:$0xf0]  ;;  %v6631_v51 = vor.u32 %v7781_v14, %v6630_v41  ;;  %v6558_v5 = vld [vmem:[#allocation6 + $0x550] sm:$0xf]  ;;  %v1754_v43 = vrot.slane %v8865_v48, 7 }
 0x43d   :  { %v1828_v59 = vsel %vm512_vm0, %v1820_v28, %v1822_v1  ;;  %v1826_v3 = vsel %vm512_vm0, %v1822_v1, %v1824_v38  ;;  %2706 = vmatpush.bf16.msra.mxu3 %v6639_v21  ;;  %v6579_v18 = vor.u32 %v7766_v4, %v6576_v9  ;;  %v6643_v19 = vor.u32 %v7782_v22, %v6640_v44  ;;  %v6624_v21 = vld [vmem:[#allocation6 + $0x5d8] sm:$0xf0] }
 0x43e   :  { %v9001_v56 = vpack.c.bf16 %v1828_v59, %v1830_v36  ;;  %v9021_v46 = vpack.c.bf16 %v1840_v61, %v1826_v3  ;;  %v1752_v40 = vpack.c.bf16 %v8939_v47, %v8935_v6  ;;  %v1753_v28 = vpack.c.bf16 %v8943_v55, %v8941_v16  ;;  %v7779_v36 = vld [vmem:[#allocation6 + $0x5d4] sm:$0xf0]  ;;  %v6550_v59 = vld [vmem:[#allocation6 + $0x540] sm:$0xf]  ;;  %v7777_v61 = vld [vmem:[#allocation6 + $0x5c4] sm:$0xf0] }
 0x43f   :  { %2735 = vmatpush.bf16.msra.mxu0 %v6579_v18  ;;  %v6559_v1 = vor.u32 %v7763_v50, %v6558_v5  ;;  %v6623_v38 = vor.u32 %v7779_v36, %v6622_v31  ;;  %v6614_v3 = vld [vmem:[#allocation6 + $0x5c0] sm:$0xf]  ;;  %v6551_v24 = vor.u32 %v7761_v62, %v6550_v59  ;;  %v1755_v0 = vrot.slane %v8869_v58, 7  ;;  %v7759_v18 = vld [vmem:[#allocation6 + $0x534] sm:$0xf0] }
 0x440   :  { %2764 = vmatpush.bf16.msra.mxu1 %v6643_v19  ;;  %2678 = vmatpush.bf16.msra.mxu2 %v6567_v12  ;;  %v6615_v10 = vor.u32 %v7777_v61, %v6614_v3  ;;  %v6563_v8 = vor.u32 %v7762_v25, %v6560_v23  ;;  %v1757_v41 = vrot.slane %v8871_v54, 7  ;;  %v1768_v14 = vrot.slane %v8939_v47, 7  ;;  %v6606_v19 = vld [vmem:[#allocation6 + $0x5b0] sm:$0xf]  ;;  %v7760_v5 = vld [vmem:[#allocation6 + $0x544] sm:$0xf] }
 0x441   :  { %2707 = vmatpush.bf16.msra.mxu3 %v6631_v51  ;;  %v1769_v4 = vrot.slane %v8943_v55, 7  ;;  %v6627_v12 = vor.u32 %v7778_v32, %v6624_v21  ;;  %v1782_v58 = vsel %vm455_vm1, %v1754_v43, %v1756_v57  ;;  %v6542_v51 = vld [vmem:[#allocation6 + $0x530] sm:$0xf]  ;;  %v6552_v50 = vld [vmem:[#allocation6 + $0x548] sm:$0xf0]  ;;  %v1760_v23 = vrot.slane %v8905_v53, 7 }
 0x442   :  { %v1784_v48 = vsel %vm455_vm1, %v1768_v14, %v1754_v43  ;;  %v1783_v54 = vsel %vm455_vm1, %v1755_v0, %v1757_v41  ;;  %v7776_v36 = vld [vmem:[#allocation6 + $0x5c4] sm:$0xf]  ;;  %v7758_v62 = vld [vmem:[#allocation6 + $0x534] sm:$0xf]  ;;  %v6544_v3 = vld [vmem:[#allocation6 + $0x538] sm:$0xf0] }
 0x443   :  { %2736 = vmatpush.bf16.msra.mxu0 %v6571_v27  ;;  %v1785_v49 = vsel %vm455_vm1, %v1769_v4, %v1755_v0  ;;  %v6486_v9 = vpack.c.bf16 %v1782_v58, %v1784_v48  ;;  %v7757_v27 = vld [vmem:[#allocation6 + $0x524] sm:$0xf0]  ;;  %v7774_v61 = vld [vmem:[#allocation6 + $0x5b4] sm:$0xf]  ;;  %v6608_v25 = vld [vmem:[#allocation6 + $0x5b8] sm:$0xf0] }
 0x444   :  { %2679 = vmatpush.bf16.msra.mxu2 %v6559_v1  ;;  %v6494_v22 = vpack.c.bf16 %v1783_v54, %v1785_v49  ;;  %v6555_v1 = vor.u32 %v7760_v5, %v6552_v50  ;;  %v6535_v59 = vor.u32 %v7757_v27, %v6534_v13  ;;  %v1759_v32 = vrot.slane %v8907_v39, 7  ;;  %v7755_v48 = vld [vmem:[#allocation6 + $0x514] sm:$0xf0]  ;;  %v6590_v49 = vld [vmem:[#allocation6 + $0x590] sm:$0xf] }
 0x445   :  { %2708 = vmatpush.bf16.msra.mxu3 %v6623_v38  ;;  %v6619_v38 = vor.u32 %v7776_v36, %v6616_v34  ;;  %v1761_v43 = vrot.slane %v8909_v42, 7  ;;  %v6611_v0 = vor.u32 %v7774_v61, %v6608_v25  ;;  %v6526_v42 = vld [vmem:[#allocation6 + $0x510] sm:$0xf]  ;;  %v7771_v54 = vld [vmem:[#allocation6 + $0x594] sm:$0xf0] }
 0x446   :  { %v1781_v53 = vsel %vm455_vm1, %v1757_v41, %v1759_v32  ;;  %v6527_v58 = vor.u32 %v7755_v48, %v6526_v42  ;;  %v6582_v5 = vld [vmem:[#allocation6 + $0x580] sm:$0xf]  ;;  %v7769_v50 = vld [vmem:[#allocation6 + $0x584] sm:$0xf0]  ;;  %v7754_v36 = vld [vmem:[#allocation6 + $0x514] sm:$0xf] }
 0x447   :  { %2737 = vmatpush.bf16.msra.mxu0 %v6563_v8  ;;  %v1779_v21 = vsel %vm455_vm1, %v1759_v32, %v1761_v43  ;;  %v6528_v34 = vld [vmem:[#allocation6 + $0x518] sm:$0xf0]  ;;  %v7770_v13 = vld [vmem:[#allocation6 + $0x594] sm:$0xf]  ;;  %v7768_v25 = vld [vmem:[#allocation6 + $0x584] sm:$0xf] }
 0x448   :  { %2680 = vmatpush.bf16.msra.mxu2 %v6551_v24  ;;  %v1758_v24 = vrot.slane %v8903_v11, 7  ;;  %v6531_v27 = vor.u32 %v7754_v36, %v6528_v34 }
 0x449   :  { %2709 = vmatpush.bf16.msra.mxu3 %v6615_v10  ;;  %v6547_v10 = vor.u32 %v7758_v62, %v6544_v3 }
 0x44a   :  { %2110 = vmatmul.bf16.gmra.mxu2 %v1750_v60  ;;  %2139 = vmatmul.bf16.gmra.mxu3 %v1751_v29  ;;  %v1778_v8 = vsel %vm455_vm1, %v1758_v24, %v1760_v23  ;;  %v1780_v11 = vsel %vm455_vm1, %v1756_v57, %v1758_v24  ;;  %v6591_v57 = vor.u32 %v7771_v54, %v6590_v49 }
 0x44b   :  { %2168 = vmatmul.bf16.gmra.mxu0 %v1750_v60  ;;  %2197 = vmatmul.bf16.gmra.mxu1 %v1751_v29  ;;  %v7780_v60 = vld [vmem:[#allocation6 + $0x5e4] sm:$0xf]  ;;  %v6632_v29 = vld [vmem:[#allocation6 + $0x5e8] sm:$0xf0]  ;;  %v1804_v39 = vpack.c.bf16 %v1778_v8, %v1780_v11  ;;  %v1767_v11 = vrot.slane %v8941_v16, 7 }
 0x44c   :  { %v6635_v63 = vor.u32 %v7780_v60, %v6632_v29  ;;  %v6598_v60 = vld [vmem:[#allocation6 + $0x5a0] sm:$0xf]  ;;  %v7773_v29 = vld [vmem:[#allocation6 + $0x5a4] sm:$0xf0]  ;;  %2738 = vmatpush.bf16.msra.mxu0 %v6555_v1  ;;  %v6583_v1 = vor.u32 %v7769_v50, %v6582_v5  ;;  %v6584_v8 = vld [vmem:[#allocation6 + $0x588] sm:$0xf0] }
 0x44e   :  { %2765 = vmatpush.bf16.msra.mxu1 %v6635_v63  ;;  %v6599_v63 = vor.u32 %v7773_v29, %v6598_v60  ;;  %v6592_v60 = vld [vmem:[#allocation6 + $0x598] sm:$0xf0]  ;;  %v1764_v29 = vrot.slane %v8929_v15, 7 }
 0x44f   :  { %v6595_v62 = vor.u32 %v7770_v13, %v6592_v60 }
 0x450   :  { %2739 = vmatpush.bf16.msra.mxu0 %v6547_v10  ;;  %v6520_v10 = vld [vmem:[#allocation6 + $0x508] sm:$0xf0] }
 0x452   :  { %2766 = vmatpush.bf16.msra.mxu1 %v6627_v12  ;;  %v1805_v12 = vpack.c.bf16 %v1779_v21, %v1781_v53 }
 0x456   :  { %2767 = vmatpush.bf16.msra.mxu1 %v6619_v38  ;;  %v1762_v38 = vrot.slane %v8927_v35, 7 }
 0x458   :  { %v1774_v3 = vsel %vm455_vm1, %v1762_v38, %v1764_v29  ;;  %v1776_v35 = vsel %vm455_vm1, %v1760_v23, %v1762_v38  ;;  %v6587_v23 = vor.u32 %v7768_v25, %v6584_v8 }
 0x45a   :  { %2115 = vmatmul.bf16.gmra.mxu2 %v1752_v40  ;;  %2144 = vmatmul.bf16.gmra.mxu3 %v1753_v28 }
 0x45b   :  { %2173 = vmatmul.bf16.gmra.mxu0 %v1752_v40  ;;  %2202 = vmatmul.bf16.gmra.mxu1 %v1753_v28  ;;  %v6543_v40 = vor.u32 %v7759_v18, %v6542_v51  ;;  %v7775_v28 = vld [vmem:[#allocation6 + $0x5b4] sm:$0xf0]  ;;  %v7772_v18 = vld [vmem:[#allocation6 + $0x5a4] sm:$0xf] }
 0x45c   :  { %v6607_v31 = vor.u32 %v7775_v28, %v6606_v19  ;;  %2768 = vmatpush.bf16.msra.mxu1 %v6611_v0  ;;  %v6600_v19 = vld [vmem:[#allocation6 + $0x5a8] sm:$0xf0]  ;;  %v7753_v28 = vld [vmem:[#allocation6 + $0x504] sm:$0xf0] }
 0x45d   :  { %2681 = vmatpush.bf16.msra.mxu2 %v6543_v40  ;;  %v6518_v40 = vld [vmem:[#allocation6 + $0x500] sm:$0xf]  ;;  %v6603_v41 = vor.u32 %v7772_v18, %v6600_v19 }
 0x45e   :  { %2710 = vmatpush.bf16.msra.mxu3 %v6607_v31  ;;  %v6519_v31 = vor.u32 %v7753_v28, %v6518_v40 }
 0x460   :  { %2769 = vmatpush.bf16.msra.mxu1 %v6603_v41 }
 0x461   :  { %2682 = vmatpush.bf16.msra.mxu2 %v6535_v59  ;;  %v1763_v59 = vrot.slane %v8931_v17, 7  ;;  %v6490_v17 = vpack.c.bf16 %v1774_v3, %v1776_v35 }
 0x462   :  { %2711 = vmatpush.bf16.msra.mxu3 %v6599_v63  ;;  %v1765_v63 = vrot.slane %v8933_v2, 7  ;;  %v7752_v2 = vld [vmem:[#allocation6 + $0x504] sm:$0xf] }
 0x463   :  { %v1777_v15 = vsel %vm455_vm1, %v1761_v43, %v1763_v59  ;;  %v6523_v0 = vor.u32 %v7752_v2, %v6520_v10  ;;  %v1766_v43 = vrot.slane %v8935_v6, 7 }
 0x464   :  { %2770 = vmatpush.bf16.msra.mxu1 %v6595_v62  ;;  %v1775_v61 = vsel %vm455_vm1, %v1763_v59, %v1765_v63 }
 0x465   :  { %2683 = vmatpush.bf16.msra.mxu2 %v6527_v58  ;;  %v6498_v24 = vpack.c.bf16 %v1775_v61, %v1777_v15  ;;  %v1770_v21 = vsel %vm455_vm1, %v1766_v43, %v1768_v14  ;;  %v1772_v53 = vsel %vm455_vm1, %v1764_v29, %v1766_v43 }
 0x466   :  { %2712 = vmatpush.bf16.msra.mxu3 %v6591_v57  ;;  %v1808_v42 = vpack.c.bf16 %v1770_v21, %v1772_v53 }
 0x468   :  { %2771 = vmatpush.bf16.msra.mxu1 %v6587_v23 }
 0x469   :  { %2684 = vmatpush.bf16.msra.mxu2 %v6519_v31 }
 0x46a   :  { %6487 = vmatmul.msk.bf16.vlgmr.msrb.gmra.mxu2 %vm8456_vm4, %v6486_v9  ;;  %6495 = vmatmul.msk.bf16.vlgmr.msrb.gmra.mxu3 %vm8456_vm4, %v6494_v22 }
 0x46b   :  { %6503 = vmatmul.msk.bf16.vlgmr.msrb.gmra.mxu0 %vm8456_vm4, %v6486_v9  ;;  %6511 = vmatmul.msk.bf16.vlgmr.msrb.gmra.mxu1 %vm8456_vm4, %v6494_v22  ;;  %v7756_v9 = vld [vmem:[#allocation6 + $0x524] sm:$0xf]  ;;  %v6536_v22 = vld [vmem:[#allocation6 + $0x528] sm:$0xf0] }
 0x46c   :  { %v6539_v51 = vor.u32 %v7756_v9, %v6536_v22  ;;  %2713 = vmatpush.bf16.msra.mxu3 %v6583_v1 }
 0x46e   :  { %2740 = vmatpush.bf16.msra.mxu0 %v6539_v51 }
 0x472   :  { %2741 = vmatpush.bf16.msra.mxu0 %v6531_v27 }
 0x476   :  { %2742 = vmatpush.bf16.msra.mxu0 %v6523_v0 }
 0x47a   :  { %2381 = vmatmul.bf16.gmra.mxu2 %v1804_v39  ;;  %2410 = vmatmul.bf16.gmra.mxu3 %v1805_v12 }
 0x47b   :  { %2439 = vmatmul.bf16.gmra.mxu0 %v1804_v39  ;;  %2468 = vmatmul.bf16.gmra.mxu1 %v1805_v12  ;;  %v1771_v39 = vsel %vm455_vm1, %v1767_v11, %v1769_v4  ;;  %v1773_v12 = vsel %vm455_vm1, %v1765_v63, %v1767_v11 }
 0x47c   :  { %v1809_v6 = vpack.c.bf16 %v1771_v39, %v1773_v12 }
 0x48a   :  { %6491 = vmatmul.msk.bf16.gmra.mxu2 %vm8496_vm6, %v6490_v17  ;;  %6499 = vmatmul.msk.bf16.gmra.mxu3 %vm8496_vm6, %v6498_v24 }
 0x48b   :  { %6507 = vmatmul.msk.bf16.gmra.mxu0 %vm8496_vm6, %v6490_v17  ;;  %6515 = vmatmul.msk.bf16.gmra.mxu1 %vm8496_vm6, %v6498_v24 }
 0x49a   :  { %2391 = vmatmul.bf16.gmra.mxu2 %v1808_v42  ;;  %2420 = vmatmul.bf16.gmra.mxu3 %v1809_v6 }
 0x49b   :  { %2449 = vmatmul.bf16.gmra.mxu0 %v1808_v42  ;;  %2478 = vmatmul.bf16.gmra.mxu1 %v1809_v6 }
 0x4a8   :  { %v2159_v47 = vpop.f32.mrf.mxu0  ;;  %v2188_v16 = vpop.f32.mrf.mxu1 }
 0x4a9   :  { %v2189_v14 = vadd.f32 %v2188_v16, %v2159_v47 }
 0x4aa   :  { %2685 = vmatmul.bf16.vlgmr.msra.gmra.mxu2 %v8954_v7  ;;  %2714 = vmatmul.bf16.vlgmr.msra.gmra.mxu3 %v8974_v20 }
 0x4ab   :  { %2743 = vmatmul.bf16.vlgmr.msra.gmra.mxu0 %v8954_v7  ;;  %2772 = vmatmul.bf16.vlgmr.msra.gmra.mxu1 %v8974_v20 }
 0x4ad   :  { %v2101_v55 = vpop.f32.mrf.mxu2  ;;  %v2130_v4 = vpop.f32.mrf.mxu3 }
 0x4ae   :  { %v2131_v48 = vadd.f32 %v2130_v4, %v2101_v55 }
 0x4b0   :  { %v9105_v49 = vpop.f32.mrf.mxu0  ;;  %v9107_v58 = vpop.f32.mrf.mxu1 }
 0x4b1   :  { %v2191_v63 = vadd.f32 %v9107_v58, %v9105_v49 }
 0x4b5   :  { %v9109_v54 = vpop.f32.mrf.mxu2  ;;  %v9111_v9 = vpop.f32.mrf.mxu3 }
 0x4b6   :  { %v2133_v18 = vadd.f32 %v9111_v9, %v9109_v54 }
 0x4b8   :  { %v2164_v22 = vpop.f32.mrf.mxu0  ;;  %v2193_v57 = vpop.f32.mrf.mxu1 }
 0x4b9   :  { %v2194_v51 = vadd.f32 %v2193_v57, %v2164_v22 }
 0x4ba   :  { %6647 = vmatmul.msk.bf16.gmra.mxu2 %vm8538_vm8, %v8984_v37  ;;  %6655 = vmatmul.msk.bf16.gmra.mxu3 %vm8538_vm8, %v8986_v33 }
 0x4bb   :  { %6663 = vmatmul.msk.bf16.gmra.mxu0 %vm8538_vm8, %v8984_v37  ;;  %6671 = vmatmul.msk.bf16.gmra.mxu1 %vm8538_vm8, %v8986_v33 }
 0x4bd   :  { %v2106_v7 = vpop.f32.mrf.mxu2  ;;  %v2135_v20 = vpop.f32.mrf.mxu3 }
 0x4be   :  { %v2136_v19 = vadd.f32 %v2135_v20, %v2106_v7 }
 0x4c0   :  { %v9125_v40 = vpop.f32.mrf.mxu0  ;;  %v9127_v41 = vpop.f32.mrf.mxu1 }
 0x4c1   :  { %v2196_v32 = vadd.f32 %v9127_v41, %v9125_v40 }
 0x4c5   :  { %v9129_v28 = vpop.f32.mrf.mxu2  ;;  %v9131_v5 = vpop.f32.mrf.mxu3 }
 0x4c8   :  { %v2169_v50 = vpop.f32.mrf.mxu0  ;;  %v2198_v31 = vpop.f32.mrf.mxu1 }
 0x4c9   :  { %v2199_v1 = vadd.f32 %v2198_v31, %v2169_v50 }
 0x4ca   :  { %2695 = vmatmul.bf16.gmra.mxu2 %v9001_v56  ;;  %2724 = vmatmul.bf16.gmra.mxu3 %v9009_v45 }
 0x4cb   :  { %2753 = vmatmul.bf16.gmra.mxu0 %v9001_v56  ;;  %2782 = vmatmul.bf16.gmra.mxu1 %v9009_v45 }
 0x4cd   :  { %v2111_v37 = vpop.f32.mrf.mxu2  ;;  %v2140_v33 = vpop.f32.mrf.mxu3 }
 0x4ce   :  { %v2141_v36 = vadd.f32 %v2140_v33, %v2111_v37 }
 0x4d0   :  { %v9137_v34 = vpop.f32.mrf.mxu0  ;;  %v9139_v13 = vpop.f32.mrf.mxu1 }
 0x4d1   :  { %v2201_v58 = vadd.f32 %v9139_v13, %v9137_v34 }
 0x4d5   :  { %v9141_v38 = vpop.f32.mrf.mxu2  ;;  %v9143_v27 = vpop.f32.mrf.mxu3 }
 0x4d6   :  { %v2143_v54 = vadd.f32 %v9143_v27, %v9141_v38 }
 0x4d8   :  { %v2174_v60 = vpop.f32.mrf.mxu0  ;;  %v2203_v29 = vpop.f32.mrf.mxu1 }
 0x4d9   :  { %v2204_v59 = vadd.f32 %v2203_v29, %v2174_v60 }
 0x4da   :  { %6651 = vmatmul.msk.bf16.gmra.mxu2 %vm8576_vm10, %v9021_v46  ;;  %6659 = vmatmul.msk.bf16.gmra.mxu3 %vm8576_vm10, %v9023_v26 }
 0x4db   :  { %6667 = vmatmul.msk.bf16.gmra.mxu0 %vm8576_vm10, %v9021_v46  ;;  %6675 = vmatmul.msk.bf16.gmra.mxu1 %vm8576_vm10, %v9023_v26 }
 0x4dd   :  { %v2116_v56 = vpop.f32.mrf.mxu2  ;;  %v2145_v45 = vpop.f32.mrf.mxu3 }
 0x4de   :  { %v2146_v62 = vadd.f32 %v2145_v45, %v2116_v56 }
 0x4e0   :  { %v9157_v3 = vpop.f32.mrf.mxu0  ;;  %v9159_v35 = vpop.f32.mrf.mxu1 }
 0x4e5   :  { %v9161_v61 = vpop.f32.mrf.mxu2  ;;  %v9163_v15 = vpop.f32.mrf.mxu3 }
 0x4e8   :  { %v2435_v17 = vpop.f32.mrf.mxu0  ;;  %v2464_v24 = vpop.f32.mrf.mxu1 }
 0x4e9   :  { %v2436_v2 = vadd.f32 %v2435_v17, %v2189_v14 }
 0x4eb   :  { %v9165_v10 = vadd.f32 %v2464_v24, %v2436_v2 }
 0x4ed   :  { %v2377_v46 = vpop.f32.mrf.mxu2  ;;  %v2406_v25 = vpop.f32.mrf.mxu3 }
 0x4ee   :  { %v2378_v0 = vadd.f32 %v2377_v46, %v2131_v48 }
 0x4f0   :  { %v9167_v26 = vadd.f32 %v2406_v25, %v2378_v0  ;;  %v2437_v8 = vpop.f32.mrf.mxu0  ;;  %v9169_v23 = vpop.f32.mrf.mxu1 }
 0x4f1   :  { %v2438_v44 = vadd.f32 %v2437_v8, %v2191_v63 }
 0x4f5   :  { %v2379_v43 = vpop.f32.mrf.mxu2  ;;  %v9171_v11 = vpop.f32.mrf.mxu3 }
 0x4f6   :  { %v2380_v52 = vadd.f32 %v2379_v43, %v2133_v18 }
 0x4f8   :  { %v2440_v21 = vpop.f32.mrf.mxu0  ;;  %v2469_v53 = vpop.f32.mrf.mxu1  ;;  %v2409_v41 = vadd.f32 %v9171_v11, %v2380_v52  ;;  %v2148_v11 = vadd.f32 %v9163_v15, %v9161_v61 }
 0x4f9   :  { %v2441_v39 = vadd.f32 %v2440_v21, %v2194_v51 }
 0x4fb   :  { %v9173_v12 = vadd.f32 %v2469_v53, %v2441_v39 }
 0x4fd   :  { %v2382_v42 = vpop.f32.mrf.mxu2  ;;  %v2411_v6 = vpop.f32.mrf.mxu3 }
 0x4fe   :  { %v2383_v47 = vadd.f32 %v2382_v42, %v2136_v19 }
 0x500   :  { %v9175_v16 = vadd.f32 %v2411_v6, %v2383_v47  ;;  %v2442_v14 = vpop.f32.mrf.mxu0  ;;  %v9177_v55 = vpop.f32.mrf.mxu1 }
 0x501   :  { %v2443_v30 = vadd.f32 %v2442_v14, %v2196_v32  ;;  %v2206_v32 = vadd.f32 %v9159_v35, %v9157_v3 }
 0x502   :  { %10591 = vst [vmem:[#allocation25_spill] sm:$0xff] %v9175_v16  ;;  %v2467_v16 = vadd.f32 %v9169_v23, %v2438_v44 }
 0x505   :  { %v9179_v4 = vpop.f32.mrf.mxu2  ;;  %v9181_v48 = vpop.f32.mrf.mxu3 }
 0x508   :  { %v2445_v22 = vpop.f32.mrf.mxu0  ;;  %v2474_v57 = vpop.f32.mrf.mxu1 }
 0x509   :  { %v2446_v7 = vadd.f32 %v2445_v22, %v2199_v1 }
 0x50b   :  { %v9183_v20 = vadd.f32 %v2474_v57, %v2446_v7 }
 0x50d   :  { %v2387_v51 = vpop.f32.mrf.mxu2  ;;  %v2416_v50 = vpop.f32.mrf.mxu3 }
 0x50e   :  { %v2388_v31 = vadd.f32 %v2387_v51, %v2141_v36 }
 0x510   :  { %v9185_v37 = vadd.f32 %v2416_v50, %v2388_v31  ;;  %v2447_v19 = vpop.f32.mrf.mxu0  ;;  %v9187_v33 = vpop.f32.mrf.mxu1 }
 0x511   :  { %v2448_v38 = vadd.f32 %v2447_v19, %v2201_v58 }
 0x512   :  { %10592 = vst [vmem:[#allocation26_spill] sm:$0xff] %v9185_v37 }
 0x515   :  { %v2389_v60 = vpop.f32.mrf.mxu2  ;;  %v9189_v29 = vpop.f32.mrf.mxu3 }
 0x516   :  { %v2390_v27 = vadd.f32 %v2389_v60, %v2143_v54 }
 0x518   :  { %v2450_v56 = vpop.f32.mrf.mxu0  ;;  %v2479_v45 = vpop.f32.mrf.mxu1 }
 0x519   :  { %v2451_v17 = vadd.f32 %v2450_v56, %v2204_v59 }
 0x51b   :  { %v9191_v24 = vadd.f32 %v2479_v45, %v2451_v17 }
 0x51d   :  { %10593 = vst [vmem:[#allocation21_spill] sm:$0xff] %v9191_v24  ;;  %v2392_v2 = vpop.f32.mrf.mxu2  ;;  %v2421_v1 = vpop.f32.mrf.mxu3  ;;  %v2138_v24 = vadd.f32 %v9131_v5, %v9129_v28  ;;  %v2472_v28 = vadd.f32 %v9177_v55, %v2443_v30 }
 0x51e   :  { %v2393_v46 = vadd.f32 %v2392_v2, %v2146_v62 }
 0x51f   :  { %v2385_v63 = vadd.f32 %v9179_v4, %v2138_v24  ;;  %v2477_v24 = vadd.f32 %v9187_v33, %v2448_v38 }
 0x520   :  { %v9193_v25 = vadd.f32 %v2421_v1, %v2393_v46  ;;  %v2452_v0 = vpop.f32.mrf.mxu0  ;;  %v9195_v36 = vpop.f32.mrf.mxu1 }
 0x521   :  { %10595 = vst [vmem:[#allocation24_spill] sm:$0xff] %v9195_v36  ;;  %v2810_v36 = vld [vmem:[#allocation7 + $0x2] sm:$0x3]  ;;  %v2453_v23 = vadd.f32 %v2452_v0, %v2206_v32  ;;  %v2414_v19 = vadd.f32 %v9181_v48, %v2385_v63  ;;  %v2419_v0 = vadd.f32 %v9189_v29, %v2390_v27 }
 0x522   :  { %10594 = vst [vmem:[#allocation23_spill] sm:$0xff] %v9193_v25  ;;  %v9220_v34 = vperm.slane %v2810_v36, 1  ;;  %v9224_v52 = vperm.slane %v2810_v36, 0  ;;  %v10599_v48 = vld [vmem:[#allocation25_spill] sm:$0xff] }
 0x525   :  { %v9197_v21 = vpop.f32.mrf.mxu2  ;;  %v9199_v53 = vpop.f32.mrf.mxu3 }
 0x526   :  { %10596 = vst [vmem:[#allocation27_spill] sm:$0xff] %v9197_v21 }
 0x527   :  { %10597 = vst [vmem:[#allocation28_spill] sm:$0xff] %v9199_v53 }
 0x528   :  { %v2744_v39 = vpop.f32.mrf.mxu0  ;;  %v2773_v42 = vpop.f32.mrf.mxu1  ;;  %v10598_v36 = vld [vmem:[#allocation24_spill] sm:$0xff] }
 0x529   :  { %v2774_v21 = vadd.f32 %v2773_v42, %v2744_v39 }
 0x52b   :  { %v2794_v8 = vadd.f32 %v2774_v21, %v9165_v10  ;;  %v2482_v21 = vadd.f32 %v10598_v36, %v2453_v23 }
 0x52d   :  { %v2686_v6 = vpop.f32.mrf.mxu2  ;;  %v2715_v47 = vpop.f32.mrf.mxu3 }
 0x52e   :  { %v2716_v9 = vadd.f32 %v2715_v47, %v2686_v6 }
 0x530   :  { %v2746_v22 = vpop.f32.mrf.mxu0  ;;  %v2775_v59 = vpop.f32.mrf.mxu1  ;;  %v2793_v43 = vadd.f32 %v2716_v9, %v9167_v26 }
 0x531   :  { %v2776_v53 = vadd.f32 %v2775_v59, %v2746_v22 }
 0x533   :  { %v2796_v5 = vadd.f32 %v2776_v53, %v2467_v16  ;;  %v9243_v53 = vadd.f32 %v9224_v52, %v2793_v43 }
 0x535   :  { %v2688_v57 = vpop.f32.mrf.mxu2  ;;  %v2717_v7 = vpop.f32.mrf.mxu3  ;;  %v9229_v16 = vadd.f32 %v9220_v34, %v2796_v5 }
 0x536   :  { %v2718_v13 = vadd.f32 %v2717_v7, %v2688_v57 }
 0x537   :  { %v2895_v33 = vmul.f32 %v9229_v16, %v9229_v16 }
 0x538   :  { %v2749_v51 = vpop.f32.mrf.mxu0  ;;  %v2778_v50 = vpop.f32.mrf.mxu1  ;;  %v2795_v60 = vadd.f32 %v2718_v13, %v2409_v41 }
 0x539   :  { %v2779_v49 = vadd.f32 %v2778_v50, %v2749_v51 }
 0x53a   :  { %v9254_v57 = vadd.f32 %v9224_v52, %v2795_v60 }
 0x53b   :  { %v2798_v3 = vadd.f32 %v2779_v49, %v9173_v12  ;;  %v9233_v12 = vadd.f32 %v9220_v34, %v2794_v8 }
 0x53c   :  { %v2832_v38 = vadd.f32 %v9254_v57, %v9243_v53 }
 0x53d   :  { %v2691_v62 = vpop.f32.mrf.mxu2  ;;  %v2720_v31 = vpop.f32.mrf.mxu3  ;;  %v9238_v61 = vadd.f32 %v9220_v34, %v2798_v3 }
 0x53e   :  { %v2721_v30 = vadd.f32 %v2720_v31, %v2691_v62  ;;  %v10600_v62 = vld [vmem:[#allocation21_spill] sm:$0xff] }
 0x540   :  { %v2751_v56 = vpop.f32.mrf.mxu0  ;;  %v2780_v45 = vpop.f32.mrf.mxu1  ;;  %v2797_v39 = vadd.f32 %v2721_v30, %v10599_v48 }
 0x541   :  { %v2781_v44 = vadd.f32 %v2780_v45, %v2751_v56  ;;  %v10601_v56 = vld [vmem:[#allocation27_spill] sm:$0xff] }
 0x542   :  { %v2395_v45 = vadd.f32 %v10601_v56, %v2148_v11 }
 0x543   :  { %v2800_v10 = vadd.f32 %v2781_v44, %v2472_v28 }
 0x545   :  { %v2693_v17 = vpop.f32.mrf.mxu2  ;;  %v2722_v2 = vpop.f32.mrf.mxu3  ;;  %v9249_v29 = vadd.f32 %v9220_v34, %v2800_v10 }
 0x546   :  { %v2723_v26 = vadd.f32 %v2722_v2, %v2693_v17  ;;  %v2892_v17 = vmul.f32 %v9243_v53, %v9243_v53  ;;  %v9268_v2 = vadd.f32 %v9224_v52, %v2797_v39 }
 0x547   :  { %v2899_v54 = vmul.f32 %v9249_v29, %v9249_v29 }
 0x548   :  { %v2754_v1 = vpop.f32.mrf.mxu0  ;;  %v2783_v46 = vpop.f32.mrf.mxu1  ;;  %v2799_v7 = vadd.f32 %v2723_v26, %v2414_v19  ;;  %v2896_v27 = vmul.f32 %v9268_v2, %v9268_v2  ;;  %v2833_v19 = vadd.f32 %v2832_v38, %v9268_v2 }
 0x549   :  { %v2784_v35 = vadd.f32 %v2783_v46, %v2754_v1  ;;  %v10602_v1 = vld [vmem:[#allocation26_spill] sm:$0xff] }
 0x54a   :  { %v9280_v41 = vadd.f32 %v9224_v52, %v2799_v7 }
 0x54b   :  { %v2802_v15 = vadd.f32 %v2784_v35, %v9183_v20  ;;  %v2893_v20 = vmul.f32 %v9233_v12, %v9233_v12  ;;  %v10603_v35 = vld [vmem:[#allocation23_spill] sm:$0xff] }
 0x54c   :  { %v2898_v60 = vmul.f32 %v9280_v41, %v9280_v41  ;;  %v2834_v39 = vadd.f32 %v2833_v19, %v9280_v41 }
 0x54d   :  { %v2696_v25 = vpop.f32.mrf.mxu2  ;;  %v2725_v37 = vpop.f32.mrf.mxu3  ;;  %v9261_v50 = vadd.f32 %v9220_v34, %v2802_v15  ;;  %v2921_v49 = vadd.f32 %v2895_v33, %v2893_v20 }
 0x54e   :  { %v2726_v42 = vadd.f32 %v2725_v37, %v2696_v25  ;;  %v2845_v37 = vadd.f32 %v9229_v16, %v9233_v12  ;;  %v2897_v25 = vmul.f32 %v9238_v61, %v9238_v61 }
 0x54f   :  { %v2901_v8 = vmul.f32 %v9261_v50, %v9261_v50 }
 0x550   :  { %v2756_v18 = vpop.f32.mrf.mxu0  ;;  %v2785_v40 = vpop.f32.mrf.mxu1  ;;  %v2801_v46 = vadd.f32 %v2726_v42, %v10602_v1  ;;  %v2846_v58 = vadd.f32 %v2845_v37, %v9238_v61  ;;  %v2922_v44 = vadd.f32 %v2921_v49, %v2897_v25 }
 0x551   :  { %v2786_v14 = vadd.f32 %v2785_v40, %v2756_v18  ;;  %v2894_v40 = vmul.f32 %v9254_v57, %v9254_v57 }
 0x552   :  { %v2847_v63 = vadd.f32 %v2846_v58, %v9249_v29  ;;  %v9293_v3 = vadd.f32 %v9224_v52, %v2801_v46  ;;  %v2923_v11 = vadd.f32 %v2922_v44, %v2899_v54 }
 0x553   :  { %v2804_v22 = vadd.f32 %v2786_v14, %v2477_v24 }
 0x554   :  { %v2848_v10 = vadd.f32 %v2847_v63, %v9261_v50  ;;  %v2924_v24 = vadd.f32 %v2923_v11, %v2901_v8  ;;  %v2900_v42 = vmul.f32 %v9293_v3, %v9293_v3  ;;  %v2835_v37 = vadd.f32 %v2834_v39, %v9293_v3 }
 0x555   :  { %v2698_v55 = vpop.f32.mrf.mxu2  ;;  %v2727_v4 = vpop.f32.mrf.mxu3  ;;  %v9275_v32 = vadd.f32 %v9220_v34, %v2804_v22 }
 0x556   :  { %v2728_v51 = vadd.f32 %v2727_v4, %v2698_v55  ;;  %v2908_v4 = vadd.f32 %v2894_v40, %v2892_v17 }
 0x557   :  { %v2903_v14 = vmul.f32 %v9275_v32, %v9275_v32 }
 0x558   :  { %v2759_v6 = vpop.f32.mrf.mxu0  ;;  %v2788_v47 = vpop.f32.mrf.mxu1  ;;  %v2803_v28 = vadd.f32 %v2728_v51, %v2419_v0  ;;  %v2849_v0 = vadd.f32 %v2848_v10, %v9275_v32  ;;  %v2909_v48 = vadd.f32 %v2908_v4, %v2896_v27 }
 0x559   :  { %v2789_v59 = vadd.f32 %v2788_v47, %v2759_v6  ;;  %v10604_v47 = vld [vmem:[#allocation28_spill] sm:$0xff]  ;;  %v2925_v51 = vadd.f32 %v2924_v24, %v2903_v14 }
 0x55a   :  { %v9303_v26 = vadd.f32 %v9224_v52, %v2803_v28  ;;  %v2424_v33 = vadd.f32 %v10604_v47, %v2395_v45 }
 0x55b   :  { %v2806_v31 = vadd.f32 %v2789_v59, %v10600_v62 }
 0x55c   :  { %v2902_v25 = vmul.f32 %v9303_v26, %v9303_v26 }
 0x55d   :  { %v2701_v9 = vpop.f32.mrf.mxu2  ;;  %v2730_v18 = vpop.f32.mrf.mxu3  ;;  %v9286_v13 = vadd.f32 %v9220_v34, %v2806_v31 }
 0x55e   :  { %v2731_v5 = vadd.f32 %v2730_v18, %v2701_v9 }
 0x55f   :  { %v2905_v15 = vmul.f32 %v9286_v13, %v9286_v13  ;;  %v2850_v22 = vadd.f32 %v2849_v0, %v9286_v13 }
 0x560   :  { %v2805_v23 = vadd.f32 %v2731_v5, %v10603_v35  ;;  %v2761_v43 = vpop.f32.mrf.mxu0  ;;  %v2790_v30 = vpop.f32.mrf.mxu1 }
 0x561   :  { %v2791_v55 = vadd.f32 %v2790_v30, %v2761_v43  ;;  %v2926_v45 = vadd.f32 %v2925_v51, %v2905_v15 }
 0x562   :  { %v9312_v6 = vadd.f32 %v9224_v52, %v2805_v23 }
 0x563   :  { %v2808_v36 = vadd.f32 %v2791_v55, %v2482_v21  ;;  %v2910_v21 = vadd.f32 %v2909_v48, %v2898_v60 }
 0x564   :  { %v2904_v1 = vmul.f32 %v9312_v6, %v9312_v6 }
 0x565   :  { %v9317_v59 = vadd.f32 %v9220_v34, %v2808_v36  ;;  %v2703_v20 = vpop.f32.mrf.mxu2  ;;  %v2732_v7 = vpop.f32.mrf.mxu3  ;;  %v2911_v17 = vadd.f32 %v2910_v21, %v2900_v42  ;;  %v2836_v34 = vadd.f32 %v2835_v37, %v9303_v26 }
 0x566   :  { %v2733_v62 = vadd.f32 %v2732_v7, %v2703_v20 }
 0x567   :  { %v2851_v31 = vadd.f32 %v2850_v22, %v9317_v59  ;;  %v2907_v56 = vmul.f32 %v9317_v59, %v9317_v59  ;;  %v2837_v54 = vadd.f32 %v2836_v34, %v9312_v6  ;;  %v2912_v18 = vadd.f32 %v2911_v17, %v2902_v25 }
 0x568   :  { %v2807_v46 = vadd.f32 %v2733_v62, %v2424_v33 }
 0x569   :  { %v2852_v49 = vrot.slane %v2851_v31, 4  ;;  %v2927_v58 = vadd.f32 %v2926_v45, %v2907_v56  ;;  %v2913_v44 = vadd.f32 %v2912_v18, %v2904_v1 }
 0x56a   :  { %v9330_v9 = vadd.f32 %v9224_v52, %v2807_v46 }
 0x56b   :  { %v2853_v40 = vadd.f32 %v2852_v49, %v2851_v31  ;;  %v2928_v63 = vrot.slane %v2927_v58, 4 }
 0x56c   :  { %v2838_v28 = vadd.f32 %v2837_v54, %v9330_v9  ;;  %v2906_v5 = vmul.f32 %v9330_v9, %v9330_v9 }
 0x56d   :  { %v2854_v8 = vrot.slane %v2853_v40, 2  ;;  %v2929_v30 = vadd.f32 %v2928_v63, %v2927_v58 }
 0x56e   :  { %v2839_v38 = vrot.slane %v2838_v28, 4  ;;  %v2914_v27 = vadd.f32 %v2913_v44, %v2906_v5 }
 0x56f   :  { %v2855_v35 = vadd.f32 %v2854_v8, %v2853_v40  ;;  %v2930_v19 = vrot.slane %v2929_v30, 2 }
 0x570   :  { %v2840_v23 = vadd.f32 %v2839_v38, %v2838_v28  ;;  %v2915_v43 = vrot.slane %v2914_v27, 4 }
 0x571   :  { %v2856_v11 = vrot.slane %v2855_v35, 1  ;;  %v2931_v36 = vadd.f32 %v2930_v19, %v2929_v30  ;;  %v6798_v19 = vld [vmem:[#allocation6 + $0x7f0] sm:$0xf] }
 0x572   :  { %v2841_v10 = vrot.slane %v2840_v23, 2  ;;  %v2916_v52 = vadd.f32 %v2915_v43, %v2914_v27 }
 0x573   :  { %v2857_v14 = vadd.f32 %v2856_v11, %v2855_v35  ;;  %v2932_v39 = vrot.slane %v2931_v36, 1 }
 0x574   :  { %v2842_v55 = vadd.f32 %v2841_v10, %v2840_v23  ;;  %v2917_v4 = vrot.slane %v2916_v52, 2 }
 0x575   :  { %2860 = vrot.lane.b32.xlu2 %v2857_v14, %s8175_s20  ;;  %v2933_v42 = vadd.f32 %v2932_v39, %v2931_v36  ;;  %v7846_v39 = vld [vmem:[#allocation6 + $0x7f4] sm:$0xf] }
 0x576   :  { %v2843_v60 = vrot.slane %v2842_v55, 1  ;;  %v2918_v24 = vadd.f32 %v2917_v4, %v2916_v52  ;;  %v7831_v4 = vld [vmem:[#allocation6 + $0x774] sm:$0xf0] }
 0x578   :  { %v2844_v0 = vadd.f32 %v2843_v60, %v2842_v55  ;;  %v2919_v15 = vrot.slane %v2918_v24, 1  ;;  %v6734_v55 = vld [vmem:[#allocation6 + $0x770] sm:$0xf] }
 0x579   :  { %v6735_v60 = vor.u32 %v7831_v4, %v6734_v55  ;;  %v6720_v55 = vld [vmem:[#allocation6 + $0x758] sm:$0xf0] }
 0x57a   :  { %2858 = vrot.lane.b32.xlu1 %v2844_v0, %s8175_s20  ;;  %v2920_v48 = vadd.f32 %v2919_v15, %v2918_v24  ;;  %v7847_v24 = vld [vmem:[#allocation6 + $0x7f4] sm:$0xf0]  ;;  %v6736_v15 = vld [vmem:[#allocation6 + $0x778] sm:$0xf0] }
 0x57b   :  { %v6799_v36 = vor.u32 %v7847_v24, %v6798_v19  ;;  %3402 = vmatpush.bf16.msrb.mxu2 %v6735_v60  ;;  %v7842_v60 = vld [vmem:[#allocation6 + $0x7d4] sm:$0xf]  ;;  %v6784_v24 = vld [vmem:[#allocation6 + $0x7d8] sm:$0xf0] }
 0x57c   :  { %2934 = vrot.lane.b32.xlu0 %v2920_v48, %s8175_s20 }
 0x57d   :  { %3431 = vmatpush.bf16.msrb.mxu3 %v6799_v36 }
 0x582   :  { %2936 = vrot.lane.b32.xlu1 %v2933_v42, %s8175_s20 }
 0x5cf   :  { %v2861_v47 = vpop.permute.xlu2 %2860 }
 0x5ec   :  { %v2859_v33 = vpop.permute.xlu1 %2858 }
 0x5ed   :  { %v2862_v20 = vsel %vm1549_vm11, %v2859_v33, %v2861_v47  ;;  %v2863_v7 = vsel %vm1549_vm11, %v2861_v47, %v2859_v33  ;;  %v6726_v33 = vld [vmem:[#allocation6 + $0x760] sm:$0xf] }
 0x5ee   :  { %v2864_v51 = vadd.f32 %v2863_v7, %v2844_v0  ;;  %v2865_v21 = vadd.f32 %v2862_v20, %v2857_v14  ;;  %v2935_v37 = vpop.permute.xlu0 %2934  ;;  %v7830_v0 = vld [vmem:[#allocation6 + $0x774] sm:$0xf]  ;;  %v7829_v20 = vld [vmem:[#allocation6 + $0x764] sm:$0xf0]  ;;  %v6790_v7 = vld [vmem:[#allocation6 + $0x7e0] sm:$0xf] }
 0x5f0   :  { %2866 = vrot.lane.b32.xlu2 %v2864_v51, %s8180_s0  ;;  %2868 = vrot.lane.b32.xlu0 %v2865_v21, %s8180_s0 }
 0x5f4   :  { %v2937_v25 = vpop.permute.xlu1 %2936 }
 0x5f5   :  { %v2938_v62 = vsel %vm1549_vm11, %v2935_v37, %v2937_v25  ;;  %v2939_v31 = vsel %vm1549_vm11, %v2937_v25, %v2935_v37  ;;  %v7828_v37 = vld [vmem:[#allocation6 + $0x764] sm:$0xf]  ;;  %v6728_v25 = vld [vmem:[#allocation6 + $0x768] sm:$0xf0] }
 0x5f6   :  { %v2940_v56 = vadd.f32 %v2939_v31, %v2920_v48  ;;  %v2941_v45 = vadd.f32 %v2938_v62, %v2933_v42  ;;  %v6739_v48 = vor.u32 %v7830_v0, %v6736_v15  ;;  %v6800_v42 = vld [vmem:[#allocation6 + $0x7f8] sm:$0xf0]  ;;  %v6731_v31 = vor.u32 %v7828_v37, %v6728_v25  ;;  %v6710_v0 = vld [vmem:[#allocation6 + $0x740] sm:$0xf]  ;;  %v6776_v37 = vld [vmem:[#allocation6 + $0x7c8] sm:$0xf0] }
 0x5f7   :  { %v6803_v47 = vor.u32 %v7846_v39, %v6800_v42  ;;  %v7841_v42 = vld [vmem:[#allocation6 + $0x7c4] sm:$0xf0]  ;;  %v6702_v25 = vld [vmem:[#allocation6 + $0x730] sm:$0xf] }
 0x5f8   :  { %2942 = vrot.lane.b32.xlu1 %v2940_v56, %s8180_s0  ;;  %2944 = vrot.lane.b32.xlu2 %v2941_v45, %s8180_s0 }
 0x5f9   :  { %3460 = vmatpush.bf16.msrb.mxu0 %v6739_v48  ;;  %3489 = vmatpush.bf16.msrb.mxu1 %v6803_v47  ;;  %v6774_v48 = vld [vmem:[#allocation6 + $0x7c0] sm:$0xf]  ;;  %v7824_v47 = vld [vmem:[#allocation6 + $0x744] sm:$0xf] }
 0x5fd   :  { %3461 = vmatpush.bf16.msrb.mxu0 %v6731_v31  ;;  %v7823_v31 = vld [vmem:[#allocation6 + $0x734] sm:$0xf0] }
 0x64a   :  { %v2867_v17 = vpop.permute.xlu2 %2866 }
 0x652   :  { %v2945_v54 = vpop.permute.xlu2 %2944 }
 0x662   :  { %v2869_v34 = vpop.permute.xlu0 %2868 }
 0x663   :  { %v2870_v1 = vsel %vm1558_vm12, %v2867_v17, %v2869_v34  ;;  %v2871_v46 = vsel %vm1558_vm12, %v2869_v34, %v2867_v17 }
 0x664   :  { %v2872_v49 = vadd.f32 %v2871_v46, %v2864_v51  ;;  %v2873_v58 = vadd.f32 %v2870_v1, %v2865_v21  ;;  %v6727_v51 = vor.u32 %v7829_v20, %v6726_v33  ;;  %v7845_v21 = vld [vmem:[#allocation6 + $0x7e4] sm:$0xf0]  ;;  %v6712_v33 = vld [vmem:[#allocation6 + $0x748] sm:$0xf0] }
 0x665   :  { %v6791_v62 = vor.u32 %v7845_v21, %v6790_v7  ;;  %v6775_v7 = vor.u32 %v7841_v42, %v6774_v48  ;;  %v7840_v21 = vld [vmem:[#allocation6 + $0x7c4] sm:$0xf]  ;;  %v6678_v48 = vld [vmem:[#allocation6 + $0x700] sm:$0xf] }
 0x666   :  { %2874 = vrot.lane.b32.xlu0 %v2872_v49, %s8171_s11  ;;  %2876 = vrot.lane.b32.xlu1 %v2873_v58, %s8171_s11 }
 0x667   :  { %3403 = vmatpush.bf16.msrb.mxu2 %v6727_v51  ;;  %3432 = vmatpush.bf16.msrb.mxu3 %v6791_v62  ;;  %v6715_v51 = vor.u32 %v7824_v47, %v6712_v33  ;;  %v6779_v62 = vor.u32 %v7840_v21, %v6776_v37  ;;  %v6680_v37 = vld [vmem:[#allocation6 + $0x708] sm:$0xf0] }
 0x66a   :  { %v2943_v18 = vpop.permute.xlu1 %2942 }
 0x66b   :  { %v2946_v40 = vsel %vm1558_vm12, %v2943_v18, %v2945_v54  ;;  %v2947_v28 = vsel %vm1558_vm12, %v2945_v54, %v2943_v18 }
 0x66c   :  { %v2948_v5 = vadd.f32 %v2947_v28, %v2940_v56  ;;  %v2949_v44 = vadd.f32 %v2946_v40, %v2941_v45  ;;  %v7844_v56 = vld [vmem:[#allocation6 + $0x7e4] sm:$0xf]  ;;  %v6792_v45 = vld [vmem:[#allocation6 + $0x7e8] sm:$0xf0] }
 0x66d   :  { %v6795_v17 = vor.u32 %v7844_v56, %v6792_v45  ;;  %v6766_v56 = vld [vmem:[#allocation6 + $0x7b0] sm:$0xf]  ;;  %v7839_v45 = vld [vmem:[#allocation6 + $0x7b4] sm:$0xf0] }
 0x66e   :  { %2950 = vrot.lane.b32.xlu2 %v2948_v5, %s8171_s11  ;;  %2952 = vrot.lane.b32.xlu0 %v2949_v44, %s8171_s11 }
 0x66f   :  { %3490 = vmatpush.bf16.msrb.mxu1 %v6795_v17 }
 0x6c8   :  { %v2951_v43 = vpop.permute.xlu2 %2950 }
 0x6d8   :  { %v2875_v63 = vpop.permute.xlu0 %2874  ;;  %v2877_v8 = vpop.permute.xlu1 %2876 }
 0x6d9   :  { %v2878_v38 = vsel %vm1567_vm13, %v2875_v63, %v2877_v8  ;;  %v2879_v27 = vsel %vm1567_vm13, %v2877_v8, %v2875_v63 }
 0x6da   :  { %v2880_v35 = vadd.f32 %v2879_v27, %v2872_v49  ;;  %v2881_v23 = vadd.f32 %v2878_v38, %v2873_v58  ;;  %v6718_v27 = vld [vmem:[#allocation6 + $0x750] sm:$0xf] }
 0x6dc   :  { %2882 = vrot.lane.b32.xlu1 %v2880_v35, %s8181_s14  ;;  %2884 = vrot.lane.b32.xlu2 %v2881_v23, %s8181_s14 }
 0x6e0   :  { %v2953_v30 = vpop.permute.xlu0 %2952 }
 0x6e1   :  { %v2954_v11 = vsel %vm1567_vm13, %v2951_v43, %v2953_v30  ;;  %v2955_v10 = vsel %vm1567_vm13, %v2953_v30, %v2951_v43  ;;  %v7827_v43 = vld [vmem:[#allocation6 + $0x754] sm:$0xf0]  ;;  %v6782_v30 = vld [vmem:[#allocation6 + $0x7d0] sm:$0xf] }
 0x6e2   :  { %v2956_v52 = vadd.f32 %v2955_v10, %v2948_v5  ;;  %v2957_v14 = vadd.f32 %v2954_v11, %v2949_v44  ;;  %v6719_v10 = vor.u32 %v7827_v43, %v6718_v27  ;;  %v6696_v27 = vld [vmem:[#allocation6 + $0x728] sm:$0xf0]  ;;  %v7836_v43 = vld [vmem:[#allocation6 + $0x7a4] sm:$0xf] }
 0x6e4   :  { %2958 = vrot.lane.b32.xlu0 %v2956_v52, %s8181_s14  ;;  %2960 = vrot.lane.b32.xlu1 %v2957_v14, %s8181_s14 }
 0x6e5   :  { %3404 = vmatpush.bf16.msrb.mxu2 %v6719_v10 }
 0x736   :  { %v2885_v34 = vpop.permute.xlu2 %2884 }
 0x74e   :  { %v2883_v1 = vpop.permute.xlu1 %2882 }
 0x74f   :  { %v2886_v46 = vsel %vm1576_vm14, %v2883_v1, %v2885_v34  ;;  %v2887_v49 = vsel %vm1576_vm14, %v2885_v34, %v2883_v1  ;;  %v6703_v34 = vor.u32 %v7823_v31, %v6702_v25  ;;  %v7822_v1 = vld [vmem:[#allocation6 + $0x734] sm:$0xf]  ;;  %v7832_v25 = vld [vmem:[#allocation6 + $0x784] sm:$0xf] }
 0x750   :  { %v2888_v58 = vadd.f32 %v2887_v49, %v2880_v35  ;;  %v2889_v54 = vadd.f32 %v2886_v46, %v2881_v23  ;;  %v7843_v35 = vld [vmem:[#allocation6 + $0x7d4] sm:$0xf0]  ;;  %v7826_v23 = vld [vmem:[#allocation6 + $0x754] sm:$0xf]  ;;  %v6704_v46 = vld [vmem:[#allocation6 + $0x738] sm:$0xf0]  ;;  %v6767_v49 = vor.u32 %v7839_v45, %v6766_v56 }
 0x751   :  { %v6783_v4 = vor.u32 %v7843_v35, %v6782_v30  ;;  %v6723_v19 = vor.u32 %v7826_v23, %v6720_v55  ;;  %v6686_v23 = vld [vmem:[#allocation6 + $0x710] sm:$0xf]  ;;  %v7819_v55 = vld [vmem:[#allocation6 + $0x714] sm:$0xf0] }
 0x752   :  { %v2890_v18 = vadd.f32 %v2889_v54, %v2888_v58  ;;  %v6707_v58 = vor.u32 %v7822_v1, %v6704_v46  ;;  %v7838_v54 = vld [vmem:[#allocation6 + $0x7b4] sm:$0xf]  ;;  %v6862_v56 = vld [vmem:[#allocation6 + $0x670] sm:$0xf]  ;;  %v7799_v45 = vld [vmem:[#allocation6 + $0x674] sm:$0xf0] }
 0x753   :  { %3433 = vmatpush.bf16.msrb.mxu3 %v6783_v4  ;;  %3462 = vmatpush.bf16.msrb.mxu0 %v6723_v19  ;;  %v6750_v4 = vld [vmem:[#allocation6 + $0x790] sm:$0xf]  ;;  %v7815_v46 = vld [vmem:[#allocation6 + $0x6f4] sm:$0xf0] }
 0x754   :  { %v9383_v63 = vmul.f32 0.00048828125, %v2890_v18  ;;  %v6768_v18 = vld [vmem:[#allocation6 + $0x7b8] sm:$0xf0] }
 0x756   :  { %v2959_v40 = vpop.permute.xlu0 %2958  ;;  %v2961_v28 = vpop.permute.xlu1 %2960  ;;  %v2968_v15 = vmul.f32 %v9383_v63, %v9383_v63 }
 0x757   :  { %v2962_v5 = vsel %vm1576_vm14, %v2959_v40, %v2961_v28  ;;  %v2963_v44 = vsel %vm1576_vm14, %v2961_v28, %v2959_v40  ;;  %3434 = vmatpush.bf16.msrb.mxu3 %v6775_v7  ;;  %3463 = vmatpush.bf16.msrb.mxu0 %v6715_v51  ;;  %v6694_v40 = vld [vmem:[#allocation6 + $0x720] sm:$0xf]  ;;  %v6771_v28 = vor.u32 %v7838_v54, %v6768_v18  ;;  %v7833_v7 = vld [vmem:[#allocation6 + $0x784] sm:$0xf0]  ;;  %v7816_v51 = vld [vmem:[#allocation6 + $0x704] sm:$0xf] }
 0x758   :  { %v2964_v8 = vadd.f32 %v2963_v44, %v2956_v52  ;;  %v2965_v38 = vadd.f32 %v2962_v5, %v2957_v14  ;;  %v6787_v52 = vor.u32 %v7842_v60, %v6784_v24  ;;  %v7825_v14 = vld [vmem:[#allocation6 + $0x744] sm:$0xf0]  ;;  %v6758_v44 = vld [vmem:[#allocation6 + $0x7a0] sm:$0xf]  ;;  %v7835_v60 = vld [vmem:[#allocation6 + $0x794] sm:$0xf0] }
 0x759   :  { %v6711_v39 = vor.u32 %v7825_v14, %v6710_v0  ;;  %v7821_v5 = vld [vmem:[#allocation6 + $0x724] sm:$0xf0]  ;;  %v7818_v24 = vld [vmem:[#allocation6 + $0x714] sm:$0xf]  ;;  %v6688_v0 = vld [vmem:[#allocation6 + $0x718] sm:$0xf0]  ;;  %v6687_v14 = vor.u32 %v7819_v55, %v6686_v23  ;;  %v6751_v47 = vor.u32 %v7835_v60, %v6750_v4 }
 0x75a   :  { %v2966_v11 = vadd.f32 %v2965_v38, %v2964_v8  ;;  %3491 = vmatpush.bf16.msrb.mxu1 %v6787_v52  ;;  %v7837_v8 = vld [vmem:[#allocation6 + $0x7a4] sm:$0xf0]  ;;  %v7820_v38 = vld [vmem:[#allocation6 + $0x724] sm:$0xf]  ;;  %v6695_v30 = vor.u32 %v7821_v5, %v6694_v40  ;;  %v6691_v33 = vor.u32 %v7818_v24, %v6688_v0  ;;  %v6683_v40 = vor.u32 %v7816_v51, %v6680_v37  ;;  %v6928_v5 = vld [vmem:[#allocation6 + $0x6f8] sm:$0xf0] }
 0x75b   :  { %3405 = vmatpush.bf16.msrb.mxu2 %v6711_v39  ;;  %3435 = vmatpush.bf16.msrb.mxu3 %v6767_v49  ;;  %v6759_v10 = vor.u32 %v7837_v8, %v6758_v44  ;;  %v6699_v35 = vor.u32 %v7820_v38, %v6696_v27  ;;  %v7817_v39 = vld [vmem:[#allocation6 + $0x704] sm:$0xf0]  ;;  %v7798_v49 = vld [vmem:[#allocation6 + $0x674] sm:$0xf]  ;;  %v6863_v8 = vor.u32 %v7799_v45, %v6862_v56  ;;  %v6854_v38 = vld [vmem:[#allocation6 + $0x660] sm:$0xf] }
 0x75c   :  { %v2967_v36 = vmul.f32 0.00048828125, %v2966_v11  ;;  %v6760_v11 = vld [vmem:[#allocation6 + $0x7a8] sm:$0xf0]  ;;  %3464 = vmatpush.bf16.msrb.mxu0 %v6707_v58  ;;  %v6679_v1 = vor.u32 %v7817_v39, %v6678_v48  ;;  %v6864_v58 = vld [vmem:[#allocation6 + $0x678] sm:$0xf0] }
 0x75d   :  { %v6763_v19 = vor.u32 %v7836_v43, %v6760_v11  ;;  %v7797_v11 = vld [vmem:[#allocation6 + $0x664] sm:$0xf0]  ;;  %v7796_v55 = vld [vmem:[#allocation6 + $0x664] sm:$0xf]  ;;  %v6856_v4 = vld [vmem:[#allocation6 + $0x668] sm:$0xf0] }
 0x75e   :  { %v2969_v20 = vsub.f32 %v2967_v36, %v2968_v15  ;;  %3492 = vmatpush.bf16.msrb.mxu1 %v6779_v62  ;;  %v7834_v15 = vld [vmem:[#allocation6 + $0x794] sm:$0xf]  ;;  %v6752_v36 = vld [vmem:[#allocation6 + $0x798] sm:$0xf0]  ;;  %v6744_v62 = vld [vmem:[#allocation6 + $0x788] sm:$0xf0]  ;;  %v6855_v0 = vor.u32 %v7797_v11, %v6854_v38 }
 0x75f   :  { %3406 = vmatpush.bf16.msrb.mxu2 %v6703_v34  ;;  %3436 = vmatpush.bf16.msrb.mxu3 %v6759_v10  ;;  %v6755_v21 = vor.u32 %v7834_v15, %v6752_v36  ;;  %v6926_v34 = vld [vmem:[#allocation6 + $0x6f0] sm:$0xf]  ;;  %v6747_v44 = vor.u32 %v7832_v25, %v6744_v62  ;;  %v6918_v10 = vld [vmem:[#allocation6 + $0x6e0] sm:$0xf]  ;;  %v7813_v23 = vld [vmem:[#allocation6 + $0x6e4] sm:$0xf0] }
 0x760   :  { %v9387_v17 = vadd.f32 1e-05, %v2969_v20  ;;  %3465 = vmatpush.bf16.msrb.mxu0 %v6699_v35  ;;  %v6742_v20 = vld [vmem:[#allocation6 + $0x780] sm:$0xf]  ;;  %v6927_v43 = vor.u32 %v7815_v46, %v6926_v34  ;;  %v7812_v60 = vld [vmem:[#allocation6 + $0x6e4] sm:$0xf]  ;;  %v6919_v36 = vor.u32 %v7813_v23, %v6918_v10 }
 0x761   :  { %v6743_v18 = vor.u32 %v7833_v7, %v6742_v20  ;;  %v6920_v24 = vld [vmem:[#allocation6 + $0x6e8] sm:$0xf0]  ;;  %v2971_v48 = vld [vmem:[#allocation9 + $0x2] sm:$0x3]  ;;  %v6846_v51 = vld [vmem:[#allocation6 + $0x650] sm:$0xf] }
 0x762   :  { %8011 = vrsqrt.f32 %v9387_v17  ;;  %3493 = vmatpush.bf16.msrb.mxu1 %v6771_v28  ;;  %v7814_v28 = vld [vmem:[#allocation6 + $0x6f4] sm:$0xf]  ;;  %vm2979_vm9 = vweird.f32 %v9387_v17  ;;  %v6910_v37 = vld [vmem:[#allocation6 + $0x6d0] sm:$0xf]  ;;  %v7811_v25 = vld [vmem:[#allocation6 + $0x6d4] sm:$0xf0] }
 0x763   :  { %3407 = vmatpush.bf16.msrb.mxu2 %v6695_v30  ;;  %3437 = vmatpush.bf16.msrb.mxu3 %v6751_v47  ;;  %v6867_v30 = vor.u32 %v7798_v49, %v6864_v58  ;;  %v6931_v35 = vor.u32 %v7814_v28, %v6928_v5  ;;  %v7794_v62 = vld [vmem:[#allocation6 + $0x654] sm:$0xf]  ;;  %v6912_v46 = vld [vmem:[#allocation6 + $0x6d8] sm:$0xf0]  ;;  %v6911_v49 = vor.u32 %v7811_v25, %v6910_v37  ;;  %v6902_v28 = vld [vmem:[#allocation6 + $0x6c0] sm:$0xf] }
 0x764   :  { %3466 = vmatpush.bf16.msrb.mxu0 %v6691_v33  ;;  %v7792_v38 = vld [vmem:[#allocation6 + $0x644] sm:$0xf]  ;;  %v6904_v11 = vld [vmem:[#allocation6 + $0x6c8] sm:$0xf0]  ;;  %v7790_v37 = vld [vmem:[#allocation6 + $0x634] sm:$0xf] }
 0x766   :  { %3494 = vmatpush.bf16.msrb.mxu1 %v6763_v19 }
 0x767   :  { %3408 = vmatpush.bf16.msrb.mxu2 %v6687_v14  ;;  %3438 = vmatpush.bf16.msrb.mxu3 %v6743_v18  ;;  %v6859_v14 = vor.u32 %v7796_v55, %v6856_v4  ;;  %v6838_v18 = vld [vmem:[#allocation6 + $0x640] sm:$0xf] }
 0x768   :  { %v8012_v52 = vpop.eup %8011  ;;  %3467 = vmatpush.bf16.msrb.mxu0 %v6683_v40  ;;  %v7793_v40 = vld [vmem:[#allocation6 + $0x644] sm:$0xf0] }
 0x769   :  { %v2974_v42 = vmul.f32 %v8012_v52, %v9387_v17  ;;  %vm2980_vm7 = vweird.f32 %v8012_v52 }
 0x76a   :  { %3495 = vmatpush.bf16.msrb.mxu1 %v6755_v21  ;;  %vm2981_vm15 = vmor %vm2979_vm9, %vm2980_vm7  ;;  %v7795_v21 = vld [vmem:[#allocation6 + $0x654] sm:$0xf0] }
 0x76b   :  { %v2975_v31 = vmul.f32 %v8012_v52, %v2974_v42  ;;  %3409 = vmatpush.bf16.msrb.mxu2 %v6679_v1  ;;  %3707 = vmatpush.bf16.msra.mxu3 %v6927_v43  ;;  %v6923_v42 = vor.u32 %v7812_v60, %v6920_v24  ;;  %v6847_v34 = vor.u32 %v7795_v21, %v6846_v51  ;;  %v7810_v1 = vld [vmem:[#allocation6 + $0x6d4] sm:$0xf]  ;;  %v7807_v21 = vld [vmem:[#allocation6 + $0x6b4] sm:$0xf0] }
 0x76c   :  { %3736 = vmatpush.bf16.msra.mxu0 %v6867_v30  ;;  %v7808_v30 = vld [vmem:[#allocation6 + $0x6c4] sm:$0xf] }
 0x76d   :  { %v2976_v54 = vmul.f32 0.5, %v2975_v31  ;;  %v6848_v31 = vld [vmem:[#allocation6 + $0x658] sm:$0xf0]  ;;  %v6907_v24 = vor.u32 %v7808_v30, %v6904_v11 }
 0x76e   :  { %3496 = vmatpush.bf16.msrb.mxu1 %v6747_v44  ;;  %v6851_v58 = vor.u32 %v7794_v62, %v6848_v31  ;;  %v6839_v44 = vor.u32 %v7793_v40, %v6838_v18  ;;  %v7805_v40 = vld [vmem:[#allocation6 + $0x6a4] sm:$0xf0] }
 0x76f   :  { %v2977_v27 = vsub.f32 1.5, %v2976_v54  ;;  %3678 = vmatpush.bf16.msra.mxu2 %v6863_v8  ;;  %3708 = vmatpush.bf16.msra.mxu3 %v6919_v36  ;;  %v6915_v54 = vor.u32 %v7810_v1, %v6912_v46  ;;  %v7809_v8 = vld [vmem:[#allocation6 + $0x6c4] sm:$0xf0]  ;;  %v6896_v46 = vld [vmem:[#allocation6 + $0x6b8] sm:$0xf0] }
 0x770   :  { %3737 = vmatpush.bf16.msra.mxu0 %v6859_v14 }
 0x771   :  { %v2978_v19 = vmul.f32 %v8012_v52, %v2977_v27  ;;  %v6840_v27 = vld [vmem:[#allocation6 + $0x648] sm:$0xf0] }
 0x772   :  { %3765 = vmatpush.bf16.msra.mxu1 %v6931_v35  ;;  %v6843_v55 = vor.u32 %v7792_v38, %v6840_v27  ;;  %v7804_v38 = vld [vmem:[#allocation6 + $0x6a4] sm:$0xf]  ;;  %v6888_v27 = vld [vmem:[#allocation6 + $0x6a8] sm:$0xf0] }
 0x773   :  { %v2982_v15 = vsel %vm2981_vm15, %v8012_v52, %v2978_v19  ;;  %3679 = vmatpush.bf16.msra.mxu2 %v6855_v0  ;;  %v2989_v52 = vld [vmem:[#allocation10 + $0x2] sm:$0x3]  ;;  %3709 = vmatpush.bf16.msra.mxu3 %v6911_v49  ;;  %v7789_v49 = vld [vmem:[#allocation6 + $0x624] sm:$0xf0]  ;;  %v6891_v11 = vor.u32 %v7804_v38, %v6888_v27  ;;  %v7784_v27 = vld [vmem:[#allocation6 + $0x604] sm:$0xf] }
 0x774   :  { %v2984_v39 = vrot.slane %v2982_v15, 7  ;;  %3738 = vmatpush.bf16.msra.mxu0 %v6851_v58 }
 0x776   :  { %v2985_v17 = vsel %vm1675_vm5, %v2982_v15, %v2984_v39  ;;  %3766 = vmatpush.bf16.msra.mxu1 %v6923_v42  ;;  %v6830_v42 = vld [vmem:[#allocation6 + $0x630] sm:$0xf] }
 0x777   :  { %v2987_v47 = vmul.f32 %v2985_v17, %v2971_v48  ;;  %3680 = vmatpush.bf16.msra.mxu2 %v6847_v34  ;;  %v7791_v17 = vld [vmem:[#allocation6 + $0x634] sm:$0xf0] }
 0x778   :  { %3739 = vmatpush.bf16.msra.mxu0 %v6843_v55  ;;  %v6831_v51 = vor.u32 %v7791_v17, %v6830_v42 }
 0x779   :  { %v9394_v33 = vperm.slane %v2987_v47, 0  ;;  %v9396_v20 = vperm.slane %v2987_v47, 1  ;;  %v6894_v47 = vld [vmem:[#allocation6 + $0x6b0] sm:$0xf] }
 0x77a   :  { %3767 = vmatpush.bf16.msra.mxu1 %v6915_v54  ;;  %v6895_v31 = vor.u32 %v7807_v21, %v6894_v47 }
 0x77b   :  { %v2996_v7 = vmul.f32 %v9396_v20, %v9383_v63  ;;  %v2995_v56 = vmul.f32 %v9394_v33, %v9383_v63  ;;  %v6903_v63 = vor.u32 %v7809_v8, %v6902_v28  ;;  %v3003_v10 = vmul.f32 %v9394_v33, %v9243_v53  ;;  %3681 = vmatpush.bf16.msra.mxu2 %v6839_v44  ;;  %v7788_v28 = vld [vmem:[#allocation6 + $0x624] sm:$0xf]  ;;  %v6824_v8 = vld [vmem:[#allocation6 + $0x628] sm:$0xf0] }
 0x77c   :  { %v3005_v35 = vmul.f32 %v9394_v33, %v9254_v57  ;;  %v3004_v23 = vmul.f32 %v9396_v20, %v9233_v12  ;;  %v3006_v19 = vmul.f32 %v9396_v20, %v9229_v16  ;;  %v3008_v25 = vmul.f32 %v9396_v20, %v9238_v61 }
 0x77d   :  { %v2999_v45 = vrot.slane %v2996_v7, 7  ;;  %3710 = vmatpush.bf16.msra.mxu3 %v6903_v63  ;;  %v3009_v7 = vmul.f32 %v9394_v33, %v9280_v41  ;;  %v3010_v62 = vmul.f32 %v9396_v20, %v9249_v29  ;;  %v6822_v41 = vld [vmem:[#allocation6 + $0x620] sm:$0xf]  ;;  %v3012_v63 = vmul.f32 %v9396_v20, %v9261_v50 }
 0x77e   :  { %3768 = vmatpush.bf16.msra.mxu1 %v6907_v24  ;;  %v6823_v18 = vor.u32 %v7789_v49, %v6822_v41  ;;  %v6886_v29 = vld [vmem:[#allocation6 + $0x6a0] sm:$0xf]  ;;  %v6827_v30 = vor.u32 %v7788_v28, %v6824_v8 }
 0x77f   :  { %v3000_v5 = vsel %vm1675_vm5, %v2995_v56, %v2999_v45  ;;  %v6832_v56 = vld [vmem:[#allocation6 + $0x638] sm:$0xf0]  ;;  %v7806_v45 = vld [vmem:[#allocation6 + $0x6b4] sm:$0xf]  ;;  %3682 = vmatpush.bf16.msra.mxu2 %v6831_v51  ;;  %v6887_v44 = vor.u32 %v7805_v40, %v6886_v29  ;;  %v7785_v40 = vld [vmem:[#allocation6 + $0x604] sm:$0xf0] }
 0x780   :  { %v3002_v43 = vsub.f32 %v2989_v52, %v3000_v5  ;;  %v3007_v52 = vmul.f32 %v9394_v33, %v9268_v2  ;;  %v6835_v2 = vor.u32 %v7790_v37, %v6832_v56  ;;  %v6899_v61 = vor.u32 %v7806_v45, %v6896_v46  ;;  %v7803_v45 = vld [vmem:[#allocation6 + $0x694] sm:$0xf0]  ;;  %v6870_v28 = vld [vmem:[#allocation6 + $0x680] sm:$0xf] }
 0x781   :  { %3711 = vmatpush.bf16.msra.mxu3 %v6895_v31  ;;  %v3011_v5 = vmul.f32 %v9394_v33, %v9293_v3  ;;  %v3015_v3 = vmul.f32 %v9394_v33, %v9312_v6  ;;  %v6878_v31 = vld [vmem:[#allocation6 + $0x690] sm:$0xf] }
 0x782   :  { %v9409_v4 = vperm.slane %v3002_v43, 0  ;;  %v9413_v60 = vperm.slane %v3002_v43, 1  ;;  %3740 = vmatpush.bf16.msra.mxu0 %v6835_v2  ;;  %v3013_v43 = vmul.f32 %v9394_v33, %v9303_v26  ;;  %3769 = vmatpush.bf16.msra.mxu1 %v6899_v61  ;;  %v6879_v41 = vor.u32 %v7803_v45, %v6878_v31  ;;  %v6806_v61 = vld [vmem:[#allocation6 + $0x600] sm:$0xf] }
 0x783   :  { %3683 = vmatpush.bf16.msra.mxu2 %v6823_v18  ;;  %v6807_v8 = vor.u32 %v7785_v40, %v6806_v61 }
 0x784   :  { %v3024_v0 = vadd.f32 %v9409_v4, %v3003_v10  ;;  %v3026_v53 = vadd.f32 %v9409_v4, %v3005_v35  ;;  %v3025_v57 = vadd.f32 %v9413_v60, %v3004_v23  ;;  %v3027_v15 = vadd.f32 %v9413_v60, %v3006_v19 }
 0x785   :  { %v3028_v34 = vadd.f32 %v9409_v4, %v3007_v52  ;;  %v3030_v1 = vadd.f32 %v9409_v4, %v3009_v7  ;;  %v3029_v58 = vadd.f32 %v9413_v60, %v3008_v25  ;;  %v3031_v54 = vadd.f32 %v9413_v60, %v3010_v62  ;;  %3712 = vmatpush.bf16.msra.mxu3 %v6887_v44  ;;  %v6814_v25 = vld [vmem:[#allocation6 + $0x610] sm:$0xf]  ;;  %v7787_v62 = vld [vmem:[#allocation6 + $0x614] sm:$0xf0] }
 0x786   :  { %v9419_v12 = vmax.f32 %v3024_v0, 0.0  ;;  %v9421_v36 = vmax.f32 %v3026_v53, 0.0  ;;  %v9423_v14 = vmax.f32 %v3025_v57, 0.0  ;;  %v9425_v16 = vmax.f32 %v3027_v15, 0.0  ;;  %3741 = vmatpush.bf16.msra.mxu0 %v6827_v30  ;;  %3770 = vmatpush.bf16.msra.mxu1 %v6891_v11  ;;  %v6872_v11 = vld [vmem:[#allocation6 + $0x688] sm:$0xf0] }
 0x787   :  { %v3014_v10 = vmul.f32 %v9396_v20, %v9275_v32  ;;  %v3017_v35 = vmul.f32 %v9394_v33, %v9330_v9  ;;  %v3016_v23 = vmul.f32 %v9396_v20, %v9286_v13  ;;  %v9457_v26 = vmax.f32 %v3028_v34, 0.0  ;;  %v7786_v34 = vld [vmem:[#allocation6 + $0x614] sm:$0xf] }
 0x788   :  { %v3056_v48 = vpack.c.bf16 %v9421_v36, %v9419_v12  ;;  %v3057_v39 = vpack.c.bf16 %v9425_v16, %v9423_v14  ;;  %v9459_v55 = vmax.f32 %v3030_v1, 0.0  ;;  %v9461_v50 = vmax.f32 %v3029_v58, 0.0  ;;  %v6816_v1 = vld [vmem:[#allocation6 + $0x618] sm:$0xf0]  ;;  %v7802_v58 = vld [vmem:[#allocation6 + $0x694] sm:$0xf] }
 0x789   :  { %v9463_v19 = vmax.f32 %v3031_v54, 0.0  ;;  %v3032_v32 = vadd.f32 %v9409_v4, %v3011_v5  ;;  %v3034_v24 = vadd.f32 %v9409_v4, %v3013_v43  ;;  %v3033_v6 = vadd.f32 %v9413_v60, %v3012_v63  ;;  %v6880_v54 = vld [vmem:[#allocation6 + $0x698] sm:$0xf0]  ;;  %v7801_v5 = vld [vmem:[#allocation6 + $0x684] sm:$0xf0]  ;;  %3713 = vmatpush.bf16.msra.mxu3 %v6879_v41 }
 0x78a   :  { %3410 = vmatmul.bf16.vlgmr.msrb.gmra.mxu2 %v3056_v48  ;;  %3439 = vmatmul.bf16.vlgmr.msrb.gmra.mxu3 %v3057_v39  ;;  %v3018_v9 = vmul.f32 %v9396_v20, %v9317_v59  ;;  %v3035_v13 = vadd.f32 %v9413_v60, %v3014_v10  ;;  %v3036_v33 = vadd.f32 %v9409_v4, %v3015_v3  ;;  %v3125_v59 = vrot.slane %v9461_v50, 1  ;;  %v6808_v43 = vld [vmem:[#allocation6 + $0x608] sm:$0xf0]  ;;  %v7800_v63 = vld [vmem:[#allocation6 + $0x684] sm:$0xf] }
 0x78b   :  { %3468 = vmatmul.bf16.vlgmr.msrb.gmra.mxu0 %v3056_v48  ;;  %3497 = vmatmul.bf16.vlgmr.msrb.gmra.mxu1 %v3057_v39  ;;  %v3038_v0 = vadd.f32 %v9409_v4, %v3017_v35  ;;  %v3037_v53 = vadd.f32 %v9413_v60, %v3016_v23  ;;  %v3058_v15 = vpack.c.bf16 %v9459_v55, %v9457_v26  ;;  %v3124_v48 = vrot.slane %v9457_v26, 1 }
 0x78c   :  { %v3039_v57 = vadd.f32 %v9413_v60, %v3018_v9  ;;  %v3059_v39 = vpack.c.bf16 %v9463_v19, %v9461_v50  ;;  %v9481_v20 = vmax.f32 %v3032_v32, 0.0  ;;  %v9483_v42 = vmax.f32 %v3034_v24, 0.0 }
 0x78d   :  { %v9485_v17 = vmax.f32 %v3033_v6, 0.0  ;;  %v9487_v4 = vmax.f32 %v3035_v13, 0.0  ;;  %v9489_v47 = vmax.f32 %v3036_v33, 0.0  ;;  %v3120_v60 = vrot.slane %v9419_v12, 1 }
 0x78e   :  { %v3122_v52 = vrot.slane %v9421_v36, 1  ;;  %v9493_v7 = vmax.f32 %v3038_v0, 0.0  ;;  %v9495_v51 = vmax.f32 %v3037_v53, 0.0  ;;  %v9497_v21 = vmax.f32 %v3039_v57, 0.0 }
 0x78f   :  { %v3121_v37 = vrot.slane %v9423_v14, 1  ;;  %v6815_v56 = vor.u32 %v7787_v62, %v6814_v25  ;;  %v6819_v49 = vor.u32 %v7786_v34, %v6816_v1  ;;  %v6883_v29 = vor.u32 %v7802_v58, %v6880_v54 }
 0x790   :  { %v3146_v46 = vsel %vm512_vm0, %v3122_v52, %v3124_v48  ;;  %v3148_v18 = vsel %vm512_vm0, %v3120_v60, %v3122_v52  ;;  %v6871_v38 = vor.u32 %v7801_v5, %v6870_v28  ;;  %v6811_v30 = vor.u32 %v7784_v27, %v6808_v43  ;;  %v7863_v5 = vld [vmem:[#allocation6 + $0x874] sm:$0xf0]  ;;  %v7862_v43 = vld [vmem:[#allocation6 + $0x874] sm:$0xf] }
 0x791   :  { %3684 = vmatpush.bf16.msra.mxu2 %v6815_v56  ;;  %v9506_v44 = vpack.c.bf16 %v3146_v46, %v3148_v18  ;;  %3742 = vmatpush.bf16.msra.mxu0 %v6819_v49  ;;  %v3123_v10 = vrot.slane %v9425_v16, 1  ;;  %v3126_v3 = vrot.slane %v9459_v55, 1  ;;  %v3128_v35 = vrot.slane %v9481_v20, 1  ;;  %v7879_v27 = vld [vmem:[#allocation6 + $0x8f4] sm:$0xf0] }
 0x792   :  { %3771 = vmatpush.bf16.msra.mxu1 %v6883_v29  ;;  %v6875_v23 = vor.u32 %v7800_v63, %v6872_v11  ;;  %v3127_v32 = vrot.slane %v9463_v19, 1  ;;  %v3129_v24 = vrot.slane %v9485_v17, 1  ;;  %v3130_v6 = vrot.slane %v9483_v42, 1  ;;  %3714 = vmatpush.bf16.msra.mxu3 %v6871_v38  ;;  %v7024_v63 = vld [vmem:[#allocation6 + $0x878] sm:$0xf0] }
 0x793   :  { %v3147_v9 = vsel %vm512_vm0, %v3123_v10, %v3125_v59  ;;  %v3149_v13 = vsel %vm512_vm0, %v3121_v37, %v3123_v10  ;;  %v3142_v33 = vsel %vm512_vm0, %v3126_v3, %v3128_v35  ;;  %v3144_v0 = vsel %vm512_vm0, %v3124_v48, %v3126_v3  ;;  %v7878_v10 = vld [vmem:[#allocation6 + $0x8f4] sm:$0xf]  ;;  %v7088_v3 = vld [vmem:[#allocation6 + $0x8f8] sm:$0xf0] }
 0x794   :  { %v9526_v53 = vpack.c.bf16 %v3147_v9, %v3149_v13  ;;  %v9528_v57 = vpack.c.bf16 %v3142_v33, %v3144_v0  ;;  %v3145_v52 = vsel %vm512_vm0, %v3125_v59, %v3127_v32  ;;  %v3140_v48 = vsel %vm512_vm0, %v3128_v35, %v3130_v6  ;;  %v7014_v35 = vld [vmem:[#allocation6 + $0x860] sm:$0xf]  ;;  %v7860_v13 = vld [vmem:[#allocation6 + $0x864] sm:$0xf]  ;;  %v7016_v33 = vld [vmem:[#allocation6 + $0x868] sm:$0xf0] }
 0x795   :  { %3685 = vmatpush.bf16.msra.mxu2 %v6807_v8  ;;  %3743 = vmatpush.bf16.msra.mxu0 %v6811_v30  ;;  %v3131_v25 = vrot.slane %v9487_v4, 1  ;;  %v3133_v62 = vrot.slane %v9495_v51, 1  ;;  %v3134_v45 = vrot.slane %v9493_v7, 1  ;;  %v3135_v34 = vrot.slane %v9497_v21, 1  ;;  %v7086_v8 = vld [vmem:[#allocation6 + $0x8f0] sm:$0xf] }
 0x796   :  { %3772 = vmatpush.bf16.msra.mxu1 %v6875_v23  ;;  %v3060_v61 = vpack.c.bf16 %v9483_v42, %v9481_v20  ;;  %v3061_v18 = vpack.c.bf16 %v9487_v4, %v9485_v17  ;;  %v7087_v30 = vor.u32 %v7879_v27, %v7086_v8  ;;  %v7027_v11 = vor.u32 %v7862_v43, %v7024_v63  ;;  %v7861_v23 = vld [vmem:[#allocation6 + $0x864] sm:$0xf0]  ;;  %v7876_v0 = vld [vmem:[#allocation6 + $0x8e4] sm:$0xf]  ;;  %v7062_v8 = vld [vmem:[#allocation6 + $0x8c0] sm:$0xf] }
 0x797   :  { %v3139_v59 = vsel %vm512_vm0, %v3131_v25, %v3133_v62  ;;  %v3141_v46 = vsel %vm512_vm0, %v3129_v24, %v3131_v25  ;;  %v3150_v58 = vsel %vm512_vm0, %v3134_v45, %v3120_v60  ;;  %v3137_v54 = vsel %vm512_vm0, %v3133_v62, %v3135_v34  ;;  %v7022_v60 = vld [vmem:[#allocation6 + $0x870] sm:$0xf]  ;;  %v7856_v63 = vld [vmem:[#allocation6 + $0x844] sm:$0xf] }
 0x798   :  { %v9553_v41 = vpack.c.bf16 %v3139_v59, %v3141_v46  ;;  %v3151_v40 = vsel %vm512_vm0, %v3135_v34, %v3121_v37  ;;  %v7023_v38 = vor.u32 %v7863_v5, %v7022_v60  ;;  %v7091_v37 = vor.u32 %v7878_v10, %v7088_v3  ;;  %4016 = vmatpush.bf16.msrb.mxu3 %v7087_v30  ;;  %v7006_v62 = vld [vmem:[#allocation6 + $0x850] sm:$0xf]  ;;  %v7875_v59 = vld [vmem:[#allocation6 + $0x8d4] sm:$0xf0]  ;;  %v7858_v46 = vld [vmem:[#allocation6 + $0x854] sm:$0xf] }
 0x799   :  { %v9573_v28 = vpack.c.bf16 %v3151_v40, %v3137_v54  ;;  %4045 = vmatpush.bf16.msrb.mxu0 %v7027_v11  ;;  %v3063_v25 = vpack.c.bf16 %v9497_v21, %v9495_v51  ;;  %v6998_v40 = vld [vmem:[#allocation6 + $0x840] sm:$0xf]  ;;  %v7857_v5 = vld [vmem:[#allocation6 + $0x844] sm:$0xf0]  ;;  %v7000_v30 = vld [vmem:[#allocation6 + $0x848] sm:$0xf0] }
 0x79a   :  { %3415 = vmatmul.bf16.gmra.mxu2 %v3058_v15  ;;  %3444 = vmatmul.bf16.gmra.mxu3 %v3059_v39  ;;  %v6999_v27 = vor.u32 %v7857_v5, %v6998_v40  ;;  %v7872_v11 = vld [vmem:[#allocation6 + $0x8c4] sm:$0xf]  ;;  %v3064_v10 = vrot.slane %v9419_v12, 7  ;;  %v3066_v3 = vrot.slane %v9421_v36, 7 }
 0x79b   :  { %3473 = vmatmul.bf16.gmra.mxu0 %v3058_v15  ;;  %3502 = vmatmul.bf16.gmra.mxu1 %v3059_v39  ;;  %v3143_v15 = vsel %vm512_vm0, %v3127_v32, %v3129_v24  ;;  %v3132_v39 = vrot.slane %v9489_v47, 1  ;;  %v7078_v32 = vld [vmem:[#allocation6 + $0x8e0] sm:$0xf]  ;;  %v7877_v24 = vld [vmem:[#allocation6 + $0x8e4] sm:$0xf0] }
 0x79c   :  { %v9541_v31 = vpack.c.bf16 %v3143_v15, %v3145_v52  ;;  %3987 = vmatpush.bf16.msrb.mxu2 %v7023_v38  ;;  %v7079_v9 = vor.u32 %v7877_v24, %v7078_v32  ;;  %4074 = vmatpush.bf16.msrb.mxu1 %v7091_v37  ;;  %v7019_v15 = vor.u32 %v7860_v13, %v7016_v33  ;;  %v7873_v38 = vld [vmem:[#allocation6 + $0x8c4] sm:$0xf0]  ;;  %v3067_v32 = vrot.slane %v9425_v16, 7  ;;  %v7852_v5 = vld [vmem:[#allocation6 + $0x824] sm:$0xf] }
 0x79d   :  { %v3138_v56 = vsel %vm512_vm0, %v3130_v6, %v3132_v39  ;;  %v3136_v49 = vsel %vm512_vm0, %v3132_v39, %v3134_v45  ;;  %v7015_v6 = vor.u32 %v7861_v23, %v7014_v35  ;;  %v7080_v39 = vld [vmem:[#allocation6 + $0x8e8] sm:$0xf0]  ;;  %v7070_v45 = vld [vmem:[#allocation6 + $0x8d0] sm:$0xf]  ;;  %v7063_v43 = vor.u32 %v7873_v38, %v7062_v8  ;;  %v7868_v38 = vld [vmem:[#allocation6 + $0x8a4] sm:$0xf] }
 0x79e   :  { %v9547_v1 = vpack.c.bf16 %v3138_v56, %v3140_v48  ;;  %v9567_v29 = vpack.c.bf16 %v3150_v58, %v3136_v49  ;;  %v7083_v52 = vor.u32 %v7876_v0, %v7080_v39  ;;  %4017 = vmatpush.bf16.msrb.mxu3 %v7079_v9  ;;  %4046 = vmatpush.bf16.msrb.mxu0 %v7019_v15  ;;  %v7859_v56 = vld [vmem:[#allocation6 + $0x854] sm:$0xf0]  ;;  %v7008_v49 = vld [vmem:[#allocation6 + $0x858] sm:$0xf0]  ;;  %v3065_v35 = vrot.slane %v9423_v14, 7 }
 0x79f   :  { %v3062_v48 = vpack.c.bf16 %v9493_v7, %v9489_v47  ;;  %v7007_v34 = vor.u32 %v7859_v56, %v7006_v62  ;;  %v7071_v58 = vor.u32 %v7875_v59, %v7070_v45  ;;  %v7011_v54 = vor.u32 %v7858_v46, %v7008_v49  ;;  %v7064_v23 = vld [vmem:[#allocation6 + $0x8c8] sm:$0xf0]  ;;  %v6990_v15 = vld [vmem:[#allocation6 + $0x830] sm:$0xf]  ;;  %v7855_v39 = vld [vmem:[#allocation6 + $0x834] sm:$0xf0] }
 0x7a0   :  { %3988 = vmatpush.bf16.msrb.mxu2 %v7015_v6  ;;  %4075 = vmatpush.bf16.msrb.mxu1 %v7083_v52  ;;  %v7003_v37 = vor.u32 %v7856_v63, %v7000_v30  ;;  %v3078_v24 = vrot.slane %v9493_v7, 7  ;;  %v3079_v6 = vrot.slane %v9497_v21, 7  ;;  %v7067_v9 = vor.u32 %v7872_v11, %v7064_v23  ;;  %v7054_v52 = vld [vmem:[#allocation6 + $0x8b0] sm:$0xf]  ;;  %v7854_v62 = vld [vmem:[#allocation6 + $0x834] sm:$0xf] }
 0x7a1   :  { %v3092_v14 = vsel %vm455_vm1, %v3064_v10, %v3066_v3  ;;  %v3093_v16 = vsel %vm455_vm1, %v3065_v35, %v3067_v32  ;;  %v6992_v56 = vld [vmem:[#allocation6 + $0x838] sm:$0xf0]  ;;  %v7870_v59 = vld [vmem:[#allocation6 + $0x8b4] sm:$0xf]  ;;  %v6982_v49 = vld [vmem:[#allocation6 + $0x820] sm:$0xf] }
 0x7a2   :  { %4018 = vmatpush.bf16.msrb.mxu3 %v7071_v58  ;;  %4047 = vmatpush.bf16.msrb.mxu0 %v7011_v54  ;;  %v3094_v12 = vsel %vm455_vm1, %v3078_v24, %v3064_v10  ;;  %v3095_v36 = vsel %vm455_vm1, %v3079_v6, %v3065_v35  ;;  %v7056_v46 = vld [vmem:[#allocation6 + $0x8b8] sm:$0xf0]  ;;  %v7853_v54 = vld [vmem:[#allocation6 + $0x824] sm:$0xf0]  ;;  %v6984_v8 = vld [vmem:[#allocation6 + $0x828] sm:$0xf0] }
 0x7a3   :  { %v6934_v13 = vpack.c.bf16 %v3092_v14, %v3094_v12  ;;  %v6942_v33 = vpack.c.bf16 %v3093_v16, %v3095_v36  ;;  %v7059_v58 = vor.u32 %v7870_v59, %v7056_v46  ;;  %v6983_v40 = vor.u32 %v7853_v54, %v6982_v49  ;;  %v7048_v63 = vld [vmem:[#allocation6 + $0x8a8] sm:$0xf0]  ;;  %v7851_v12 = vld [vmem:[#allocation6 + $0x814] sm:$0xf0]  ;;  %v7038_v36 = vld [vmem:[#allocation6 + $0x890] sm:$0xf] }
 0x7a4   :  { %3989 = vmatpush.bf16.msrb.mxu2 %v7007_v34  ;;  %v6995_v34 = vor.u32 %v7854_v62, %v6992_v56  ;;  %v3070_v30 = vrot.slane %v9459_v55, 7  ;;  %v3069_v11 = vrot.slane %v9461_v50, 7  ;;  %v3071_v10 = vrot.slane %v9463_v19, 7  ;;  %v6974_v19 = vld [vmem:[#allocation6 + $0x810] sm:$0xf] }
 0x7a5   :  { %v7051_v35 = vor.u32 %v7868_v38, %v7048_v63  ;;  %v6975_v14 = vor.u32 %v7851_v12, %v6974_v19  ;;  %v7867_v16 = vld [vmem:[#allocation6 + $0x894] sm:$0xf0]  ;;  %v7030_v62 = vld [vmem:[#allocation6 + $0x880] sm:$0xf]  ;;  %v7865_v56 = vld [vmem:[#allocation6 + $0x884] sm:$0xf0] }
 0x7a6   :  { %4019 = vmatpush.bf16.msrb.mxu3 %v7063_v43  ;;  %4048 = vmatpush.bf16.msrb.mxu0 %v7003_v37  ;;  %v6987_v43 = vor.u32 %v7852_v5, %v6984_v8  ;;  %v3089_v23 = vsel %vm455_vm1, %v3069_v11, %v3071_v10  ;;  %v3091_v55 = vsel %vm455_vm1, %v3067_v32, %v3069_v11  ;;  %v7848_v59 = vld [vmem:[#allocation6 + $0x804] sm:$0xf]  ;;  %v6968_v46 = vld [vmem:[#allocation6 + $0x808] sm:$0xf0]  ;;  %v3077_v63 = vrot.slane %v9495_v51, 7 }
 0x7a7   :  { %v7864_v49 = vld [vmem:[#allocation6 + $0x884] sm:$0xf]  ;;  %v6971_v54 = vor.u32 %v7848_v59, %v6968_v46 }
 0x7a8   :  { %3990 = vmatpush.bf16.msrb.mxu2 %v6999_v27  ;;  %v3068_v27 = vrot.slane %v9457_v26, 7 }
 0x7aa   :  { %3420 = vmatmul.bf16.gmra.mxu2 %v3060_v61  ;;  %3449 = vmatmul.bf16.gmra.mxu3 %v3061_v18  ;;  %v3088_v37 = vsel %vm455_vm1, %v3068_v27, %v3070_v30  ;;  %v3090_v26 = vsel %vm455_vm1, %v3066_v3, %v3068_v27  ;;  %v7039_v3 = vor.u32 %v7867_v16, %v7038_v36 }
 0x7ab   :  { %3478 = vmatmul.bf16.gmra.mxu0 %v3060_v61  ;;  %3507 = vmatmul.bf16.gmra.mxu1 %v3061_v18  ;;  %v7874_v61 = vld [vmem:[#allocation6 + $0x8d4] sm:$0xf]  ;;  %v7072_v18 = vld [vmem:[#allocation6 + $0x8d8] sm:$0xf0]  ;;  %v3114_v50 = vpack.c.bf16 %v3088_v37, %v3090_v26 }
 0x7ac   :  { %v7075_v60 = vor.u32 %v7874_v61, %v7072_v18  ;;  %v7046_v61 = vld [vmem:[#allocation6 + $0x8a0] sm:$0xf]  ;;  %v7869_v18 = vld [vmem:[#allocation6 + $0x8a4] sm:$0xf0]  ;;  %4049 = vmatpush.bf16.msrb.mxu0 %v6995_v34  ;;  %v7031_v34 = vor.u32 %v7865_v56, %v7030_v62 }
 0x7ae   :  { %4076 = vmatpush.bf16.msrb.mxu1 %v7075_v60  ;;  %v7047_v60 = vor.u32 %v7869_v18, %v7046_v61  ;;  %v7032_v61 = vld [vmem:[#allocation6 + $0x888] sm:$0xf0]  ;;  %v3074_v18 = vrot.slane %v9483_v42, 7 }
 0x7af   :  { %v7035_v5 = vor.u32 %v7864_v49, %v7032_v61 }
 0x7b0   :  { %4050 = vmatpush.bf16.msrb.mxu0 %v6987_v43  ;;  %v3076_v43 = vrot.slane %v9489_v47, 7 }
 0x7b2   :  { %4077 = vmatpush.bf16.msrb.mxu1 %v7067_v9  ;;  %v3115_v9 = vpack.c.bf16 %v3089_v23, %v3091_v55  ;;  %v3082_v11 = vsel %vm455_vm1, %v3074_v18, %v3076_v43 }
 0x7b6   :  { %4078 = vmatpush.bf16.msrb.mxu1 %v7059_v58  ;;  %v3072_v58 = vrot.slane %v9481_v20, 7 }
 0x7b8   :  { %v3084_v8 = vsel %vm455_vm1, %v3072_v58, %v3074_v18  ;;  %v3086_v20 = vsel %vm455_vm1, %v3070_v30, %v3072_v58  ;;  %v3080_v30 = vsel %vm455_vm1, %v3076_v43, %v3078_v24 }
 0x7b9   :  { %v3118_v37 = vpack.c.bf16 %v3080_v30, %v3082_v11 }
 0x7ba   :  { %3425 = vmatmul.bf16.gmra.mxu2 %v3062_v48  ;;  %3454 = vmatmul.bf16.gmra.mxu3 %v3063_v25 }
 0x7bb   :  { %3483 = vmatmul.bf16.gmra.mxu0 %v3062_v48  ;;  %3512 = vmatmul.bf16.gmra.mxu1 %v3063_v25  ;;  %v6991_v48 = vor.u32 %v7855_v39, %v6990_v15  ;;  %v7871_v25 = vld [vmem:[#allocation6 + $0x8b4] sm:$0xf0]  ;;  %v7866_v39 = vld [vmem:[#allocation6 + $0x894] sm:$0xf] }
 0x7bc   :  { %v7055_v45 = vor.u32 %v7871_v25, %v7054_v52  ;;  %4079 = vmatpush.bf16.msrb.mxu1 %v7051_v35  ;;  %v7040_v52 = vld [vmem:[#allocation6 + $0x898] sm:$0xf0]  ;;  %v7849_v25 = vld [vmem:[#allocation6 + $0x804] sm:$0xf0] }
 0x7bd   :  { %3991 = vmatpush.bf16.msrb.mxu2 %v6991_v48  ;;  %v6966_v48 = vld [vmem:[#allocation6 + $0x800] sm:$0xf]  ;;  %v7043_v32 = vor.u32 %v7866_v39, %v7040_v52 }
 0x7be   :  { %4020 = vmatpush.bf16.msrb.mxu3 %v7055_v45  ;;  %v6967_v45 = vor.u32 %v7849_v25, %v6966_v48 }
 0x7c0   :  { %4080 = vmatpush.bf16.msrb.mxu1 %v7043_v32 }
 0x7c1   :  { %3992 = vmatpush.bf16.msrb.mxu2 %v6983_v40  ;;  %v3073_v40 = vrot.slane %v9485_v17, 7  ;;  %v6938_v17 = vpack.c.bf16 %v3084_v8, %v3086_v20 }
 0x7c2   :  { %4021 = vmatpush.bf16.msrb.mxu3 %v7047_v60  ;;  %v3075_v60 = vrot.slane %v9487_v4, 7 }
 0x7c3   :  { %v3087_v42 = vsel %vm455_vm1, %v3071_v10, %v3073_v40  ;;  %v3081_v10 = vsel %vm455_vm1, %v3077_v63, %v3079_v6 }
 0x7c4   :  { %4081 = vmatpush.bf16.msrb.mxu1 %v7035_v5  ;;  %v3085_v38 = vsel %vm455_vm1, %v3073_v40, %v3075_v60  ;;  %v3083_v35 = vsel %vm455_vm1, %v3075_v60, %v3077_v63 }
 0x7c5   :  { %3993 = vmatpush.bf16.msrb.mxu2 %v6975_v14  ;;  %v6946_v27 = vpack.c.bf16 %v3085_v38, %v3087_v42  ;;  %v3119_v47 = vpack.c.bf16 %v3081_v10, %v3083_v35 }
 0x7c6   :  { %4022 = vmatpush.bf16.msrb.mxu3 %v7039_v3 }
 0x7c9   :  { %3994 = vmatpush.bf16.msrb.mxu2 %v6967_v45 }
 0x7ca   :  { %6935 = vmatmul.msk.bf16.vlgmr.msra.gmra.mxu2 %vm8456_vm4, %v6934_v13  ;;  %6943 = vmatmul.msk.bf16.vlgmr.msra.gmra.mxu3 %vm8456_vm4, %v6942_v33 }
 0x7cb   :  { %6951 = vmatmul.msk.bf16.vlgmr.msra.gmra.mxu0 %vm8456_vm4, %v6934_v13  ;;  %6959 = vmatmul.msk.bf16.vlgmr.msra.gmra.mxu1 %vm8456_vm4, %v6942_v33  ;;  %v7850_v13 = vld [vmem:[#allocation6 + $0x814] sm:$0xf]  ;;  %v6976_v33 = vld [vmem:[#allocation6 + $0x818] sm:$0xf0] }
 0x7cc   :  { %v6979_v15 = vor.u32 %v7850_v13, %v6976_v33  ;;  %4023 = vmatpush.bf16.msrb.mxu3 %v7031_v34 }
 0x7ce   :  { %4051 = vmatpush.bf16.msrb.mxu0 %v6979_v15 }
 0x7d2   :  { %4052 = vmatpush.bf16.msrb.mxu0 %v6971_v54 }
 0x7da   :  { %3691 = vmatmul.bf16.gmra.mxu2 %v3114_v50  ;;  %3720 = vmatmul.bf16.gmra.mxu3 %v3115_v9 }
 0x7db   :  { %3749 = vmatmul.bf16.gmra.mxu0 %v3114_v50  ;;  %3778 = vmatmul.bf16.gmra.mxu1 %v3115_v9 }
 0x7ea   :  { %6939 = vmatmul.msk.bf16.gmra.mxu2 %vm8496_vm6, %v6938_v17  ;;  %6947 = vmatmul.msk.bf16.gmra.mxu3 %vm8496_vm6, %v6946_v27 }
 0x7eb   :  { %6955 = vmatmul.msk.bf16.gmra.mxu0 %vm8496_vm6, %v6938_v17  ;;  %6963 = vmatmul.msk.bf16.gmra.mxu1 %vm8496_vm6, %v6946_v27 }
 0x7fa   :  { %3701 = vmatmul.bf16.gmra.mxu2 %v3118_v37  ;;  %3730 = vmatmul.bf16.gmra.mxu3 %v3119_v47 }
 0x7fb   :  { %3759 = vmatmul.bf16.gmra.mxu0 %v3118_v37  ;;  %3788 = vmatmul.bf16.gmra.mxu1 %v3119_v47 }
 0x808   :  { %v3469_v7 = vpop.f32.mrf.mxu0  ;;  %v3498_v51 = vpop.f32.mrf.mxu1 }
 0x809   :  { %v3499_v24 = vadd.f32 %v3498_v51, %v3469_v7 }
 0x80a   :  { %3995 = vmatmul.bf16.vlgmr.msrb.gmra.mxu2 %v9506_v44  ;;  %4024 = vmatmul.bf16.vlgmr.msrb.gmra.mxu3 %v9526_v53 }
 0x80b   :  { %4053 = vmatmul.bf16.vlgmr.msrb.gmra.mxu0 %v9506_v44  ;;  %4082 = vmatmul.bf16.vlgmr.msrb.gmra.mxu1 %v9526_v53 }
 0x80d   :  { %v3411_v21 = vpop.f32.mrf.mxu2  ;;  %v3440_v6 = vpop.f32.mrf.mxu3 }
 0x80e   :  { %v3441_v26 = vadd.f32 %v3440_v6, %v3411_v21 }
 0x810   :  { %v9655_v23 = vpop.f32.mrf.mxu0  ;;  %v9657_v55 = vpop.f32.mrf.mxu1 }
 0x811   :  { %v3501_v49 = vadd.f32 %v9657_v55, %v9655_v23 }
 0x815   :  { %v9659_v50 = vpop.f32.mrf.mxu2  ;;  %v9661_v9 = vpop.f32.mrf.mxu3 }
 0x816   :  { %v3443_v14 = vadd.f32 %v9661_v9, %v9659_v50 }
 0x818   :  { %v3474_v19 = vpop.f32.mrf.mxu0  ;;  %v3503_v12 = vpop.f32.mrf.mxu1 }
 0x819   :  { %v3504_v36 = vadd.f32 %v3503_v12, %v3474_v19 }
 0x81a   :  { %7095 = vmatmul.msk.bf16.gmra.mxu2 %vm8538_vm8, %v9528_v57  ;;  %7103 = vmatmul.msk.bf16.gmra.mxu3 %vm8538_vm8, %v9541_v31 }
 0x81b   :  { %7111 = vmatmul.msk.bf16.gmra.mxu0 %vm8538_vm8, %v9528_v57  ;;  %7119 = vmatmul.msk.bf16.gmra.mxu1 %vm8538_vm8, %v9541_v31 }
 0x81d   :  { %v3416_v44 = vpop.f32.mrf.mxu2  ;;  %v3445_v53 = vpop.f32.mrf.mxu3 }
 0x81e   :  { %v3446_v16 = vadd.f32 %v3445_v53, %v3416_v44 }
 0x820   :  { %v9675_v13 = vpop.f32.mrf.mxu0  ;;  %v9677_v33 = vpop.f32.mrf.mxu1 }
 0x821   :  { %v3506_v4 = vadd.f32 %v9677_v33, %v9675_v13 }
 0x825   :  { %v9679_v3 = vpop.f32.mrf.mxu2  ;;  %v9681_v15 = vpop.f32.mrf.mxu3 }
 0x828   :  { %v3479_v39 = vpop.f32.mrf.mxu0  ;;  %v3508_v52 = vpop.f32.mrf.mxu1 }
 0x829   :  { %v3509_v48 = vadd.f32 %v3508_v52, %v3479_v39 }
 0x82a   :  { %4005 = vmatmul.bf16.gmra.mxu2 %v9547_v1  ;;  %4034 = vmatmul.bf16.gmra.mxu3 %v9553_v41 }
 0x82b   :  { %4063 = vmatmul.bf16.gmra.mxu0 %v9547_v1  ;;  %4092 = vmatmul.bf16.gmra.mxu1 %v9553_v41 }
 0x82d   :  { %v3421_v57 = vpop.f32.mrf.mxu2  ;;  %v3450_v31 = vpop.f32.mrf.mxu3 }
 0x82e   :  { %v3451_v32 = vadd.f32 %v3450_v31, %v3421_v57 }
 0x830   :  { %v9687_v25 = vpop.f32.mrf.mxu0  ;;  %v9689_v62 = vpop.f32.mrf.mxu1 }
 0x831   :  { %v3511_v55 = vadd.f32 %v9689_v62, %v9687_v25 }
 0x835   :  { %v9691_v56 = vpop.f32.mrf.mxu2  ;;  %v9693_v45 = vpop.f32.mrf.mxu3 }
 0x836   :  { %v3453_v50 = vadd.f32 %v9693_v45, %v9691_v56 }
 0x838   :  { %v3484_v34 = vpop.f32.mrf.mxu0  ;;  %v3513_v59 = vpop.f32.mrf.mxu1 }
 0x839   :  { %v3514_v46 = vadd.f32 %v3513_v59, %v3484_v34 }
 0x83a   :  { %7099 = vmatmul.msk.bf16.gmra.mxu2 %vm8576_vm10, %v9567_v29  ;;  %7107 = vmatmul.msk.bf16.gmra.mxu3 %vm8576_vm10, %v9573_v28 }
 0x83b   :  { %7115 = vmatmul.msk.bf16.gmra.mxu0 %vm8576_vm10, %v9567_v29  ;;  %7123 = vmatmul.msk.bf16.gmra.mxu1 %vm8576_vm10, %v9573_v28 }
 0x83d   :  { %v3426_v1 = vpop.f32.mrf.mxu2  ;;  %v3455_v41 = vpop.f32.mrf.mxu3 }
 0x83e   :  { %v3456_v58 = vadd.f32 %v3455_v41, %v3426_v1 }
 0x840   :  { %v9707_v54 = vpop.f32.mrf.mxu0  ;;  %v9709_v61 = vpop.f32.mrf.mxu1 }
 0x845   :  { %v9711_v18 = vpop.f32.mrf.mxu2  ;;  %v9713_v40 = vpop.f32.mrf.mxu3 }
 0x848   :  { %v3745_v60 = vpop.f32.mrf.mxu0  ;;  %v3774_v5 = vpop.f32.mrf.mxu1 }
 0x849   :  { %v3746_v8 = vadd.f32 %v3745_v60, %v3499_v24 }
 0x84b   :  { %v9715_v20 = vadd.f32 %v3774_v5, %v3746_v8 }
 0x84d   :  { %v3687_v29 = vpop.f32.mrf.mxu2  ;;  %v3716_v38 = vpop.f32.mrf.mxu3 }
 0x84e   :  { %v3688_v42 = vadd.f32 %v3687_v29, %v3441_v26 }
 0x850   :  { %v9717_v28 = vadd.f32 %v3716_v38, %v3688_v42  ;;  %v3747_v17 = vpop.f32.mrf.mxu0  ;;  %v9719_v27 = vpop.f32.mrf.mxu1 }
 0x851   :  { %v3748_v0 = vadd.f32 %v3747_v17, %v3501_v49 }
 0x855   :  { %v3689_v43 = vpop.f32.mrf.mxu2  ;;  %v9721_v63 = vpop.f32.mrf.mxu3 }
 0x856   :  { %v3690_v2 = vadd.f32 %v3689_v43, %v3443_v14 }
 0x858   :  { %v3750_v30 = vpop.f32.mrf.mxu0  ;;  %v3779_v11 = vpop.f32.mrf.mxu1  ;;  %v3719_v33 = vadd.f32 %v9721_v63, %v3690_v2  ;;  %v3458_v63 = vadd.f32 %v9713_v40, %v9711_v18 }
 0x859   :  { %v3751_v10 = vadd.f32 %v3750_v30, %v3504_v36 }
 0x85b   :  { %v9723_v35 = vadd.f32 %v3779_v11, %v3751_v10 }
 0x85d   :  { %v3692_v37 = vpop.f32.mrf.mxu2  ;;  %v3721_v47 = vpop.f32.mrf.mxu3 }
 0x85e   :  { %v3693_v7 = vadd.f32 %v3692_v37, %v3446_v16 }
 0x860   :  { %v9725_v51 = vadd.f32 %v3721_v47, %v3693_v7  ;;  %v3752_v24 = vpop.f32.mrf.mxu0  ;;  %v9727_v21 = vpop.f32.mrf.mxu1 }
 0x861   :  { %v3753_v22 = vadd.f32 %v3752_v24, %v3506_v4  ;;  %v3516_v4 = vadd.f32 %v9709_v61, %v9707_v54 }
 0x862   :  { %10611 = vst [vmem:[#allocation24_spill] sm:$0xff] %v9725_v51  ;;  %v3777_v51 = vadd.f32 %v9719_v27, %v3748_v0 }
 0x865   :  { %v9729_v6 = vpop.f32.mrf.mxu2  ;;  %v9731_v26 = vpop.f32.mrf.mxu3 }
 0x868   :  { %v3755_v19 = vpop.f32.mrf.mxu0  ;;  %v3784_v12 = vpop.f32.mrf.mxu1 }
 0x869   :  { %v3756_v44 = vadd.f32 %v3755_v19, %v3509_v48 }
 0x86b   :  { %v9733_v53 = vadd.f32 %v3784_v12, %v3756_v44 }
 0x86d   :  { %v3697_v36 = vpop.f32.mrf.mxu2  ;;  %v3726_v39 = vpop.f32.mrf.mxu3 }
 0x86e   :  { %v3698_v52 = vadd.f32 %v3697_v36, %v3451_v32 }
 0x870   :  { %v9735_v57 = vadd.f32 %v3726_v39, %v3698_v52  ;;  %v3757_v16 = vpop.f32.mrf.mxu0  ;;  %v9737_v31 = vpop.f32.mrf.mxu1 }
 0x871   :  { %v3758_v56 = vadd.f32 %v3757_v16, %v3511_v55 }
 0x872   :  { %10612 = vst [vmem:[#allocation25_spill] sm:$0xff] %v9735_v57 }
 0x875   :  { %v3699_v34 = vpop.f32.mrf.mxu2  ;;  %v9739_v59 = vpop.f32.mrf.mxu3 }
 0x876   :  { %v3700_v45 = vadd.f32 %v3699_v34, %v3453_v50 }
 0x878   :  { %v3760_v1 = vpop.f32.mrf.mxu0  ;;  %v3789_v41 = vpop.f32.mrf.mxu1 }
 0x879   :  { %v3761_v60 = vadd.f32 %v3760_v1, %v3514_v46 }
 0x87b   :  { %v9741_v5 = vadd.f32 %v3789_v41, %v3761_v60 }
 0x87d   :  { %10613 = vst [vmem:[#allocation21_spill] sm:$0xff] %v9741_v5  ;;  %v3702_v8 = vpop.f32.mrf.mxu2  ;;  %v3731_v48 = vpop.f32.mrf.mxu3  ;;  %v3448_v5 = vadd.f32 %v9681_v15, %v9679_v3  ;;  %v3782_v3 = vadd.f32 %v9727_v21, %v3753_v22 }
 0x87e   :  { %v3703_v29 = vadd.f32 %v3702_v8, %v3456_v58 }
 0x87f   :  { %v3695_v49 = vadd.f32 %v9729_v6, %v3448_v5  ;;  %v3787_v5 = vadd.f32 %v9737_v31, %v3758_v56 }
 0x880   :  { %v9743_v38 = vadd.f32 %v3731_v48, %v3703_v29  ;;  %v3762_v42 = vpop.f32.mrf.mxu0  ;;  %v9745_v32 = vpop.f32.mrf.mxu1 }
 0x881   :  { %10615 = vst [vmem:[#allocation26_spill] sm:$0xff] %v9745_v32  ;;  %v4120_v32 = vld [vmem:[#allocation7 + $0x4] sm:$0x3]  ;;  %v3763_v27 = vadd.f32 %v3762_v42, %v3516_v4  ;;  %v3724_v16 = vadd.f32 %v9731_v26, %v3695_v49  ;;  %v3729_v42 = vadd.f32 %v9739_v59, %v3700_v45  ;;  %v10619_v26 = vld [vmem:[#allocation24_spill] sm:$0xff] }
 0x882   :  { %10614 = vst [vmem:[#allocation27_spill] sm:$0xff] %v9743_v38  ;;  %v9770_v25 = vperm.slane %v4120_v32, 1  ;;  %v9774_v2 = vperm.slane %v4120_v32, 0 }
 0x885   :  { %v9747_v30 = vpop.f32.mrf.mxu2  ;;  %v9749_v11 = vpop.f32.mrf.mxu3 }
 0x886   :  { %10616 = vst [vmem:[#allocation23_spill] sm:$0xff] %v9747_v30 }
 0x887   :  { %10617 = vst [vmem:[#allocation28_spill] sm:$0xff] %v9749_v11 }
 0x888   :  { %v4054_v10 = vpop.f32.mrf.mxu0  ;;  %v4083_v37 = vpop.f32.mrf.mxu1  ;;  %v10618_v32 = vld [vmem:[#allocation26_spill] sm:$0xff] }
 0x889   :  { %v4084_v30 = vadd.f32 %v4083_v37, %v4054_v10 }
 0x88b   :  { %v4104_v17 = vadd.f32 %v4084_v30, %v9715_v20  ;;  %v3792_v30 = vadd.f32 %v10618_v32, %v3763_v27 }
 0x88d   :  { %v3996_v47 = vpop.f32.mrf.mxu2  ;;  %v4025_v7 = vpop.f32.mrf.mxu3 }
 0x88e   :  { %v4026_v9 = vadd.f32 %v4025_v7, %v3996_v47 }
 0x890   :  { %v4056_v19 = vpop.f32.mrf.mxu0  ;;  %v4085_v46 = vpop.f32.mrf.mxu1  ;;  %v4103_v43 = vadd.f32 %v4026_v9, %v9717_v28 }
 0x891   :  { %v4086_v11 = vadd.f32 %v4085_v46, %v4056_v19 }
 0x893   :  { %v4106_v15 = vadd.f32 %v4086_v11, %v3777_v51  ;;  %v9793_v11 = vadd.f32 %v9774_v2, %v4103_v43 }
 0x895   :  { %v3998_v12 = vpop.f32.mrf.mxu2  ;;  %v4027_v44 = vpop.f32.mrf.mxu3  ;;  %v9779_v51 = vadd.f32 %v9770_v25, %v4106_v15 }
 0x896   :  { %v4028_v62 = vadd.f32 %v4027_v44, %v3998_v12 }
 0x897   :  { %v4205_v31 = vmul.f32 %v9779_v51, %v9779_v51 }
 0x898   :  { %v4059_v36 = vpop.f32.mrf.mxu0  ;;  %v4088_v39 = vpop.f32.mrf.mxu1  ;;  %v4105_v34 = vadd.f32 %v4028_v62, %v3719_v33 }
 0x899   :  { %v4089_v23 = vadd.f32 %v4088_v39, %v4059_v36 }
 0x89a   :  { %v9804_v12 = vadd.f32 %v9774_v2, %v4105_v34 }
 0x89b   :  { %v4108_v54 = vadd.f32 %v4089_v23, %v9723_v35  ;;  %v9783_v35 = vadd.f32 %v9770_v25, %v4104_v17 }
 0x89c   :  { %v4142_v56 = vadd.f32 %v9804_v12, %v9793_v11 }
 0x89d   :  { %v4001_v58 = vpop.f32.mrf.mxu2  ;;  %v4030_v52 = vpop.f32.mrf.mxu3  ;;  %v9788_v18 = vadd.f32 %v9770_v25, %v4108_v54 }
 0x89e   :  { %v4031_v22 = vadd.f32 %v4030_v52, %v4001_v58  ;;  %v10620_v58 = vld [vmem:[#allocation21_spill] sm:$0xff] }
 0x8a0   :  { %v4061_v1 = vpop.f32.mrf.mxu0  ;;  %v4090_v41 = vpop.f32.mrf.mxu1  ;;  %v4107_v10 = vadd.f32 %v4031_v22, %v10619_v26 }
 0x8a1   :  { %v4091_v0 = vadd.f32 %v4090_v41, %v4061_v1  ;;  %v10621_v1 = vld [vmem:[#allocation23_spill] sm:$0xff] }
 0x8a2   :  { %v3705_v41 = vadd.f32 %v10621_v1, %v3458_v63 }
 0x8a3   :  { %v4110_v20 = vadd.f32 %v4091_v0, %v3782_v3 }
 0x8a5   :  { %v4003_v60 = vpop.f32.mrf.mxu2  ;;  %v4032_v8 = vpop.f32.mrf.mxu3  ;;  %v9799_v59 = vadd.f32 %v9770_v25, %v4110_v20 }
 0x8a6   :  { %v4033_v28 = vadd.f32 %v4032_v8, %v4003_v60  ;;  %v4202_v60 = vmul.f32 %v9793_v11, %v9793_v11  ;;  %v9818_v8 = vadd.f32 %v9774_v2, %v4107_v10 }
 0x8a7   :  { %v4209_v50 = vmul.f32 %v9799_v59, %v9799_v59 }
 0x8a8   :  { %v4064_v48 = vpop.f32.mrf.mxu0  ;;  %v4093_v29 = vpop.f32.mrf.mxu1  ;;  %v4109_v44 = vadd.f32 %v4033_v28, %v3724_v16  ;;  %v4206_v45 = vmul.f32 %v9818_v8, %v9818_v8  ;;  %v4143_v16 = vadd.f32 %v4142_v56, %v9818_v8 }
 0x8a9   :  { %v4094_v61 = vadd.f32 %v4093_v29, %v4064_v48  ;;  %v10622_v48 = vld [vmem:[#allocation25_spill] sm:$0xff] }
 0x8aa   :  { %v9830_v33 = vadd.f32 %v9774_v2, %v4109_v44 }
 0x8ab   :  { %v4112_v40 = vadd.f32 %v4094_v61, %v9733_v53  ;;  %v4203_v53 = vmul.f32 %v9783_v35, %v9783_v35  ;;  %v10623_v61 = vld [vmem:[#allocation27_spill] sm:$0xff] }
 0x8ac   :  { %v4208_v34 = vmul.f32 %v9830_v33, %v9830_v33  ;;  %v4144_v10 = vadd.f32 %v4143_v16, %v9830_v33 }
 0x8ad   :  { %v4006_v38 = vpop.f32.mrf.mxu2  ;;  %v4035_v57 = vpop.f32.mrf.mxu3  ;;  %v9811_v39 = vadd.f32 %v9770_v25, %v4112_v40  ;;  %v4231_v23 = vadd.f32 %v4205_v31, %v4203_v53 }
 0x8ae   :  { %v4036_v37 = vadd.f32 %v4035_v57, %v4006_v38  ;;  %v4155_v57 = vadd.f32 %v9779_v51, %v9783_v35  ;;  %v4207_v38 = vmul.f32 %v9788_v18, %v9788_v18 }
 0x8af   :  { %v4211_v17 = vmul.f32 %v9811_v39, %v9811_v39 }
 0x8b0   :  { %v4066_v14 = vpop.f32.mrf.mxu0  ;;  %v4095_v13 = vpop.f32.mrf.mxu1  ;;  %v4111_v29 = vadd.f32 %v4036_v37, %v10622_v48  ;;  %v4156_v55 = vadd.f32 %v4155_v57, %v9788_v18  ;;  %v4232_v0 = vadd.f32 %v4231_v23, %v4207_v38 }
 0x8b1   :  { %v4096_v24 = vadd.f32 %v4095_v13, %v4066_v14  ;;  %v4204_v13 = vmul.f32 %v9804_v12, %v9804_v12 }
 0x8b2   :  { %v4157_v49 = vadd.f32 %v4156_v55, %v9799_v59  ;;  %v9843_v54 = vadd.f32 %v9774_v2, %v4111_v29  ;;  %v4233_v63 = vadd.f32 %v4232_v0, %v4209_v50 }
 0x8b3   :  { %v4114_v19 = vadd.f32 %v4096_v24, %v3787_v5 }
 0x8b4   :  { %v4158_v20 = vadd.f32 %v4157_v49, %v9811_v39  ;;  %v4234_v5 = vadd.f32 %v4233_v63, %v4211_v17  ;;  %v4210_v37 = vmul.f32 %v9843_v54, %v9843_v54  ;;  %v4145_v57 = vadd.f32 %v4144_v10, %v9843_v54 }
 0x8b5   :  { %v4008_v21 = vpop.f32.mrf.mxu2  ;;  %v4037_v6 = vpop.f32.mrf.mxu3  ;;  %v9825_v4 = vadd.f32 %v9770_v25, %v4114_v19 }
 0x8b6   :  { %v4038_v36 = vadd.f32 %v4037_v6, %v4008_v21  ;;  %v4218_v6 = vadd.f32 %v4204_v13, %v4202_v60 }
 0x8b7   :  { %v4213_v24 = vmul.f32 %v9825_v4, %v9825_v4 }
 0x8b8   :  { %v4069_v47 = vpop.f32.mrf.mxu0  ;;  %v4098_v7 = vpop.f32.mrf.mxu1  ;;  %v4113_v3 = vadd.f32 %v4038_v36, %v3729_v42  ;;  %v4159_v42 = vadd.f32 %v4158_v20, %v9825_v4  ;;  %v4219_v26 = vadd.f32 %v4218_v6, %v4206_v45 }
 0x8b9   :  { %v4099_v46 = vadd.f32 %v4098_v7, %v4069_v47  ;;  %v10624_v7 = vld [vmem:[#allocation28_spill] sm:$0xff]  ;;  %v4235_v36 = vadd.f32 %v4234_v5, %v4213_v24 }
 0x8ba   :  { %v9853_v28 = vadd.f32 %v9774_v2, %v4113_v3  ;;  %v3734_v31 = vadd.f32 %v10624_v7, %v3705_v41 }
 0x8bb   :  { %v4116_v52 = vadd.f32 %v4099_v46, %v10620_v58 }
 0x8bc   :  { %v4212_v38 = vmul.f32 %v9853_v28, %v9853_v28 }
 0x8bd   :  { %v4011_v9 = vpop.f32.mrf.mxu2  ;;  %v4040_v14 = vpop.f32.mrf.mxu3  ;;  %v9836_v62 = vadd.f32 %v9770_v25, %v4116_v52 }
 0x8be   :  { %v4041_v15 = vadd.f32 %v4040_v14, %v4011_v9 }
 0x8bf   :  { %v4215_v40 = vmul.f32 %v9836_v62, %v9836_v62  ;;  %v4160_v19 = vadd.f32 %v4159_v42, %v9836_v62 }
 0x8c0   :  { %v4115_v27 = vadd.f32 %v4041_v15, %v10623_v61  ;;  %v4071_v43 = vpop.f32.mrf.mxu0  ;;  %v4100_v22 = vpop.f32.mrf.mxu1 }
 0x8c1   :  { %v4101_v21 = vadd.f32 %v4100_v22, %v4071_v43  ;;  %v4236_v41 = vadd.f32 %v4235_v36, %v4215_v40 }
 0x8c2   :  { %v9862_v47 = vadd.f32 %v9774_v2, %v4115_v27 }
 0x8c3   :  { %v4118_v32 = vadd.f32 %v4101_v21, %v3792_v30  ;;  %v4220_v30 = vadd.f32 %v4219_v26, %v4208_v34 }
 0x8c4   :  { %v4214_v48 = vmul.f32 %v9862_v47, %v9862_v47 }
 0x8c5   :  { %v9867_v46 = vadd.f32 %v9770_v25, %v4118_v32  ;;  %v4013_v53 = vpop.f32.mrf.mxu2  ;;  %v4042_v44 = vpop.f32.mrf.mxu3  ;;  %v4221_v60 = vadd.f32 %v4220_v30, %v4210_v37  ;;  %v4146_v25 = vadd.f32 %v4145_v57, %v9853_v28 }
 0x8c6   :  { %v4043_v58 = vadd.f32 %v4042_v44, %v4013_v53 }
 0x8c7   :  { %v4161_v52 = vadd.f32 %v4160_v19, %v9867_v46  ;;  %v4217_v1 = vmul.f32 %v9867_v46, %v9867_v46  ;;  %v4147_v50 = vadd.f32 %v4146_v25, %v9862_v47  ;;  %v4222_v14 = vadd.f32 %v4221_v60, %v4212_v38 }
 0x8c8   :  { %v4117_v29 = vadd.f32 %v4043_v58, %v3734_v31 }
 0x8c9   :  { %v4162_v23 = vrot.slane %v4161_v52, 4  ;;  %v4237_v55 = vadd.f32 %v4236_v41, %v4217_v1  ;;  %v4223_v0 = vadd.f32 %v4222_v14, %v4214_v48 }
 0x8ca   :  { %v9880_v9 = vadd.f32 %v9774_v2, %v4117_v29 }
 0x8cb   :  { %v4163_v13 = vadd.f32 %v4162_v23, %v4161_v52  ;;  %v4238_v49 = vrot.slane %v4237_v55, 4 }
 0x8cc   :  { %v4148_v3 = vadd.f32 %v4147_v50, %v9880_v9  ;;  %v4216_v15 = vmul.f32 %v9880_v9, %v9880_v9 }
 0x8cd   :  { %v4164_v17 = vrot.slane %v4163_v13, 2  ;;  %v4239_v22 = vadd.f32 %v4238_v49, %v4237_v55 }
 0x8ce   :  { %v4149_v56 = vrot.slane %v4148_v3, 4  ;;  %v4224_v45 = vadd.f32 %v4223_v0, %v4216_v15 }
 0x8cf   :  { %v4165_v61 = vadd.f32 %v4164_v17, %v4163_v13  ;;  %v4240_v16 = vrot.slane %v4239_v22, 2 }
 0x8d0   :  { %v4150_v27 = vadd.f32 %v4149_v56, %v4148_v3  ;;  %v4225_v43 = vrot.slane %v4224_v45, 4 }
 0x8d1   :  { %v4166_v63 = vrot.slane %v4165_v61, 1  ;;  %v4241_v32 = vadd.f32 %v4240_v16, %v4239_v22  ;;  %v7246_v16 = vld [vmem:[#allocation6 + $0xaf0] sm:$0xf] }
 0x8d2   :  { %v4151_v20 = vrot.slane %v4150_v27, 2  ;;  %v4226_v2 = vadd.f32 %v4225_v43, %v4224_v45 }
 0x8d3   :  { %v4167_v24 = vadd.f32 %v4166_v63, %v4165_v61  ;;  %v4242_v10 = vrot.slane %v4241_v32, 1 }
 0x8d4   :  { %v4152_v21 = vadd.f32 %v4151_v20, %v4150_v27  ;;  %v4227_v6 = vrot.slane %v4226_v2, 2 }
 0x8d5   :  { %4170 = vrot.lane.b32.xlu0 %v4167_v24, %s8175_s20  ;;  %v4243_v37 = vadd.f32 %v4242_v10, %v4241_v32  ;;  %v7184_v32 = vld [vmem:[#allocation6 + $0xa78] sm:$0xf0] }
 0x8d6   :  { %v4153_v34 = vrot.slane %v4152_v21, 1  ;;  %v4228_v5 = vadd.f32 %v4227_v6, %v4226_v2  ;;  %v7927_v6 = vld [vmem:[#allocation6 + $0xa74] sm:$0xf0] }
 0x8d8   :  { %v4154_v42 = vadd.f32 %v4153_v34, %v4152_v21  ;;  %v4229_v40 = vrot.slane %v4228_v5, 1  ;;  %v7182_v21 = vld [vmem:[#allocation6 + $0xa70] sm:$0xf] }
 0x8d9   :  { %v7183_v34 = vor.u32 %v7927_v6, %v7182_v21 }
 0x8da   :  { %4168 = vrot.lane.b32.xlu2 %v4154_v42, %s8175_s20  ;;  %v4230_v26 = vadd.f32 %v4229_v40, %v4228_v5  ;;  %v7943_v5 = vld [vmem:[#allocation6 + $0xaf4] sm:$0xf0]  ;;  %v7926_v40 = vld [vmem:[#allocation6 + $0xa74] sm:$0xf] }
 0x8db   :  { %4712 = vmatpush.bf16.msra.mxu2 %v7183_v34  ;;  %v7187_v10 = vor.u32 %v7926_v40, %v7184_v32  ;;  %v7921_v40 = vld [vmem:[#allocation6 + $0xa44] sm:$0xf0] }
 0x8dc   :  { %4244 = vrot.lane.b32.xlu1 %v4230_v26, %s8175_s20 }
 0x8dd   :  { %4770 = vmatpush.bf16.msra.mxu0 %v7187_v10 }
 0x8e2   :  { %4246 = vrot.lane.b32.xlu2 %v4243_v37, %s8175_s20 }
 0x934   :  { %v4169_v7 = vpop.permute.xlu2 %4168 }
 0x93c   :  { %v4247_v57 = vpop.permute.xlu2 %4246 }
 0x947   :  { %v4171_v31 = vpop.permute.xlu0 %4170 }
 0x948   :  { %v4172_v53 = vsel %vm1549_vm11, %v4169_v7, %v4171_v31  ;;  %v4173_v44 = vsel %vm1549_vm11, %v4171_v31, %v4169_v7  ;;  %v7174_v7 = vld [vmem:[#allocation6 + $0xa60] sm:$0xf]  ;;  %v7925_v31 = vld [vmem:[#allocation6 + $0xa64] sm:$0xf0] }
 0x949   :  { %v4174_v36 = vadd.f32 %v4173_v44, %v4154_v42  ;;  %v4175_v30 = vadd.f32 %v4172_v53, %v4167_v24  ;;  %v7247_v42 = vor.u32 %v7943_v5, %v7246_v16  ;;  %v7175_v44 = vor.u32 %v7925_v31, %v7174_v7  ;;  %v7938_v16 = vld [vmem:[#allocation6 + $0xad4] sm:$0xf]  ;;  %v7232_v5 = vld [vmem:[#allocation6 + $0xad8] sm:$0xf0]  ;;  %v7937_v7 = vld [vmem:[#allocation6 + $0xac4] sm:$0xf0] }
 0x94a   :  { %v7920_v31 = vld [vmem:[#allocation6 + $0xa44] sm:$0xf] }
 0x94b   :  { %4176 = vrot.lane.b32.xlu0 %v4174_v36, %s8180_s0  ;;  %4178 = vrot.lane.b32.xlu1 %v4175_v30, %s8180_s0 }
 0x94c   :  { %4741 = vmatpush.bf16.msra.mxu3 %v7247_v42  ;;  %4713 = vmatpush.bf16.msra.mxu2 %v7175_v44  ;;  %v7158_v42 = vld [vmem:[#allocation6 + $0xa40] sm:$0xf]  ;;  %v7160_v44 = vld [vmem:[#allocation6 + $0xa48] sm:$0xf0] }
 0x94d   :  { %v7159_v10 = vor.u32 %v7921_v40, %v7158_v42 }
 0x94e   :  { %v4245_v38 = vpop.permute.xlu1 %4244 }
 0x94f   :  { %v4248_v58 = vsel %vm1549_vm11, %v4245_v38, %v4247_v57  ;;  %v4249_v52 = vsel %vm1549_vm11, %v4247_v57, %v4245_v38 }
 0x950   :  { %v4250_v1 = vadd.f32 %v4249_v52, %v4230_v26  ;;  %v4251_v41 = vadd.f32 %v4248_v58, %v4243_v37  ;;  %v7942_v26 = vld [vmem:[#allocation6 + $0xaf4] sm:$0xf]  ;;  %v7248_v37 = vld [vmem:[#allocation6 + $0xaf8] sm:$0xf0] }
 0x951   :  { %v7251_v53 = vor.u32 %v7942_v26, %v7248_v37  ;;  %v7235_v26 = vor.u32 %v7938_v16, %v7232_v5  ;;  %v7222_v37 = vld [vmem:[#allocation6 + $0xac0] sm:$0xf]  ;;  %v7914_v16 = vld [vmem:[#allocation6 + $0xa14] sm:$0xf] }
 0x952   :  { %4252 = vrot.lane.b32.xlu2 %v4250_v1, %s8180_s0 }
 0x953   :  { %4254 = vrot.lane.b32.xlu0 %v4251_v41, %s8180_s0  ;;  %4799 = vmatpush.bf16.msra.mxu1 %v7251_v53  ;;  %v7223_v53 = vor.u32 %v7937_v7, %v7222_v37  ;;  %v7913_v7 = vld [vmem:[#allocation6 + $0xa04] sm:$0xf0] }
 0x9ac   :  { %v4253_v50 = vpop.permute.xlu2 %4252 }
 0x9bd   :  { %v4177_v60 = vpop.permute.xlu0 %4176  ;;  %v4179_v25 = vpop.permute.xlu1 %4178 }
 0x9be   :  { %v4180_v48 = vsel %vm1558_vm12, %v4177_v60, %v4179_v25  ;;  %v4181_v29 = vsel %vm1558_vm12, %v4179_v25, %v4177_v60 }
 0x9bf   :  { %v4182_v23 = vadd.f32 %v4181_v29, %v4174_v36  ;;  %v4183_v55 = vadd.f32 %v4180_v48, %v4175_v30  ;;  %v7238_v36 = vld [vmem:[#allocation6 + $0xae0] sm:$0xf]  ;;  %v7941_v30 = vld [vmem:[#allocation6 + $0xae4] sm:$0xf0] }
 0x9c0   :  { %v7239_v57 = vor.u32 %v7941_v30, %v7238_v36  ;;  %v7936_v36 = vld [vmem:[#allocation6 + $0xac4] sm:$0xf]  ;;  %v7224_v30 = vld [vmem:[#allocation6 + $0xac8] sm:$0xf0] }
 0x9c1   :  { %4184 = vrot.lane.b32.xlu1 %v4182_v23, %s8171_s11  ;;  %4186 = vrot.lane.b32.xlu2 %v4183_v55, %s8171_s11 }
 0x9c2   :  { %4742 = vmatpush.bf16.msra.mxu3 %v7239_v57 }
 0x9c5   :  { %v4255_v14 = vpop.permute.xlu0 %4254 }
 0x9c6   :  { %v4256_v13 = vsel %vm1558_vm12, %v4253_v50, %v4255_v14  ;;  %v4257_v3 = vsel %vm1558_vm12, %v4255_v14, %v4253_v50 }
 0x9c7   :  { %v4258_v15 = vadd.f32 %v4257_v3, %v4250_v1  ;;  %v4259_v0 = vadd.f32 %v4256_v13, %v4251_v41  ;;  %v7924_v3 = vld [vmem:[#allocation6 + $0xa64] sm:$0xf] }
 0x9c9   :  { %4260 = vrot.lane.b32.xlu0 %v4258_v15, %s8171_s11  ;;  %4262 = vrot.lane.b32.xlu1 %v4259_v0, %s8171_s11 }
 0xa1b   :  { %v4187_v49 = vpop.permute.xlu2 %4186 }
 0xa33   :  { %v4185_v17 = vpop.permute.xlu1 %4184 }
 0xa34   :  { %v4188_v56 = vsel %vm1567_vm13, %v4185_v17, %v4187_v49  ;;  %v4189_v45 = vsel %vm1567_vm13, %v4187_v49, %v4185_v17 }
 0xa35   :  { %v4190_v61 = vadd.f32 %v4189_v45, %v4182_v23  ;;  %v4191_v27 = vadd.f32 %v4188_v56, %v4183_v55  ;;  %v7240_v56 = vld [vmem:[#allocation6 + $0xae8] sm:$0xf0]  ;;  %v7166_v45 = vld [vmem:[#allocation6 + $0xa50] sm:$0xf] }
 0xa37   :  { %4192 = vrot.lane.b32.xlu2 %v4190_v61, %s8181_s14  ;;  %4194 = vrot.lane.b32.xlu0 %v4191_v27, %s8181_s14 }
 0xa3b   :  { %v4261_v43 = vpop.permute.xlu0 %4260  ;;  %v4263_v22 = vpop.permute.xlu1 %4262 }
 0xa3c   :  { %v4264_v63 = vsel %vm1567_vm13, %v4261_v43, %v4263_v22  ;;  %v4265_v20 = vsel %vm1567_vm13, %v4263_v22, %v4261_v43  ;;  %v7230_v22 = vld [vmem:[#allocation6 + $0xad0] sm:$0xf] }
 0xa3d   :  { %v4266_v2 = vadd.f32 %v4265_v20, %v4258_v15  ;;  %v4267_v24 = vadd.f32 %v4264_v63, %v4259_v0  ;;  %v7176_v15 = vld [vmem:[#allocation6 + $0xa68] sm:$0xf0]  ;;  %v7940_v0 = vld [vmem:[#allocation6 + $0xae4] sm:$0xf]  ;;  %v7939_v63 = vld [vmem:[#allocation6 + $0xad4] sm:$0xf0] }
 0xa3e   :  { %v7179_v17 = vor.u32 %v7924_v3, %v7176_v15  ;;  %v7922_v20 = vld [vmem:[#allocation6 + $0xa54] sm:$0xf]  ;;  %v7917_v3 = vld [vmem:[#allocation6 + $0xa24] sm:$0xf0]  ;;  %v7206_v15 = vld [vmem:[#allocation6 + $0xaa0] sm:$0xf] }
 0xa3f   :  { %4268 = vrot.lane.b32.xlu1 %v4266_v2, %s8181_s14  ;;  %4270 = vrot.lane.b32.xlu2 %v4267_v24, %s8181_s14 }
 0xa40   :  { %4771 = vmatpush.bf16.msra.mxu0 %v7179_v17 }
 0xa91   :  { %v4193_v38 = vpop.permute.xlu2 %4192 }
 0xa99   :  { %v4271_v48 = vpop.permute.xlu2 %4270 }
 0xaa9   :  { %v4195_v58 = vpop.permute.xlu0 %4194 }
 0xaaa   :  { %v4196_v52 = vsel %vm1576_vm14, %v4193_v38, %v4195_v58  ;;  %v4197_v1 = vsel %vm1576_vm14, %v4195_v58, %v4193_v38  ;;  %v7163_v38 = vor.u32 %v7920_v31, %v7160_v44  ;;  %v7150_v58 = vld [vmem:[#allocation6 + $0xa30] sm:$0xf]  ;;  %v7190_v31 = vld [vmem:[#allocation6 + $0xa80] sm:$0xf] }
 0xaab   :  { %v4198_v41 = vadd.f32 %v4197_v1, %v4190_v61  ;;  %v4199_v60 = vadd.f32 %v4196_v52, %v4191_v27  ;;  %v7923_v61 = vld [vmem:[#allocation6 + $0xa54] sm:$0xf0]  ;;  %v7243_v27 = vor.u32 %v7940_v0, %v7240_v56  ;;  %v7227_v1 = vor.u32 %v7936_v36, %v7224_v30  ;;  %v7912_v36 = vld [vmem:[#allocation6 + $0xa04] sm:$0xf]  ;;  %v7128_v30 = vld [vmem:[#allocation6 + $0xa08] sm:$0xf0] }
 0xaac   :  { %v7167_v43 = vor.u32 %v7923_v61, %v7166_v45  ;;  %v7919_v52 = vld [vmem:[#allocation6 + $0xa34] sm:$0xf0]  ;;  %v7916_v45 = vld [vmem:[#allocation6 + $0xa24] sm:$0xf]  ;;  %v7144_v61 = vld [vmem:[#allocation6 + $0xa28] sm:$0xf0] }
 0xaad   :  { %v4200_v25 = vadd.f32 %v4199_v60, %v4198_v41  ;;  %4800 = vmatpush.bf16.msra.mxu1 %v7243_v27  ;;  %v7151_v41 = vor.u32 %v7919_v52, %v7150_v58  ;;  %v7214_v60 = vld [vmem:[#allocation6 + $0xab0] sm:$0xf]  ;;  %v7932_v27 = vld [vmem:[#allocation6 + $0xaa4] sm:$0xf] }
 0xaae   :  { %4714 = vmatpush.bf16.msra.mxu2 %v7167_v43  ;;  %v7928_v52 = vld [vmem:[#allocation6 + $0xa84] sm:$0xf] }
 0xaaf   :  { %v9933_v50 = vmul.f32 0.00048828125, %v4200_v25  ;;  %v7935_v25 = vld [vmem:[#allocation6 + $0xab4] sm:$0xf0] }
 0xab1   :  { %v4269_v29 = vpop.permute.xlu1 %4268  ;;  %v4278_v21 = vmul.f32 %v9933_v50, %v9933_v50  ;;  %4801 = vmatpush.bf16.msra.mxu1 %v7235_v26  ;;  %v7200_v26 = vld [vmem:[#allocation6 + $0xa98] sm:$0xf0] }
 0xab2   :  { %v4272_v23 = vsel %vm1576_vm14, %v4269_v29, %v4271_v48  ;;  %v4273_v55 = vsel %vm1576_vm14, %v4271_v48, %v4269_v29  ;;  %4715 = vmatpush.bf16.msra.mxu2 %v7159_v10  ;;  %v7918_v48 = vld [vmem:[#allocation6 + $0xa34] sm:$0xf]  ;;  %v7215_v29 = vor.u32 %v7935_v25, %v7214_v60  ;;  %v7126_v10 = vld [vmem:[#allocation6 + $0xa00] sm:$0xf]  ;;  %v7911_v60 = vld [vmem:[#allocation6 + $0x9f4] sm:$0xf0] }
 0xab3   :  { %v4274_v14 = vadd.f32 %v4273_v55, %v4266_v2  ;;  %v4275_v13 = vadd.f32 %v4272_v23, %v4267_v24  ;;  %v7231_v2 = vor.u32 %v7939_v63, %v7230_v22  ;;  %v7168_v24 = vld [vmem:[#allocation6 + $0xa58] sm:$0xf0]  ;;  %v7934_v55 = vld [vmem:[#allocation6 + $0xab4] sm:$0xf]  ;;  %v7208_v22 = vld [vmem:[#allocation6 + $0xaa8] sm:$0xf0] }
 0xab4   :  { %v7171_v34 = vor.u32 %v7922_v20, %v7168_v24  ;;  %v7152_v23 = vld [vmem:[#allocation6 + $0xa38] sm:$0xf0]  ;;  %v7134_v63 = vld [vmem:[#allocation6 + $0xa10] sm:$0xf]  ;;  %v7915_v20 = vld [vmem:[#allocation6 + $0xa14] sm:$0xf0]  ;;  %v7147_v24 = vor.u32 %v7916_v45, %v7144_v61  ;;  %v7211_v42 = vor.u32 %v7932_v27, %v7208_v22  ;;  %v7131_v61 = vor.u32 %v7912_v36, %v7128_v30 }
 0xab5   :  { %v4276_v49 = vadd.f32 %v4275_v13, %v4274_v14  ;;  %4743 = vmatpush.bf16.msra.mxu3 %v7231_v2  ;;  %v7216_v14 = vld [vmem:[#allocation6 + $0xab8] sm:$0xf0]  ;;  %v7142_v13 = vld [vmem:[#allocation6 + $0xa20] sm:$0xf]  ;;  %v7155_v0 = vor.u32 %v7918_v48, %v7152_v23  ;;  %4802 = vmatpush.bf16.msra.mxu1 %v7227_v1  ;;  %v7135_v40 = vor.u32 %v7915_v20, %v7134_v63  ;;  %v7895_v1 = vld [vmem:[#allocation6 + $0x974] sm:$0xf0] }
 0xab6   :  { %4772 = vmatpush.bf16.msra.mxu0 %v7171_v34  ;;  %4716 = vmatpush.bf16.msra.mxu2 %v7151_v41  ;;  %v7219_v17 = vor.u32 %v7934_v55, %v7216_v14  ;;  %v7143_v56 = vor.u32 %v7917_v3, %v7142_v13  ;;  %v7136_v34 = vld [vmem:[#allocation6 + $0xa18] sm:$0xf0]  ;;  %v7374_v41 = vld [vmem:[#allocation6 + $0x9f0] sm:$0xf]  ;;  %v7192_v23 = vld [vmem:[#allocation6 + $0xa88] sm:$0xf0] }
 0xab7   :  { %v4277_v6 = vmul.f32 0.00048828125, %v4276_v49  ;;  %v7933_v49 = vld [vmem:[#allocation6 + $0xaa4] sm:$0xf0]  ;;  %v7139_v58 = vor.u32 %v7914_v16, %v7136_v34  ;;  %v7894_v55 = vld [vmem:[#allocation6 + $0x974] sm:$0xf]  ;;  %v7195_v63 = vor.u32 %v7928_v52, %v7192_v23 }
 0xab8   :  { %v7207_v43 = vor.u32 %v7933_v49, %v7206_v15  ;;  %v7312_v3 = vld [vmem:[#allocation6 + $0x978] sm:$0xf0]  ;;  %v7910_v15 = vld [vmem:[#allocation6 + $0x9f4] sm:$0xf]  ;;  %v7893_v45 = vld [vmem:[#allocation6 + $0x964] sm:$0xf0] }
 0xab9   :  { %v4279_v32 = vsub.f32 %v4277_v6, %v4278_v21  ;;  %4744 = vmatpush.bf16.msra.mxu3 %v7223_v53  ;;  %v7198_v21 = vld [vmem:[#allocation6 + $0xa90] sm:$0xf]  ;;  %v7931_v6 = vld [vmem:[#allocation6 + $0xa94] sm:$0xf0]  ;;  %4803 = vmatpush.bf16.msra.mxu1 %v7219_v17  ;;  %v7929_v53 = vld [vmem:[#allocation6 + $0xa84] sm:$0xf0]  ;;  %v7375_v17 = vor.u32 %v7911_v60, %v7374_v41  ;;  %v7315_v20 = vor.u32 %v7894_v55, %v7312_v3 }
 0xaba   :  { %4773 = vmatpush.bf16.msra.mxu0 %v7163_v38  ;;  %4717 = vmatpush.bf16.msra.mxu2 %v7143_v56  ;;  %v7199_v37 = vor.u32 %v7931_v6, %v7198_v21  ;;  %v7310_v38 = vld [vmem:[#allocation6 + $0x970] sm:$0xf]  ;;  %v7191_v14 = vor.u32 %v7929_v53, %v7190_v31  ;;  %v7302_v56 = vld [vmem:[#allocation6 + $0x960] sm:$0xf]  ;;  %v7304_v16 = vld [vmem:[#allocation6 + $0x968] sm:$0xf0] }
 0xabb   :  { %v9937_v57 = vadd.f32 1e-05, %v4279_v32  ;;  %v7930_v32 = vld [vmem:[#allocation6 + $0xa94] sm:$0xf]  ;;  %v7311_v13 = vor.u32 %v7895_v1, %v7310_v38  ;;  %v7366_v27 = vld [vmem:[#allocation6 + $0x9e0] sm:$0xf]  ;;  %v7303_v6 = vor.u32 %v7893_v45, %v7302_v56 }
 0xabc   :  { %v7203_v48 = vor.u32 %v7930_v32, %v7200_v26  ;;  %v4281_v32 = vld [vmem:[#allocation9 + $0x4] sm:$0x3]  ;;  %v4299_v53 = vld [vmem:[#allocation10 + $0x4] sm:$0x3]  ;;  %v7294_v36 = vld [vmem:[#allocation6 + $0x950] sm:$0xf] }
 0xabd   :  { %8013 = vrsqrt.f32 %v9937_v57  ;;  %4745 = vmatpush.bf16.msra.mxu3 %v7215_v29  ;;  %4804 = vmatpush.bf16.msra.mxu1 %v7211_v42  ;;  %v7127_v29 = vor.u32 %v7913_v7, %v7126_v10  ;;  %vm4289_vm3 = vweird.f32 %v9937_v57  ;;  %v7908_v42 = vld [vmem:[#allocation6 + $0x9e4] sm:$0xf]  ;;  %v7891_v30 = vld [vmem:[#allocation6 + $0x954] sm:$0xf0]  ;;  %v7358_v38 = vld [vmem:[#allocation6 + $0x9d0] sm:$0xf] }
 0xabe   :  { %4774 = vmatpush.bf16.msra.mxu0 %v7155_v0  ;;  %4718 = vmatpush.bf16.msra.mxu2 %v7135_v40  ;;  %v7376_v0 = vld [vmem:[#allocation6 + $0x9f8] sm:$0xf0]  ;;  %v7368_v40 = vld [vmem:[#allocation6 + $0x9e8] sm:$0xf0]  ;;  %v7890_v52 = vld [vmem:[#allocation6 + $0x954] sm:$0xf] }
 0xabf   :  { %v7379_v21 = vor.u32 %v7910_v15, %v7376_v0  ;;  %v7296_v1 = vld [vmem:[#allocation6 + $0x958] sm:$0xf0]  ;;  %v7889_v3 = vld [vmem:[#allocation6 + $0x944] sm:$0xf0]  ;;  %v7350_v15 = vld [vmem:[#allocation6 + $0x9c0] sm:$0xf] }
 0xac0   :  { %v7299_v55 = vor.u32 %v7890_v52, %v7296_v1  ;;  %v7888_v56 = vld [vmem:[#allocation6 + $0x944] sm:$0xf]  ;;  %v7288_v45 = vld [vmem:[#allocation6 + $0x948] sm:$0xf0] }
 0xac1   :  { %4746 = vmatpush.bf16.msra.mxu3 %v7207_v43  ;;  %v7909_v43 = vld [vmem:[#allocation6 + $0x9e4] sm:$0xf0]  ;;  %4805 = vmatpush.bf16.msra.mxu1 %v7203_v48  ;;  %v7906_v48 = vld [vmem:[#allocation6 + $0x9d4] sm:$0xf] }
 0xac2   :  { %4775 = vmatpush.bf16.msra.mxu0 %v7147_v24  ;;  %4719 = vmatpush.bf16.msra.mxu2 %v7127_v29  ;;  %v7892_v24 = vld [vmem:[#allocation6 + $0x964] sm:$0xf]  ;;  %v7360_v29 = vld [vmem:[#allocation6 + $0x9d8] sm:$0xf0] }
 0xac3   :  { %v9940_v2 = vpop.eup %8013 }
 0xac4   :  { %v4284_v5 = vmul.f32 %v9940_v2, %v9937_v57  ;;  %vm4290_vm2 = vweird.f32 %v9940_v2  ;;  %v7307_v57 = vor.u32 %v7892_v24, %v7304_v16 }
 0xac5   :  { %4747 = vmatpush.bf16.msra.mxu3 %v7199_v37  ;;  %vm4291_vm7 = vmor %vm4289_vm3, %vm4290_vm2  ;;  %4806 = vmatpush.bf16.msra.mxu1 %v7195_v63  ;;  %v7371_v37 = vor.u32 %v7908_v42, %v7368_v40 }
 0xac6   :  { %v4285_v44 = vmul.f32 %v9940_v2, %v4284_v5  ;;  %4776 = vmatpush.bf16.msra.mxu0 %v7139_v58  ;;  %4988 = vmatpush.bf16.msrb.mxu2 %v7311_v13  ;;  %v7367_v5 = vor.u32 %v7909_v43, %v7366_v27  ;;  %v7907_v58 = vld [vmem:[#allocation6 + $0x9d4] sm:$0xf0]  ;;  %v7286_v13 = vld [vmem:[#allocation6 + $0x940] sm:$0xf]  ;;  %v7904_v27 = vld [vmem:[#allocation6 + $0x9c4] sm:$0xf] }
 0xac7   :  { %v7359_v23 = vor.u32 %v7907_v58, %v7358_v38  ;;  %v7352_v43 = vld [vmem:[#allocation6 + $0x9c8] sm:$0xf0]  ;;  %v7886_v38 = vld [vmem:[#allocation6 + $0x934] sm:$0xf] }
 0xac8   :  { %v4286_v25 = vmul.f32 0.5, %v4285_v44 }
 0xac9   :  { %4748 = vmatpush.bf16.msra.mxu3 %v7191_v14  ;;  %5075 = vmatpush.bf16.msrb.mxu1 %v7379_v21  ;;  %v7363_v14 = vor.u32 %v7906_v48, %v7360_v29  ;;  %v7291_v21 = vor.u32 %v7888_v56, %v7288_v45  ;;  %v7344_v29 = vld [vmem:[#allocation6 + $0x9b8] sm:$0xf0]  ;;  %v7900_v56 = vld [vmem:[#allocation6 + $0x9a4] sm:$0xf]  ;;  %v7336_v45 = vld [vmem:[#allocation6 + $0x9a8] sm:$0xf0] }
 0xaca   :  { %v4287_v49 = vsub.f32 1.5, %v4286_v25  ;;  %4777 = vmatpush.bf16.msra.mxu0 %v7131_v61  ;;  %4989 = vmatpush.bf16.msrb.mxu2 %v7303_v6  ;;  %v7295_v25 = vor.u32 %v7891_v30, %v7294_v36  ;;  %v7903_v30 = vld [vmem:[#allocation6 + $0x9b4] sm:$0xf0] }
 0xacc   :  { %v4288_v22 = vmul.f32 %v9940_v2, %v4287_v49  ;;  %v7287_v49 = vor.u32 %v7889_v3, %v7286_v13  ;;  %v7901_v3 = vld [vmem:[#allocation6 + $0x9a4] sm:$0xf0] }
 0xacd   :  { %5017 = vmatpush.bf16.msrb.mxu3 %v7375_v17  ;;  %5076 = vmatpush.bf16.msrb.mxu1 %v7371_v37  ;;  %v7905_v17 = vld [vmem:[#allocation6 + $0x9c4] sm:$0xf0]  ;;  %v7887_v37 = vld [vmem:[#allocation6 + $0x934] sm:$0xf0] }
 0xace   :  { %v4292_v34 = vsel %vm4291_vm7, %v9940_v2, %v4288_v22  ;;  %5046 = vmatpush.bf16.msrb.mxu0 %v7315_v20  ;;  %4990 = vmatpush.bf16.msrb.mxu2 %v7295_v25 }
 0xacf   :  { %v4294_v26 = vrot.slane %v4292_v34, 7 }
 0xad1   :  { %v4295_v10 = vsel %vm1675_vm5, %v4292_v34, %v4294_v26  ;;  %5018 = vmatpush.bf16.msrb.mxu3 %v7367_v5  ;;  %5077 = vmatpush.bf16.msrb.mxu1 %v7363_v14  ;;  %v7355_v34 = vor.u32 %v7904_v27, %v7352_v43  ;;  %v7339_v43 = vor.u32 %v7900_v56, %v7336_v45  ;;  %v7880_v45 = vld [vmem:[#allocation6 + $0x904] sm:$0xf] }
 0xad2   :  { %v4297_v7 = vmul.f32 %v4295_v10, %v4281_v32  ;;  %5047 = vmatpush.bf16.msrb.mxu0 %v7307_v57  ;;  %4991 = vmatpush.bf16.msrb.mxu2 %v7287_v49  ;;  %v7278_v10 = vld [vmem:[#allocation6 + $0x930] sm:$0xf] }
 0xad3   :  { %v7279_v36 = vor.u32 %v7887_v37, %v7278_v10 }
 0xad4   :  { %v9950_v31 = vperm.slane %v4297_v7, 0  ;;  %v9952_v2 = vperm.slane %v4297_v7, 1  ;;  %v7342_v7 = vld [vmem:[#allocation6 + $0x9b0] sm:$0xf] }
 0xad5   :  { %5019 = vmatpush.bf16.msrb.mxu3 %v7359_v23  ;;  %5078 = vmatpush.bf16.msrb.mxu1 %v7355_v34  ;;  %v7343_v1 = vor.u32 %v7903_v30, %v7342_v7  ;;  %v7885_v23 = vld [vmem:[#allocation6 + $0x924] sm:$0xf0] }
 0xad6   :  { %v4306_v44 = vmul.f32 %v9952_v2, %v9933_v50  ;;  %v4305_v41 = vmul.f32 %v9950_v31, %v9933_v50  ;;  %5048 = vmatpush.bf16.msrb.mxu0 %v7299_v55  ;;  %v7351_v50 = vor.u32 %v7905_v17, %v7350_v15  ;;  %v4313_v22 = vmul.f32 %v9950_v31, %v9793_v11  ;;  %v7884_v15 = vld [vmem:[#allocation6 + $0x924] sm:$0xf]  ;;  %v7272_v17 = vld [vmem:[#allocation6 + $0x928] sm:$0xf0] }
 0xad7   :  { %v4315_v63 = vmul.f32 %v9950_v31, %v9804_v12  ;;  %v4314_v20 = vmul.f32 %v9952_v2, %v9783_v35  ;;  %v4316_v24 = vmul.f32 %v9952_v2, %v9779_v51  ;;  %v4318_v58 = vmul.f32 %v9952_v2, %v9788_v18  ;;  %4992 = vmatpush.bf16.msrb.mxu2 %v7279_v36 }
 0xad8   :  { %v4309_v60 = vrot.slane %v4306_v44, 7  ;;  %v4319_v44 = vmul.f32 %v9950_v31, %v9830_v33  ;;  %v4320_v52 = vmul.f32 %v9952_v2, %v9799_v59  ;;  %v7270_v33 = vld [vmem:[#allocation6 + $0x920] sm:$0xf]  ;;  %v7275_v27 = vor.u32 %v7884_v15, %v7272_v17 }
 0xad9   :  { %5020 = vmatpush.bf16.msrb.mxu3 %v7351_v50  ;;  %v7271_v13 = vor.u32 %v7885_v23, %v7270_v33  ;;  %v7334_v59 = vld [vmem:[#allocation6 + $0x9a0] sm:$0xf]  ;;  %v4322_v50 = vmul.f32 %v9952_v2, %v9811_v39 }
 0xada   :  { %v4310_v0 = vsel %vm1675_vm5, %v4305_v41, %v4309_v60  ;;  %5049 = vmatpush.bf16.msrb.mxu0 %v7291_v21  ;;  %v7280_v41 = vld [vmem:[#allocation6 + $0x938] sm:$0xf0]  ;;  %v7902_v60 = vld [vmem:[#allocation6 + $0x9b4] sm:$0xf]  ;;  %v7335_v49 = vor.u32 %v7901_v3, %v7334_v59  ;;  %v7881_v3 = vld [vmem:[#allocation6 + $0x904] sm:$0xf0] }
 0xadb   :  { %v4312_v61 = vsub.f32 %v4299_v53, %v4310_v0  ;;  %v4317_v53 = vmul.f32 %v9950_v31, %v9818_v8  ;;  %v7283_v8 = vor.u32 %v7886_v38, %v7280_v41  ;;  %v7347_v18 = vor.u32 %v7902_v60, %v7344_v29  ;;  %4993 = vmatpush.bf16.msrb.mxu2 %v7271_v13  ;;  %v7899_v60 = vld [vmem:[#allocation6 + $0x994] sm:$0xf0]  ;;  %v7318_v15 = vld [vmem:[#allocation6 + $0x980] sm:$0xf] }
 0xadc   :  { %v4321_v0 = vmul.f32 %v9950_v31, %v9843_v54  ;;  %v4325_v54 = vmul.f32 %v9950_v31, %v9862_v47 }
 0xadd   :  { %v9965_v6 = vperm.slane %v4312_v61, 0  ;;  %v9969_v16 = vperm.slane %v4312_v61, 1  ;;  %5021 = vmatpush.bf16.msrb.mxu3 %v7343_v1  ;;  %v4323_v61 = vmul.f32 %v9950_v31, %v9853_v28  ;;  %5079 = vmatpush.bf16.msrb.mxu1 %v7347_v18  ;;  %v7326_v1 = vld [vmem:[#allocation6 + $0x990] sm:$0xf]  ;;  %v7254_v18 = vld [vmem:[#allocation6 + $0x900] sm:$0xf] }
 0xade   :  { %5050 = vmatpush.bf16.msrb.mxu0 %v7283_v8  ;;  %v7327_v33 = vor.u32 %v7899_v60, %v7326_v1  ;;  %v7255_v17 = vor.u32 %v7881_v3, %v7254_v18 }
 0xadf   :  { %v4334_v5 = vadd.f32 %v9965_v6, %v4313_v22  ;;  %v4336_v11 = vadd.f32 %v9965_v6, %v4315_v63  ;;  %v4335_v12 = vadd.f32 %v9969_v16, %v4314_v20  ;;  %v4337_v42 = vadd.f32 %v9969_v16, %v4316_v24 }
 0xae0   :  { %v4338_v25 = vadd.f32 %v9965_v6, %v4317_v53  ;;  %v4340_v48 = vadd.f32 %v9965_v6, %v4319_v44  ;;  %v4339_v55 = vadd.f32 %v9969_v16, %v4318_v58  ;;  %v4341_v14 = vadd.f32 %v9969_v16, %v4320_v52  ;;  %v7262_v58 = vld [vmem:[#allocation6 + $0x910] sm:$0xf]  ;;  %v7883_v52 = vld [vmem:[#allocation6 + $0x914] sm:$0xf0] }
 0xae1   :  { %v9975_v35 = vmax.f32 %v4334_v5, 0.0  ;;  %v9977_v40 = vmax.f32 %v4336_v11, 0.0  ;;  %v9979_v32 = vmax.f32 %v4335_v12, 0.0  ;;  %v9981_v51 = vmax.f32 %v4337_v42, 0.0  ;;  %5022 = vmatpush.bf16.msrb.mxu3 %v7335_v49  ;;  %5080 = vmatpush.bf16.msrb.mxu1 %v7339_v43  ;;  %v7320_v43 = vld [vmem:[#allocation6 + $0x988] sm:$0xf0] }
 0xae2   :  { %v4324_v22 = vmul.f32 %v9952_v2, %v9825_v4  ;;  %v4327_v63 = vmul.f32 %v9950_v31, %v9880_v9  ;;  %v4326_v20 = vmul.f32 %v9952_v2, %v9836_v62  ;;  %v10013_v28 = vmax.f32 %v4338_v25, 0.0  ;;  %5051 = vmatpush.bf16.msrb.mxu0 %v7275_v27  ;;  %v7882_v25 = vld [vmem:[#allocation6 + $0x914] sm:$0xf] }
 0xae3   :  { %v4366_v26 = vpack.c.bf16 %v9977_v40, %v9975_v35  ;;  %v4367_v57 = vpack.c.bf16 %v9981_v51, %v9979_v32  ;;  %v10015_v21 = vmax.f32 %v4340_v48, 0.0  ;;  %v10017_v39 = vmax.f32 %v4339_v55, 0.0  ;;  %v7264_v48 = vld [vmem:[#allocation6 + $0x918] sm:$0xf0]  ;;  %v7898_v55 = vld [vmem:[#allocation6 + $0x994] sm:$0xf] }
 0xae4   :  { %v10019_v24 = vmax.f32 %v4341_v14, 0.0  ;;  %v4342_v4 = vadd.f32 %v9965_v6, %v4321_v0  ;;  %v4344_v34 = vadd.f32 %v9965_v6, %v4323_v61  ;;  %v4343_v47 = vadd.f32 %v9969_v16, %v4322_v50  ;;  %v7328_v14 = vld [vmem:[#allocation6 + $0x998] sm:$0xf0]  ;;  %v7897_v0 = vld [vmem:[#allocation6 + $0x984] sm:$0xf0] }
 0xae5   :  { %4720 = vmatmul.bf16.vlgmr.msra.gmra.mxu2 %v4366_v26  ;;  %4749 = vmatmul.bf16.vlgmr.msra.gmra.mxu3 %v4367_v57  ;;  %v4328_v9 = vmul.f32 %v9952_v2, %v9867_v46  ;;  %v4345_v62 = vadd.f32 %v9969_v16, %v4324_v22  ;;  %v4346_v31 = vadd.f32 %v9965_v6, %v4325_v54  ;;  %v4435_v46 = vrot.slane %v10017_v39, 1  ;;  %v7256_v61 = vld [vmem:[#allocation6 + $0x908] sm:$0xf0]  ;;  %v7896_v50 = vld [vmem:[#allocation6 + $0x984] sm:$0xf] }
 0xae6   :  { %4778 = vmatmul.bf16.vlgmr.msra.gmra.mxu0 %v4366_v26  ;;  %4807 = vmatmul.bf16.vlgmr.msra.gmra.mxu1 %v4367_v57  ;;  %v4348_v5 = vadd.f32 %v9965_v6, %v4327_v63  ;;  %v4347_v11 = vadd.f32 %v9969_v16, %v4326_v20  ;;  %v4368_v42 = vpack.c.bf16 %v10015_v21, %v10013_v28  ;;  %v4434_v26 = vrot.slane %v10013_v28, 1 }
 0xae7   :  { %v4349_v12 = vadd.f32 %v9969_v16, %v4328_v9  ;;  %v4369_v57 = vpack.c.bf16 %v10019_v24, %v10017_v39  ;;  %v10037_v2 = vmax.f32 %v4342_v4, 0.0  ;;  %v10039_v10 = vmax.f32 %v4344_v34, 0.0  ;;  %5023 = vmatpush.bf16.msrb.mxu3 %v7327_v33 }
 0xae8   :  { %v10041_v37 = vmax.f32 %v4343_v47, 0.0  ;;  %v10043_v6 = vmax.f32 %v4345_v62, 0.0  ;;  %v10045_v7 = vmax.f32 %v4346_v31, 0.0  ;;  %v4430_v16 = vrot.slane %v9975_v35, 1 }
 0xae9   :  { %v4432_v53 = vrot.slane %v9977_v40, 1  ;;  %v10049_v44 = vmax.f32 %v4348_v5, 0.0  ;;  %v10051_v36 = vmax.f32 %v4347_v11, 0.0  ;;  %v10053_v30 = vmax.f32 %v4349_v12, 0.0 }
 0xaea   :  { %v4431_v38 = vrot.slane %v9979_v32, 1  ;;  %v7263_v41 = vor.u32 %v7883_v52, %v7262_v58  ;;  %v7267_v23 = vor.u32 %v7882_v25, %v7264_v48  ;;  %v7331_v59 = vor.u32 %v7898_v55, %v7328_v14 }
 0xaeb   :  { %v4456_v29 = vsel %vm512_vm0, %v4432_v53, %v4434_v26  ;;  %v4458_v13 = vsel %vm512_vm0, %v4430_v16, %v4432_v53  ;;  %v7319_v56 = vor.u32 %v7897_v0, %v7318_v15  ;;  %v7259_v27 = vor.u32 %v7880_v45, %v7256_v61  ;;  %v7959_v0 = vld [vmem:[#allocation6 + $0xb74] sm:$0xf0]  ;;  %v7958_v61 = vld [vmem:[#allocation6 + $0xb74] sm:$0xf] }
 0xaec   :  { %4994 = vmatpush.bf16.msrb.mxu2 %v7263_v41  ;;  %v10062_v49 = vpack.c.bf16 %v4456_v29, %v4458_v13  ;;  %5052 = vmatpush.bf16.msrb.mxu0 %v7267_v23  ;;  %v4433_v22 = vrot.slane %v9981_v51, 1  ;;  %v4436_v54 = vrot.slane %v10015_v21, 1  ;;  %v4438_v63 = vrot.slane %v10037_v2, 1  ;;  %v7975_v45 = vld [vmem:[#allocation6 + $0xbf4] sm:$0xf0] }
 0xaed   :  { %5081 = vmatpush.bf16.msrb.mxu1 %v7331_v59  ;;  %v7323_v20 = vor.u32 %v7896_v50, %v7320_v43  ;;  %v4437_v4 = vrot.slane %v10019_v24, 1  ;;  %v4439_v34 = vrot.slane %v10041_v37, 1  ;;  %v4440_v47 = vrot.slane %v10039_v10, 1  ;;  %5024 = vmatpush.bf16.msrb.mxu3 %v7319_v56  ;;  %v7472_v50 = vld [vmem:[#allocation6 + $0xb78] sm:$0xf0] }
 0xaee   :  { %v4457_v9 = vsel %vm512_vm0, %v4433_v22, %v4435_v46  ;;  %v4459_v62 = vsel %vm512_vm0, %v4431_v38, %v4433_v22  ;;  %v4452_v31 = vsel %vm512_vm0, %v4436_v54, %v4438_v63  ;;  %v4454_v5 = vsel %vm512_vm0, %v4434_v26, %v4436_v54  ;;  %v7974_v22 = vld [vmem:[#allocation6 + $0xbf4] sm:$0xf]  ;;  %v7536_v54 = vld [vmem:[#allocation6 + $0xbf8] sm:$0xf0] }
 0xaef   :  { %v10082_v11 = vpack.c.bf16 %v4457_v9, %v4459_v62  ;;  %v10084_v12 = vpack.c.bf16 %v4452_v31, %v4454_v5  ;;  %v4455_v53 = vsel %vm512_vm0, %v4435_v46, %v4437_v4  ;;  %v4450_v26 = vsel %vm512_vm0, %v4438_v63, %v4440_v47  ;;  %v7462_v63 = vld [vmem:[#allocation6 + $0xb60] sm:$0xf]  ;;  %v7956_v62 = vld [vmem:[#allocation6 + $0xb64] sm:$0xf]  ;;  %v7464_v31 = vld [vmem:[#allocation6 + $0xb68] sm:$0xf0] }
 0xaf0   :  { %4995 = vmatpush.bf16.msrb.mxu2 %v7255_v17  ;;  %5053 = vmatpush.bf16.msrb.mxu0 %v7259_v27  ;;  %v4441_v58 = vrot.slane %v10043_v6, 1  ;;  %v4443_v52 = vrot.slane %v10051_v36, 1  ;;  %v4444_v60 = vrot.slane %v10049_v44, 1  ;;  %v4445_v25 = vrot.slane %v10053_v30, 1  ;;  %v7534_v17 = vld [vmem:[#allocation6 + $0xbf0] sm:$0xf] }
 0xaf1   :  { %5082 = vmatpush.bf16.msrb.mxu1 %v7323_v20  ;;  %v4370_v18 = vpack.c.bf16 %v10039_v10, %v10037_v2  ;;  %v4371_v13 = vpack.c.bf16 %v10043_v6, %v10041_v37  ;;  %v7535_v27 = vor.u32 %v7975_v45, %v7534_v17  ;;  %v7475_v43 = vor.u32 %v7958_v61, %v7472_v50  ;;  %v7957_v20 = vld [vmem:[#allocation6 + $0xb64] sm:$0xf0]  ;;  %v7972_v5 = vld [vmem:[#allocation6 + $0xbe4] sm:$0xf]  ;;  %v7510_v17 = vld [vmem:[#allocation6 + $0xbc0] sm:$0xf] }
 0xaf2   :  { %v4449_v46 = vsel %vm512_vm0, %v4441_v58, %v4443_v52  ;;  %v4451_v29 = vsel %vm512_vm0, %v4439_v34, %v4441_v58  ;;  %v4460_v55 = vsel %vm512_vm0, %v4444_v60, %v4430_v16  ;;  %v4447_v14 = vsel %vm512_vm0, %v4443_v52, %v4445_v25  ;;  %v7470_v16 = vld [vmem:[#allocation6 + $0xb70] sm:$0xf]  ;;  %v7952_v50 = vld [vmem:[#allocation6 + $0xb44] sm:$0xf] }
 0xaf3   :  { %v10109_v33 = vpack.c.bf16 %v4449_v46, %v4451_v29  ;;  %v4461_v3 = vsel %vm512_vm0, %v4445_v25, %v4431_v38  ;;  %v7471_v56 = vor.u32 %v7959_v0, %v7470_v16  ;;  %v7539_v38 = vor.u32 %v7974_v22, %v7536_v54  ;;  %5326 = vmatpush.bf16.msra.mxu3 %v7535_v27  ;;  %v7454_v52 = vld [vmem:[#allocation6 + $0xb50] sm:$0xf]  ;;  %v7971_v46 = vld [vmem:[#allocation6 + $0xbd4] sm:$0xf0]  ;;  %v7954_v29 = vld [vmem:[#allocation6 + $0xb54] sm:$0xf] }
 0xaf4   :  { %v10129_v15 = vpack.c.bf16 %v4461_v3, %v4447_v14  ;;  %5355 = vmatpush.bf16.msra.mxu0 %v7475_v43  ;;  %v4373_v58 = vpack.c.bf16 %v10053_v30, %v10051_v36  ;;  %v7446_v3 = vld [vmem:[#allocation6 + $0xb40] sm:$0xf]  ;;  %v7953_v0 = vld [vmem:[#allocation6 + $0xb44] sm:$0xf0]  ;;  %v7448_v27 = vld [vmem:[#allocation6 + $0xb48] sm:$0xf0] }
 0xaf5   :  { %4725 = vmatmul.bf16.gmra.mxu2 %v4368_v42  ;;  %4754 = vmatmul.bf16.gmra.mxu3 %v4369_v57  ;;  %v7447_v45 = vor.u32 %v7953_v0, %v7446_v3  ;;  %v7968_v43 = vld [vmem:[#allocation6 + $0xbc4] sm:$0xf]  ;;  %v4374_v22 = vrot.slane %v9975_v35, 7  ;;  %v4376_v54 = vrot.slane %v9977_v40, 7 }
 0xaf6   :  { %4783 = vmatmul.bf16.gmra.mxu0 %v4368_v42  ;;  %4812 = vmatmul.bf16.gmra.mxu1 %v4369_v57  ;;  %v4453_v42 = vsel %vm512_vm0, %v4437_v4, %v4439_v34  ;;  %v4442_v57 = vrot.slane %v10045_v7, 1  ;;  %v7526_v4 = vld [vmem:[#allocation6 + $0xbe0] sm:$0xf]  ;;  %v7973_v34 = vld [vmem:[#allocation6 + $0xbe4] sm:$0xf0] }
 0xaf7   :  { %v10097_v1 = vpack.c.bf16 %v4453_v42, %v4455_v53  ;;  %5297 = vmatpush.bf16.msra.mxu2 %v7471_v56  ;;  %v7527_v9 = vor.u32 %v7973_v34, %v7526_v4  ;;  %5384 = vmatpush.bf16.msra.mxu1 %v7539_v38  ;;  %v7467_v42 = vor.u32 %v7956_v62, %v7464_v31  ;;  %v7969_v56 = vld [vmem:[#allocation6 + $0xbc4] sm:$0xf0]  ;;  %v4377_v4 = vrot.slane %v9981_v51, 7  ;;  %v7948_v0 = vld [vmem:[#allocation6 + $0xb24] sm:$0xf] }
 0xaf8   :  { %v4448_v41 = vsel %vm512_vm0, %v4440_v47, %v4442_v57  ;;  %v4446_v23 = vsel %vm512_vm0, %v4442_v57, %v4444_v60  ;;  %v7463_v47 = vor.u32 %v7957_v20, %v7462_v63  ;;  %v7528_v57 = vld [vmem:[#allocation6 + $0xbe8] sm:$0xf0]  ;;  %v7518_v60 = vld [vmem:[#allocation6 + $0xbd0] sm:$0xf]  ;;  %v7511_v61 = vor.u32 %v7969_v56, %v7510_v17  ;;  %v7964_v56 = vld [vmem:[#allocation6 + $0xba4] sm:$0xf] }
 0xaf9   :  { %v10103_v48 = vpack.c.bf16 %v4448_v41, %v4450_v26  ;;  %v10123_v59 = vpack.c.bf16 %v4460_v55, %v4446_v23  ;;  %v7531_v53 = vor.u32 %v7972_v5, %v7528_v57  ;;  %5327 = vmatpush.bf16.msra.mxu3 %v7527_v9  ;;  %5356 = vmatpush.bf16.msra.mxu0 %v7467_v42  ;;  %v7955_v41 = vld [vmem:[#allocation6 + $0xb54] sm:$0xf0]  ;;  %v7456_v23 = vld [vmem:[#allocation6 + $0xb58] sm:$0xf0]  ;;  %v4375_v63 = vrot.slane %v9979_v32, 7 }
 0xafa   :  { %v4372_v26 = vpack.c.bf16 %v10049_v44, %v10045_v7  ;;  %v7455_v25 = vor.u32 %v7955_v41, %v7454_v52  ;;  %v7519_v55 = vor.u32 %v7971_v46, %v7518_v60  ;;  %v7459_v14 = vor.u32 %v7954_v29, %v7456_v23  ;;  %v7512_v20 = vld [vmem:[#allocation6 + $0xbc8] sm:$0xf0]  ;;  %v7438_v42 = vld [vmem:[#allocation6 + $0xb30] sm:$0xf]  ;;  %v7951_v57 = vld [vmem:[#allocation6 + $0xb34] sm:$0xf0] }
 0xafb   :  { %5298 = vmatpush.bf16.msra.mxu2 %v7463_v47  ;;  %5385 = vmatpush.bf16.msra.mxu1 %v7531_v53  ;;  %v7451_v38 = vor.u32 %v7952_v50, %v7448_v27  ;;  %v4388_v34 = vrot.slane %v10049_v44, 7  ;;  %v4389_v47 = vrot.slane %v10053_v30, 7  ;;  %v7515_v9 = vor.u32 %v7968_v43, %v7512_v20  ;;  %v7502_v53 = vld [vmem:[#allocation6 + $0xbb0] sm:$0xf]  ;;  %v7950_v52 = vld [vmem:[#allocation6 + $0xb34] sm:$0xf] }
 0xafc   :  { %v4402_v32 = vsel %vm455_vm1, %v4374_v22, %v4376_v54  ;;  %v4403_v51 = vsel %vm455_vm1, %v4375_v63, %v4377_v4  ;;  %v7440_v41 = vld [vmem:[#allocation6 + $0xb38] sm:$0xf0]  ;;  %v7966_v46 = vld [vmem:[#allocation6 + $0xbb4] sm:$0xf]  ;;  %v7430_v23 = vld [vmem:[#allocation6 + $0xb20] sm:$0xf] }
 0xafd   :  { %5328 = vmatpush.bf16.msra.mxu3 %v7519_v55  ;;  %5357 = vmatpush.bf16.msra.mxu0 %v7459_v14  ;;  %v4404_v35 = vsel %vm455_vm1, %v4388_v34, %v4374_v22  ;;  %v4405_v40 = vsel %vm455_vm1, %v4389_v47, %v4375_v63  ;;  %v7504_v29 = vld [vmem:[#allocation6 + $0xbb8] sm:$0xf0]  ;;  %v7949_v14 = vld [vmem:[#allocation6 + $0xb24] sm:$0xf0]  ;;  %v7432_v17 = vld [vmem:[#allocation6 + $0xb28] sm:$0xf0] }
 0xafe   :  { %v7382_v62 = vpack.c.bf16 %v4402_v32, %v4404_v35  ;;  %v7390_v31 = vpack.c.bf16 %v4403_v51, %v4405_v40  ;;  %v7507_v55 = vor.u32 %v7966_v46, %v7504_v29  ;;  %v7431_v3 = vor.u32 %v7949_v14, %v7430_v23  ;;  %v7496_v50 = vld [vmem:[#allocation6 + $0xba8] sm:$0xf0]  ;;  %v7947_v35 = vld [vmem:[#allocation6 + $0xb14] sm:$0xf0]  ;;  %v7486_v40 = vld [vmem:[#allocation6 + $0xb90] sm:$0xf] }
 0xaff   :  { %5299 = vmatpush.bf16.msra.mxu2 %v7455_v25  ;;  %v7443_v25 = vor.u32 %v7950_v52, %v7440_v41  ;;  %v4380_v27 = vrot.slane %v10015_v21, 7  ;;  %v4379_v43 = vrot.slane %v10017_v39, 7  ;;  %v4381_v22 = vrot.slane %v10019_v24, 7  ;;  %v7422_v24 = vld [vmem:[#allocation6 + $0xb10] sm:$0xf] }
 0xb00   :  { %v7499_v63 = vor.u32 %v7964_v56, %v7496_v50  ;;  %v7423_v32 = vor.u32 %v7947_v35, %v7422_v24  ;;  %v7963_v51 = vld [vmem:[#allocation6 + $0xb94] sm:$0xf0]  ;;  %v7961_v52 = vld [vmem:[#allocation6 + $0xb84] sm:$0xf0]  ;;  %v4384_v46 = vrot.slane %v10039_v10, 7  ;;  %v4383_v29 = vrot.slane %v10041_v37, 7 }
 0xb01   :  { %5329 = vmatpush.bf16.msra.mxu3 %v7511_v61  ;;  %5358 = vmatpush.bf16.msra.mxu0 %v7451_v38  ;;  %v7435_v61 = vor.u32 %v7948_v0, %v7432_v17  ;;  %v4399_v20 = vsel %vm455_vm1, %v4379_v43, %v4381_v22  ;;  %v4401_v21 = vsel %vm455_vm1, %v4377_v4, %v4379_v43  ;;  %v4385_v23 = vrot.slane %v10043_v6, 7  ;;  %v7416_v37 = vld [vmem:[#allocation6 + $0xb08] sm:$0xf0] }
 0xb02   :  { %v7480_v17 = vld [vmem:[#allocation6 + $0xb88] sm:$0xf0] }
 0xb03   :  { %5300 = vmatpush.bf16.msra.mxu2 %v7447_v45  ;;  %v4378_v45 = vrot.slane %v10013_v28, 7 }
 0xb05   :  { %4730 = vmatmul.bf16.gmra.mxu2 %v4370_v18  ;;  %4759 = vmatmul.bf16.gmra.mxu3 %v4371_v13  ;;  %v4398_v38 = vsel %vm455_vm1, %v4378_v45, %v4380_v27  ;;  %v4400_v28 = vsel %vm455_vm1, %v4376_v54, %v4378_v45  ;;  %v7487_v54 = vor.u32 %v7963_v51, %v7486_v40  ;;  %v4386_v45 = vrot.slane %v10045_v7, 7 }
 0xb06   :  { %4788 = vmatmul.bf16.gmra.mxu0 %v4370_v18  ;;  %4817 = vmatmul.bf16.gmra.mxu1 %v4371_v13  ;;  %v7970_v18 = vld [vmem:[#allocation6 + $0xbd4] sm:$0xf]  ;;  %v7520_v13 = vld [vmem:[#allocation6 + $0xbd8] sm:$0xf0]  ;;  %v4424_v39 = vpack.c.bf16 %v4398_v38, %v4400_v28 }
 0xb07   :  { %v7523_v16 = vor.u32 %v7970_v18, %v7520_v13  ;;  %v7494_v18 = vld [vmem:[#allocation6 + $0xba0] sm:$0xf]  ;;  %v7965_v13 = vld [vmem:[#allocation6 + $0xba4] sm:$0xf0]  ;;  %5359 = vmatpush.bf16.msra.mxu0 %v7443_v25  ;;  %v4382_v25 = vrot.slane %v10037_v2, 7  ;;  %v4397_v2 = vsel %vm455_vm1, %v4381_v22, %v4383_v29  ;;  %v4390_v50 = vsel %vm455_vm1, %v4386_v45, %v4388_v34 }
 0xb09   :  { %5386 = vmatpush.bf16.msra.mxu1 %v7523_v16  ;;  %v7495_v16 = vor.u32 %v7965_v13, %v7494_v18  ;;  %v4396_v14 = vsel %vm455_vm1, %v4380_v27, %v4382_v25  ;;  %v4395_v18 = vsel %vm455_vm1, %v4383_v29, %v4385_v23  ;;  %v4392_v27 = vsel %vm455_vm1, %v4384_v46, %v4386_v45 }
 0xb0a   :  { %v7394_v10 = vpack.c.bf16 %v4395_v18, %v4397_v2 }
 0xb0b   :  { %5360 = vmatpush.bf16.msra.mxu0 %v7435_v61  ;;  %v4387_v61 = vrot.slane %v10051_v36, 7 }
 0xb0d   :  { %5387 = vmatpush.bf16.msra.mxu1 %v7515_v9  ;;  %v4425_v9 = vpack.c.bf16 %v4399_v20, %v4401_v21  ;;  %v4391_v43 = vsel %vm455_vm1, %v4387_v61, %v4389_v47  ;;  %v4393_v22 = vsel %vm455_vm1, %v4385_v23, %v4387_v61 }
 0xb0e   :  { %v4429_v7 = vpack.c.bf16 %v4391_v43, %v4393_v22 }
 0xb11   :  { %5388 = vmatpush.bf16.msra.mxu1 %v7507_v55  ;;  %v4394_v55 = vsel %vm455_vm1, %v4382_v25, %v4384_v46 }
 0xb12   :  { %v7386_v13 = vpack.c.bf16 %v4394_v55, %v4396_v14 }
 0xb15   :  { %4735 = vmatmul.bf16.gmra.mxu2 %v4372_v26  ;;  %4764 = vmatmul.bf16.gmra.mxu3 %v4373_v58 }
 0xb16   :  { %4793 = vmatmul.bf16.gmra.mxu0 %v4372_v26  ;;  %4822 = vmatmul.bf16.gmra.mxu1 %v4373_v58  ;;  %v7439_v26 = vor.u32 %v7951_v57, %v7438_v42  ;;  %v7967_v58 = vld [vmem:[#allocation6 + $0xbb4] sm:$0xf0]  ;;  %v7962_v42 = vld [vmem:[#allocation6 + $0xb94] sm:$0xf]  ;;  %v7488_v57 = vld [vmem:[#allocation6 + $0xb98] sm:$0xf0] }
 0xb17   :  { %v7503_v60 = vor.u32 %v7967_v58, %v7502_v53  ;;  %5389 = vmatpush.bf16.msra.mxu1 %v7499_v63  ;;  %v7414_v53 = vld [vmem:[#allocation6 + $0xb00] sm:$0xf]  ;;  %v7491_v4 = vor.u32 %v7962_v42, %v7488_v57  ;;  %v4428_v63 = vpack.c.bf16 %v4390_v50, %v4392_v27 }
 0xb18   :  { %5301 = vmatpush.bf16.msra.mxu2 %v7439_v26  ;;  %v7945_v26 = vld [vmem:[#allocation6 + $0xb04] sm:$0xf0]  ;;  %v7478_v58 = vld [vmem:[#allocation6 + $0xb80] sm:$0xf] }
 0xb19   :  { %5330 = vmatpush.bf16.msra.mxu3 %v7503_v60  ;;  %v7415_v41 = vor.u32 %v7945_v26, %v7414_v53  ;;  %v7479_v60 = vor.u32 %v7961_v52, %v7478_v58 }
 0xb1b   :  { %5390 = vmatpush.bf16.msra.mxu1 %v7491_v4 }
 0xb1c   :  { %5302 = vmatpush.bf16.msra.mxu2 %v7431_v3  ;;  %v7944_v3 = vld [vmem:[#allocation6 + $0xb04] sm:$0xf] }
 0xb1d   :  { %5331 = vmatpush.bf16.msra.mxu3 %v7495_v16  ;;  %v7960_v16 = vld [vmem:[#allocation6 + $0xb84] sm:$0xf]  ;;  %v7419_v0 = vor.u32 %v7944_v3, %v7416_v37 }
 0xb1e   :  { %v7483_v56 = vor.u32 %v7960_v16, %v7480_v17 }
 0xb20   :  { %5303 = vmatpush.bf16.msra.mxu2 %v7423_v32  ;;  %5391 = vmatpush.bf16.msra.mxu1 %v7483_v56 }
 0xb21   :  { %5332 = vmatpush.bf16.msra.mxu3 %v7487_v54 }
 0xb24   :  { %5304 = vmatpush.bf16.msra.mxu2 %v7415_v41 }
 0xb25   :  { %7383 = vmatmul.msk.bf16.vlgmr.msrb.gmra.mxu2 %vm8456_vm4, %v7382_v62  ;;  %7391 = vmatmul.msk.bf16.vlgmr.msrb.gmra.mxu3 %vm8456_vm4, %v7390_v31 }
 0xb26   :  { %7399 = vmatmul.msk.bf16.vlgmr.msrb.gmra.mxu0 %vm8456_vm4, %v7382_v62  ;;  %7407 = vmatmul.msk.bf16.vlgmr.msrb.gmra.mxu1 %vm8456_vm4, %v7390_v31  ;;  %v7946_v62 = vld [vmem:[#allocation6 + $0xb14] sm:$0xf]  ;;  %v7424_v31 = vld [vmem:[#allocation6 + $0xb18] sm:$0xf0] }
 0xb27   :  { %v7427_v5 = vor.u32 %v7946_v62, %v7424_v31  ;;  %5333 = vmatpush.bf16.msra.mxu3 %v7479_v60 }
 0xb29   :  { %5361 = vmatpush.bf16.msra.mxu0 %v7427_v5 }
 0xb2d   :  { %5362 = vmatpush.bf16.msra.mxu0 %v7419_v0 }
 0xb35   :  { %5001 = vmatmul.bf16.gmra.mxu2 %v4424_v39  ;;  %5030 = vmatmul.bf16.gmra.mxu3 %v4425_v9 }
 0xb36   :  { %5059 = vmatmul.bf16.gmra.mxu0 %v4424_v39  ;;  %5088 = vmatmul.bf16.gmra.mxu1 %v4425_v9 }
 0xb45   :  { %7387 = vmatmul.msk.bf16.gmra.mxu2 %vm8496_vm6, %v7386_v13  ;;  %7395 = vmatmul.msk.bf16.gmra.mxu3 %vm8496_vm6, %v7394_v10 }
 0xb46   :  { %7403 = vmatmul.msk.bf16.gmra.mxu0 %vm8496_vm6, %v7386_v13  ;;  %7411 = vmatmul.msk.bf16.gmra.mxu1 %vm8496_vm6, %v7394_v10 }
 0xb55   :  { %5011 = vmatmul.bf16.gmra.mxu2 %v4428_v63  ;;  %5040 = vmatmul.bf16.gmra.mxu3 %v4429_v7 }
 0xb56   :  { %5069 = vmatmul.bf16.gmra.mxu0 %v4428_v63  ;;  %5098 = vmatmul.bf16.gmra.mxu1 %v4429_v7 }
 0xb63   :  { %v4779_v44 = vpop.f32.mrf.mxu0  ;;  %v4808_v36 = vpop.f32.mrf.mxu1 }
 0xb64   :  { %v10207_v34 = vadd.f32 %v4808_v36, %v4779_v44 }
 0xb65   :  { %5305 = vmatmul.bf16.vlgmr.msra.gmra.mxu2 %v10062_v49  ;;  %5334 = vmatmul.bf16.vlgmr.msra.gmra.mxu3 %v10082_v11 }
 0xb66   :  { %5363 = vmatmul.bf16.vlgmr.msra.gmra.mxu0 %v10062_v49  ;;  %5392 = vmatmul.bf16.vlgmr.msra.gmra.mxu1 %v10082_v11 }
 0xb68   :  { %v4721_v30 = vpop.f32.mrf.mxu2  ;;  %v4750_v8 = vpop.f32.mrf.mxu3 }
 0xb69   :  { %v4751_v47 = vadd.f32 %v4750_v8, %v4721_v30 }
 0xb6b   :  { %v4781_v38 = vpop.f32.mrf.mxu0  ;;  %v4810_v28 = vpop.f32.mrf.mxu1 }
 0xb6c   :  { %v4811_v20 = vadd.f32 %v4810_v28, %v4781_v38 }
 0xb70   :  { %v4723_v21 = vpop.f32.mrf.mxu2  ;;  %v4752_v39 = vpop.f32.mrf.mxu3 }
 0xb71   :  { %v10213_v9 = vadd.f32 %v4752_v39, %v4723_v21 }
 0xb73   :  { %v4784_v24 = vpop.f32.mrf.mxu0  ;;  %v4813_v35 = vpop.f32.mrf.mxu1 }
 0xb74   :  { %v10215_v40 = vadd.f32 %v4813_v35, %v4784_v24 }
 0xb75   :  { %7543 = vmatmul.msk.bf16.gmra.mxu2 %vm8538_vm8, %v10084_v12  ;;  %7551 = vmatmul.msk.bf16.gmra.mxu3 %vm8538_vm8, %v10097_v1 }
 0xb76   :  { %7559 = vmatmul.msk.bf16.gmra.mxu0 %vm8538_vm8, %v10084_v12  ;;  %7567 = vmatmul.msk.bf16.gmra.mxu1 %vm8538_vm8, %v10097_v1 }
 0xb78   :  { %v4726_v49 = vpop.f32.mrf.mxu2  ;;  %v4755_v11 = vpop.f32.mrf.mxu3 }
 0xb79   :  { %v4756_v51 = vadd.f32 %v4755_v11, %v4726_v49 }
 0xb7b   :  { %v4786_v62 = vpop.f32.mrf.mxu0  ;;  %v4815_v31 = vpop.f32.mrf.mxu1 }
 0xb7c   :  { %v4816_v54 = vadd.f32 %v4815_v31, %v4786_v62 }
 0xb80   :  { %v4728_v5 = vpop.f32.mrf.mxu2  ;;  %v4757_v42 = vpop.f32.mrf.mxu3 }
 0xb81   :  { %v10229_v57 = vadd.f32 %v4757_v42, %v4728_v5 }
 0xb83   :  { %v4789_v53 = vpop.f32.mrf.mxu0  ;;  %v4818_v4 = vpop.f32.mrf.mxu1 }
 0xb84   :  { %v10231_v26 = vadd.f32 %v4818_v4, %v4789_v53 }
 0xb85   :  { %5315 = vmatmul.bf16.gmra.mxu2 %v10103_v48  ;;  %5344 = vmatmul.bf16.gmra.mxu3 %v10109_v33 }
 0xb86   :  { %5373 = vmatmul.bf16.gmra.mxu0 %v10103_v48  ;;  %5402 = vmatmul.bf16.gmra.mxu1 %v10109_v33 }
 0xb88   :  { %v4731_v12 = vpop.f32.mrf.mxu2  ;;  %v4760_v1 = vpop.f32.mrf.mxu3 }
 0xb89   :  { %v4761_v58 = vadd.f32 %v4760_v1, %v4731_v12 }
 0xb8b   :  { %v4791_v52 = vpop.f32.mrf.mxu0  ;;  %v4820_v41 = vpop.f32.mrf.mxu1 }
 0xb8c   :  { %v4821_v60 = vadd.f32 %v4820_v41, %v4791_v52 }
 0xb90   :  { %v4733_v25 = vpop.f32.mrf.mxu2  ;;  %v4762_v46 = vpop.f32.mrf.mxu3 }
 0xb91   :  { %v10237_v29 = vadd.f32 %v4762_v46, %v4733_v25 }
 0xb93   :  { %v4794_v23 = vpop.f32.mrf.mxu0  ;;  %v4823_v55 = vpop.f32.mrf.mxu1 }
 0xb94   :  { %v10239_v14 = vadd.f32 %v4823_v55, %v4794_v23 }
 0xb95   :  { %7547 = vmatmul.msk.bf16.gmra.mxu2 %vm8576_vm10, %v10123_v59  ;;  %7555 = vmatmul.msk.bf16.gmra.mxu3 %vm8576_vm10, %v10129_v15 }
 0xb96   :  { %7563 = vmatmul.msk.bf16.gmra.mxu0 %vm8576_vm10, %v10123_v59  ;;  %7571 = vmatmul.msk.bf16.gmra.mxu1 %vm8576_vm10, %v10129_v15 }
 0xb98   :  { %v4736_v48 = vpop.f32.mrf.mxu2  ;;  %v4765_v33 = vpop.f32.mrf.mxu3 }
 0xb99   :  { %v4766_v2 = vadd.f32 %v4765_v33, %v4736_v48 }
 0xb9b   :  { %v4796_v13 = vpop.f32.mrf.mxu0  ;;  %v4825_v10 = vpop.f32.mrf.mxu1 }
 0xb9c   :  { %v4826_v3 = vadd.f32 %v4825_v10, %v4796_v13 }
 0xba0   :  { %v4738_v37 = vpop.f32.mrf.mxu2  ;;  %v4767_v16 = vpop.f32.mrf.mxu3 }
 0xba1   :  { %v10253_v6 = vadd.f32 %v4767_v16, %v4738_v37 }
 0xba3   :  { %v5055_v0 = vpop.f32.mrf.mxu0  ;;  %v5084_v17 = vpop.f32.mrf.mxu1 }
 0xba4   :  { %v5056_v56 = vadd.f32 %v5055_v0, %v10207_v34 }
 0xba6   :  { %v10256_v45 = vadd.f32 %v5084_v17, %v5056_v56 }
 0xba8   :  { %v4997_v59 = vpop.f32.mrf.mxu2  ;;  %v5026_v61 = vpop.f32.mrf.mxu3 }
 0xba9   :  { %v4998_v50 = vadd.f32 %v4997_v59, %v4751_v47 }
 0xbab   :  { %v10258_v15 = vadd.f32 %v5026_v61, %v4998_v50  ;;  %v5057_v27 = vpop.f32.mrf.mxu0  ;;  %v5086_v43 = vpop.f32.mrf.mxu1 }
 0xbac   :  { %v5058_v22 = vadd.f32 %v5057_v27, %v4811_v20 }
 0xbae   :  { %v10260_v63 = vadd.f32 %v5086_v43, %v5058_v22 }
 0xbb0   :  { %v4999_v7 = vpop.f32.mrf.mxu2  ;;  %v5028_v44 = vpop.f32.mrf.mxu3 }
 0xbb1   :  { %v5000_v36 = vadd.f32 %v4999_v7, %v10213_v9 }
 0xbb3   :  { %v10263_v30 = vadd.f32 %v5028_v44, %v5000_v36  ;;  %v5060_v8 = vpop.f32.mrf.mxu0  ;;  %v5089_v34 = vpop.f32.mrf.mxu1 }
 0xbb4   :  { %v5061_v38 = vadd.f32 %v5060_v8, %v10215_v40 }
 0xbb6   :  { %v10266_v28 = vadd.f32 %v5089_v34, %v5061_v38 }
 0xbb8   :  { %v5002_v47 = vpop.f32.mrf.mxu2  ;;  %v5031_v21 = vpop.f32.mrf.mxu3 }
 0xbb9   :  { %v5003_v39 = vadd.f32 %v5002_v47, %v4756_v51 }
 0xbbb   :  { %v10268_v24 = vadd.f32 %v5031_v21, %v5003_v39  ;;  %v5062_v20 = vpop.f32.mrf.mxu0  ;;  %v5091_v35 = vpop.f32.mrf.mxu1 }
 0xbbc   :  { %v5063_v32 = vadd.f32 %v5062_v20, %v4816_v54 }
 0xbbe   :  { %v10270_v49 = vadd.f32 %v5091_v35, %v5063_v32 }
 0xbc0   :  { %v5004_v11 = vpop.f32.mrf.mxu2  ;;  %v5033_v9 = vpop.f32.mrf.mxu3 }
 0xbc1   :  { %v5005_v62 = vadd.f32 %v5004_v11, %v10229_v57 }
 0xbc3   :  { %v10273_v31 = vadd.f32 %v5033_v9, %v5005_v62  ;;  %v5065_v5 = vpop.f32.mrf.mxu0  ;;  %v5094_v40 = vpop.f32.mrf.mxu1  ;;  %v5430_v62 = vld [vmem:[#allocation7 + $0x6] sm:$0x3] }
 0xbc4   :  { %v5066_v42 = vadd.f32 %v5065_v5, %v10231_v26 }
 0xbc6   :  { %v10276_v53 = vadd.f32 %v5094_v40, %v5066_v42 }
 0xbc8   :  { %v5007_v51 = vpop.f32.mrf.mxu2  ;;  %v5036_v4 = vpop.f32.mrf.mxu3 }
 0xbc9   :  { %v5008_v12 = vadd.f32 %v5007_v51, %v4761_v58 }
 0xbcb   :  { %v10278_v1 = vadd.f32 %v5036_v4, %v5008_v12  ;;  %v5067_v54 = vpop.f32.mrf.mxu0  ;;  %v5096_v52 = vpop.f32.mrf.mxu1 }
 0xbcc   :  { %v5068_v41 = vadd.f32 %v5067_v54, %v4821_v60 }
 0xbce   :  { %v10280_v25 = vadd.f32 %v5096_v52, %v5068_v41  ;;  %v10297_v52 = vperm.slane %v5430_v62, 1 }
 0xbd0   :  { %v5009_v46 = vpop.f32.mrf.mxu2  ;;  %v5038_v57 = vpop.f32.mrf.mxu3 }
 0xbd1   :  { %v5010_v23 = vadd.f32 %v5009_v46, %v10237_v29 }
 0xbd3   :  { %v10283_v55 = vadd.f32 %v5038_v57, %v5010_v23  ;;  %v5070_v18 = vpop.f32.mrf.mxu0  ;;  %v5099_v26 = vpop.f32.mrf.mxu1 }
 0xbd4   :  { %v5071_v48 = vadd.f32 %v5070_v18, %v10239_v14  ;;  %v10301_v18 = vperm.slane %v5430_v62, 0 }
 0xbd6   :  { %v10286_v33 = vadd.f32 %v5099_v26, %v5071_v48 }
 0xbd8   :  { %v5012_v58 = vpop.f32.mrf.mxu2  ;;  %v5041_v13 = vpop.f32.mrf.mxu3 }
 0xbd9   :  { %v5013_v10 = vadd.f32 %v5012_v58, %v4766_v2 }
 0xbdb   :  { %v10288_v37 = vadd.f32 %v5041_v13, %v5013_v10  ;;  %v5072_v60 = vpop.f32.mrf.mxu0  ;;  %v5101_v16 = vpop.f32.mrf.mxu1 }
 0xbdc   :  { %v5073_v0 = vadd.f32 %v5072_v60, %v4826_v3 }
 0xbde   :  { %v10290_v17 = vadd.f32 %v5101_v16, %v5073_v0 }
 0xbe0   :  { %v5014_v56 = vpop.f32.mrf.mxu2  ;;  %v5043_v29 = vpop.f32.mrf.mxu3 }
 0xbe1   :  { %v5015_v59 = vadd.f32 %v5014_v56, %v10253_v6 }
 0xbe3   :  { %v10293_v61 = vadd.f32 %v5043_v29, %v5015_v59  ;;  %v5364_v50 = vpop.f32.mrf.mxu0  ;;  %v5393_v14 = vpop.f32.mrf.mxu1 }
 0xbe4   :  { %v5394_v9 = vadd.f32 %v5393_v14, %v5364_v50 }
 0xbe6   :  { %v5414_v54 = vadd.f32 %v5394_v9, %v10256_v45 }
 0xbe8   :  { %v5306_v27 = vpop.f32.mrf.mxu2  ;;  %v5335_v43 = vpop.f32.mrf.mxu3  ;;  %v10308_v45 = vadd.f32 %v10297_v52, %v5414_v54 }
 0xbe9   :  { %v5336_v40 = vadd.f32 %v5335_v43, %v5306_v27 }
 0xbeb   :  { %v5366_v22 = vpop.f32.mrf.mxu0  ;;  %v5395_v7 = vpop.f32.mrf.mxu1  ;;  %v5413_v23 = vadd.f32 %v5336_v40, %v10258_v15 }
 0xbec   :  { %v5396_v35 = vadd.f32 %v5395_v7, %v5366_v22 }
 0xbed   :  { %v10316_v0 = vadd.f32 %v10301_v18, %v5413_v23 }
 0xbee   :  { %v5416_v4 = vadd.f32 %v5396_v35, %v10260_v63 }
 0xbf0   :  { %v5308_v2 = vpop.f32.mrf.mxu2  ;;  %v5337_v44 = vpop.f32.mrf.mxu3  ;;  %v10304_v48 = vadd.f32 %v10297_v52, %v5416_v4 }
 0xbf1   :  { %v5338_v41 = vadd.f32 %v5337_v44, %v5308_v2 }
 0xbf2   :  { %v5515_v50 = vmul.f32 %v10304_v48, %v10304_v48  ;;  %v5465_v7 = vadd.f32 %v10304_v48, %v10308_v45 }
 0xbf3   :  { %v5369_v36 = vpop.f32.mrf.mxu0  ;;  %v5398_v8 = vpop.f32.mrf.mxu1  ;;  %v5415_v60 = vadd.f32 %v5338_v41, %v10263_v30 }
 0xbf4   :  { %v5399_v5 = vadd.f32 %v5398_v8, %v5369_v36  ;;  %v5512_v36 = vmul.f32 %v10316_v0, %v10316_v0 }
 0xbf5   :  { %v10328_v43 = vadd.f32 %v10301_v18, %v5415_v60 }
 0xbf6   :  { %v5418_v46 = vadd.f32 %v5399_v5, %v10266_v28 }
 0xbf7   :  { %v5452_v62 = vadd.f32 %v10328_v43, %v10316_v0 }
 0xbf8   :  { %v5311_v34 = vpop.f32.mrf.mxu2  ;;  %v5340_v3 = vpop.f32.mrf.mxu3  ;;  %v10312_v16 = vadd.f32 %v10297_v52, %v5418_v46 }
 0xbf9   :  { %v5341_v26 = vadd.f32 %v5340_v3, %v5311_v34 }
 0xbfa   :  { %v5517_v2 = vmul.f32 %v10312_v16, %v10312_v16  ;;  %v5466_v3 = vadd.f32 %v5465_v7, %v10312_v16 }
 0xbfb   :  { %v5371_v38 = vpop.f32.mrf.mxu0  ;;  %v5400_v47 = vpop.f32.mrf.mxu1  ;;  %v5417_v56 = vadd.f32 %v5341_v26, %v10268_v24 }
 0xbfc   :  { %v5401_v12 = vadd.f32 %v5400_v47, %v5371_v38 }
 0xbfd   :  { %v10342_v8 = vadd.f32 %v10301_v18, %v5417_v56 }
 0xbfe   :  { %v5420_v58 = vadd.f32 %v5401_v12, %v10270_v49 }
 0xbff   :  { %v5516_v5 = vmul.f32 %v10342_v8, %v10342_v8 }
 0xc00   :  { %v5313_v21 = vpop.f32.mrf.mxu2  ;;  %v5342_v39 = vpop.f32.mrf.mxu3  ;;  %v10322_v14 = vadd.f32 %v10297_v52, %v5420_v58 }
 0xc01   :  { %v5343_v28 = vadd.f32 %v5342_v39, %v5313_v21 }
 0xc02   :  { %v5519_v38 = vmul.f32 %v10322_v14, %v10322_v14 }
 0xc03   :  { %v5374_v20 = vpop.f32.mrf.mxu0  ;;  %v5403_v6 = vpop.f32.mrf.mxu1  ;;  %v5419_v24 = vadd.f32 %v5343_v28, %v10273_v31 }
 0xc04   :  { %v5404_v57 = vadd.f32 %v5403_v6, %v5374_v20 }
 0xc05   :  { %v10354_v20 = vadd.f32 %v10301_v18, %v5419_v24 }
 0xc06   :  { %v5422_v15 = vadd.f32 %v5404_v57, %v10276_v53  ;;  %v5513_v53 = vmul.f32 %v10308_v45, %v10308_v45  ;;  %v5453_v57 = vadd.f32 %v5452_v62, %v10342_v8 }
 0xc07   :  { %v5518_v23 = vmul.f32 %v10354_v20, %v10354_v20 }
 0xc08   :  { %v5316_v32 = vpop.f32.mrf.mxu2  ;;  %v5345_v11 = vpop.f32.mrf.mxu3  ;;  %v10336_v44 = vadd.f32 %v10297_v52, %v5422_v15  ;;  %v5541_v34 = vadd.f32 %v5515_v50, %v5513_v53  ;;  %v5454_v60 = vadd.f32 %v5453_v57, %v10354_v20 }
 0xc09   :  { %v5346_v49 = vadd.f32 %v5345_v11, %v5316_v32  ;;  %v5467_v32 = vadd.f32 %v5466_v3, %v10322_v14 }
 0xc0a   :  { %v5542_v35 = vadd.f32 %v5541_v34, %v5517_v2  ;;  %v5521_v11 = vmul.f32 %v10336_v44, %v10336_v44 }
 0xc0b   :  { %v5376_v42 = vpop.f32.mrf.mxu0  ;;  %v5405_v51 = vpop.f32.mrf.mxu1  ;;  %v5421_v31 = vadd.f32 %v5346_v49, %v10278_v1  ;;  %v5468_v12 = vadd.f32 %v5467_v32, %v10336_v44 }
 0xc0c   :  { %v5406_v63 = vadd.f32 %v5405_v51, %v5376_v42  ;;  %v5543_v4 = vadd.f32 %v5542_v35, %v5519_v38 }
 0xc0d   :  { %v10368_v40 = vadd.f32 %v10301_v18, %v5421_v31 }
 0xc0e   :  { %v5424_v30 = vadd.f32 %v5406_v63, %v10280_v25  ;;  %v5544_v58 = vadd.f32 %v5543_v4, %v5521_v11 }
 0xc0f   :  { %v5520_v28 = vmul.f32 %v10368_v40, %v10368_v40 }
 0xc10   :  { %v5318_v13 = vpop.f32.mrf.mxu2  ;;  %v5347_v10 = vpop.f32.mrf.mxu3  ;;  %v10349_v47 = vadd.f32 %v10297_v52, %v5424_v30 }
 0xc11   :  { %v5348_v22 = vadd.f32 %v5347_v10, %v5318_v13 }
 0xc12   :  { %v5523_v54 = vmul.f32 %v10349_v47, %v10349_v47 }
 0xc13   :  { %v5379_v29 = vpop.f32.mrf.mxu0  ;;  %v5408_v59 = vpop.f32.mrf.mxu1  ;;  %v5423_v6 = vadd.f32 %v5348_v22, %v10283_v55 }
 0xc14   :  { %v5409_v27 = vadd.f32 %v5408_v59, %v5379_v29  ;;  %v5545_v56 = vadd.f32 %v5544_v58, %v5523_v54 }
 0xc15   :  { %v10378_v26 = vadd.f32 %v10301_v18, %v5423_v6 }
 0xc16   :  { %v5426_v25 = vadd.f32 %v5409_v27, %v10286_v33  ;;  %v5514_v33 = vmul.f32 %v10328_v43, %v10328_v43 }
 0xc17   :  { %v5522_v27 = vmul.f32 %v10378_v26, %v10378_v26 }
 0xc18   :  { %v5321_v21 = vpop.f32.mrf.mxu2  ;;  %v5350_v39 = vpop.f32.mrf.mxu3  ;;  %v10361_v9 = vadd.f32 %v10297_v52, %v5426_v25  ;;  %v5528_v46 = vadd.f32 %v5514_v33, %v5512_v36 }
 0xc19   :  { %v5351_v1 = vadd.f32 %v5350_v39, %v5321_v21 }
 0xc1a   :  { %v5525_v63 = vmul.f32 %v10361_v9, %v10361_v9  ;;  %v5529_v10 = vadd.f32 %v5528_v46, %v5516_v5 }
 0xc1b   :  { %v5425_v55 = vadd.f32 %v5351_v1, %v10288_v37  ;;  %v5381_v42 = vpop.f32.mrf.mxu0  ;;  %v5410_v51 = vpop.f32.mrf.mxu1  ;;  %v5469_v37 = vadd.f32 %v5468_v12, %v10349_v47 }
 0xc1c   :  { %v5411_v41 = vadd.f32 %v5410_v51, %v5381_v42  ;;  %v5530_v30 = vadd.f32 %v5529_v10, %v5518_v23  ;;  %v5546_v7 = vadd.f32 %v5545_v56, %v5525_v63 }
 0xc1d   :  { %v10388_v15 = vadd.f32 %v10301_v18, %v5425_v55  ;;  %v5470_v49 = vadd.f32 %v5469_v37, %v10361_v9 }
 0xc1e   :  { %v5428_v13 = vadd.f32 %v5411_v41, %v10290_v17  ;;  %v5455_v17 = vadd.f32 %v5454_v60, %v10368_v40  ;;  %v5531_v2 = vadd.f32 %v5530_v30, %v5520_v28 }
 0xc20   :  { %v10392_v29 = vadd.f32 %v10297_v52, %v5428_v13  ;;  %v5323_v59 = vpop.f32.mrf.mxu2  ;;  %v5352_v50 = vpop.f32.mrf.mxu3  ;;  %v5456_v25 = vadd.f32 %v5455_v17, %v10378_v26  ;;  %v5524_v52 = vmul.f32 %v10388_v15, %v10388_v15  ;;  %v5532_v3 = vadd.f32 %v5531_v2, %v5522_v27 }
 0xc21   :  { %v5353_v53 = vadd.f32 %v5352_v50, %v5323_v59 }
 0xc22   :  { %v5527_v24 = vmul.f32 %v10392_v29, %v10392_v29  ;;  %v5471_v22 = vadd.f32 %v5470_v49, %v10392_v29  ;;  %v5457_v38 = vadd.f32 %v5456_v25, %v10388_v15  ;;  %v5533_v1 = vadd.f32 %v5532_v3, %v5524_v52 }
 0xc23   :  { %v5427_v36 = vadd.f32 %v5353_v53, %v10293_v61 }
 0xc24   :  { %v5472_v31 = vrot.slane %v5471_v22, 4  ;;  %v5547_v34 = vadd.f32 %v5546_v7, %v5527_v24 }
 0xc25   :  { %v10406_v21 = vadd.f32 %v10301_v18, %v5427_v36 }
 0xc26   :  { %v5473_v39 = vadd.f32 %v5472_v31, %v5471_v22  ;;  %v5548_v35 = vrot.slane %v5547_v34, 4 }
 0xc27   :  { %v5526_v33 = vmul.f32 %v10406_v21, %v10406_v21  ;;  %v5458_v6 = vadd.f32 %v5457_v38, %v10406_v21 }
 0xc28   :  { %v5474_v32 = vrot.slane %v5473_v39, 2  ;;  %v5549_v42 = vadd.f32 %v5548_v35, %v5547_v34 }
 0xc29   :  { %v5459_v11 = vrot.slane %v5458_v6, 4  ;;  %v5534_v62 = vadd.f32 %v5533_v1, %v5526_v33 }
 0xc2a   :  { %v5475_v61 = vadd.f32 %v5474_v32, %v5473_v39  ;;  %v5550_v46 = vrot.slane %v5549_v42, 2 }
 0xc2b   :  { %v5460_v5 = vadd.f32 %v5459_v11, %v5458_v6  ;;  %v5535_v55 = vrot.slane %v5534_v62, 4 }
 0xc2c   :  { %v5476_v51 = vrot.slane %v5475_v61, 1  ;;  %v5551_v63 = vadd.f32 %v5550_v46, %v5549_v42 }
 0xc2d   :  { %v5461_v4 = vrot.slane %v5460_v5, 2  ;;  %v5536_v12 = vadd.f32 %v5535_v55, %v5534_v62 }
 0xc2e   :  { %v5477_v18 = vadd.f32 %v5476_v51, %v5475_v61  ;;  %v5552_v10 = vrot.slane %v5551_v63, 1 }
 0xc2f   :  { %v5462_v54 = vadd.f32 %v5461_v4, %v5460_v5  ;;  %v5537_v41 = vrot.slane %v5536_v12, 2 }
 0xc30   :  { %5480 = vrot.lane.b32.xlu1 %v5477_v18, %s8175_s20  ;;  %v5553_v60 = vadd.f32 %v5552_v10, %v5551_v63 }
 0xc31   :  { %v5463_v57 = vrot.slane %v5462_v54, 1  ;;  %v5538_v23 = vadd.f32 %v5537_v41, %v5536_v12 }
 0xc33   :  { %v5464_v58 = vadd.f32 %v5463_v57, %v5462_v54  ;;  %v5539_v37 = vrot.slane %v5538_v23, 1 }
 0xc35   :  { %5478 = vrot.lane.b32.xlu0 %v5464_v58, %s8175_s20  ;;  %v5540_v13 = vadd.f32 %v5539_v37, %v5538_v23 }
 0xc37   :  { %5554 = vrot.lane.b32.xlu2 %v5540_v13, %s8175_s20 }
 0xc3d   :  { %5556 = vrot.lane.b32.xlu0 %v5553_v60, %s8175_s20 }
 0xc91   :  { %v5555_v17 = vpop.permute.xlu2 %5554 }
 0xca2   :  { %v5481_v28 = vpop.permute.xlu1 %5480 }
 0xca7   :  { %v5479_v56 = vpop.permute.xlu0 %5478 }
 0xca8   :  { %v5482_v49 = vsel %vm1549_vm11, %v5479_v56, %v5481_v28  ;;  %v5483_v59 = vsel %vm1549_vm11, %v5481_v28, %v5479_v56 }
 0xca9   :  { %v5484_v50 = vadd.f32 %v5483_v59, %v5464_v58  ;;  %v5485_v30 = vadd.f32 %v5482_v49, %v5477_v18 }
 0xcab   :  { %5486 = vrot.lane.b32.xlu1 %v5484_v50, %s8180_s0  ;;  %5488 = vrot.lane.b32.xlu2 %v5485_v30, %s8180_s0 }
 0xcaf   :  { %v5557_v27 = vpop.permute.xlu0 %5556 }
 0xcb0   :  { %v5558_v53 = vsel %vm1549_vm11, %v5555_v17, %v5557_v27  ;;  %v5559_v24 = vsel %vm1549_vm11, %v5557_v27, %v5555_v17 }
 0xcb1   :  { %v5560_v22 = vadd.f32 %v5559_v24, %v5540_v13  ;;  %v5561_v7 = vadd.f32 %v5558_v53, %v5553_v60 }
 0xcb3   :  { %5562 = vrot.lane.b32.xlu0 %v5560_v22, %s8180_s0  ;;  %5564 = vrot.lane.b32.xlu1 %v5561_v7, %s8180_s0 }
 0xd05   :  { %v5489_v2 = vpop.permute.xlu2 %5488 }
 0xd1d   :  { %v5487_v25 = vpop.permute.xlu1 %5486 }
 0xd1e   :  { %v5490_v52 = vsel %vm1558_vm12, %v5487_v25, %v5489_v2  ;;  %v5491_v36 = vsel %vm1558_vm12, %v5489_v2, %v5487_v25 }
 0xd1f   :  { %v5492_v31 = vadd.f32 %v5491_v36, %v5484_v50  ;;  %v5493_v34 = vadd.f32 %v5490_v52, %v5485_v30  ;;  %v5591_v52 = vld [vmem:[#allocation9 + $0x6] sm:$0x3] }
 0xd21   :  { %5494 = vrot.lane.b32.xlu2 %v5492_v31, %s8171_s11  ;;  %5496 = vrot.lane.b32.xlu0 %v5493_v34, %s8171_s11 }
 0xd25   :  { %v5563_v3 = vpop.permute.xlu0 %5562  ;;  %v5565_v38 = vpop.permute.xlu1 %5564 }
 0xd26   :  { %v5566_v39 = vsel %vm1558_vm12, %v5563_v3, %v5565_v38  ;;  %v5567_v33 = vsel %vm1558_vm12, %v5565_v38, %v5563_v3 }
 0xd27   :  { %v5568_v6 = vadd.f32 %v5567_v33, %v5560_v22  ;;  %v5569_v1 = vadd.f32 %v5566_v39, %v5561_v7  ;;  %v5609_v33 = vld [vmem:[#allocation10 + $0x6] sm:$0x3] }
 0xd29   :  { %5570 = vrot.lane.b32.xlu1 %v5568_v6, %s8171_s11  ;;  %5572 = vrot.lane.b32.xlu2 %v5569_v1, %s8171_s11 }
 0xd7b   :  { %v5495_v35 = vpop.permute.xlu2 %5494 }
 0xd83   :  { %v5573_v55 = vpop.permute.xlu2 %5572 }
 0xd93   :  { %v5497_v32 = vpop.permute.xlu0 %5496 }
 0xd94   :  { %v5498_v11 = vsel %vm1567_vm13, %v5495_v35, %v5497_v32  ;;  %v5499_v62 = vsel %vm1567_vm13, %v5497_v32, %v5495_v35 }
 0xd95   :  { %v5500_v61 = vadd.f32 %v5499_v62, %v5492_v31  ;;  %v5501_v5 = vadd.f32 %v5498_v11, %v5493_v34 }
 0xd97   :  { %5502 = vrot.lane.b32.xlu0 %v5500_v61, %s8181_s14  ;;  %5504 = vrot.lane.b32.xlu1 %v5501_v5, %s8181_s14 }
 0xd9b   :  { %v5571_v42 = vpop.permute.xlu1 %5570 }
 0xd9c   :  { %v5574_v51 = vsel %vm1567_vm13, %v5571_v42, %v5573_v55  ;;  %v5575_v4 = vsel %vm1567_vm13, %v5573_v55, %v5571_v42 }
 0xd9d   :  { %v5576_v12 = vadd.f32 %v5575_v4, %v5568_v6  ;;  %v5577_v18 = vadd.f32 %v5574_v51, %v5569_v1 }
 0xd9f   :  { %5578 = vrot.lane.b32.xlu2 %v5576_v12, %s8181_s14  ;;  %5580 = vrot.lane.b32.xlu0 %v5577_v18, %s8181_s14 }
 0xdf9   :  { %v5579_v63 = vpop.permute.xlu2 %5578 }
 0xe09   :  { %v5503_v54 = vpop.permute.xlu0 %5502  ;;  %v5505_v41 = vpop.permute.xlu1 %5504 }
 0xe0a   :  { %v5506_v46 = vsel %vm1576_vm14, %v5503_v54, %v5505_v41  ;;  %v5507_v57 = vsel %vm1576_vm14, %v5505_v41, %v5503_v54 }
 0xe0b   :  { %v5508_v23 = vadd.f32 %v5507_v57, %v5500_v61  ;;  %v5509_v58 = vadd.f32 %v5506_v46, %v5501_v5 }
 0xe0d   :  { %v5510_v37 = vadd.f32 %v5509_v58, %v5508_v23 }
 0xe0f   :  { %v5511_v28 = vmul.f32 0.00048828125, %v5510_v37 }
 0xe11   :  { %v5581_v13 = vpop.permute.xlu0 %5580  ;;  %v5588_v50 = vmul.f32 %v5511_v28, %v5511_v28 }
 0xe12   :  { %v5582_v10 = vsel %vm1576_vm14, %v5579_v63, %v5581_v13  ;;  %v5583_v60 = vsel %vm1576_vm14, %v5581_v13, %v5579_v63 }
 0xe13   :  { %v5584_v56 = vadd.f32 %v5583_v60, %v5576_v12  ;;  %v5585_v49 = vadd.f32 %v5582_v10, %v5577_v18 }
 0xe15   :  { %v5586_v59 = vadd.f32 %v5585_v49, %v5584_v56 }
 0xe17   :  { %v5587_v30 = vmul.f32 0.00048828125, %v5586_v59 }
 0xe19   :  { %v5589_v17 = vsub.f32 %v5587_v30, %v5588_v50 }
 0xe1b   :  { %v5592_v27 = vadd.f32 1e-05, %v5589_v17 }
 0xe1d   :  { %8015 = vrsqrt.f32 %v5592_v27  ;;  %vm5599_vm1 = vweird.f32 %v5592_v27 }
 0xe23   :  { %v8016_v53 = vpop.eup %8015 }
 0xe24   :  { %v5594_v24 = vmul.f32 %v8016_v53, %v5592_v27  ;;  %vm5600_vm0 = vweird.f32 %v8016_v53 }
 0xe25   :  { %vm5601_vm4 = vmor %vm5599_vm1, %vm5600_vm0 }
 0xe26   :  { %v5595_v22 = vmul.f32 %v8016_v53, %v5594_v24 }
 0xe28   :  { %v5596_v7 = vmul.f32 0.5, %v5595_v22 }
 0xe2a   :  { %v5597_v2 = vsub.f32 1.5, %v5596_v7 }
 0xe2c   :  { %v5598_v25 = vmul.f32 %v8016_v53, %v5597_v2 }
 0xe2e   :  { %v5602_v19 = vsel %vm5601_vm4, %v8016_v53, %v5598_v25 }
 0xe2f   :  { %v5604_v36 = vrot.slane %v5602_v19, 7 }
 0xe31   :  { %v5605_v31 = vsel %vm1675_vm5, %v5602_v19, %v5604_v36 }
 0xe32   :  { %v5607_v34 = vmul.f32 %v5605_v31, %v5591_v52 }
 0xe34   :  { %v5611_v3 = vperm.slane %v5607_v34, 0  ;;  %v5612_v38 = vperm.slane %v5607_v34, 1 }
 0xe36   :  { %v5616_v39 = vmul.f32 %v5612_v38, %v5511_v28  ;;  %v5615_v6 = vmul.f32 %v5611_v3, %v5511_v28  ;;  %v5623_v11 = vmul.f32 %v5611_v3, %v10316_v0  ;;  %v5624_v62 = vmul.f32 %v5612_v38, %v10308_v45 }
 0xe37   :  { %v5625_v61 = vmul.f32 %v5611_v3, %v10328_v43  ;;  %v5626_v42 = vmul.f32 %v5612_v38, %v10304_v48  ;;  %v5627_v51 = vmul.f32 %v5611_v3, %v10342_v8  ;;  %v5628_v54 = vmul.f32 %v5612_v38, %v10312_v16 }
 0xe38   :  { %v5619_v1 = vrot.slane %v5616_v39, 7  ;;  %v5629_v46 = vmul.f32 %v5611_v3, %v10354_v20  ;;  %v5630_v0 = vmul.f32 %v5612_v38, %v10322_v14  ;;  %v5631_v45 = vmul.f32 %v5611_v3, %v10368_v40 }
 0xe39   :  { %v5632_v8 = vmul.f32 %v5612_v38, %v10336_v44  ;;  %v5633_v10 = vmul.f32 %v5611_v3, %v10378_v26  ;;  %v5634_v14 = vmul.f32 %v5612_v38, %v10349_v47  ;;  %v5635_v44 = vmul.f32 %v5611_v3, %v10388_v15 }
 0xe3a   :  { %v5620_v35 = vsel %vm1675_vm5, %v5615_v6, %v5619_v1  ;;  %v5636_v26 = vmul.f32 %v5612_v38, %v10361_v9  ;;  %v5637_v47 = vmul.f32 %v5611_v3, %v10406_v21  ;;  %v5638_v15 = vmul.f32 %v5612_v38, %v10392_v29 }
 0xe3b   :  { %v5622_v32 = vsub.f32 %v5609_v33, %v5620_v35 }
 0xe3d   :  { %v5640_v5 = vperm.slane %v5622_v32, 0  ;;  %v5641_v55 = vperm.slane %v5622_v32, 1 }
 0xe3f   :  { %v5644_v4 = vadd.f32 %v5640_v5, %v5623_v11  ;;  %v5645_v12 = vadd.f32 %v5641_v55, %v5624_v62  ;;  %v5646_v18 = vadd.f32 %v5640_v5, %v5625_v61  ;;  %v5647_v41 = vadd.f32 %v5641_v55, %v5626_v42 }
 0xe40   :  { %v5648_v57 = vadd.f32 %v5640_v5, %v5627_v51  ;;  %v5649_v43 = vadd.f32 %v5641_v55, %v5628_v54  ;;  %v5650_v23 = vadd.f32 %v5640_v5, %v5629_v46  ;;  %v5651_v63 = vadd.f32 %v5641_v55, %v5630_v0 }
 0xe41   :  { %v5660_v58 = vmax.f32 %v5644_v4, 0.0  ;;  %v5661_v37 = vmax.f32 %v5645_v12, 0.0  ;;  %v5662_v48 = vmax.f32 %v5646_v18, 0.0  ;;  %v5663_v13 = vmax.f32 %v5647_v41, 0.0 }
 0xe42   :  { %v5652_v16 = vadd.f32 %v5640_v5, %v5631_v45  ;;  %v5664_v60 = vmax.f32 %v5648_v57, 0.0  ;;  %v5653_v20 = vadd.f32 %v5641_v55, %v5632_v8  ;;  %v5665_v40 = vmax.f32 %v5649_v43, 0.0 }
 0xe43   :  { %5676 = vst [vmem:[%s10532_s7] sm:$0xff] %v5660_v58  ;;  %v5654_v28 = vadd.f32 %v5640_v5, %v5633_v10  ;;  %v5666_v56 = vmax.f32 %v5650_v23, 0.0  ;;  %v5655_v49 = vadd.f32 %v5641_v55, %v5634_v14  ;;  %v5667_v59 = vmax.f32 %v5651_v63, 0.0 }
 0xe44   :  { %5677 = vst [vmem:[%s10532_s7 + $0x8] sm:$0xff] %v5661_v37  ;;  %v5656_v50 = vadd.f32 %v5640_v5, %v5635_v44  ;;  %v5668_v30 = vmax.f32 %v5652_v16, 0.0  ;;  %v5657_v17 = vadd.f32 %v5641_v55, %v5636_v26  ;;  %v5669_v27 = vmax.f32 %v5653_v20, 0.0 }
 0xe45   :  { %5678 = vst [vmem:[%s10532_s7 + $0x10] sm:$0xff] %v5662_v48  ;;  %v5658_v9 = vadd.f32 %v5640_v5, %v5637_v47  ;;  %v5670_v53 = vmax.f32 %v5654_v28, 0.0  ;;  %v5659_v21 = vadd.f32 %v5641_v55, %v5638_v15  ;;  %v5671_v24 = vmax.f32 %v5655_v49, 0.0 }
 0xe46   :  { %5679 = vst [vmem:[%s10532_s7 + $0x18] sm:$0xff] %v5663_v13  ;;  %v5672_v22 = vmax.f32 %v5656_v50, 0.0  ;;  %v5673_v29 = vmax.f32 %v5657_v17, 0.0 }
 0xe47   :  { %5680 = vst [vmem:[%s10532_s7 + $0x20] sm:$0xff] %v5664_v60  ;;  %v5674_v7 = vmax.f32 %v5658_v9, 0.0  ;;  %v5675_v2 = vmax.f32 %v5659_v21, 0.0 }
 0xe48   :  { %5681 = vst [vmem:[%s10532_s7 + $0x28] sm:$0xff] %v5665_v40 }
 0xe49   :  { %5682 = vst [vmem:[%s10532_s7 + $0x30] sm:$0xff] %v5666_v56 }
 0xe4a   :  { %5683 = vst [vmem:[%s10532_s7 + $0x38] sm:$0xff] %v5667_v59 }
 0xe4b   :  { %5684 = vst [vmem:[%s10532_s7 + $0x40] sm:$0xff] %v5668_v30 }
 0xe4c   :  { %5685 = vst [vmem:[%s10532_s7 + $0x48] sm:$0xff] %v5669_v27 }
 0xe4d   :  { %5686 = vst [vmem:[%s10532_s7 + $0x50] sm:$0xff] %v5670_v53 }
 0xe4e   :  { %5687 = vst [vmem:[%s10532_s7 + $0x58] sm:$0xff] %v5671_v24 }
 0xe4f   :  { %5688 = vst [vmem:[%s10532_s7 + $0x60] sm:$0xff] %v5672_v22 }
 0xe50   :  { %5689 = vst [vmem:[%s10532_s7 + $0x68] sm:$0xff] %v5673_v29 }
 0xe51   :  { %5690 = vst [vmem:[%s10532_s7 + $0x70] sm:$0xff] %v5674_v7 }
 0xe52   :  { %5691 = vst [vmem:[%s10532_s7 + $0x78] sm:$0xff] %v5675_v2 }
 0xe53   :  { %5696 = vsyncpa [#allocation3], 1 }
 0xe54   :  { %5697 = vsyncpa [#allocation5], 1 }
 0xe55   :  { %5698 = vsyncpa [#allocation8], 1 }
 0xe56   :  { %5699 = vsyncpa [#allocation11], 1 }

</bundles_post_ra>
